<compile_context>
chip_gen: v7x
topology: tpu7x:2x2x1
jax: 0.10.0
libtpu: 0.0.40
codegen_flags: <defaults>
</compile_context>

<pallas_src>
import math
from functools import partial

import jax
import jax.numpy as jnp
from jax import lax
from jax.experimental import pallas as pl
from jax.experimental.pallas import tpu as pltpu

# ---------------- synthetic (small) DinoV2-ViT-S/14-reg config ----------------
PATCH = 14
IMG = 28                      # 2x2 = 4 patches per frame (keeps shapes small)
IN_CHANS = 3
EMBED_DIM = 128               # real model: 384 (kept a multiple of 128 lanes)
NUM_HEADS = 2                 # real model: 6
HEAD_DIM = EMBED_DIM // NUM_HEADS
DEPTH = 2                     # real model: 12
NUM_REG = 4                   # dinov2 *_reg models use 4 register tokens
MLP_HIDDEN = 4 * EMBED_DIM
GRID_HW = IMG // PATCH
NUM_PATCHES = GRID_HW * GRID_HW
NUM_TOKENS = 1 + NUM_REG + NUM_PATCHES      # 9
T_PAD = 16                    # tokens padded per sample (sublane friendly)
PATCH_DIM = IN_CHANS * PATCH * PATCH        # 588
LN_EPS = 1e-6

VMEM = pl.BlockSpec(memory_space=pltpu.MemorySpace.VMEM)


# ------------------------------ in-kernel helpers ------------------------------
def _mm(a, b):
    """Matmul with bf16 MXU inputs, f32 accumulation."""
    return jnp.dot(a.astype(jnp.bfloat16), b.astype(jnp.bfloat16),
                   preferred_element_type=jnp.float32)


def _mm_nt(a, b):
    """a @ b.T with bf16 MXU inputs, f32 accumulation (no explicit transpose)."""
    return lax.dot_general(a.astype(jnp.bfloat16), b.astype(jnp.bfloat16),
                           (((1,), (1,)), ((), ())),
                           preferred_element_type=jnp.float32)


def _layernorm(x, g, b):
    mu = jnp.mean(x, axis=-1, keepdims=True)
    var = jnp.mean(jnp.square(x - mu), axis=-1, keepdims=True)
    return (x - mu) * lax.rsqrt(var + LN_EPS) * g + b


def _gelu_tanh(h):
    c = math.sqrt(2.0 / math.pi)
    return 0.5 * h * (1.0 + jnp.tanh(c * (h + 0.044715 * h * h * h)))


# ------------------------------ fused Pallas kernel -----------------------------
def _dino_fused_kernel(
    patches_ref, patch_w_ref, patch_b_ref, cls_ref, reg_ref, pos_ref,
    ln1_g_ref, ln1_b_ref, qkv_w_ref, qkv_b_ref, proj_w_ref, proj_b_ref, g1_ref,
    ln2_g_ref, ln2_b_ref, fc1_w_ref, fc1_b_ref, fc2_w_ref, fc2_b_ref, g2_ref,
    lnf_g_ref, lnf_b_ref,
    out_ref, tok_ref, attn_ref, *, bs,
):
    scale = HEAD_DIM ** -0.5

    # ---------------- patch embed + token assembly (all in VMEM) ---------------
    pe = _mm(patches_ref[...], patch_w_ref[...]) + patch_b_ref[...]   # (bs*NP, D)
    pos = pos_ref[...]                                                # (1+NP, D)
    cls_row = cls_ref[...] + pos[0:1, :]                              # (1, D)
    regs = reg_ref[...]                                               # (NUM_REG, D)
    pos_patch = pos[1:, :]                                            # (NP, D)

    tok_ref[...] = jnp.zeros_like(tok_ref)      # zero the padded token rows
    for b in range(bs):
        r0 = b * T_PAD
        tok_ref[pl.ds(r0, 1), :] = cls_row
        tok_ref[pl.ds(r0 + 1, NUM_REG), :] = regs
        tok_ref[pl.ds(r0 + 1 + NUM_REG, NUM_PATCHES), :] = (
            pe[b * NUM_PATCHES:(b + 1) * NUM_PATCHES, :] + pos_patch)

    # key-padding bias (hoisted; same for every block / sample / head)
    key_ids = lax.broadcasted_iota(jnp.int32, (T_PAD, T_PAD), 1)
    att_bias = jnp.where(key_ids >= NUM_TOKENS,
                         jnp.float32(-1e30), jnp.float32(0.0))

    # ---------------------------- transformer blocks ----------------------------
    x = tok_ref[...]                                                  # (bs*T_PAD, D)
    for d in range(DEPTH):
        # --- attention branch ---
        n1 = _layernorm(x, ln1_g_ref[d], ln1_b_ref[d])
        qkv = _mm(n1, qkv_w_ref[d]) + qkv_b_ref[d]                    # (R, 3D)
        q = qkv[:, :EMBED_DIM] * scale
        k = qkv[:, EMBED_DIM:2 * EMBED_DIM]
        v = qkv[:, 2 * EMBED_DIM:]

        for b in range(bs):
            r0 = b * T_PAD
            for h in range(NUM_HEADS):
                c0 = h * HEAD_DIM
                qh = q[r0:r0 + T_PAD, c0:c0 + HEAD_DIM]
                kh = k[r0:r0 + T_PAD, c0:c0 + HEAD_DIM]
                vh = v[r0:r0 + T_PAD, c0:c0 + HEAD_DIM]
                s = _mm_nt(qh, kh) + att_bias                         # (T_PAD, T_PAD)
                s = s - jnp.max(s, axis=-1, keepdims=True)
                p = jnp.exp(s)
                p = p * pl.reciprocal(jnp.sum(p, axis=-1, keepdims=True),
                                      approx=True)
                attn_ref[pl.ds(r0, T_PAD), pl.ds(c0, HEAD_DIM)] = _mm(p, vh)

        a = _mm(attn_ref[...], proj_w_ref[d]) + proj_b_ref[d]
        x = x + a * g1_ref[d]                                         # LayerScale + residual

        # --- MLP branch ---
        n2 = _layernorm(x, ln2_g_ref[d], ln2_b_ref[d])
        hmid = _gelu_tanh(_mm(n2, fc1_w_ref[d]) + fc1_b_ref[d])
        m = _mm(hmid, fc2_w_ref[d]) + fc2_b_ref[d]
        x = x + m * g2_ref[d]

    # ---------------------- final LayerNorm + CLS extraction --------------------
    xn = _layernorm(x, lnf_g_ref[...], lnf_b_ref[...])
    for b in range(bs):
        out_ref[pl.ds(b, 1), :] = xn[b * T_PAD:b * T_PAD + 1, :]


# ------------------------------ forward wrapper --------------------------------
def dino_forward_pallas(x, params):
    B, S, C, H, W = x.shape
    BS = B * S
    xf = x.reshape(BS, C, H, W)                       # == x.view(B*S, C, H, W)

    # Patch extraction (14x14 / stride-14 conv as matmul over flattened patches).
    # TODO(synk): at production sizes fold this relayout into the kernel with an
    # index_map-driven per-patch gather; here it is a one-time ~37 KB op.
    gh, gw = H // PATCH, W // PATCH
    p = xf.reshape(BS, C, gh, PATCH, gw, PATCH)
    p = p.transpose(0, 2, 4, 1, 3, 5).reshape(BS * gh * gw, PATCH_DIM)

    blocks = params["blocks"]

    def stack_mat(name):
        return jnp.stack([blk[name] for blk in blocks], axis=0)

    def stack_vec(name, width):
        return jnp.stack([blk[name].reshape(1, width) for blk in blocks], axis=0)

    D, MD = EMBED_DIM, MLP_HIDDEN
    args = (
        p,
        params["patch_w"],
        params["patch_b"].reshape(1, D),
        params["cls_token"].reshape(1, D),
        params["reg_tokens"].reshape(NUM_REG, D),
        params["pos_embed"].reshape(1 + NUM_PATCHES, D),
        stack_vec("ln1_g", D), stack_vec("ln1_b", D),
        stack_mat("qkv_w"), stack_vec("qkv_b", 3 * D),
        stack_mat("proj_w"), stack_vec("proj_b", D),
        stack_vec("gamma1", D),
        stack_vec("ln2_g", D), stack_vec("ln2_b", D),
        stack_mat("fc1_w"), stack_vec("fc1_b", MD),
        stack_mat("fc2_w"), stack_vec("fc2_b", D),
        stack_vec("gamma2", D),
        params["ln_g"].reshape(1, D), params["ln_b"].reshape(1, D),
    )

    cls_out = pl.pallas_call(
        partial(_dino_fused_kernel, bs=BS),
        out_shape=jax.ShapeDtypeStruct((BS, EMBED_DIM), jnp.float32),
        in_specs=[VMEM] * len(args),
        out_specs=VMEM,
        scratch_shapes=[
            pltpu.VMEM((BS * T_PAD, EMBED_DIM), jnp.float32),   # residual stream
            pltpu.VMEM((BS * T_PAD, EMBED_DIM), jnp.float32),   # attention assembly
        ],
    )(*args)

    return cls_out.reshape(B, S, EMBED_DIM)           # == outputs.view(B, S, -1)


# ------------------------------ pure-jnp reference ------------------------------
def dino_forward_ref(x, params):
    hp = lax.Precision.HIGHEST
    B, S, C, H, W = x.shape
    BS = B * S
    xf = x.reshape(BS, C, H, W)
    gh, gw = H // PATCH, W // PATCH
    p = xf.reshape(BS, C, gh, PATCH, gw, PATCH)
    p = p.transpose(0, 2, 4, 1, 3, 5).reshape(BS, gh * gw, PATCH_DIM)

    def ln(xx, g, b):
        mu = xx.mean(-1, keepdims=True)
        var = ((xx - mu) ** 2).mean(-1, keepdims=True)
        return (xx - mu) / jnp.sqrt(var + LN_EPS) * g + b

    def gelu(h):
        c = math.sqrt(2.0 / math.pi)
        return 0.5 * h * (1.0 + jnp.tanh(c * (h + 0.044715 * h * h * h)))

    tok = jnp.einsum("bpf,fd->bpd", p, params["patch_w"], precision=hp) + params["patch_b"]
    cls = jnp.broadcast_to(params["cls_token"], (BS, 1, EMBED_DIM))
    t = jnp.concatenate([cls, tok], axis=1) + params["pos_embed"]
    regs = jnp.broadcast_to(params["reg_tokens"], (BS, NUM_REG, EMBED_DIM))
    t = jnp.concatenate([t[:, :1], regs, t[:, 1:]], axis=1)          # (BS, T, D)
    T = t.shape[1]

    h = t
    for blk in params["blocks"]:
        n1 = ln(h, blk["ln1_g"], blk["ln1_b"])
        qkv = jnp.einsum("btd,de->bte", n1, blk["qkv_w"], precision=hp) + blk["qkv_b"]
        qkv = qkv.reshape(BS, T, 3, NUM_HEADS, HEAD_DIM)
        q = qkv[:, :, 0].transpose(0, 2, 1, 3) * (HEAD_DIM ** -0.5)
        k = qkv[:, :, 1].transpose(0, 2, 1, 3)
        v = qkv[:, :, 2].transpose(0, 2, 1, 3)
        s = jnp.einsum("bhqd,bhkd->bhqk", q, k, precision=hp)
        pz = jax.nn.softmax(s, axis=-1)
        a = jnp.einsum("bhqk,bhkd->bhqd", pz, v, precision=hp)
        a = a.transpose(0, 2, 1, 3).reshape(BS, T, EMBED_DIM)
        a = jnp.einsum("btd,de->bte", a, blk["proj_w"], precision=hp) + blk["proj_b"]
        h = h + a * blk["gamma1"]
        n2 = ln(h, blk["ln2_g"], blk["ln2_b"])
        m = gelu(jnp.einsum("btd,de->bte", n2, blk["fc1_w"], precision=hp) + blk["fc1_b"])
        m = jnp.einsum("bte,ed->btd", m, blk["fc2_w"], precision=hp) + blk["fc2_b"]
        h = h + m * blk["gamma2"]

    hn = ln(h, params["ln_g"], params["ln_b"])
    return hn[:, 0].reshape(B, S, EMBED_DIM)


# ------------------------------ parameter init ---------------------------------
def init_params(key):
    keys = jax.random.split(key, 5 + DEPTH)

    def rnd(kk, shape, std=0.02):
        return (std * jax.random.normal(kk, shape)).astype(jnp.float32)

    params = {
        "patch_w": rnd(keys[0], (PATCH_DIM, EMBED_DIM)),
        "patch_b": rnd(keys[1], (EMBED_DIM,)),
        "cls_token": rnd(keys[2], (1, 1, EMBED_DIM)),
        "reg_tokens": rnd(keys[3], (1, NUM_REG, EMBED_DIM)),
        "pos_embed": rnd(keys[4], (1, 1 + NUM_PATCHES, EMBED_DIM)),
        "ln_g": jnp.ones((EMBED_DIM,), jnp.float32),
        "ln_b": jnp.zeros((EMBED_DIM,), jnp.float32),
        "blocks": [],
    }
    for d in range(DEPTH):
        bk = jax.random.split(keys[5 + d], 8)
        params["blocks"].append({
            "ln1_g": jnp.ones((EMBED_DIM,), jnp.float32),
            "ln1_b": jnp.zeros((EMBED_DIM,), jnp.float32),
            "qkv_w": rnd(bk[0], (EMBED_DIM, 3 * EMBED_DIM)),
            "qkv_b": rnd(bk[1], (3 * EMBED_DIM,)),
            "proj_w": rnd(bk[2], (EMBED_DIM, EMBED_DIM)),
            "proj_b": rnd(bk[3], (EMBED_DIM,)),
            # dinov2 LayerScale init is 1e-5; 0.1 keeps the branch visible with
            # synthetic weights.
            "gamma1": 0.1 * jnp.ones((EMBED_DIM,), jnp.float32),
            "ln2_g": jnp.ones((EMBED_DIM,), jnp.float32),
            "ln2_b": jnp.zeros((EMBED_DIM,), jnp.float32),
            "fc1_w": rnd(bk[4], (EMBED_DIM, MLP_HIDDEN)),
            "fc1_b": rnd(bk[5], (MLP_HIDDEN,)),
            "fc2_w": rnd(bk[6], (MLP_HIDDEN, EMBED_DIM)),
            "fc2_b": rnd(bk[7], (EMBED_DIM,)),
            "gamma2": 0.1 * jnp.ones((EMBED_DIM,), jnp.float32),
        })
    return params


# ----------------------------------- main ---------------------------------------
if __name__ == "__main__":
    key = jax.random.PRNGKey(0)
    pkey, xkey = jax.random.split(key)
    params = init_params(pkey)

    B, S = 2, 2
    x = jax.random.normal(xkey, (B, S, IN_CHANS, IMG, IMG), dtype=jnp.float32)

    fwd = jax.jit(dino_forward_pallas)
    out = jax.block_until_ready(fwd(x, params))
    assert out.shape == (B, S, EMBED_DIM), out.shape

    ref = jax.block_until_ready(dino_forward_ref(x, params))
    max_err = float(jnp.max(jnp.abs(out - ref)))
    assert jnp.allclose(out, ref, rtol=2e-2, atol=2e-2), f"max_err={max_err}"

    print("KERNEL_OK")
</pallas_src>

<mosaic_0001>
module attributes {stable_mosaic.version = 11 : i64} {
  func.func @_dino_fused_kernel(%arg0: memref<16x588xf32, #tpu.memory_space<vmem>>, %arg1: memref<588x128xf32, #tpu.memory_space<vmem>>, %arg2: memref<1x128xf32, #tpu.memory_space<vmem>>, %arg3: memref<1x128xf32, #tpu.memory_space<vmem>>, %arg4: memref<4x128xf32, #tpu.memory_space<vmem>>, %arg5: memref<5x128xf32, #tpu.memory_space<vmem>>, %arg6: memref<2x1x128xf32, #tpu.memory_space<vmem>>, %arg7: memref<2x1x128xf32, #tpu.memory_space<vmem>>, %arg8: memref<2x128x384xf32, #tpu.memory_space<vmem>>, %arg9: memref<2x1x384xf32, #tpu.memory_space<vmem>>, %arg10: memref<2x128x128xf32, #tpu.memory_space<vmem>>, %arg11: memref<2x1x128xf32, #tpu.memory_space<vmem>>, %arg12: memref<2x1x128xf32, #tpu.memory_space<vmem>>, %arg13: memref<2x1x128xf32, #tpu.memory_space<vmem>>, %arg14: memref<2x1x128xf32, #tpu.memory_space<vmem>>, %arg15: memref<2x128x512xf32, #tpu.memory_space<vmem>>, %arg16: memref<2x1x512xf32, #tpu.memory_space<vmem>>, %arg17: memref<2x512x128xf32, #tpu.memory_space<vmem>>, %arg18: memref<2x1x128xf32, #tpu.memory_space<vmem>>, %arg19: memref<2x1x128xf32, #tpu.memory_space<vmem>>, %arg20: memref<1x128xf32, #tpu.memory_space<vmem>>, %arg21: memref<1x128xf32, #tpu.memory_space<vmem>>, %arg22: memref<4x128xf32, #tpu.memory_space<vmem>>, %arg23: memref<64x128xf32, #tpu.memory_space<vmem>>, %arg24: memref<64x128xf32, #tpu.memory_space<vmem>>) attributes {dimension_semantics = [], scalar_prefetch = 0 : i64, scratch_operands = 2 : i64, tpu.core_type = #tpu.core_type<tc>} {
    %c0 = arith.constant 0 : index
    %c0_0 = arith.constant 0 : index
    %0 = vector.load %arg0[%c0, %c0_0] : memref<16x588xf32, #tpu.memory_space<vmem>>, vector<16x588xf32>
    %c0_1 = arith.constant 0 : index
    %c0_2 = arith.constant 0 : index
    %1 = vector.load %arg1[%c0_1, %c0_2] : memref<588x128xf32, #tpu.memory_space<vmem>>, vector<588x128xf32>
    %2 = arith.truncf %0 : vector<16x588xf32> to vector<16x588xbf16>
    %3 = arith.truncf %1 : vector<588x128xf32> to vector<588x128xbf16>
    %cst = arith.constant dense<0.000000e+00> : vector<16x128xf32>
    %4 = tpu.matmul %2, %3, %cst {dimension_numbers = #tpu.dot_dimension_numbers<[1], [0], [0], [1], [0, 0, 1, 1], [], []>} : vector<16x588xbf16>, vector<588x128xbf16>, vector<16x128xf32> -> vector<16x128xf32>
    %c0_3 = arith.constant 0 : index
    %c0_4 = arith.constant 0 : index
    %5 = vector.load %arg2[%c0_3, %c0_4] : memref<1x128xf32, #tpu.memory_space<vmem>>, vector<1x128xf32>
    %6 = vector.broadcast %5 : vector<1x128xf32> to vector<16x128xf32>
    %7 = arith.addf %4, %6 : vector<16x128xf32>
    %c0_5 = arith.constant 0 : index
    %c0_6 = arith.constant 0 : index
    %8 = vector.load %arg5[%c0_5, %c0_6] : memref<5x128xf32, #tpu.memory_space<vmem>>, vector<5x128xf32>
    %c0_7 = arith.constant 0 : index
    %c0_8 = arith.constant 0 : index
    %9 = vector.load %arg3[%c0_7, %c0_8] : memref<1x128xf32, #tpu.memory_space<vmem>>, vector<1x128xf32>
    %10 = vector.extract_strided_slice %8 {offsets = [0, 0], sizes = [1, 128], strides = [1, 1]} : vector<5x128xf32> to vector<1x128xf32>
    %11 = arith.addf %9, %10 : vector<1x128xf32>
    %c0_9 = arith.constant 0 : index
    %c0_10 = arith.constant 0 : index
    %12 = vector.load %arg4[%c0_9, %c0_10] : memref<4x128xf32, #tpu.memory_space<vmem>>, vector<4x128xf32>
    %13 = vector.extract_strided_slice %8 {offsets = [1, 0], sizes = [4, 128], strides = [1, 1]} : vector<5x128xf32> to vector<4x128xf32>
    %cst_11 = arith.constant 0.000000e+00 : f32
    %14 = vector.broadcast %cst_11 : f32 to vector<64x128xf32>
    %c0_12 = arith.constant 0 : index
    %c0_13 = arith.constant 0 : index
    %15 = vector.load %arg23[%c0_12, %c0_13] : memref<64x128xf32, #tpu.memory_space<vmem>>, vector<64x128xf32>
    tpu.vector_store %arg23[%c0_12, %c0_13], %14 {strides = array<i32>} : memref<64x128xf32, #tpu.memory_space<vmem>>, vector<64x128xf32>,
    %c0_14 = arith.constant 0 : index
    %c0_15 = arith.constant 0 : index
    %16 = vector.load %arg23[%c0_14, %c0_15] : memref<64x128xf32, #tpu.memory_space<vmem>>, vector<1x128xf32>
    tpu.vector_store %arg23[%c0_14, %c0_15], %11 {strides = array<i32>} : memref<64x128xf32, #tpu.memory_space<vmem>>, vector<1x128xf32>,
    %c1 = arith.constant 1 : index
    %c0_16 = arith.constant 0 : index
    %17 = vector.load %arg23[%c1, %c0_16] : memref<64x128xf32, #tpu.memory_space<vmem>>, vector<4x128xf32>
    tpu.vector_store %arg23[%c1, %c0_16], %12 {strides = array<i32>} : memref<64x128xf32, #tpu.memory_space<vmem>>, vector<4x128xf32>,
    %18 = vector.extract_strided_slice %7 {offsets = [0, 0], sizes = [4, 128], strides = [1, 1]} : vector<16x128xf32> to vector<4x128xf32>
    %19 = arith.addf %18, %13 : vector<4x128xf32>
    %c5 = arith.constant 5 : index
    %c0_17 = arith.constant 0 : index
    %20 = vector.load %arg23[%c5, %c0_17] : memref<64x128xf32, #tpu.memory_space<vmem>>, vector<4x128xf32>
    tpu.vector_store %arg23[%c5, %c0_17], %19 {strides = array<i32>} : memref<64x128xf32, #tpu.memory_space<vmem>>, vector<4x128xf32>,
    %c16 = arith.constant 16 : index
    %c0_18 = arith.constant 0 : index
    %21 = vector.load %arg23[%c16, %c0_18] : memref<64x128xf32, #tpu.memory_space<vmem>>, vector<1x128xf32>
    tpu.vector_store %arg23[%c16, %c0_18], %11 {strides = array<i32>} : memref<64x128xf32, #tpu.memory_space<vmem>>, vector<1x128xf32>,
    %c17 = arith.constant 17 : index
    %c0_19 = arith.constant 0 : index
    %22 = vector.load %arg23[%c17, %c0_19] : memref<64x128xf32, #tpu.memory_space<vmem>>, vector<4x128xf32>
    tpu.vector_store %arg23[%c17, %c0_19], %12 {strides = array<i32>} : memref<64x128xf32, #tpu.memory_space<vmem>>, vector<4x128xf32>,
    %23 = vector.extract_strided_slice %7 {offsets = [4, 0], sizes = [4, 128], strides = [1, 1]} : vector<16x128xf32> to vector<4x128xf32>
    %24 = arith.addf %23, %13 : vector<4x128xf32>
    %c21 = arith.constant 21 : index
    %c0_20 = arith.constant 0 : index
    %25 = vector.load %arg23[%c21, %c0_20] : memref<64x128xf32, #tpu.memory_space<vmem>>, vector<4x128xf32>
    tpu.vector_store %arg23[%c21, %c0_20], %24 {strides = array<i32>} : memref<64x128xf32, #tpu.memory_space<vmem>>, vector<4x128xf32>,
    %c32 = arith.constant 32 : index
    %c0_21 = arith.constant 0 : index
    %26 = vector.load %arg23[%c32, %c0_21] : memref<64x128xf32, #tpu.memory_space<vmem>>, vector<1x128xf32>
    tpu.vector_store %arg23[%c32, %c0_21], %11 {strides = array<i32>} : memref<64x128xf32, #tpu.memory_space<vmem>>, vector<1x128xf32>,
    %c33 = arith.constant 33 : index
    %c0_22 = arith.constant 0 : index
    %27 = vector.load %arg23[%c33, %c0_22] : memref<64x128xf32, #tpu.memory_space<vmem>>, vector<4x128xf32>
    tpu.vector_store %arg23[%c33, %c0_22], %12 {strides = array<i32>} : memref<64x128xf32, #tpu.memory_space<vmem>>, vector<4x128xf32>,
    %28 = vector.extract_strided_slice %7 {offsets = [8, 0], sizes = [4, 128], strides = [1, 1]} : vector<16x128xf32> to vector<4x128xf32>
    %29 = arith.addf %28, %13 : vector<4x128xf32>
    %c37 = arith.constant 37 : index
    %c0_23 = arith.constant 0 : index
    %30 = vector.load %arg23[%c37, %c0_23] : memref<64x128xf32, #tpu.memory_space<vmem>>, vector<4x128xf32>
    tpu.vector_store %arg23[%c37, %c0_23], %29 {strides = array<i32>} : memref<64x128xf32, #tpu.memory_space<vmem>>, vector<4x128xf32>,
    %c48 = arith.constant 48 : index
    %c0_24 = arith.constant 0 : index
    %31 = vector.load %arg23[%c48, %c0_24] : memref<64x128xf32, #tpu.memory_space<vmem>>, vector<1x128xf32>
    tpu.vector_store %arg23[%c48, %c0_24], %11 {strides = array<i32>} : memref<64x128xf32, #tpu.memory_space<vmem>>, vector<1x128xf32>,
    %c49 = arith.constant 49 : index
    %c0_25 = arith.constant 0 : index
    %32 = vector.load %arg23[%c49, %c0_25] : memref<64x128xf32, #tpu.memory_space<vmem>>, vector<4x128xf32>
    tpu.vector_store %arg23[%c49, %c0_25], %12 {strides = array<i32>} : memref<64x128xf32, #tpu.memory_space<vmem>>, vector<4x128xf32>,
    %33 = vector.extract_strided_slice %7 {offsets = [12, 0], sizes = [4, 128], strides = [1, 1]} : vector<16x128xf32> to vector<4x128xf32>
    %34 = arith.addf %33, %13 : vector<4x128xf32>
    %c53 = arith.constant 53 : index
    %c0_26 = arith.constant 0 : index
    %35 = vector.load %arg23[%c53, %c0_26] : memref<64x128xf32, #tpu.memory_space<vmem>>, vector<4x128xf32>
    tpu.vector_store %arg23[%c53, %c0_26], %34 {strides = array<i32>} : memref<64x128xf32, #tpu.memory_space<vmem>>, vector<4x128xf32>,
    %36 = tpu.iota {dimensions = array<i32: 1>} : vector<16x16xi32>
    %c9_i32 = arith.constant 9 : i32
    %37 = vector.broadcast %c9_i32 : i32 to vector<16x16xi32>
    %38 = arith.cmpi sge, %36, %37 : vector<16x16xi32>
    %cst_27 = arith.constant -1.000000e+30 : f32
    %cst_28 = arith.constant 0.000000e+00 : f32
    %39 = vector.broadcast %cst_27 : f32 to vector<16x16xf32>
    %40 = vector.broadcast %cst_28 : f32 to vector<16x16xf32>
    %41 = arith.select %38, %39, %40 : vector<16x16xi1>, vector<16x16xf32>
    %c0_29 = arith.constant 0 : index
    %c0_30 = arith.constant 0 : index
    %42 = vector.load %arg23[%c0_29, %c0_30] : memref<64x128xf32, #tpu.memory_space<vmem>>, vector<64x128xf32>
    %c0_31 = arith.constant 0 : index
    %c0_32 = arith.constant 0 : index
    %c0_33 = arith.constant 0 : index
    %43 = vector.load %arg6[%c0_31, %c0_32, %c0_33] : memref<2x1x128xf32, #tpu.memory_space<vmem>>, vector<1x1x128xf32>
    %44 = vector.shape_cast %43 : vector<1x1x128xf32> to vector<1x128xf32>
    %c0_34 = arith.constant 0 : index
    %c0_35 = arith.constant 0 : index
    %c0_36 = arith.constant 0 : index
    %45 = vector.load %arg7[%c0_34, %c0_35, %c0_36] : memref<2x1x128xf32, #tpu.memory_space<vmem>>, vector<1x1x128xf32>
    %46 = vector.shape_cast %45 : vector<1x1x128xf32> to vector<1x128xf32>
    %cst_37 = arith.constant dense<0.000000e+00> : vector<64xf32>
    %47 = vector.multi_reduction <add>, %42, %cst_37 [1] : vector<64x128xf32> to vector<64xf32>
    %48 = vector.shape_cast %47 : vector<64xf32> to vector<64x1xf32>
    %cst_38 = arith.constant 1.280000e+02 : f32
    %49 = vector.broadcast %cst_38 : f32 to vector<64x1xf32>
    %50 = arith.divf %48, %49 : vector<64x1xf32>
    %51 = vector.broadcast %50 : vector<64x1xf32> to vector<64x128xf32>
    %52 = arith.subf %42, %51 : vector<64x128xf32>
    %53 = arith.mulf %52, %52 : vector<64x128xf32>
    %cst_39 = arith.constant dense<0.000000e+00> : vector<64xf32>
    %54 = vector.multi_reduction <add>, %53, %cst_39 [1] : vector<64x128xf32> to vector<64xf32>
    %55 = vector.shape_cast %54 : vector<64xf32> to vector<64x1xf32>
    %cst_40 = arith.constant 1.280000e+02 : f32
    %56 = vector.broadcast %cst_40 : f32 to vector<64x1xf32>
    %57 = arith.divf %55, %56 : vector<64x1xf32>
    %58 = vector.broadcast %50 : vector<64x1xf32> to vector<64x128xf32>
    %59 = arith.subf %42, %58 : vector<64x128xf32>
    %cst_41 = arith.constant 9.99999997E-7 : f32
    %60 = vector.broadcast %cst_41 : f32 to vector<64x1xf32>
    %61 = arith.addf %57, %60 : vector<64x1xf32>
    %62 = math.rsqrt %61 : vector<64x1xf32>
    %63 = vector.broadcast %62 : vector<64x1xf32> to vector<64x128xf32>
    %64 = arith.mulf %59, %63 : vector<64x128xf32>
    %65 = vector.broadcast %44 : vector<1x128xf32> to vector<64x128xf32>
    %66 = arith.mulf %64, %65 : vector<64x128xf32>
    %67 = vector.broadcast %46 : vector<1x128xf32> to vector<64x128xf32>
    %68 = arith.addf %66, %67 : vector<64x128xf32>
    %c0_42 = arith.constant 0 : index
    %c0_43 = arith.constant 0 : index
    %c0_44 = arith.constant 0 : index
    %69 = vector.load %arg8[%c0_42, %c0_43, %c0_44] : memref<2x128x384xf32, #tpu.memory_space<vmem>>, vector<1x128x384xf32>
    %70 = vector.shape_cast %69 : vector<1x128x384xf32> to vector<128x384xf32>
    %71 = arith.truncf %68 : vector<64x128xf32> to vector<64x128xbf16>
    %72 = arith.truncf %70 : vector<128x384xf32> to vector<128x384xbf16>
    %cst_45 = arith.constant dense<0.000000e+00> : vector<64x384xf32>
    %73 = tpu.matmul %71, %72, %cst_45 {dimension_numbers = #tpu.dot_dimension_numbers<[1], [0], [0], [1], [0, 0, 1, 1], [], []>} : vector<64x128xbf16>, vector<128x384xbf16>, vector<64x384xf32> -> vector<64x384xf32>
    %c0_46 = arith.constant 0 : index
    %c0_47 = arith.constant 0 : index
    %c0_48 = arith.constant 0 : index
    %74 = vector.load %arg9[%c0_46, %c0_47, %c0_48] : memref<2x1x384xf32, #tpu.memory_space<vmem>>, vector<1x1x384xf32>
    %75 = vector.shape_cast %74 : vector<1x1x384xf32> to vector<1x384xf32>
    %76 = vector.broadcast %75 : vector<1x384xf32> to vector<64x384xf32>
    %77 = arith.addf %73, %76 : vector<64x384xf32>
    %78 = vector.extract_strided_slice %77 {offsets = [0, 0], sizes = [64, 128], strides = [1, 1]} : vector<64x384xf32> to vector<64x128xf32>
    %cst_49 = arith.constant 1.250000e-01 : f32
    %79 = vector.broadcast %cst_49 : f32 to vector<64x128xf32>
    %80 = arith.mulf %78, %79 : vector<64x128xf32>
    %81 = vector.extract_strided_slice %77 {offsets = [0, 128], sizes = [64, 128], strides = [1, 1]} : vector<64x384xf32> to vector<64x128xf32>
    %82 = vector.extract_strided_slice %77 {offsets = [0, 256], sizes = [64, 128], strides = [1, 1]} : vector<64x384xf32> to vector<64x128xf32>
    %83 = vector.extract_strided_slice %80 {offsets = [0, 0], sizes = [16, 64], strides = [1, 1]} : vector<64x128xf32> to vector<16x64xf32>
    %84 = vector.extract_strided_slice %81 {offsets = [0, 0], sizes = [16, 64], strides = [1, 1]} : vector<64x128xf32> to vector<16x64xf32>
    %85 = vector.extract_strided_slice %82 {offsets = [0, 0], sizes = [16, 64], strides = [1, 1]} : vector<64x128xf32> to vector<16x64xf32>
    %86 = arith.truncf %83 : vector<16x64xf32> to vector<16x64xbf16>
    %87 = arith.truncf %84 : vector<16x64xf32> to vector<16x64xbf16>
    %cst_50 = arith.constant dense<0.000000e+00> : vector<16x16xf32>
    %88 = tpu.matmul %86, %87, %cst_50 {dimension_numbers = #tpu.dot_dimension_numbers<[1], [1], [0], [0], [0, 0, 1, 0], [], []>} : vector<16x64xbf16>, vector<16x64xbf16>, vector<16x16xf32> -> vector<16x16xf32>
    %89 = arith.addf %88, %41 : vector<16x16xf32>
    %cst_51 = arith.constant dense<0xFF800000> : vector<16xf32>
    %90 = vector.multi_reduction <maximumf>, %89, %cst_51 [1] : vector<16x16xf32> to vector<16xf32>
    %91 = vector.shape_cast %90 : vector<16xf32> to vector<16x1xf32>
    %92 = vector.broadcast %91 : vector<16x1xf32> to vector<16x16xf32>
    %93 = arith.subf %89, %92 : vector<16x16xf32>
    %94 = math.exp %93 : vector<16x16xf32>
    %cst_52 = arith.constant dense<0.000000e+00> : vector<16xf32>
    %95 = vector.multi_reduction <add>, %94, %cst_52 [1] : vector<16x16xf32> to vector<16xf32>
    %96 = vector.shape_cast %95 : vector<16xf32> to vector<16x1xf32>
    %97 = tpu.reciprocal %96 {approx = true} : vector<16x1xf32> -> vector<16x1xf32>
    %98 = vector.broadcast %97 : vector<16x1xf32> to vector<16x16xf32>
    %99 = arith.mulf %94, %98 : vector<16x16xf32>
    %100 = arith.truncf %99 : vector<16x16xf32> to vector<16x16xbf16>
    %101 = arith.truncf %85 : vector<16x64xf32> to vector<16x64xbf16>
    %cst_53 = arith.constant dense<0.000000e+00> : vector<16x64xf32>
    %102 = tpu.matmul %100, %101, %cst_53 {dimension_numbers = #tpu.dot_dimension_numbers<[1], [0], [0], [1], [0, 0, 1, 1], [], []>} : vector<16x16xbf16>, vector<16x64xbf16>, vector<16x64xf32> -> vector<16x64xf32>
    %c0_54 = arith.constant 0 : index
    %c0_55 = arith.constant 0 : index
    %103 = vector.load %arg24[%c0_54, %c0_55] : memref<64x128xf32, #tpu.memory_space<vmem>>, vector<16x64xf32>
    tpu.vector_store %arg24[%c0_54, %c0_55], %102 {strides = array<i32>} : memref<64x128xf32, #tpu.memory_space<vmem>>, vector<16x64xf32>,
    %104 = vector.extract_strided_slice %80 {offsets = [0, 64], sizes = [16, 64], strides = [1, 1]} : vector<64x128xf32> to vector<16x64xf32>
    %105 = vector.extract_strided_slice %81 {offsets = [0, 64], sizes = [16, 64], strides = [1, 1]} : vector<64x128xf32> to vector<16x64xf32>
    %106 = vector.extract_strided_slice %82 {offsets = [0, 64], sizes = [16, 64], strides = [1, 1]} : vector<64x128xf32> to vector<16x64xf32>
    %107 = arith.truncf %104 : vector<16x64xf32> to vector<16x64xbf16>
    %108 = arith.truncf %105 : vector<16x64xf32> to vector<16x64xbf16>
    %cst_56 = arith.constant dense<0.000000e+00> : vector<16x16xf32>
    %109 = tpu.matmul %107, %108, %cst_56 {dimension_numbers = #tpu.dot_dimension_numbers<[1], [1], [0], [0], [0, 0, 1, 0], [], []>} : vector<16x64xbf16>, vector<16x64xbf16>, vector<16x16xf32> -> vector<16x16xf32>
    %110 = arith.addf %109, %41 : vector<16x16xf32>
    %cst_57 = arith.constant dense<0xFF800000> : vector<16xf32>
    %111 = vector.multi_reduction <maximumf>, %110, %cst_57 [1] : vector<16x16xf32> to vector<16xf32>
    %112 = vector.shape_cast %111 : vector<16xf32> to vector<16x1xf32>
    %113 = vector.broadcast %112 : vector<16x1xf32> to vector<16x16xf32>
    %114 = arith.subf %110, %113 : vector<16x16xf32>
    %115 = math.exp %114 : vector<16x16xf32>
    %cst_58 = arith.constant dense<0.000000e+00> : vector<16xf32>
    %116 = vector.multi_reduction <add>, %115, %cst_58 [1] : vector<16x16xf32> to vector<16xf32>
    %117 = vector.shape_cast %116 : vector<16xf32> to vector<16x1xf32>
    %118 = tpu.reciprocal %117 {approx = true} : vector<16x1xf32> -> vector<16x1xf32>
    %119 = vector.broadcast %118 : vector<16x1xf32> to vector<16x16xf32>
    %120 = arith.mulf %115, %119 : vector<16x16xf32>
    %121 = arith.truncf %120 : vector<16x16xf32> to vector<16x16xbf16>
    %122 = arith.truncf %106 : vector<16x64xf32> to vector<16x64xbf16>
    %cst_59 = arith.constant dense<0.000000e+00> : vector<16x64xf32>
    %123 = tpu.matmul %121, %122, %cst_59 {dimension_numbers = #tpu.dot_dimension_numbers<[1], [0], [0], [1], [0, 0, 1, 1], [], []>} : vector<16x16xbf16>, vector<16x64xbf16>, vector<16x64xf32> -> vector<16x64xf32>
    %c0_60 = arith.constant 0 : index
    %c64 = arith.constant 64 : index
    %124 = vector.load %arg24[%c0_60, %c64] : memref<64x128xf32, #tpu.memory_space<vmem>>, vector<16x64xf32>
    tpu.vector_store %arg24[%c0_60, %c64], %123 {strides = array<i32>} : memref<64x128xf32, #tpu.memory_space<vmem>>, vector<16x64xf32>,
    %125 = vector.extract_strided_slice %80 {offsets = [16, 0], sizes = [16, 64], strides = [1, 1]} : vector<64x128xf32> to vector<16x64xf32>
    %126 = vector.extract_strided_slice %81 {offsets = [16, 0], sizes = [16, 64], strides = [1, 1]} : vector<64x128xf32> to vector<16x64xf32>
    %127 = vector.extract_strided_slice %82 {offsets = [16, 0], sizes = [16, 64], strides = [1, 1]} : vector<64x128xf32> to vector<16x64xf32>
    %128 = arith.truncf %125 : vector<16x64xf32> to vector<16x64xbf16>
    %129 = arith.truncf %126 : vector<16x64xf32> to vector<16x64xbf16>
    %cst_61 = arith.constant dense<0.000000e+00> : vector<16x16xf32>
    %130 = tpu.matmul %128, %129, %cst_61 {dimension_numbers = #tpu.dot_dimension_numbers<[1], [1], [0], [0], [0, 0, 1, 0], [], []>} : vector<16x64xbf16>, vector<16x64xbf16>, vector<16x16xf32> -> vector<16x16xf32>
    %131 = arith.addf %130, %41 : vector<16x16xf32>
    %cst_62 = arith.constant dense<0xFF800000> : vector<16xf32>
    %132 = vector.multi_reduction <maximumf>, %131, %cst_62 [1] : vector<16x16xf32> to vector<16xf32>
    %133 = vector.shape_cast %132 : vector<16xf32> to vector<16x1xf32>
    %134 = vector.broadcast %133 : vector<16x1xf32> to vector<16x16xf32>
    %135 = arith.subf %131, %134 : vector<16x16xf32>
    %136 = math.exp %135 : vector<16x16xf32>
    %cst_63 = arith.constant dense<0.000000e+00> : vector<16xf32>
    %137 = vector.multi_reduction <add>, %136, %cst_63 [1] : vector<16x16xf32> to vector<16xf32>
    %138 = vector.shape_cast %137 : vector<16xf32> to vector<16x1xf32>
    %139 = tpu.reciprocal %138 {approx = true} : vector<16x1xf32> -> vector<16x1xf32>
    %140 = vector.broadcast %139 : vector<16x1xf32> to vector<16x16xf32>
    %141 = arith.mulf %136, %140 : vector<16x16xf32>
    %142 = arith.truncf %141 : vector<16x16xf32> to vector<16x16xbf16>
    %143 = arith.truncf %127 : vector<16x64xf32> to vector<16x64xbf16>
    %cst_64 = arith.constant dense<0.000000e+00> : vector<16x64xf32>
    %144 = tpu.matmul %142, %143, %cst_64 {dimension_numbers = #tpu.dot_dimension_numbers<[1], [0], [0], [1], [0, 0, 1, 1], [], []>} : vector<16x16xbf16>, vector<16x64xbf16>, vector<16x64xf32> -> vector<16x64xf32>
    %c16_65 = arith.constant 16 : index
    %c0_66 = arith.constant 0 : index
    %145 = vector.load %arg24[%c16_65, %c0_66] : memref<64x128xf32, #tpu.memory_space<vmem>>, vector<16x64xf32>
    tpu.vector_store %arg24[%c16_65, %c0_66], %144 {strides = array<i32>} : memref<64x128xf32, #tpu.memory_space<vmem>>, vector<16x64xf32>,
    %146 = vector.extract_strided_slice %80 {offsets = [16, 64], sizes = [16, 64], strides = [1, 1]} : vector<64x128xf32> to vector<16x64xf32>
    %147 = vector.extract_strided_slice %81 {offsets = [16, 64], sizes = [16, 64], strides = [1, 1]} : vector<64x128xf32> to vector<16x64xf32>
    %148 = vector.extract_strided_slice %82 {offsets = [16, 64], sizes = [16, 64], strides = [1, 1]} : vector<64x128xf32> to vector<16x64xf32>
    %149 = arith.truncf %146 : vector<16x64xf32> to vector<16x64xbf16>
    %150 = arith.truncf %147 : vector<16x64xf32> to vector<16x64xbf16>
    %cst_67 = arith.constant dense<0.000000e+00> : vector<16x16xf32>
    %151 = tpu.matmul %149, %150, %cst_67 {dimension_numbers = #tpu.dot_dimension_numbers<[1], [1], [0], [0], [0, 0, 1, 0], [], []>} : vector<16x64xbf16>, vector<16x64xbf16>, vector<16x16xf32> -> vector<16x16xf32>
    %152 = arith.addf %151, %41 : vector<16x16xf32>
    %cst_68 = arith.constant dense<0xFF800000> : vector<16xf32>
    %153 = vector.multi_reduction <maximumf>, %152, %cst_68 [1] : vector<16x16xf32> to vector<16xf32>
    %154 = vector.shape_cast %153 : vector<16xf32> to vector<16x1xf32>
    %155 = vector.broadcast %154 : vector<16x1xf32> to vector<16x16xf32>
    %156 = arith.subf %152, %155 : vector<16x16xf32>
    %157 = math.exp %156 : vector<16x16xf32>
    %cst_69 = arith.constant dense<0.000000e+00> : vector<16xf32>
    %158 = vector.multi_reduction <add>, %157, %cst_69 [1] : vector<16x16xf32> to vector<16xf32>
    %159 = vector.shape_cast %158 : vector<16xf32> to vector<16x1xf32>
    %160 = tpu.reciprocal %159 {approx = true} : vector<16x1xf32> -> vector<16x1xf32>
    %161 = vector.broadcast %160 : vector<16x1xf32> to vector<16x16xf32>
    %162 = arith.mulf %157, %161 : vector<16x16xf32>
    %163 = arith.truncf %162 : vector<16x16xf32> to vector<16x16xbf16>
    %164 = arith.truncf %148 : vector<16x64xf32> to vector<16x64xbf16>
    %cst_70 = arith.constant dense<0.000000e+00> : vector<16x64xf32>
    %165 = tpu.matmul %163, %164, %cst_70 {dimension_numbers = #tpu.dot_dimension_numbers<[1], [0], [0], [1], [0, 0, 1, 1], [], []>} : vector<16x16xbf16>, vector<16x64xbf16>, vector<16x64xf32> -> vector<16x64xf32>
    %c16_71 = arith.constant 16 : index
    %c64_72 = arith.constant 64 : index
    %166 = vector.load %arg24[%c16_71, %c64_72] : memref<64x128xf32, #tpu.memory_space<vmem>>, vector<16x64xf32>
    tpu.vector_store %arg24[%c16_71, %c64_72], %165 {strides = array<i32>} : memref<64x128xf32, #tpu.memory_space<vmem>>, vector<16x64xf32>,
    %167 = vector.extract_strided_slice %80 {offsets = [32, 0], sizes = [16, 64], strides = [1, 1]} : vector<64x128xf32> to vector<16x64xf32>
    %168 = vector.extract_strided_slice %81 {offsets = [32, 0], sizes = [16, 64], strides = [1, 1]} : vector<64x128xf32> to vector<16x64xf32>
    %169 = vector.extract_strided_slice %82 {offsets = [32, 0], sizes = [16, 64], strides = [1, 1]} : vector<64x128xf32> to vector<16x64xf32>
    %170 = arith.truncf %167 : vector<16x64xf32> to vector<16x64xbf16>
    %171 = arith.truncf %168 : vector<16x64xf32> to vector<16x64xbf16>
    %cst_73 = arith.constant dense<0.000000e+00> : vector<16x16xf32>
    %172 = tpu.matmul %170, %171, %cst_73 {dimension_numbers = #tpu.dot_dimension_numbers<[1], [1], [0], [0], [0, 0, 1, 0], [], []>} : vector<16x64xbf16>, vector<16x64xbf16>, vector<16x16xf32> -> vector<16x16xf32>
    %173 = arith.addf %172, %41 : vector<16x16xf32>
    %cst_74 = arith.constant dense<0xFF800000> : vector<16xf32>
    %174 = vector.multi_reduction <maximumf>, %173, %cst_74 [1] : vector<16x16xf32> to vector<16xf32>
    %175 = vector.shape_cast %174 : vector<16xf32> to vector<16x1xf32>
    %176 = vector.broadcast %175 : vector<16x1xf32> to vector<16x16xf32>
    %177 = arith.subf %173, %176 : vector<16x16xf32>
    %178 = math.exp %177 : vector<16x16xf32>
    %cst_75 = arith.constant dense<0.000000e+00> : vector<16xf32>
    %179 = vector.multi_reduction <add>, %178, %cst_75 [1] : vector<16x16xf32> to vector<16xf32>
    %180 = vector.shape_cast %179 : vector<16xf32> to vector<16x1xf32>
    %181 = tpu.reciprocal %180 {approx = true} : vector<16x1xf32> -> vector<16x1xf32>
    %182 = vector.broadcast %181 : vector<16x1xf32> to vector<16x16xf32>
    %183 = arith.mulf %178, %182 : vector<16x16xf32>
    %184 = arith.truncf %183 : vector<16x16xf32> to vector<16x16xbf16>
    %185 = arith.truncf %169 : vector<16x64xf32> to vector<16x64xbf16>
    %cst_76 = arith.constant dense<0.000000e+00> : vector<16x64xf32>
    %186 = tpu.matmul %184, %185, %cst_76 {dimension_numbers = #tpu.dot_dimension_numbers<[1], [0], [0], [1], [0, 0, 1, 1], [], []>} : vector<16x16xbf16>, vector<16x64xbf16>, vector<16x64xf32> -> vector<16x64xf32>
    %c32_77 = arith.constant 32 : index
    %c0_78 = arith.constant 0 : index
    %187 = vector.load %arg24[%c32_77, %c0_78] : memref<64x128xf32, #tpu.memory_space<vmem>>, vector<16x64xf32>
    tpu.vector_store %arg24[%c32_77, %c0_78], %186 {strides = array<i32>} : memref<64x128xf32, #tpu.memory_space<vmem>>, vector<16x64xf32>,
    %188 = vector.extract_strided_slice %80 {offsets = [32, 64], sizes = [16, 64], strides = [1, 1]} : vector<64x128xf32> to vector<16x64xf32>
    %189 = vector.extract_strided_slice %81 {offsets = [32, 64], sizes = [16, 64], strides = [1, 1]} : vector<64x128xf32> to vector<16x64xf32>
    %190 = vector.extract_strided_slice %82 {offsets = [32, 64], sizes = [16, 64], strides = [1, 1]} : vector<64x128xf32> to vector<16x64xf32>
    %191 = arith.truncf %188 : vector<16x64xf32> to vector<16x64xbf16>
    %192 = arith.truncf %189 : vector<16x64xf32> to vector<16x64xbf16>
    %cst_79 = arith.constant dense<0.000000e+00> : vector<16x16xf32>
    %193 = tpu.matmul %191, %192, %cst_79 {dimension_numbers = #tpu.dot_dimension_numbers<[1], [1], [0], [0], [0, 0, 1, 0], [], []>} : vector<16x64xbf16>, vector<16x64xbf16>, vector<16x16xf32> -> vector<16x16xf32>
    %194 = arith.addf %193, %41 : vector<16x16xf32>
    %cst_80 = arith.constant dense<0xFF800000> : vector<16xf32>
    %195 = vector.multi_reduction <maximumf>, %194, %cst_80 [1] : vector<16x16xf32> to vector<16xf32>
    %196 = vector.shape_cast %195 : vector<16xf32> to vector<16x1xf32>
    %197 = vector.broadcast %196 : vector<16x1xf32> to vector<16x16xf32>
    %198 = arith.subf %194, %197 : vector<16x16xf32>
    %199 = math.exp %198 : vector<16x16xf32>
    %cst_81 = arith.constant dense<0.000000e+00> : vector<16xf32>
    %200 = vector.multi_reduction <add>, %199, %cst_81 [1] : vector<16x16xf32> to vector<16xf32>
    %201 = vector.shape_cast %200 : vector<16xf32> to vector<16x1xf32>
    %202 = tpu.reciprocal %201 {approx = true} : vector<16x1xf32> -> vector<16x1xf32>
    %203 = vector.broadcast %202 : vector<16x1xf32> to vector<16x16xf32>
    %204 = arith.mulf %199, %203 : vector<16x16xf32>
    %205 = arith.truncf %204 : vector<16x16xf32> to vector<16x16xbf16>
    %206 = arith.truncf %190 : vector<16x64xf32> to vector<16x64xbf16>
    %cst_82 = arith.constant dense<0.000000e+00> : vector<16x64xf32>
    %207 = tpu.matmul %205, %206, %cst_82 {dimension_numbers = #tpu.dot_dimension_numbers<[1], [0], [0], [1], [0, 0, 1, 1], [], []>} : vector<16x16xbf16>, vector<16x64xbf16>, vector<16x64xf32> -> vector<16x64xf32>
    %c32_83 = arith.constant 32 : index
    %c64_84 = arith.constant 64 : index
    %208 = vector.load %arg24[%c32_83, %c64_84] : memref<64x128xf32, #tpu.memory_space<vmem>>, vector<16x64xf32>
    tpu.vector_store %arg24[%c32_83, %c64_84], %207 {strides = array<i32>} : memref<64x128xf32, #tpu.memory_space<vmem>>, vector<16x64xf32>,
    %209 = vector.extract_strided_slice %80 {offsets = [48, 0], sizes = [16, 64], strides = [1, 1]} : vector<64x128xf32> to vector<16x64xf32>
    %210 = vector.extract_strided_slice %81 {offsets = [48, 0], sizes = [16, 64], strides = [1, 1]} : vector<64x128xf32> to vector<16x64xf32>
    %211 = vector.extract_strided_slice %82 {offsets = [48, 0], sizes = [16, 64], strides = [1, 1]} : vector<64x128xf32> to vector<16x64xf32>
    %212 = arith.truncf %209 : vector<16x64xf32> to vector<16x64xbf16>
    %213 = arith.truncf %210 : vector<16x64xf32> to vector<16x64xbf16>
    %cst_85 = arith.constant dense<0.000000e+00> : vector<16x16xf32>
    %214 = tpu.matmul %212, %213, %cst_85 {dimension_numbers = #tpu.dot_dimension_numbers<[1], [1], [0], [0], [0, 0, 1, 0], [], []>} : vector<16x64xbf16>, vector<16x64xbf16>, vector<16x16xf32> -> vector<16x16xf32>
    %215 = arith.addf %214, %41 : vector<16x16xf32>
    %cst_86 = arith.constant dense<0xFF800000> : vector<16xf32>
    %216 = vector.multi_reduction <maximumf>, %215, %cst_86 [1] : vector<16x16xf32> to vector<16xf32>
    %217 = vector.shape_cast %216 : vector<16xf32> to vector<16x1xf32>
    %218 = vector.broadcast %217 : vector<16x1xf32> to vector<16x16xf32>
    %219 = arith.subf %215, %218 : vector<16x16xf32>
    %220 = math.exp %219 : vector<16x16xf32>
    %cst_87 = arith.constant dense<0.000000e+00> : vector<16xf32>
    %221 = vector.multi_reduction <add>, %220, %cst_87 [1] : vector<16x16xf32> to vector<16xf32>
    %222 = vector.shape_cast %221 : vector<16xf32> to vector<16x1xf32>
    %223 = tpu.reciprocal %222 {approx = true} : vector<16x1xf32> -> vector<16x1xf32>
    %224 = vector.broadcast %223 : vector<16x1xf32> to vector<16x16xf32>
    %225 = arith.mulf %220, %224 : vector<16x16xf32>
    %226 = arith.truncf %225 : vector<16x16xf32> to vector<16x16xbf16>
    %227 = arith.truncf %211 : vector<16x64xf32> to vector<16x64xbf16>
    %cst_88 = arith.constant dense<0.000000e+00> : vector<16x64xf32>
    %228 = tpu.matmul %226, %227, %cst_88 {dimension_numbers = #tpu.dot_dimension_numbers<[1], [0], [0], [1], [0, 0, 1, 1], [], []>} : vector<16x16xbf16>, vector<16x64xbf16>, vector<16x64xf32> -> vector<16x64xf32>
    %c48_89 = arith.constant 48 : index
    %c0_90 = arith.constant 0 : index
    %229 = vector.load %arg24[%c48_89, %c0_90] : memref<64x128xf32, #tpu.memory_space<vmem>>, vector<16x64xf32>
    tpu.vector_store %arg24[%c48_89, %c0_90], %228 {strides = array<i32>} : memref<64x128xf32, #tpu.memory_space<vmem>>, vector<16x64xf32>,
    %230 = vector.extract_strided_slice %80 {offsets = [48, 64], sizes = [16, 64], strides = [1, 1]} : vector<64x128xf32> to vector<16x64xf32>
    %231 = vector.extract_strided_slice %81 {offsets = [48, 64], sizes = [16, 64], strides = [1, 1]} : vector<64x128xf32> to vector<16x64xf32>
    %232 = vector.extract_strided_slice %82 {offsets = [48, 64], sizes = [16, 64], strides = [1, 1]} : vector<64x128xf32> to vector<16x64xf32>
    %233 = arith.truncf %230 : vector<16x64xf32> to vector<16x64xbf16>
    %234 = arith.truncf %231 : vector<16x64xf32> to vector<16x64xbf16>
    %cst_91 = arith.constant dense<0.000000e+00> : vector<16x16xf32>
    %235 = tpu.matmul %233, %234, %cst_91 {dimension_numbers = #tpu.dot_dimension_numbers<[1], [1], [0], [0], [0, 0, 1, 0], [], []>} : vector<16x64xbf16>, vector<16x64xbf16>, vector<16x16xf32> -> vector<16x16xf32>
    %236 = arith.addf %235, %41 : vector<16x16xf32>
    %cst_92 = arith.constant dense<0xFF800000> : vector<16xf32>
    %237 = vector.multi_reduction <maximumf>, %236, %cst_92 [1] : vector<16x16xf32> to vector<16xf32>
    %238 = vector.shape_cast %237 : vector<16xf32> to vector<16x1xf32>
    %239 = vector.broadcast %238 : vector<16x1xf32> to vector<16x16xf32>
    %240 = arith.subf %236, %239 : vector<16x16xf32>
    %241 = math.exp %240 : vector<16x16xf32>
    %cst_93 = arith.constant dense<0.000000e+00> : vector<16xf32>
    %242 = vector.multi_reduction <add>, %241, %cst_93 [1] : vector<16x16xf32> to vector<16xf32>
    %243 = vector.shape_cast %242 : vector<16xf32> to vector<16x1xf32>
    %244 = tpu.reciprocal %243 {approx = true} : vector<16x1xf32> -> vector<16x1xf32>
    %245 = vector.broadcast %244 : vector<16x1xf32> to vector<16x16xf32>
    %246 = arith.mulf %241, %245 : vector<16x16xf32>
    %247 = arith.truncf %246 : vector<16x16xf32> to vector<16x16xbf16>
    %248 = arith.truncf %232 : vector<16x64xf32> to vector<16x64xbf16>
    %cst_94 = arith.constant dense<0.000000e+00> : vector<16x64xf32>
    %249 = tpu.matmul %247, %248, %cst_94 {dimension_numbers = #tpu.dot_dimension_numbers<[1], [0], [0], [1], [0, 0, 1, 1], [], []>} : vector<16x16xbf16>, vector<16x64xbf16>, vector<16x64xf32> -> vector<16x64xf32>
    %c48_95 = arith.constant 48 : index
    %c64_96 = arith.constant 64 : index
    %250 = vector.load %arg24[%c48_95, %c64_96] : memref<64x128xf32, #tpu.memory_space<vmem>>, vector<16x64xf32>
    tpu.vector_store %arg24[%c48_95, %c64_96], %249 {strides = array<i32>} : memref<64x128xf32, #tpu.memory_space<vmem>>, vector<16x64xf32>,
    %c0_97 = arith.constant 0 : index
    %c0_98 = arith.constant 0 : index
    %251 = vector.load %arg24[%c0_97, %c0_98] : memref<64x128xf32, #tpu.memory_space<vmem>>, vector<64x128xf32>
    %c0_99 = arith.constant 0 : index
    %c0_100 = arith.constant 0 : index
    %c0_101 = arith.constant 0 : index
    %252 = vector.load %arg10[%c0_99, %c0_100, %c0_101] : memref<2x128x128xf32, #tpu.memory_space<vmem>>, vector<1x128x128xf32>
    %253 = vector.shape_cast %252 : vector<1x128x128xf32> to vector<128x128xf32>
    %254 = arith.truncf %251 : vector<64x128xf32> to vector<64x128xbf16>
    %255 = arith.truncf %253 : vector<128x128xf32> to vector<128x128xbf16>
    %cst_102 = arith.constant dense<0.000000e+00> : vector<64x128xf32>
    %256 = tpu.matmul %254, %255, %cst_102 {dimension_numbers = #tpu.dot_dimension_numbers<[1], [0], [0], [1], [0, 0, 1, 1], [], []>} : vector<64x128xbf16>, vector<128x128xbf16>, vector<64x128xf32> -> vector<64x128xf32>
    %c0_103 = arith.constant 0 : index
    %c0_104 = arith.constant 0 : index
    %c0_105 = arith.constant 0 : index
    %257 = vector.load %arg11[%c0_103, %c0_104, %c0_105] : memref<2x1x128xf32, #tpu.memory_space<vmem>>, vector<1x1x128xf32>
    %258 = vector.shape_cast %257 : vector<1x1x128xf32> to vector<1x128xf32>
    %259 = vector.broadcast %258 : vector<1x128xf32> to vector<64x128xf32>
    %260 = arith.addf %256, %259 : vector<64x128xf32>
    %c0_106 = arith.constant 0 : index
    %c0_107 = arith.constant 0 : index
    %c0_108 = arith.constant 0 : index
    %261 = vector.load %arg12[%c0_106, %c0_107, %c0_108] : memref<2x1x128xf32, #tpu.memory_space<vmem>>, vector<1x1x128xf32>
    %262 = vector.shape_cast %261 : vector<1x1x128xf32> to vector<1x128xf32>
    %263 = vector.broadcast %262 : vector<1x128xf32> to vector<64x128xf32>
    %264 = arith.mulf %260, %263 : vector<64x128xf32>
    %265 = arith.addf %42, %264 : vector<64x128xf32>
    %c0_109 = arith.constant 0 : index
    %c0_110 = arith.constant 0 : index
    %c0_111 = arith.constant 0 : index
    %266 = vector.load %arg13[%c0_109, %c0_110, %c0_111] : memref<2x1x128xf32, #tpu.memory_space<vmem>>, vector<1x1x128xf32>
    %267 = vector.shape_cast %266 : vector<1x1x128xf32> to vector<1x128xf32>
    %c0_112 = arith.constant 0 : index
    %c0_113 = arith.constant 0 : index
    %c0_114 = arith.constant 0 : index
    %268 = vector.load %arg14[%c0_112, %c0_113, %c0_114] : memref<2x1x128xf32, #tpu.memory_space<vmem>>, vector<1x1x128xf32>
    %269 = vector.shape_cast %268 : vector<1x1x128xf32> to vector<1x128xf32>
    %cst_115 = arith.constant dense<0.000000e+00> : vector<64xf32>
    %270 = vector.multi_reduction <add>, %265, %cst_115 [1] : vector<64x128xf32> to vector<64xf32>
    %271 = vector.shape_cast %270 : vector<64xf32> to vector<64x1xf32>
    %cst_116 = arith.constant 1.280000e+02 : f32
    %272 = vector.broadcast %cst_116 : f32 to vector<64x1xf32>
    %273 = arith.divf %271, %272 : vector<64x1xf32>
    %274 = vector.broadcast %273 : vector<64x1xf32> to vector<64x128xf32>
    %275 = arith.subf %265, %274 : vector<64x128xf32>
    %276 = arith.mulf %275, %275 : vector<64x128xf32>
    %cst_117 = arith.constant dense<0.000000e+00> : vector<64xf32>
    %277 = vector.multi_reduction <add>, %276, %cst_117 [1] : vector<64x128xf32> to vector<64xf32>
    %278 = vector.shape_cast %277 : vector<64xf32> to vector<64x1xf32>
    %cst_118 = arith.constant 1.280000e+02 : f32
    %279 = vector.broadcast %cst_118 : f32 to vector<64x1xf32>
    %280 = arith.divf %278, %279 : vector<64x1xf32>
    %281 = vector.broadcast %273 : vector<64x1xf32> to vector<64x128xf32>
    %282 = arith.subf %265, %281 : vector<64x128xf32>
    %cst_119 = arith.constant 9.99999997E-7 : f32
    %283 = vector.broadcast %cst_119 : f32 to vector<64x1xf32>
    %284 = arith.addf %280, %283 : vector<64x1xf32>
    %285 = math.rsqrt %284 : vector<64x1xf32>
    %286 = vector.broadcast %285 : vector<64x1xf32> to vector<64x128xf32>
    %287 = arith.mulf %282, %286 : vector<64x128xf32>
    %288 = vector.broadcast %267 : vector<1x128xf32> to vector<64x128xf32>
    %289 = arith.mulf %287, %288 : vector<64x128xf32>
    %290 = vector.broadcast %269 : vector<1x128xf32> to vector<64x128xf32>
    %291 = arith.addf %289, %290 : vector<64x128xf32>
    %c0_120 = arith.constant 0 : index
    %c0_121 = arith.constant 0 : index
    %c0_122 = arith.constant 0 : index
    %292 = vector.load %arg15[%c0_120, %c0_121, %c0_122] : memref<2x128x512xf32, #tpu.memory_space<vmem>>, vector<1x128x512xf32>
    %293 = vector.shape_cast %292 : vector<1x128x512xf32> to vector<128x512xf32>
    %294 = arith.truncf %291 : vector<64x128xf32> to vector<64x128xbf16>
    %295 = arith.truncf %293 : vector<128x512xf32> to vector<128x512xbf16>
    %cst_123 = arith.constant dense<0.000000e+00> : vector<64x512xf32>
    %296 = tpu.matmul %294, %295, %cst_123 {dimension_numbers = #tpu.dot_dimension_numbers<[1], [0], [0], [1], [0, 0, 1, 1], [], []>} : vector<64x128xbf16>, vector<128x512xbf16>, vector<64x512xf32> -> vector<64x512xf32>
    %c0_124 = arith.constant 0 : index
    %c0_125 = arith.constant 0 : index
    %c0_126 = arith.constant 0 : index
    %297 = vector.load %arg16[%c0_124, %c0_125, %c0_126] : memref<2x1x512xf32, #tpu.memory_space<vmem>>, vector<1x1x512xf32>
    %298 = vector.shape_cast %297 : vector<1x1x512xf32> to vector<1x512xf32>
    %299 = vector.broadcast %298 : vector<1x512xf32> to vector<64x512xf32>
    %300 = arith.addf %296, %299 : vector<64x512xf32>
    %cst_127 = arith.constant 5.000000e-01 : f32
    %301 = vector.broadcast %cst_127 : f32 to vector<64x512xf32>
    %302 = arith.mulf %301, %300 : vector<64x512xf32>
    %cst_128 = arith.constant 4.471500e-02 : f32
    %303 = vector.broadcast %cst_128 : f32 to vector<64x512xf32>
    %304 = arith.mulf %303, %300 : vector<64x512xf32>
    %305 = arith.mulf %304, %300 : vector<64x512xf32>
    %306 = arith.mulf %305, %300 : vector<64x512xf32>
    %307 = arith.addf %300, %306 : vector<64x512xf32>
    %cst_129 = arith.constant 0.797884583 : f32
    %308 = vector.broadcast %cst_129 : f32 to vector<64x512xf32>
    %309 = arith.mulf %308, %307 : vector<64x512xf32>
    %310 = math.tanh %309 : vector<64x512xf32>
    %cst_130 = arith.constant 1.000000e+00 : f32
    %311 = vector.broadcast %cst_130 : f32 to vector<64x512xf32>
    %312 = arith.addf %311, %310 : vector<64x512xf32>
    %313 = arith.mulf %302, %312 : vector<64x512xf32>
    %c0_131 = arith.constant 0 : index
    %c0_132 = arith.constant 0 : index
    %c0_133 = arith.constant 0 : index
    %314 = vector.load %arg17[%c0_131, %c0_132, %c0_133] : memref<2x512x128xf32, #tpu.memory_space<vmem>>, vector<1x512x128xf32>
    %315 = vector.shape_cast %314 : vector<1x512x128xf32> to vector<512x128xf32>
    %316 = arith.truncf %313 : vector<64x512xf32> to vector<64x512xbf16>
    %317 = arith.truncf %315 : vector<512x128xf32> to vector<512x128xbf16>
    %cst_134 = arith.constant dense<0.000000e+00> : vector<64x128xf32>
    %318 = tpu.matmul %316, %317, %cst_134 {dimension_numbers = #tpu.dot_dimension_numbers<[1], [0], [0], [1], [0, 0, 1, 1], [], []>} : vector<64x512xbf16>, vector<512x128xbf16>, vector<64x128xf32> -> vector<64x128xf32>
    %c0_135 = arith.constant 0 : index
    %c0_136 = arith.constant 0 : index
    %c0_137 = arith.constant 0 : index
    %319 = vector.load %arg18[%c0_135, %c0_136, %c0_137] : memref<2x1x128xf32, #tpu.memory_space<vmem>>, vector<1x1x128xf32>
    %320 = vector.shape_cast %319 : vector<1x1x128xf32> to vector<1x128xf32>
    %321 = vector.broadcast %320 : vector<1x128xf32> to vector<64x128xf32>
    %322 = arith.addf %318, %321 : vector<64x128xf32>
    %c0_138 = arith.constant 0 : index
    %c0_139 = arith.constant 0 : index
    %c0_140 = arith.constant 0 : index
    %323 = vector.load %arg19[%c0_138, %c0_139, %c0_140] : memref<2x1x128xf32, #tpu.memory_space<vmem>>, vector<1x1x128xf32>
    %324 = vector.shape_cast %323 : vector<1x1x128xf32> to vector<1x128xf32>
    %325 = vector.broadcast %324 : vector<1x128xf32> to vector<64x128xf32>
    %326 = arith.mulf %322, %325 : vector<64x128xf32>
    %327 = arith.addf %265, %326 : vector<64x128xf32>
    %c1_141 = arith.constant 1 : index
    %c0_142 = arith.constant 0 : index
    %c0_143 = arith.constant 0 : index
    %328 = vector.load %arg6[%c1_141, %c0_142, %c0_143] : memref<2x1x128xf32, #tpu.memory_space<vmem>>, vector<1x1x128xf32>
    %329 = vector.shape_cast %328 : vector<1x1x128xf32> to vector<1x128xf32>
    %c1_144 = arith.constant 1 : index
    %c0_145 = arith.constant 0 : index
    %c0_146 = arith.constant 0 : index
    %330 = vector.load %arg7[%c1_144, %c0_145, %c0_146] : memref<2x1x128xf32, #tpu.memory_space<vmem>>, vector<1x1x128xf32>
    %331 = vector.shape_cast %330 : vector<1x1x128xf32> to vector<1x128xf32>
    %cst_147 = arith.constant dense<0.000000e+00> : vector<64xf32>
    %332 = vector.multi_reduction <add>, %327, %cst_147 [1] : vector<64x128xf32> to vector<64xf32>
    %333 = vector.shape_cast %332 : vector<64xf32> to vector<64x1xf32>
    %cst_148 = arith.constant 1.280000e+02 : f32
    %334 = vector.broadcast %cst_148 : f32 to vector<64x1xf32>
    %335 = arith.divf %333, %334 : vector<64x1xf32>
    %336 = vector.broadcast %335 : vector<64x1xf32> to vector<64x128xf32>
    %337 = arith.subf %327, %336 : vector<64x128xf32>
    %338 = arith.mulf %337, %337 : vector<64x128xf32>
    %cst_149 = arith.constant dense<0.000000e+00> : vector<64xf32>
    %339 = vector.multi_reduction <add>, %338, %cst_149 [1] : vector<64x128xf32> to vector<64xf32>
    %340 = vector.shape_cast %339 : vector<64xf32> to vector<64x1xf32>
    %cst_150 = arith.constant 1.280000e+02 : f32
    %341 = vector.broadcast %cst_150 : f32 to vector<64x1xf32>
    %342 = arith.divf %340, %341 : vector<64x1xf32>
    %343 = vector.broadcast %335 : vector<64x1xf32> to vector<64x128xf32>
    %344 = arith.subf %327, %343 : vector<64x128xf32>
    %cst_151 = arith.constant 9.99999997E-7 : f32
    %345 = vector.broadcast %cst_151 : f32 to vector<64x1xf32>
    %346 = arith.addf %342, %345 : vector<64x1xf32>
    %347 = math.rsqrt %346 : vector<64x1xf32>
    %348 = vector.broadcast %347 : vector<64x1xf32> to vector<64x128xf32>
    %349 = arith.mulf %344, %348 : vector<64x128xf32>
    %350 = vector.broadcast %329 : vector<1x128xf32> to vector<64x128xf32>
    %351 = arith.mulf %349, %350 : vector<64x128xf32>
    %352 = vector.broadcast %331 : vector<1x128xf32> to vector<64x128xf32>
    %353 = arith.addf %351, %352 : vector<64x128xf32>
    %c1_152 = arith.constant 1 : index
    %c0_153 = arith.constant 0 : index
    %c0_154 = arith.constant 0 : index
    %354 = vector.load %arg8[%c1_152, %c0_153, %c0_154] : memref<2x128x384xf32, #tpu.memory_space<vmem>>, vector<1x128x384xf32>
    %355 = vector.shape_cast %354 : vector<1x128x384xf32> to vector<128x384xf32>
    %356 = arith.truncf %353 : vector<64x128xf32> to vector<64x128xbf16>
    %357 = arith.truncf %355 : vector<128x384xf32> to vector<128x384xbf16>
    %cst_155 = arith.constant dense<0.000000e+00> : vector<64x384xf32>
    %358 = tpu.matmul %356, %357, %cst_155 {dimension_numbers = #tpu.dot_dimension_numbers<[1], [0], [0], [1], [0, 0, 1, 1], [], []>} : vector<64x128xbf16>, vector<128x384xbf16>, vector<64x384xf32> -> vector<64x384xf32>
    %c1_156 = arith.constant 1 : index
    %c0_157 = arith.constant 0 : index
    %c0_158 = arith.constant 0 : index
    %359 = vector.load %arg9[%c1_156, %c0_157, %c0_158] : memref<2x1x384xf32, #tpu.memory_space<vmem>>, vector<1x1x384xf32>
    %360 = vector.shape_cast %359 : vector<1x1x384xf32> to vector<1x384xf32>
    %361 = vector.broadcast %360 : vector<1x384xf32> to vector<64x384xf32>
    %362 = arith.addf %358, %361 : vector<64x384xf32>
    %363 = vector.extract_strided_slice %362 {offsets = [0, 0], sizes = [64, 128], strides = [1, 1]} : vector<64x384xf32> to vector<64x128xf32>
    %cst_159 = arith.constant 1.250000e-01 : f32
    %364 = vector.broadcast %cst_159 : f32 to vector<64x128xf32>
    %365 = arith.mulf %363, %364 : vector<64x128xf32>
    %366 = vector.extract_strided_slice %362 {offsets = [0, 128], sizes = [64, 128], strides = [1, 1]} : vector<64x384xf32> to vector<64x128xf32>
    %367 = vector.extract_strided_slice %362 {offsets = [0, 256], sizes = [64, 128], strides = [1, 1]} : vector<64x384xf32> to vector<64x128xf32>
    %368 = vector.extract_strided_slice %365 {offsets = [0, 0], sizes = [16, 64], strides = [1, 1]} : vector<64x128xf32> to vector<16x64xf32>
    %369 = vector.extract_strided_slice %366 {offsets = [0, 0], sizes = [16, 64], strides = [1, 1]} : vector<64x128xf32> to vector<16x64xf32>
    %370 = vector.extract_strided_slice %367 {offsets = [0, 0], sizes = [16, 64], strides = [1, 1]} : vector<64x128xf32> to vector<16x64xf32>
    %371 = arith.truncf %368 : vector<16x64xf32> to vector<16x64xbf16>
    %372 = arith.truncf %369 : vector<16x64xf32> to vector<16x64xbf16>
    %cst_160 = arith.constant dense<0.000000e+00> : vector<16x16xf32>
    %373 = tpu.matmul %371, %372, %cst_160 {dimension_numbers = #tpu.dot_dimension_numbers<[1], [1], [0], [0], [0, 0, 1, 0], [], []>} : vector<16x64xbf16>, vector<16x64xbf16>, vector<16x16xf32> -> vector<16x16xf32>
    %374 = arith.addf %373, %41 : vector<16x16xf32>
    %cst_161 = arith.constant dense<0xFF800000> : vector<16xf32>
    %375 = vector.multi_reduction <maximumf>, %374, %cst_161 [1] : vector<16x16xf32> to vector<16xf32>
    %376 = vector.shape_cast %375 : vector<16xf32> to vector<16x1xf32>
    %377 = vector.broadcast %376 : vector<16x1xf32> to vector<16x16xf32>
    %378 = arith.subf %374, %377 : vector<16x16xf32>
    %379 = math.exp %378 : vector<16x16xf32>
    %cst_162 = arith.constant dense<0.000000e+00> : vector<16xf32>
    %380 = vector.multi_reduction <add>, %379, %cst_162 [1] : vector<16x16xf32> to vector<16xf32>
    %381 = vector.shape_cast %380 : vector<16xf32> to vector<16x1xf32>
    %382 = tpu.reciprocal %381 {approx = true} : vector<16x1xf32> -> vector<16x1xf32>
    %383 = vector.broadcast %382 : vector<16x1xf32> to vector<16x16xf32>
    %384 = arith.mulf %379, %383 : vector<16x16xf32>
    %385 = arith.truncf %384 : vector<16x16xf32> to vector<16x16xbf16>
    %386 = arith.truncf %370 : vector<16x64xf32> to vector<16x64xbf16>
    %cst_163 = arith.constant dense<0.000000e+00> : vector<16x64xf32>
    %387 = tpu.matmul %385, %386, %cst_163 {dimension_numbers = #tpu.dot_dimension_numbers<[1], [0], [0], [1], [0, 0, 1, 1], [], []>} : vector<16x16xbf16>, vector<16x64xbf16>, vector<16x64xf32> -> vector<16x64xf32>
    %c0_164 = arith.constant 0 : index
    %c0_165 = arith.constant 0 : index
    %388 = vector.load %arg24[%c0_164, %c0_165] : memref<64x128xf32, #tpu.memory_space<vmem>>, vector<16x64xf32>
    tpu.vector_store %arg24[%c0_164, %c0_165], %387 {strides = array<i32>} : memref<64x128xf32, #tpu.memory_space<vmem>>, vector<16x64xf32>,
    %389 = vector.extract_strided_slice %365 {offsets = [0, 64], sizes = [16, 64], strides = [1, 1]} : vector<64x128xf32> to vector<16x64xf32>
    %390 = vector.extract_strided_slice %366 {offsets = [0, 64], sizes = [16, 64], strides = [1, 1]} : vector<64x128xf32> to vector<16x64xf32>
    %391 = vector.extract_strided_slice %367 {offsets = [0, 64], sizes = [16, 64], strides = [1, 1]} : vector<64x128xf32> to vector<16x64xf32>
    %392 = arith.truncf %389 : vector<16x64xf32> to vector<16x64xbf16>
    %393 = arith.truncf %390 : vector<16x64xf32> to vector<16x64xbf16>
    %cst_166 = arith.constant dense<0.000000e+00> : vector<16x16xf32>
    %394 = tpu.matmul %392, %393, %cst_166 {dimension_numbers = #tpu.dot_dimension_numbers<[1], [1], [0], [0], [0, 0, 1, 0], [], []>} : vector<16x64xbf16>, vector<16x64xbf16>, vector<16x16xf32> -> vector<16x16xf32>
    %395 = arith.addf %394, %41 : vector<16x16xf32>
    %cst_167 = arith.constant dense<0xFF800000> : vector<16xf32>
    %396 = vector.multi_reduction <maximumf>, %395, %cst_167 [1] : vector<16x16xf32> to vector<16xf32>
    %397 = vector.shape_cast %396 : vector<16xf32> to vector<16x1xf32>
    %398 = vector.broadcast %397 : vector<16x1xf32> to vector<16x16xf32>
    %399 = arith.subf %395, %398 : vector<16x16xf32>
    %400 = math.exp %399 : vector<16x16xf32>
    %cst_168 = arith.constant dense<0.000000e+00> : vector<16xf32>
    %401 = vector.multi_reduction <add>, %400, %cst_168 [1] : vector<16x16xf32> to vector<16xf32>
    %402 = vector.shape_cast %401 : vector<16xf32> to vector<16x1xf32>
    %403 = tpu.reciprocal %402 {approx = true} : vector<16x1xf32> -> vector<16x1xf32>
    %404 = vector.broadcast %403 : vector<16x1xf32> to vector<16x16xf32>
    %405 = arith.mulf %400, %404 : vector<16x16xf32>
    %406 = arith.truncf %405 : vector<16x16xf32> to vector<16x16xbf16>
    %407 = arith.truncf %391 : vector<16x64xf32> to vector<16x64xbf16>
    %cst_169 = arith.constant dense<0.000000e+00> : vector<16x64xf32>
    %408 = tpu.matmul %406, %407, %cst_169 {dimension_numbers = #tpu.dot_dimension_numbers<[1], [0], [0], [1], [0, 0, 1, 1], [], []>} : vector<16x16xbf16>, vector<16x64xbf16>, vector<16x64xf32> -> vector<16x64xf32>
    %c0_170 = arith.constant 0 : index
    %c64_171 = arith.constant 64 : index
    %409 = vector.load %arg24[%c0_170, %c64_171] : memref<64x128xf32, #tpu.memory_space<vmem>>, vector<16x64xf32>
    tpu.vector_store %arg24[%c0_170, %c64_171], %408 {strides = array<i32>} : memref<64x128xf32, #tpu.memory_space<vmem>>, vector<16x64xf32>,
    %410 = vector.extract_strided_slice %365 {offsets = [16, 0], sizes = [16, 64], strides = [1, 1]} : vector<64x128xf32> to vector<16x64xf32>
    %411 = vector.extract_strided_slice %366 {offsets = [16, 0], sizes = [16, 64], strides = [1, 1]} : vector<64x128xf32> to vector<16x64xf32>
    %412 = vector.extract_strided_slice %367 {offsets = [16, 0], sizes = [16, 64], strides = [1, 1]} : vector<64x128xf32> to vector<16x64xf32>
    %413 = arith.truncf %410 : vector<16x64xf32> to vector<16x64xbf16>
    %414 = arith.truncf %411 : vector<16x64xf32> to vector<16x64xbf16>
    %cst_172 = arith.constant dense<0.000000e+00> : vector<16x16xf32>
    %415 = tpu.matmul %413, %414, %cst_172 {dimension_numbers = #tpu.dot_dimension_numbers<[1], [1], [0], [0], [0, 0, 1, 0], [], []>} : vector<16x64xbf16>, vector<16x64xbf16>, vector<16x16xf32> -> vector<16x16xf32>
    %416 = arith.addf %415, %41 : vector<16x16xf32>
    %cst_173 = arith.constant dense<0xFF800000> : vector<16xf32>
    %417 = vector.multi_reduction <maximumf>, %416, %cst_173 [1] : vector<16x16xf32> to vector<16xf32>
    %418 = vector.shape_cast %417 : vector<16xf32> to vector<16x1xf32>
    %419 = vector.broadcast %418 : vector<16x1xf32> to vector<16x16xf32>
    %420 = arith.subf %416, %419 : vector<16x16xf32>
    %421 = math.exp %420 : vector<16x16xf32>
    %cst_174 = arith.constant dense<0.000000e+00> : vector<16xf32>
    %422 = vector.multi_reduction <add>, %421, %cst_174 [1] : vector<16x16xf32> to vector<16xf32>
    %423 = vector.shape_cast %422 : vector<16xf32> to vector<16x1xf32>
    %424 = tpu.reciprocal %423 {approx = true} : vector<16x1xf32> -> vector<16x1xf32>
    %425 = vector.broadcast %424 : vector<16x1xf32> to vector<16x16xf32>
    %426 = arith.mulf %421, %425 : vector<16x16xf32>
    %427 = arith.truncf %426 : vector<16x16xf32> to vector<16x16xbf16>
    %428 = arith.truncf %412 : vector<16x64xf32> to vector<16x64xbf16>
    %cst_175 = arith.constant dense<0.000000e+00> : vector<16x64xf32>
    %429 = tpu.matmul %427, %428, %cst_175 {dimension_numbers = #tpu.dot_dimension_numbers<[1], [0], [0], [1], [0, 0, 1, 1], [], []>} : vector<16x16xbf16>, vector<16x64xbf16>, vector<16x64xf32> -> vector<16x64xf32>
    %c16_176 = arith.constant 16 : index
    %c0_177 = arith.constant 0 : index
    %430 = vector.load %arg24[%c16_176, %c0_177] : memref<64x128xf32, #tpu.memory_space<vmem>>, vector<16x64xf32>
    tpu.vector_store %arg24[%c16_176, %c0_177], %429 {strides = array<i32>} : memref<64x128xf32, #tpu.memory_space<vmem>>, vector<16x64xf32>,
    %431 = vector.extract_strided_slice %365 {offsets = [16, 64], sizes = [16, 64], strides = [1, 1]} : vector<64x128xf32> to vector<16x64xf32>
    %432 = vector.extract_strided_slice %366 {offsets = [16, 64], sizes = [16, 64], strides = [1, 1]} : vector<64x128xf32> to vector<16x64xf32>
    %433 = vector.extract_strided_slice %367 {offsets = [16, 64], sizes = [16, 64], strides = [1, 1]} : vector<64x128xf32> to vector<16x64xf32>
    %434 = arith.truncf %431 : vector<16x64xf32> to vector<16x64xbf16>
    %435 = arith.truncf %432 : vector<16x64xf32> to vector<16x64xbf16>
    %cst_178 = arith.constant dense<0.000000e+00> : vector<16x16xf32>
    %436 = tpu.matmul %434, %435, %cst_178 {dimension_numbers = #tpu.dot_dimension_numbers<[1], [1], [0], [0], [0, 0, 1, 0], [], []>} : vector<16x64xbf16>, vector<16x64xbf16>, vector<16x16xf32> -> vector<16x16xf32>
    %437 = arith.addf %436, %41 : vector<16x16xf32>
    %cst_179 = arith.constant dense<0xFF800000> : vector<16xf32>
    %438 = vector.multi_reduction <maximumf>, %437, %cst_179 [1] : vector<16x16xf32> to vector<16xf32>
    %439 = vector.shape_cast %438 : vector<16xf32> to vector<16x1xf32>
    %440 = vector.broadcast %439 : vector<16x1xf32> to vector<16x16xf32>
    %441 = arith.subf %437, %440 : vector<16x16xf32>
    %442 = math.exp %441 : vector<16x16xf32>
    %cst_180 = arith.constant dense<0.000000e+00> : vector<16xf32>
    %443 = vector.multi_reduction <add>, %442, %cst_180 [1] : vector<16x16xf32> to vector<16xf32>
    %444 = vector.shape_cast %443 : vector<16xf32> to vector<16x1xf32>
    %445 = tpu.reciprocal %444 {approx = true} : vector<16x1xf32> -> vector<16x1xf32>
    %446 = vector.broadcast %445 : vector<16x1xf32> to vector<16x16xf32>
    %447 = arith.mulf %442, %446 : vector<16x16xf32>
    %448 = arith.truncf %447 : vector<16x16xf32> to vector<16x16xbf16>
    %449 = arith.truncf %433 : vector<16x64xf32> to vector<16x64xbf16>
    %cst_181 = arith.constant dense<0.000000e+00> : vector<16x64xf32>
    %450 = tpu.matmul %448, %449, %cst_181 {dimension_numbers = #tpu.dot_dimension_numbers<[1], [0], [0], [1], [0, 0, 1, 1], [], []>} : vector<16x16xbf16>, vector<16x64xbf16>, vector<16x64xf32> -> vector<16x64xf32>
    %c16_182 = arith.constant 16 : index
    %c64_183 = arith.constant 64 : index
    %451 = vector.load %arg24[%c16_182, %c64_183] : memref<64x128xf32, #tpu.memory_space<vmem>>, vector<16x64xf32>
    tpu.vector_store %arg24[%c16_182, %c64_183], %450 {strides = array<i32>} : memref<64x128xf32, #tpu.memory_space<vmem>>, vector<16x64xf32>,
    %452 = vector.extract_strided_slice %365 {offsets = [32, 0], sizes = [16, 64], strides = [1, 1]} : vector<64x128xf32> to vector<16x64xf32>
    %453 = vector.extract_strided_slice %366 {offsets = [32, 0], sizes = [16, 64], strides = [1, 1]} : vector<64x128xf32> to vector<16x64xf32>
    %454 = vector.extract_strided_slice %367 {offsets = [32, 0], sizes = [16, 64], strides = [1, 1]} : vector<64x128xf32> to vector<16x64xf32>
    %455 = arith.truncf %452 : vector<16x64xf32> to vector<16x64xbf16>
    %456 = arith.truncf %453 : vector<16x64xf32> to vector<16x64xbf16>
    %cst_184 = arith.constant dense<0.000000e+00> : vector<16x16xf32>
    %457 = tpu.matmul %455, %456, %cst_184 {dimension_numbers = #tpu.dot_dimension_numbers<[1], [1], [0], [0], [0, 0, 1, 0], [], []>} : vector<16x64xbf16>, vector<16x64xbf16>, vector<16x16xf32> -> vector<16x16xf32>
    %458 = arith.addf %457, %41 : vector<16x16xf32>
    %cst_185 = arith.constant dense<0xFF800000> : vector<16xf32>
    %459 = vector.multi_reduction <maximumf>, %458, %cst_185 [1] : vector<16x16xf32> to vector<16xf32>
    %460 = vector.shape_cast %459 : vector<16xf32> to vector<16x1xf32>
    %461 = vector.broadcast %460 : vector<16x1xf32> to vector<16x16xf32>
    %462 = arith.subf %458, %461 : vector<16x16xf32>
    %463 = math.exp %462 : vector<16x16xf32>
    %cst_186 = arith.constant dense<0.000000e+00> : vector<16xf32>
    %464 = vector.multi_reduction <add>, %463, %cst_186 [1] : vector<16x16xf32> to vector<16xf32>
    %465 = vector.shape_cast %464 : vector<16xf32> to vector<16x1xf32>
    %466 = tpu.reciprocal %465 {approx = true} : vector<16x1xf32> -> vector<16x1xf32>
    %467 = vector.broadcast %466 : vector<16x1xf32> to vector<16x16xf32>
    %468 = arith.mulf %463, %467 : vector<16x16xf32>
    %469 = arith.truncf %468 : vector<16x16xf32> to vector<16x16xbf16>
    %470 = arith.truncf %454 : vector<16x64xf32> to vector<16x64xbf16>
    %cst_187 = arith.constant dense<0.000000e+00> : vector<16x64xf32>
    %471 = tpu.matmul %469, %470, %cst_187 {dimension_numbers = #tpu.dot_dimension_numbers<[1], [0], [0], [1], [0, 0, 1, 1], [], []>} : vector<16x16xbf16>, vector<16x64xbf16>, vector<16x64xf32> -> vector<16x64xf32>
    %c32_188 = arith.constant 32 : index
    %c0_189 = arith.constant 0 : index
    %472 = vector.load %arg24[%c32_188, %c0_189] : memref<64x128xf32, #tpu.memory_space<vmem>>, vector<16x64xf32>
    tpu.vector_store %arg24[%c32_188, %c0_189], %471 {strides = array<i32>} : memref<64x128xf32, #tpu.memory_space<vmem>>, vector<16x64xf32>,
    %473 = vector.extract_strided_slice %365 {offsets = [32, 64], sizes = [16, 64], strides = [1, 1]} : vector<64x128xf32> to vector<16x64xf32>
    %474 = vector.extract_strided_slice %366 {offsets = [32, 64], sizes = [16, 64], strides = [1, 1]} : vector<64x128xf32> to vector<16x64xf32>
    %475 = vector.extract_strided_slice %367 {offsets = [32, 64], sizes = [16, 64], strides = [1, 1]} : vector<64x128xf32> to vector<16x64xf32>
    %476 = arith.truncf %473 : vector<16x64xf32> to vector<16x64xbf16>
    %477 = arith.truncf %474 : vector<16x64xf32> to vector<16x64xbf16>
    %cst_190 = arith.constant dense<0.000000e+00> : vector<16x16xf32>
    %478 = tpu.matmul %476, %477, %cst_190 {dimension_numbers = #tpu.dot_dimension_numbers<[1], [1], [0], [0], [0, 0, 1, 0], [], []>} : vector<16x64xbf16>, vector<16x64xbf16>, vector<16x16xf32> -> vector<16x16xf32>
    %479 = arith.addf %478, %41 : vector<16x16xf32>
    %cst_191 = arith.constant dense<0xFF800000> : vector<16xf32>
    %480 = vector.multi_reduction <maximumf>, %479, %cst_191 [1] : vector<16x16xf32> to vector<16xf32>
    %481 = vector.shape_cast %480 : vector<16xf32> to vector<16x1xf32>
    %482 = vector.broadcast %481 : vector<16x1xf32> to vector<16x16xf32>
    %483 = arith.subf %479, %482 : vector<16x16xf32>
    %484 = math.exp %483 : vector<16x16xf32>
    %cst_192 = arith.constant dense<0.000000e+00> : vector<16xf32>
    %485 = vector.multi_reduction <add>, %484, %cst_192 [1] : vector<16x16xf32> to vector<16xf32>
    %486 = vector.shape_cast %485 : vector<16xf32> to vector<16x1xf32>
    %487 = tpu.reciprocal %486 {approx = true} : vector<16x1xf32> -> vector<16x1xf32>
    %488 = vector.broadcast %487 : vector<16x1xf32> to vector<16x16xf32>
    %489 = arith.mulf %484, %488 : vector<16x16xf32>
    %490 = arith.truncf %489 : vector<16x16xf32> to vector<16x16xbf16>
    %491 = arith.truncf %475 : vector<16x64xf32> to vector<16x64xbf16>
    %cst_193 = arith.constant dense<0.000000e+00> : vector<16x64xf32>
    %492 = tpu.matmul %490, %491, %cst_193 {dimension_numbers = #tpu.dot_dimension_numbers<[1], [0], [0], [1], [0, 0, 1, 1], [], []>} : vector<16x16xbf16>, vector<16x64xbf16>, vector<16x64xf32> -> vector<16x64xf32>
    %c32_194 = arith.constant 32 : index
    %c64_195 = arith.constant 64 : index
    %493 = vector.load %arg24[%c32_194, %c64_195] : memref<64x128xf32, #tpu.memory_space<vmem>>, vector<16x64xf32>
    tpu.vector_store %arg24[%c32_194, %c64_195], %492 {strides = array<i32>} : memref<64x128xf32, #tpu.memory_space<vmem>>, vector<16x64xf32>,
    %494 = vector.extract_strided_slice %365 {offsets = [48, 0], sizes = [16, 64], strides = [1, 1]} : vector<64x128xf32> to vector<16x64xf32>
    %495 = vector.extract_strided_slice %366 {offsets = [48, 0], sizes = [16, 64], strides = [1, 1]} : vector<64x128xf32> to vector<16x64xf32>
    %496 = vector.extract_strided_slice %367 {offsets = [48, 0], sizes = [16, 64], strides = [1, 1]} : vector<64x128xf32> to vector<16x64xf32>
    %497 = arith.truncf %494 : vector<16x64xf32> to vector<16x64xbf16>
    %498 = arith.truncf %495 : vector<16x64xf32> to vector<16x64xbf16>
    %cst_196 = arith.constant dense<0.000000e+00> : vector<16x16xf32>
    %499 = tpu.matmul %497, %498, %cst_196 {dimension_numbers = #tpu.dot_dimension_numbers<[1], [1], [0], [0], [0, 0, 1, 0], [], []>} : vector<16x64xbf16>, vector<16x64xbf16>, vector<16x16xf32> -> vector<16x16xf32>
    %500 = arith.addf %499, %41 : vector<16x16xf32>
    %cst_197 = arith.constant dense<0xFF800000> : vector<16xf32>
    %501 = vector.multi_reduction <maximumf>, %500, %cst_197 [1] : vector<16x16xf32> to vector<16xf32>
    %502 = vector.shape_cast %501 : vector<16xf32> to vector<16x1xf32>
    %503 = vector.broadcast %502 : vector<16x1xf32> to vector<16x16xf32>
    %504 = arith.subf %500, %503 : vector<16x16xf32>
    %505 = math.exp %504 : vector<16x16xf32>
    %cst_198 = arith.constant dense<0.000000e+00> : vector<16xf32>
    %506 = vector.multi_reduction <add>, %505, %cst_198 [1] : vector<16x16xf32> to vector<16xf32>
    %507 = vector.shape_cast %506 : vector<16xf32> to vector<16x1xf32>
    %508 = tpu.reciprocal %507 {approx = true} : vector<16x1xf32> -> vector<16x1xf32>
    %509 = vector.broadcast %508 : vector<16x1xf32> to vector<16x16xf32>
    %510 = arith.mulf %505, %509 : vector<16x16xf32>
    %511 = arith.truncf %510 : vector<16x16xf32> to vector<16x16xbf16>
    %512 = arith.truncf %496 : vector<16x64xf32> to vector<16x64xbf16>
    %cst_199 = arith.constant dense<0.000000e+00> : vector<16x64xf32>
    %513 = tpu.matmul %511, %512, %cst_199 {dimension_numbers = #tpu.dot_dimension_numbers<[1], [0], [0], [1], [0, 0, 1, 1], [], []>} : vector<16x16xbf16>, vector<16x64xbf16>, vector<16x64xf32> -> vector<16x64xf32>
    %c48_200 = arith.constant 48 : index
    %c0_201 = arith.constant 0 : index
    %514 = vector.load %arg24[%c48_200, %c0_201] : memref<64x128xf32, #tpu.memory_space<vmem>>, vector<16x64xf32>
    tpu.vector_store %arg24[%c48_200, %c0_201], %513 {strides = array<i32>} : memref<64x128xf32, #tpu.memory_space<vmem>>, vector<16x64xf32>,
    %515 = vector.extract_strided_slice %365 {offsets = [48, 64], sizes = [16, 64], strides = [1, 1]} : vector<64x128xf32> to vector<16x64xf32>
    %516 = vector.extract_strided_slice %366 {offsets = [48, 64], sizes = [16, 64], strides = [1, 1]} : vector<64x128xf32> to vector<16x64xf32>
    %517 = vector.extract_strided_slice %367 {offsets = [48, 64], sizes = [16, 64], strides = [1, 1]} : vector<64x128xf32> to vector<16x64xf32>
    %518 = arith.truncf %515 : vector<16x64xf32> to vector<16x64xbf16>
    %519 = arith.truncf %516 : vector<16x64xf32> to vector<16x64xbf16>
    %cst_202 = arith.constant dense<0.000000e+00> : vector<16x16xf32>
    %520 = tpu.matmul %518, %519, %cst_202 {dimension_numbers = #tpu.dot_dimension_numbers<[1], [1], [0], [0], [0, 0, 1, 0], [], []>} : vector<16x64xbf16>, vector<16x64xbf16>, vector<16x16xf32> -> vector<16x16xf32>
    %521 = arith.addf %520, %41 : vector<16x16xf32>
    %cst_203 = arith.constant dense<0xFF800000> : vector<16xf32>
    %522 = vector.multi_reduction <maximumf>, %521, %cst_203 [1] : vector<16x16xf32> to vector<16xf32>
    %523 = vector.shape_cast %522 : vector<16xf32> to vector<16x1xf32>
    %524 = vector.broadcast %523 : vector<16x1xf32> to vector<16x16xf32>
    %525 = arith.subf %521, %524 : vector<16x16xf32>
    %526 = math.exp %525 : vector<16x16xf32>
    %cst_204 = arith.constant dense<0.000000e+00> : vector<16xf32>
    %527 = vector.multi_reduction <add>, %526, %cst_204 [1] : vector<16x16xf32> to vector<16xf32>
    %528 = vector.shape_cast %527 : vector<16xf32> to vector<16x1xf32>
    %529 = tpu.reciprocal %528 {approx = true} : vector<16x1xf32> -> vector<16x1xf32>
    %530 = vector.broadcast %529 : vector<16x1xf32> to vector<16x16xf32>
    %531 = arith.mulf %526, %530 : vector<16x16xf32>
    %532 = arith.truncf %531 : vector<16x16xf32> to vector<16x16xbf16>
    %533 = arith.truncf %517 : vector<16x64xf32> to vector<16x64xbf16>
    %cst_205 = arith.constant dense<0.000000e+00> : vector<16x64xf32>
    %534 = tpu.matmul %532, %533, %cst_205 {dimension_numbers = #tpu.dot_dimension_numbers<[1], [0], [0], [1], [0, 0, 1, 1], [], []>} : vector<16x16xbf16>, vector<16x64xbf16>, vector<16x64xf32> -> vector<16x64xf32>
    %c48_206 = arith.constant 48 : index
    %c64_207 = arith.constant 64 : index
    %535 = vector.load %arg24[%c48_206, %c64_207] : memref<64x128xf32, #tpu.memory_space<vmem>>, vector<16x64xf32>
    tpu.vector_store %arg24[%c48_206, %c64_207], %534 {strides = array<i32>} : memref<64x128xf32, #tpu.memory_space<vmem>>, vector<16x64xf32>,
    %c0_208 = arith.constant 0 : index
    %c0_209 = arith.constant 0 : index
    %536 = vector.load %arg24[%c0_208, %c0_209] : memref<64x128xf32, #tpu.memory_space<vmem>>, vector<64x128xf32>
    %c1_210 = arith.constant 1 : index
    %c0_211 = arith.constant 0 : index
    %c0_212 = arith.constant 0 : index
    %537 = vector.load %arg10[%c1_210, %c0_211, %c0_212] : memref<2x128x128xf32, #tpu.memory_space<vmem>>, vector<1x128x128xf32>
    %538 = vector.shape_cast %537 : vector<1x128x128xf32> to vector<128x128xf32>
    %539 = arith.truncf %536 : vector<64x128xf32> to vector<64x128xbf16>
    %540 = arith.truncf %538 : vector<128x128xf32> to vector<128x128xbf16>
    %cst_213 = arith.constant dense<0.000000e+00> : vector<64x128xf32>
    %541 = tpu.matmul %539, %540, %cst_213 {dimension_numbers = #tpu.dot_dimension_numbers<[1], [0], [0], [1], [0, 0, 1, 1], [], []>} : vector<64x128xbf16>, vector<128x128xbf16>, vector<64x128xf32> -> vector<64x128xf32>
    %c1_214 = arith.constant 1 : index
    %c0_215 = arith.constant 0 : index
    %c0_216 = arith.constant 0 : index
    %542 = vector.load %arg11[%c1_214, %c0_215, %c0_216] : memref<2x1x128xf32, #tpu.memory_space<vmem>>, vector<1x1x128xf32>
    %543 = vector.shape_cast %542 : vector<1x1x128xf32> to vector<1x128xf32>
    %544 = vector.broadcast %543 : vector<1x128xf32> to vector<64x128xf32>
    %545 = arith.addf %541, %544 : vector<64x128xf32>
    %c1_217 = arith.constant 1 : index
    %c0_218 = arith.constant 0 : index
    %c0_219 = arith.constant 0 : index
    %546 = vector.load %arg12[%c1_217, %c0_218, %c0_219] : memref<2x1x128xf32, #tpu.memory_space<vmem>>, vector<1x1x128xf32>
    %547 = vector.shape_cast %546 : vector<1x1x128xf32> to vector<1x128xf32>
    %548 = vector.broadcast %547 : vector<1x128xf32> to vector<64x128xf32>
    %549 = arith.mulf %545, %548 : vector<64x128xf32>
    %550 = arith.addf %327, %549 : vector<64x128xf32>
    %c1_220 = arith.constant 1 : index
    %c0_221 = arith.constant 0 : index
    %c0_222 = arith.constant 0 : index
    %551 = vector.load %arg13[%c1_220, %c0_221, %c0_222] : memref<2x1x128xf32, #tpu.memory_space<vmem>>, vector<1x1x128xf32>
    %552 = vector.shape_cast %551 : vector<1x1x128xf32> to vector<1x128xf32>
    %c1_223 = arith.constant 1 : index
    %c0_224 = arith.constant 0 : index
    %c0_225 = arith.constant 0 : index
    %553 = vector.load %arg14[%c1_223, %c0_224, %c0_225] : memref<2x1x128xf32, #tpu.memory_space<vmem>>, vector<1x1x128xf32>
    %554 = vector.shape_cast %553 : vector<1x1x128xf32> to vector<1x128xf32>
    %cst_226 = arith.constant dense<0.000000e+00> : vector<64xf32>
    %555 = vector.multi_reduction <add>, %550, %cst_226 [1] : vector<64x128xf32> to vector<64xf32>
    %556 = vector.shape_cast %555 : vector<64xf32> to vector<64x1xf32>
    %cst_227 = arith.constant 1.280000e+02 : f32
    %557 = vector.broadcast %cst_227 : f32 to vector<64x1xf32>
    %558 = arith.divf %556, %557 : vector<64x1xf32>
    %559 = vector.broadcast %558 : vector<64x1xf32> to vector<64x128xf32>
    %560 = arith.subf %550, %559 : vector<64x128xf32>
    %561 = arith.mulf %560, %560 : vector<64x128xf32>
    %cst_228 = arith.constant dense<0.000000e+00> : vector<64xf32>
    %562 = vector.multi_reduction <add>, %561, %cst_228 [1] : vector<64x128xf32> to vector<64xf32>
    %563 = vector.shape_cast %562 : vector<64xf32> to vector<64x1xf32>
    %cst_229 = arith.constant 1.280000e+02 : f32
    %564 = vector.broadcast %cst_229 : f32 to vector<64x1xf32>
    %565 = arith.divf %563, %564 : vector<64x1xf32>
    %566 = vector.broadcast %558 : vector<64x1xf32> to vector<64x128xf32>
    %567 = arith.subf %550, %566 : vector<64x128xf32>
    %cst_230 = arith.constant 9.99999997E-7 : f32
    %568 = vector.broadcast %cst_230 : f32 to vector<64x1xf32>
    %569 = arith.addf %565, %568 : vector<64x1xf32>
    %570 = math.rsqrt %569 : vector<64x1xf32>
    %571 = vector.broadcast %570 : vector<64x1xf32> to vector<64x128xf32>
    %572 = arith.mulf %567, %571 : vector<64x128xf32>
    %573 = vector.broadcast %552 : vector<1x128xf32> to vector<64x128xf32>
    %574 = arith.mulf %572, %573 : vector<64x128xf32>
    %575 = vector.broadcast %554 : vector<1x128xf32> to vector<64x128xf32>
    %576 = arith.addf %574, %575 : vector<64x128xf32>
    %c1_231 = arith.constant 1 : index
    %c0_232 = arith.constant 0 : index
    %c0_233 = arith.constant 0 : index
    %577 = vector.load %arg15[%c1_231, %c0_232, %c0_233] : memref<2x128x512xf32, #tpu.memory_space<vmem>>, vector<1x128x512xf32>
    %578 = vector.shape_cast %577 : vector<1x128x512xf32> to vector<128x512xf32>
    %579 = arith.truncf %576 : vector<64x128xf32> to vector<64x128xbf16>
    %580 = arith.truncf %578 : vector<128x512xf32> to vector<128x512xbf16>
    %cst_234 = arith.constant dense<0.000000e+00> : vector<64x512xf32>
    %581 = tpu.matmul %579, %580, %cst_234 {dimension_numbers = #tpu.dot_dimension_numbers<[1], [0], [0], [1], [0, 0, 1, 1], [], []>} : vector<64x128xbf16>, vector<128x512xbf16>, vector<64x512xf32> -> vector<64x512xf32>
    %c1_235 = arith.constant 1 : index
    %c0_236 = arith.constant 0 : index
    %c0_237 = arith.constant 0 : index
    %582 = vector.load %arg16[%c1_235, %c0_236, %c0_237] : memref<2x1x512xf32, #tpu.memory_space<vmem>>, vector<1x1x512xf32>
    %583 = vector.shape_cast %582 : vector<1x1x512xf32> to vector<1x512xf32>
    %584 = vector.broadcast %583 : vector<1x512xf32> to vector<64x512xf32>
    %585 = arith.addf %581, %584 : vector<64x512xf32>
    %cst_238 = arith.constant 5.000000e-01 : f32
    %586 = vector.broadcast %cst_238 : f32 to vector<64x512xf32>
    %587 = arith.mulf %586, %585 : vector<64x512xf32>
    %cst_239 = arith.constant 4.471500e-02 : f32
    %588 = vector.broadcast %cst_239 : f32 to vector<64x512xf32>
    %589 = arith.mulf %588, %585 : vector<64x512xf32>
    %590 = arith.mulf %589, %585 : vector<64x512xf32>
    %591 = arith.mulf %590, %585 : vector<64x512xf32>
    %592 = arith.addf %585, %591 : vector<64x512xf32>
    %cst_240 = arith.constant 0.797884583 : f32
    %593 = vector.broadcast %cst_240 : f32 to vector<64x512xf32>
    %594 = arith.mulf %593, %592 : vector<64x512xf32>
    %595 = math.tanh %594 : vector<64x512xf32>
    %cst_241 = arith.constant 1.000000e+00 : f32
    %596 = vector.broadcast %cst_241 : f32 to vector<64x512xf32>
    %597 = arith.addf %596, %595 : vector<64x512xf32>
    %598 = arith.mulf %587, %597 : vector<64x512xf32>
    %c1_242 = arith.constant 1 : index
    %c0_243 = arith.constant 0 : index
    %c0_244 = arith.constant 0 : index
    %599 = vector.load %arg17[%c1_242, %c0_243, %c0_244] : memref<2x512x128xf32, #tpu.memory_space<vmem>>, vector<1x512x128xf32>
    %600 = vector.shape_cast %599 : vector<1x512x128xf32> to vector<512x128xf32>
    %601 = arith.truncf %598 : vector<64x512xf32> to vector<64x512xbf16>
    %602 = arith.truncf %600 : vector<512x128xf32> to vector<512x128xbf16>
    %cst_245 = arith.constant dense<0.000000e+00> : vector<64x128xf32>
    %603 = tpu.matmul %601, %602, %cst_245 {dimension_numbers = #tpu.dot_dimension_numbers<[1], [0], [0], [1], [0, 0, 1, 1], [], []>} : vector<64x512xbf16>, vector<512x128xbf16>, vector<64x128xf32> -> vector<64x128xf32>
    %c1_246 = arith.constant 1 : index
    %c0_247 = arith.constant 0 : index
    %c0_248 = arith.constant 0 : index
    %604 = vector.load %arg18[%c1_246, %c0_247, %c0_248] : memref<2x1x128xf32, #tpu.memory_space<vmem>>, vector<1x1x128xf32>
    %605 = vector.shape_cast %604 : vector<1x1x128xf32> to vector<1x128xf32>
    %606 = vector.broadcast %605 : vector<1x128xf32> to vector<64x128xf32>
    %607 = arith.addf %603, %606 : vector<64x128xf32>
    %c1_249 = arith.constant 1 : index
    %c0_250 = arith.constant 0 : index
    %c0_251 = arith.constant 0 : index
    %608 = vector.load %arg19[%c1_249, %c0_250, %c0_251] : memref<2x1x128xf32, #tpu.memory_space<vmem>>, vector<1x1x128xf32>
    %609 = vector.shape_cast %608 : vector<1x1x128xf32> to vector<1x128xf32>
    %610 = vector.broadcast %609 : vector<1x128xf32> to vector<64x128xf32>
    %611 = arith.mulf %607, %610 : vector<64x128xf32>
    %612 = arith.addf %550, %611 : vector<64x128xf32>
    %c0_252 = arith.constant 0 : index
    %c0_253 = arith.constant 0 : index
    %613 = vector.load %arg20[%c0_252, %c0_253] : memref<1x128xf32, #tpu.memory_space<vmem>>, vector<1x128xf32>
    %c0_254 = arith.constant 0 : index
    %c0_255 = arith.constant 0 : index
    %614 = vector.load %arg21[%c0_254, %c0_255] : memref<1x128xf32, #tpu.memory_space<vmem>>, vector<1x128xf32>
    %cst_256 = arith.constant dense<0.000000e+00> : vector<64xf32>
    %615 = vector.multi_reduction <add>, %612, %cst_256 [1] : vector<64x128xf32> to vector<64xf32>
    %616 = vector.shape_cast %615 : vector<64xf32> to vector<64x1xf32>
    %cst_257 = arith.constant 1.280000e+02 : f32
    %617 = vector.broadcast %cst_257 : f32 to vector<64x1xf32>
    %618 = arith.divf %616, %617 : vector<64x1xf32>
    %619 = vector.broadcast %618 : vector<64x1xf32> to vector<64x128xf32>
    %620 = arith.subf %612, %619 : vector<64x128xf32>
    %621 = arith.mulf %620, %620 : vector<64x128xf32>
    %cst_258 = arith.constant dense<0.000000e+00> : vector<64xf32>
    %622 = vector.multi_reduction <add>, %621, %cst_258 [1] : vector<64x128xf32> to vector<64xf32>
    %623 = vector.shape_cast %622 : vector<64xf32> to vector<64x1xf32>
    %cst_259 = arith.constant 1.280000e+02 : f32
    %624 = vector.broadcast %cst_259 : f32 to vector<64x1xf32>
    %625 = arith.divf %623, %624 : vector<64x1xf32>
    %626 = vector.broadcast %618 : vector<64x1xf32> to vector<64x128xf32>
    %627 = arith.subf %612, %626 : vector<64x128xf32>
    %cst_260 = arith.constant 9.99999997E-7 : f32
    %628 = vector.broadcast %cst_260 : f32 to vector<64x1xf32>
    %629 = arith.addf %625, %628 : vector<64x1xf32>
    %630 = math.rsqrt %629 : vector<64x1xf32>
    %631 = vector.broadcast %630 : vector<64x1xf32> to vector<64x128xf32>
    %632 = arith.mulf %627, %631 : vector<64x128xf32>
    %633 = vector.broadcast %613 : vector<1x128xf32> to vector<64x128xf32>
    %634 = arith.mulf %632, %633 : vector<64x128xf32>
    %635 = vector.broadcast %614 : vector<1x128xf32> to vector<64x128xf32>
    %636 = arith.addf %634, %635 : vector<64x128xf32>
    %637 = vector.extract_strided_slice %636 {offsets = [0, 0], sizes = [1, 128], strides = [1, 1]} : vector<64x128xf32> to vector<1x128xf32>
    %c0_261 = arith.constant 0 : index
    %c0_262 = arith.constant 0 : index
    %638 = vector.load %arg22[%c0_261, %c0_262] : memref<4x128xf32, #tpu.memory_space<vmem>>, vector<1x128xf32>
    tpu.vector_store %arg22[%c0_261, %c0_262], %637 {strides = array<i32>} : memref<4x128xf32, #tpu.memory_space<vmem>>, vector<1x128xf32>,
    %639 = vector.extract_strided_slice %636 {offsets = [16, 0], sizes = [1, 128], strides = [1, 1]} : vector<64x128xf32> to vector<1x128xf32>
    %c1_263 = arith.constant 1 : index
    %c0_264 = arith.constant 0 : index
    %640 = vector.load %arg22[%c1_263, %c0_264] : memref<4x128xf32, #tpu.memory_space<vmem>>, vector<1x128xf32>
    tpu.vector_store %arg22[%c1_263, %c0_264], %639 {strides = array<i32>} : memref<4x128xf32, #tpu.memory_space<vmem>>, vector<1x128xf32>,
    %641 = vector.extract_strided_slice %636 {offsets = [32, 0], sizes = [1, 128], strides = [1, 1]} : vector<64x128xf32> to vector<1x128xf32>
    %c2 = arith.constant 2 : index
    %c0_265 = arith.constant 0 : index
    %642 = vector.load %arg22[%c2, %c0_265] : memref<4x128xf32, #tpu.memory_space<vmem>>, vector<1x128xf32>
    tpu.vector_store %arg22[%c2, %c0_265], %641 {strides = array<i32>} : memref<4x128xf32, #tpu.memory_space<vmem>>, vector<1x128xf32>,
    %643 = vector.extract_strided_slice %636 {offsets = [48, 0], sizes = [1, 128], strides = [1, 1]} : vector<64x128xf32> to vector<1x128xf32>
    %c3 = arith.constant 3 : index
    %c0_266 = arith.constant 0 : index
    %644 = vector.load %arg22[%c3, %c0_266] : memref<4x128xf32, #tpu.memory_space<vmem>>, vector<1x128xf32>
    tpu.vector_store %arg22[%c3, %c0_266], %643 {strides = array<i32>} : memref<4x128xf32, #tpu.memory_space<vmem>>, vector<1x128xf32>,
    return
  }
}

</mosaic_0001>

<bundles_post_ra>
// kernel: dino_forward_pallas.1
= control target key start
LH: loop header
LB: loop body
LE: loop exit
PB: predicated region body
PF: predicated region fallthrough
CT: control target
= control target key end

     0   :  { %s9784_s0 = inlined_call_operand.vmem [shape: f32[16,588], index: 0, kind: input, shape index: {}]   ;;  %s9785_s1 = inlined_call_operand.vmem [shape: f32[588,128], index: 1, kind: input, shape index: {}]   ;;  %s9786_s2 = inlined_call_operand.vmem [shape: f32[1,128], index: 2, kind: input, shape index: {}]   ;;  %s9787_s3 = inlined_call_operand.vmem [shape: f32[1,128], index: 3, kind: input, shape index: {}]   ;;  %s9788_s4 = inlined_call_operand.vmem [shape: f32[4,128], index: 4, kind: input, shape index: {}]   ;;  %s9789_s5 = inlined_call_operand.vmem [shape: f32[5,128], index: 5, kind: input, shape index: {}]   ;;  %s9790_s6 = inlined_call_operand.vmem [shape: f32[2,1,128], index: 6, kind: input, shape index: {}]   ;;  %s9791_s7 = inlined_call_operand.vmem [shape: f32[2,1,128], index: 7, kind: input, shape index: {}]   ;;  %s9792_s8 = inlined_call_operand.vmem [shape: f32[2,128,384], index: 8, kind: input, shape index: {}]   ;;  %s9793_s9 = inlined_call_operand.vmem [shape: f32[2,1,384], index: 9, kind: input, shape index: {}]   ;;  %s9794_s10 = inlined_call_operand.vmem [shape: f32[2,128,128], index: 10, kind: input, shape index: {}]   ;;  %s9795_s11 = inlined_call_operand.vmem [shape: f32[2,1,128], index: 11, kind: input, shape index: {}]   ;;  %s9796_s12 = inlined_call_operand.vmem [shape: f32[2,1,128], index: 12, kind: input, shape index: {}]   ;;  %s9797_s13 = inlined_call_operand.vmem [shape: f32[2,1,128], index: 13, kind: input, shape index: {}]   ;;  %s9798_s14 = inlined_call_operand.vmem [shape: f32[2,1,128], index: 14, kind: input, shape index: {}]   ;;  %s9799_s15 = inlined_call_operand.vmem [shape: f32[2,128,512], index: 15, kind: input, shape index: {}]   ;;  %s9800_s16 = inlined_call_operand.vmem [shape: f32[2,1,512], index: 16, kind: input, shape index: {}]   ;;  %s9801_s17 = inlined_call_operand.vmem [shape: f32[2,512,128], index: 17, kind: input, shape index: {}]   ;;  %s9802_s18 = inlined_call_operand.vmem [shape: f32[2,1,128], index: 18, kind: input, shape index: {}]   ;;  %s9803_s19 = inlined_call_operand.vmem [shape: f32[2,1,128], index: 19, kind: input, shape index: {}]   ;;  %s9804_s20 = inlined_call_operand.vmem [shape: f32[1,128], index: 20, kind: input, shape index: {}]   ;;  %s9805_s21 = inlined_call_operand.vmem [shape: f32[1,128], index: 21, kind: input, shape index: {}]   ;;  %s9806_s22 = inlined_call_operand.hbm [shape: f32[4,128], index: 22, kind: output, shape index: {}]  }
   0x1   :  { %9828 = sst [smem:[#allocation16_spill]] %s9784_s0 }
   0x2   :  { %9829 = sst [smem:[#allocation17_spill]] %s9785_s1 }
   0x3   :  { %9830 = sst [smem:[#allocation18_spill]] %s9786_s2 }
   0x4   :  { %9831 = sst [smem:[#allocation19_spill]] %s9787_s3 }
   0x5   :  { %9832 = sst [smem:[#allocation20_spill]] %s9788_s4 }
   0x6   :  { %9833 = sst [smem:[#allocation21_spill]] %s9789_s5 }
   0x7   :  { %9834 = sst [smem:[#allocation22_spill]] %s9790_s6 }
   0x8   :  { %s9835_s29 = sld [smem:[#allocation17_spill]]  ;;  %v9811_v7 = vmov 0.0   ;;  %s9836_s2 = sld [smem:[#allocation16_spill]] }
   0x9   :  { %341 = vst [vmem:[#allocation2] sm:$0xff] %v9811_v7  ;;  %342 = vst [vmem:[#allocation2 + $0x8] sm:$0xff] %v9811_v7 }
   0xa   :  { %343 = vst [vmem:[#allocation2 + $0x10] sm:$0xff] %v9811_v7  ;;  %344 = vst [vmem:[#allocation2 + $0x18] sm:$0xff] %v9811_v7 }
   0xb   :  { %345 = vst [vmem:[#allocation2 + $0x20] sm:$0xff] %v9811_v7  ;;  %346 = vst [vmem:[#allocation2 + $0x28] sm:$0xff] %v9811_v7 }
   0xc   :  { %347 = vst [vmem:[#allocation2 + $0x30] sm:$0xff] %v9811_v7  ;;  %348 = vst [vmem:[#allocation2 + $0x38] sm:$0xff] %v9811_v7 }
   0xe   :  { %v99_v0 = vld [vmem:[%s9835_s29 + $0x80] sm:$0xff]  ;;  %v100_v1 = vld [vmem:[%s9835_s29 + $0x88] sm:$0xff]  ;;  %v101_v12 = vld [vmem:[%s9835_s29 + $0x90] sm:$0xff] }
   0xf   :  { %v83_v2 = vld [vmem:[%s9835_s29] sm:$0xff]  ;;  %v170_v3 = vpack.c.bf16 %v100_v1, %v99_v0  ;;  %v84_v4 = vld [vmem:[%s9835_s29 + $0x8] sm:$0xff]  ;;  %v102_v14 = vld [vmem:[%s9835_s29 + $0x98] sm:$0xff] }
  0x10   :  { %v131_v5 = vld [vmem:[%s9835_s29 + $0x180] sm:$0xff]  ;;  %v132_v6 = vld [vmem:[%s9835_s29 + $0x188] sm:$0xff]  ;;  %v162_v8 = vpack.c.bf16 %v84_v4, %v83_v2  ;;  %v85_v15 = vld [vmem:[%s9835_s29 + $0x10] sm:$0xff]  ;;  %v171_v17 = vpack.c.bf16 %v102_v14, %v101_v12 }
  0x11   :  { %v186_v9 = vpack.c.bf16 %v132_v6, %v131_v5  ;;  %v115_v10 = vld [vmem:[%s9835_s29 + $0x100] sm:$0xff]  ;;  %v116_v11 = vld [vmem:[%s9835_s29 + $0x108] sm:$0xff]  ;;  %5614 = vmatprep.subr.bf16.mxu0 %v170_v3  ;;  %v86_v16 = vld [vmem:[%s9835_s29 + $0x18] sm:$0xff] }
  0x12   :  { %v178_v13 = vpack.c.bf16 %v116_v11, %v115_v10  ;;  %5615 = vmatpush3.bf16.msra.mxu0 %v162_v8  ;;  %v163_v18 = vpack.c.bf16 %v86_v16, %v85_v15  ;;  %v133_v19 = vld [vmem:[%s9835_s29 + $0x190] sm:$0xff]  ;;  %v134_v20 = vld [vmem:[%s9835_s29 + $0x198] sm:$0xff]  ;;  %v103_v24 = vld [vmem:[%s9835_s29 + $0xa0] sm:$0xff] }
  0x13   :  { %5636 = vmatprep.subr.bf16.mxu1 %v186_v9  ;;  %v117_v21 = vld [vmem:[%s9835_s29 + $0x110] sm:$0xff]  ;;  %v187_v22 = vpack.c.bf16 %v134_v20, %v133_v19  ;;  %v118_v23 = vld [vmem:[%s9835_s29 + $0x118] sm:$0xff]  ;;  %v104_v25 = vld [vmem:[%s9835_s29 + $0xa8] sm:$0xff]  ;;  %5616 = vmatprep.subr.bf16.mxu0 %v171_v17 }
  0x14   :  { %5637 = vmatpush3.bf16.msra.mxu1 %v178_v13  ;;  %v179_v26 = vpack.c.bf16 %v118_v23, %v117_v21  ;;  %v172_v27 = vpack.c.bf16 %v104_v25, %v103_v24  ;;  %v87_v28 = vld [vmem:[%s9835_s29 + $0x20] sm:$0xff]  ;;  %v88_v29 = vld [vmem:[%s9835_s29 + $0x28] sm:$0xff]  ;;  %v105_v36 = vld [vmem:[%s9835_s29 + $0xb0] sm:$0xff] }
  0x15   :  { %v135_v30 = vld [vmem:[%s9835_s29 + $0x1a0] sm:$0xff]  ;;  %5638 = vmatprep.subr.bf16.mxu1 %v187_v22  ;;  %v136_v31 = vld [vmem:[%s9835_s29 + $0x1a8] sm:$0xff]  ;;  %v164_v34 = vpack.c.bf16 %v88_v29, %v87_v28  ;;  %v106_v37 = vld [vmem:[%s9835_s29 + $0xb8] sm:$0xff] }
  0x16   :  { %v119_v32 = vld [vmem:[%s9835_s29 + $0x120] sm:$0xff]  ;;  %v120_v33 = vld [vmem:[%s9835_s29 + $0x128] sm:$0xff]  ;;  %5617 = vmatpush3.bf16.msra.mxu0 %v163_v18  ;;  %v188_v35 = vpack.c.bf16 %v136_v31, %v135_v30  ;;  %v89_v38 = vld [vmem:[%s9835_s29 + $0x30] sm:$0xff]  ;;  %v173_v40 = vpack.c.bf16 %v106_v37, %v105_v36 }
  0x17   :  { %5618 = vmatprep.subr.bf16.mxu0 %v172_v27  ;;  %v180_v39 = vpack.c.bf16 %v120_v33, %v119_v32  ;;  %v90_v41 = vld [vmem:[%s9835_s29 + $0x38] sm:$0xff]  ;;  %v137_v42 = vld [vmem:[%s9835_s29 + $0x1b0] sm:$0xff]  ;;  %v107_v47 = vld [vmem:[%s9835_s29 + $0xc0] sm:$0xff] }
  0x18   :  { %5639 = vmatpush3.bf16.msra.mxu1 %v179_v26  ;;  %v138_v43 = vld [vmem:[%s9835_s29 + $0x1b8] sm:$0xff]  ;;  %v121_v45 = vld [vmem:[%s9835_s29 + $0x130] sm:$0xff]  ;;  %v108_v48 = vld [vmem:[%s9835_s29 + $0xc8] sm:$0xff]  ;;  %v165_v49 = vpack.c.bf16 %v90_v41, %v89_v38 }
  0x19   :  { %5640 = vmatprep.subr.bf16.mxu1 %v188_v35  ;;  %v189_v44 = vpack.c.bf16 %v138_v43, %v137_v42  ;;  %v122_v46 = vld [vmem:[%s9835_s29 + $0x138] sm:$0xff]  ;;  %v139_v50 = vld [vmem:[%s9835_s29 + $0x1c0] sm:$0xff]  ;;  %v140_v51 = vld [vmem:[%s9835_s29 + $0x1c8] sm:$0xff]  ;;  %v174_v53 = vpack.c.bf16 %v108_v48, %v107_v47 }
  0x1a   :  { %5619 = vmatpush3.bf16.msra.mxu0 %v164_v34  ;;  %v181_v52 = vpack.c.bf16 %v122_v46, %v121_v45  ;;  %v91_v54 = vld [vmem:[%s9835_s29 + $0x40] sm:$0xff]  ;;  %v92_v55 = vld [vmem:[%s9835_s29 + $0x48] sm:$0xff]  ;;  %v190_v57 = vpack.c.bf16 %v140_v51, %v139_v50  ;;  %v109_v59 = vld [vmem:[%s9835_s29 + $0xd0] sm:$0xff] }
  0x1b   :  { %5620 = vmatprep.subr.bf16.mxu0 %v173_v40  ;;  %v123_v56 = vld [vmem:[%s9835_s29 + $0x140] sm:$0xff]  ;;  %v124_v58 = vld [vmem:[%s9835_s29 + $0x148] sm:$0xff]  ;;  %v110_v60 = vld [vmem:[%s9835_s29 + $0xd8] sm:$0xff]  ;;  %v166_v63 = vpack.c.bf16 %v92_v55, %v91_v54 }
  0x1c   :  { %5641 = vmatpush3.bf16.msra.mxu1 %v180_v39  ;;  %v141_v61 = vld [vmem:[%s9835_s29 + $0x1d0] sm:$0xff]  ;;  %v142_v62 = vld [vmem:[%s9835_s29 + $0x1d8] sm:$0xff]  ;;  %v182_v0 = vpack.c.bf16 %v124_v58, %v123_v56  ;;  %v175_v1 = vpack.c.bf16 %v110_v60, %v109_v59  ;;  %v111_v8 = vld [vmem:[%s9835_s29 + $0xe0] sm:$0xff] }
  0x1d   :  { %5642 = vmatprep.subr.bf16.mxu1 %v189_v44  ;;  %v93_v2 = vld [vmem:[%s9835_s29 + $0x50] sm:$0xff]  ;;  %v94_v3 = vld [vmem:[%s9835_s29 + $0x58] sm:$0xff]  ;;  %v191_v5 = vpack.c.bf16 %v142_v62, %v141_v61  ;;  %v112_v9 = vld [vmem:[%s9835_s29 + $0xe8] sm:$0xff] }
  0x1e   :  { %5621 = vmatpush3.bf16.msra.mxu0 %v165_v49  ;;  %v125_v4 = vld [vmem:[%s9835_s29 + $0x150] sm:$0xff]  ;;  %v126_v6 = vld [vmem:[%s9835_s29 + $0x158] sm:$0xff]  ;;  %v143_v10 = vld [vmem:[%s9835_s29 + $0x1e0] sm:$0xff]  ;;  %v167_v12 = vpack.c.bf16 %v94_v3, %v93_v2  ;;  %v176_v17 = vpack.c.bf16 %v112_v9, %v111_v8 }
  0x1f   :  { %5622 = vmatprep.subr.bf16.mxu0 %v174_v53  ;;  %v144_v11 = vld [vmem:[%s9835_s29 + $0x1e8] sm:$0xff]  ;;  %v95_v13 = vld [vmem:[%s9835_s29 + $0x60] sm:$0xff]  ;;  %v183_v16 = vpack.c.bf16 %v126_v6, %v125_v4  ;;  %v79_v20 = vld [vmem:[%s9836_s2 + $0x30] sm:$0xff] }
  0x20   :  { %5643 = vmatpush3.bf16.msra.mxu1 %v181_v52  ;;  %v96_v14 = vld [vmem:[%s9835_s29 + $0x68] sm:$0xff]  ;;  %v127_v18 = vld [vmem:[%s9835_s29 + $0x160] sm:$0xff]  ;;  %v192_v21 = vpack.c.bf16 %v144_v11, %v143_v10  ;;  %v113_v22 = vld [vmem:[%s9835_s29 + $0xf0] sm:$0xff] }
  0x21   :  { %5644 = vmatprep.subr.bf16.mxu1 %v190_v57  ;;  %v74_v15 = vld [vmem:[%s9836_s2 + $0x8] sm:$0xff]  ;;  %v114_v23 = vld [vmem:[%s9835_s29 + $0xf8] sm:$0xff]  ;;  %v145_v26 = vld [vmem:[%s9835_s29 + $0x1f0] sm:$0xff]  ;;  %v168_v29 = vpack.c.bf16 %v96_v14, %v95_v13 }
  0x22   :  { %5623 = vmatpush3.bf16.msra.mxu0 %v166_v63  ;;  %v128_v19 = vld [vmem:[%s9835_s29 + $0x168] sm:$0xff]  ;;  %v158_v24 = vpack.c.bf16 %v79_v20, %v74_v15  ;;  %v76_v25 = vld [vmem:[%s9836_s2 + $0x18] sm:$0xff]  ;;  %v81_v28 = vld [vmem:[%s9836_s2 + $0x40] sm:$0xff]  ;;  %v177_v32 = vpack.c.bf16 %v114_v23, %v113_v22 }
  0x23   :  { %5624 = vmatprep.subr.bf16.mxu0 %v175_v1  ;;  %v146_v27 = vld [vmem:[%s9835_s29 + $0x1f8] sm:$0xff]  ;;  %v160_v30 = vpack.c.bf16 %v81_v28, %v76_v25  ;;  %v184_v31 = vpack.c.bf16 %v128_v19, %v127_v18  ;;  %v97_v33 = vld [vmem:[%s9835_s29 + $0x70] sm:$0xff]  ;;  %v73_v38 = vld [vmem:[%s9836_s2] sm:$0xff] }
  0x24   :  { %5645 = vmatpush3.bf16.msra.mxu1 %v182_v0  ;;  %246 = vmatprep.mubr.bf16.mxu0 %v158_v24  ;;  %v98_v34 = vld [vmem:[%s9835_s29 + $0x78] sm:$0xff]  ;;  %v193_v35 = vpack.c.bf16 %v146_v27, %v145_v26  ;;  %v129_v36 = vld [vmem:[%s9835_s29 + $0x170] sm:$0xff]  ;;  %v78_v40 = vld [vmem:[%s9836_s2 + $0x28] sm:$0xff] }
  0x25   :  { %5646 = vmatprep.subr.bf16.mxu1 %v191_v5  ;;  %v130_v37 = vld [vmem:[%s9835_s29 + $0x178] sm:$0xff]  ;;  %287 = vmatprep.mubr.bf16.mxu1 %v160_v30  ;;  %v169_v39 = vpack.c.bf16 %v98_v34, %v97_v33  ;;  %v147_v41 = vld [vmem:[%s9835_s29 + $0x200] sm:$0xff] }
  0x26   :  { %5625 = vmatpush3.bf16.msra.mxu0 %v167_v12 }
  0x27   :  { %5626 = vmatprep.subr.bf16.mxu0 %v176_v17 }
  0x28   :  { %5647 = vmatpush3.bf16.msra.mxu1 %v183_v16 }
  0x29   :  { %5648 = vmatprep.subr.bf16.mxu1 %v192_v21 }
  0x2a   :  { %5627 = vmatpush3.bf16.msra.mxu0 %v168_v29 }
  0x2b   :  { %27 = vsyncpa [#allocation5], 0  ;;  %5628 = vmatprep.subr.bf16.mxu0 %v177_v32  ;;  %v185_v42 = vpack.c.bf16 %v130_v37, %v129_v36  ;;  %v148_v43 = vld [vmem:[%s9835_s29 + $0x208] sm:$0xff]  ;;  %v75_v44 = vld [vmem:[%s9836_s2 + $0x10] sm:$0xff]  ;;  %v157_v46 = vpack.c.bf16 %v78_v40, %v73_v38  ;;  %vm6604_vm0 = vmmov 0   ;;  %vm210_vm1 = vcmask 1045504  }
  0x2c   :  { %5649 = vmatpush3.bf16.msra.mxu1 %v184_v31  ;;  %v80_v45 = vld [vmem:[%s9836_s2 + $0x38] sm:$0xff]  ;;  %v194_v47 = vpack.c.bf16 %v148_v43, %v147_v41  ;;  %v149_v49 = vld [vmem:[%s9835_s29 + $0x210] sm:$0xff]  ;;  %v151_v52 = vld [vmem:[%s9835_s29 + $0x220] sm:$0xff]  ;;  %vm206_vm2 = vcmask 621568   ;;  %s9837_s1 = sld [smem:[#allocation21_spill]]  ;;  %s9838_s6 = sld [smem:[#allocation19_spill]] }
  0x2d   :  { %5650 = vmatprep.subr.bf16.mxu1 %v193_v35  ;;  %v159_v48 = vpack.c.bf16 %v80_v45, %v75_v44  ;;  %v150_v50 = vld [vmem:[%s9835_s29 + $0x218] sm:$0xff]  ;;  %v152_v53 = vld [vmem:[%s9835_s29 + $0x228] sm:$0xff]  ;;  %v153_v55 = vld [vmem:[%s9835_s29 + $0x230] sm:$0xff]  ;;  %s9839_s27 = sld [smem:[#allocation20_spill]]  ;;  %s9840_s28 = sld [smem:[#allocation18_spill]]  ;;  %vm742_vm3 = vcmask 523264  }
  0x2e   :  { %5629 = vmatpush3.bf16.msra.mxu0 %v169_v39  ;;  %v195_v51 = vpack.c.bf16 %v150_v50, %v149_v49  ;;  %v196_v54 = vpack.c.bf16 %v152_v53, %v151_v52  ;;  %v154_v56 = vld [vmem:[%s9835_s29 + $0x238] sm:$0xff]  ;;  %v155_v57 = vld [vmem:[%s9835_s29 + $0x240] sm:$0xff]  ;;  %v156_v58 = vld [vmem:[%s9835_s29 + $0x248] sm:$0xf]  ;;  %s6606_s3 = smov 64   ;;  %vm790_vm5 = vcmask 130048  }
  0x2f   :  { %5936 = vmatprep.subr.bf16.mxu0 %v9811_v7  ;;  %v197_v59 = vpack.c.bf16 %v154_v56, %v153_v55  ;;  %v198_v60 = vpack.c.bf16 %v156_v58, %v155_v57  ;;  %v77_v61 = vld [vmem:[%s9836_s2 + $0x20] sm:$0xff]  ;;  %v82_v62 = vld [vmem:[%s9836_s2 + $0x48] sm:$0xff]  ;;  %v511_v49 = vld [vmem:[%s9792_s8 + $0x50] sm:$0xff]  ;;  %vm993_vm6 = vcmask 1048064  }
  0x30   :  { %5651 = vmatpush3.bf16.msra.mxu1 %v185_v42  ;;  %v161_v0 = vpack.c.bf16 %v82_v62, %v77_v61  ;;  %v502_v43 = vld [vmem:[%s9792_s8 + $0x8] sm:$0xff]  ;;  %v505_v44 = vld [vmem:[%s9792_s8 + $0x20] sm:$0xff]  ;;  %v503_v52 = vld [vmem:[%s9792_s8 + $0x10] sm:$0xff] }
  0x31   :  { %247 = vmatmul.mubr.bf16.vlgmr.msra.gmra.mrb[0].mxu0 %v157_v46  ;;  %v212_v63 = vsel %vm210_vm1, %v198_v60, 0  ;;  %v501_v45 = vld [vmem:[%s9792_s8] sm:$0xff]  ;;  %v554_v46 = vpack.c.bf16 %v505_v44, %v502_v43  ;;  %v506_v53 = vld [vmem:[%s9792_s8 + $0x28] sm:$0xff] }
  0x32   :  { %5937 = vmatpush3.bf16.msra.mxu0 %v194_v47  ;;  %5946 = vmatprep.mubr.msk.bf16.mxu0 %vm6604_vm0, %v9811_v7  ;;  %v337_v1 = vld [vmem:[%s9837_s1] sm:$0x1f]  ;;  %v504_v47 = vld [vmem:[%s9792_s8 + $0x18] sm:$0xff] }
  0x33   :  { %288 = vmatmul.mubr.bf16.vlgmr.msra.gmra.mrb[0].mxu1 %v159_v48  ;;  %5938 = vmatprep.subr.bf16.mxu0 %v9811_v7  ;;  %v338_v2 = vld [vmem:[%s9838_s6] sm:$0x1]  ;;  %v352_v23 = vrot.slane %v337_v1, 1  ;;  %v358_v24 = vrot.slane %v337_v1, 5  ;;  %v508_v48 = vld [vmem:[%s9792_s8 + $0x38] sm:$0xff]  ;;  %v553_v50 = vpack.c.bf16 %v504_v47, %v501_v45  ;;  %v526_v45 = vld [vmem:[%s9792_s8 + $0xc8] sm:$0xff] }
  0x34   :  { %v340_v3 = vld [vmem:[%s9839_s27] sm:$0xf]  ;;  %v339_v4 = vadd.f32 %v338_v2, %v337_v1  ;;  %594 = vmatprep.subr.bf16.mxu1 %v554_v46  ;;  %s9841_s6 = sld [smem:[#allocation22_spill]] }
  0x35   :  { %350 = vst [vmem:[#allocation2 + $0x1] sm:$0xf] %v340_v3  ;;  %357 = vst [vmem:[#allocation2 + $0x11] sm:$0xf] %v340_v3  ;;  %v5360_v6 = vld [vmem:[%s9840_s28] ss:$0 sm:$0xff]  ;;  %595 = vmatpush1.bf16.msra.mxu1 %v553_v50 }
  0x36   :  { %5939 = vmatpush3.bf16.msra.mxu0 %v195_v51  ;;  %363 = vst [vmem:[#allocation2 + $0x21] sm:$0xf] %v340_v3  ;;  %367 = vst [vmem:[#allocation2 + $0x31] sm:$0xf] %v340_v3  ;;  %v557_v51 = vpack.c.bf16 %v511_v49, %v508_v48  ;;  %v529_v46 = vld [vmem:[%s9792_s8 + $0xe0] sm:$0xff]  ;;  %v524_v49 = vld [vmem:[%s9792_s8 + $0xb8] sm:$0xff] }
  0x37   :  { %5940 = vmatprep.subr.bf16.mxu0 %v9811_v7  ;;  %349 = vst [vmem:[#allocation2] sm:$0x1] %v339_v4  ;;  %356 = vst [vmem:[#allocation2 + $0x10] sm:$0x1] %v339_v4  ;;  %v521_v47 = vld [vmem:[%s9792_s8 + $0xa0] sm:$0xff]  ;;  %v566_v48 = vpack.c.bf16 %v529_v46, %v526_v45 }
  0x38   :  { %362 = vst [vmem:[#allocation2 + $0x20] sm:$0x1] %v339_v4  ;;  %366 = vst [vmem:[#allocation2 + $0x30] sm:$0x1] %v339_v4  ;;  %596 = vmatprep.subr.bf16.mxu1 %v557_v51  ;;  %v525_v50 = vld [vmem:[%s9792_s8 + $0xc0] sm:$0xff]  ;;  %v528_v51 = vld [vmem:[%s9792_s8 + $0xd8] sm:$0xff] }
  0x3a   :  { %5941 = vmatpush3.bf16.msra.mxu0 %v196_v54  ;;  %v555_v54 = vpack.c.bf16 %v506_v53, %v503_v52  ;;  %v564_v52 = vpack.c.bf16 %v524_v49, %v521_v47  ;;  %v565_v53 = vpack.c.bf16 %v528_v51, %v525_v50 }
  0x3b   :  { %5942 = vmatprep.subr.bf16.mxu0 %v9811_v7 }
  0x3e   :  { %5943 = vmatpush3.bf16.msra.mxu0 %v197_v59 }
  0x3f   :  { %5944 = vmatprep.subr.bf16.mxu0 %v9811_v7 }
  0x42   :  { %5945 = vmatpush3.bf16.msra.mxu0 %v212_v63 }
  0x43   :  { %5950 = vmatprep.subr.bf16.mxu0 %v555_v54 }
  0x45   :  { %5947 = vmatmul.mubr.msk.bf16.vlgmr.msra.gmra.mrb[4].mxu0 %vm206_vm2, %v161_v0 }
  0x46   :  { %5951 = vmatpush3.bf16.msra.mxu0 %v555_v54  ;;  %v532_v54 = vld [vmem:[%s9792_s8 + $0xf8] sm:$0xff] }
 0x104   :  { %v5630_v5 = vpop.f32.mrb[0].mxu0 }
 0x105   :  { %v5631_v8 = vpop.f32.mrb[1].mxu0 }
 0x106   :  { %v5652_v9 = vpop.f32.mrb[0].mxu1  ;;  %v5632_v10 = vadd.f32 %v5631_v8, %v5630_v5  ;;  %v5633_v11 = vpop.f32.mrb[2].mxu0 }
 0x107   :  { %v5653_v12 = vpop.f32.mrb[1].mxu1  ;;  %v5634_v13 = vpop.f32.mrb[3].mxu0 }
 0x108   :  { %v5654_v14 = vadd.f32 %v5653_v12, %v5652_v9  ;;  %v5655_v15 = vpop.f32.mrb[2].mxu1  ;;  %v249_v16 = vadd.f32 %v5632_v10, %v5360_v6  ;;  %v5635_v17 = vadd.f32 %v5634_v13, %v5633_v11 }
 0x109   :  { %v5656_v18 = vpop.f32.mrb[3].mxu1 }
 0x10a   :  { %v5657_v19 = vadd.f32 %v5656_v18, %v5655_v15  ;;  %v252_v20 = vadd.f32 %v5635_v17, %v5360_v6  ;;  %v290_v21 = vadd.f32 %v5654_v14, %v249_v16 }
 0x10c   :  { %v293_v22 = vadd.f32 %v5657_v19, %v252_v20 }
 0x118   :  { %v330_v25 = vpop.f32.mrb[4].mxu0 }
 0x119   :  { %v331_v26 = vadd.f32 %v330_v25, %v290_v21  ;;  %v5948_v27 = vpop.f32.mrb[5].mxu0 }
 0x11a   :  { %v333_v28 = vpop.f32.mrb[6].mxu0  ;;  %v514_v27 = vld [vmem:[%s9792_s8 + $0x68] sm:$0xff] }
 0x11b   :  { %v354_v29 = vadd.f32 %v352_v23, %v331_v26  ;;  %v360_v30 = vadd.f32 %v358_v24, %v331_v26  ;;  %v334_v31 = vadd.f32 %v333_v28, %v293_v22  ;;  %v5949_v32 = vpop.f32.mrb[7].mxu0  ;;  %v517_v28 = vld [vmem:[%s9792_s8 + $0x80] sm:$0xff] }
 0x11c   :  { %v513_v32 = vld [vmem:[%s9792_s8 + $0x60] sm:$0xff] }
 0x11d   :  { %355 = vst [vmem:[#allocation2 + $0x5] sm:$0xf] %v354_v29  ;;  %361 = vst [vmem:[#allocation2 + $0x11] sm:$0xf0] %v360_v30  ;;  %v364_v33 = vadd.f32 %v352_v23, %v334_v31  ;;  %v368_v34 = vadd.f32 %v358_v24, %v334_v31  ;;  %v507_v23 = vld [vmem:[%s9792_s8 + $0x30] sm:$0xff]  ;;  %v510_v24 = vld [vmem:[%s9792_s8 + $0x48] sm:$0xff]  ;;  %v560_v30 = vpack.c.bf16 %v517_v28, %v514_v27 }
 0x11e   :  { %v556_v25 = vpack.c.bf16 %v510_v24, %v507_v23  ;;  %v509_v29 = vld [vmem:[%s9792_s8 + $0x40] sm:$0xff]  ;;  %v512_v31 = vld [vmem:[%s9792_s8 + $0x58] sm:$0xff]  ;;  %v546_v23 = vld [vmem:[%s9792_s8 + $0x168] sm:$0xff] }
 0x11f   :  { %365 = vst [vmem:[#allocation2 + $0x25] sm:$0xf] %v364_v33  ;;  %369 = vst [vmem:[#allocation2 + $0x31] sm:$0xf0] %v368_v34  ;;  %v516_v33 = vld [vmem:[%s9792_s8 + $0x78] sm:$0xff]  ;;  %v558_v34 = vpack.c.bf16 %v512_v31, %v509_v29  ;;  %v545_v27 = vld [vmem:[%s9792_s8 + $0x160] sm:$0xff] }
 0x120   :  { %597 = vmatpush1.bf16.msra.mxu1 %v556_v25  ;;  %v548_v28 = vld [vmem:[%s9792_s8 + $0x178] sm:$0xff] }
 0x121   :  { %598 = vmatprep.subr.bf16.mxu1 %v560_v30  ;;  %5952 = vmatprep.subr.bf16.mxu0 %v558_v34  ;;  %v576_v29 = vpack.c.bf16 %v548_v28, %v545_v27 }
 0x122   :  { %5953 = vmatpush3.bf16.msra.mxu0 %v558_v34 }
 0x124   :  { %v376_v35 = vld [vmem:[#allocation2 + $0x10] sm:$0xff]  ;;  %v374_v36 = vld [vmem:[#allocation2] sm:$0xff]  ;;  %v377_v37 = vld [vmem:[#allocation2 + $0x18] sm:$0xff] }
 0x125   :  { %388 = vadd.xlane.f32.xlu1 %v376_v35  ;;  %384 = vadd.xlane.f32.xlu0 %v374_v36  ;;  %v375_v38 = vld [vmem:[#allocation2 + $0x8] sm:$0xff] }
 0x126   :  { %v379_v39 = vld [vmem:[#allocation2 + $0x28] sm:$0xff]  ;;  %v378_v40 = vld [vmem:[#allocation2 + $0x20] sm:$0xff]  ;;  %v381_v41 = vld [vmem:[#allocation2 + $0x38] sm:$0xff] }
 0x127   :  { %v380_v42 = vld [vmem:[#allocation2 + $0x30] sm:$0xff] }
 0x129   :  { %390 = vadd.xlane.f32.xlu1 %v377_v37  ;;  %386 = vadd.xlane.f32.xlu0 %v375_v38 }
 0x12d   :  { %394 = vadd.xlane.f32.xlu1 %v379_v39  ;;  %392 = vadd.xlane.f32.xlu0 %v378_v40 }
 0x131   :  { %398 = vadd.xlane.f32.xlu1 %v381_v41  ;;  %396 = vadd.xlane.f32.xlu0 %v380_v42 }
 0x1b2   :  { %v389_v55 = vpop.xlane.xlu1 %388  ;;  %v385_v56 = vpop.xlane.xlu0 %384 }
 0x1b3   :  { %v403_v57 = vmul.f32 0.0078125, %v389_v55  ;;  %v401_v58 = vmul.f32 0.0078125, %v385_v56  ;;  %v535_v55 = vld [vmem:[%s9792_s8 + $0x110] sm:$0xff] }
 0x1b4   :  { %v527_v56 = vld [vmem:[%s9792_s8 + $0xd0] sm:$0xff] }
 0x1b5   :  { %v7026_v59 = vsub.f32 %v374_v36, %v401_v58  ;;  %v7030_v1 = vsub.f32 %v376_v35, %v403_v57  ;;  %v559_v35 = vpack.c.bf16 %v516_v33, %v513_v32  ;;  %v520_v36 = vld [vmem:[%s9792_s8 + $0x98] sm:$0xff]  ;;  %v569_v57 = vpack.c.bf16 %v535_v55, %v532_v54  ;;  %v530_v58 = vld [vmem:[%s9792_s8 + $0xe8] sm:$0xff]  ;;  %v5362_v55 = vld [vmem:[%s9841_s6] ss:$0 sm:$0xff] }
 0x1b6   :  { %v391_v60 = vpop.xlane.xlu1 %390  ;;  %v387_v61 = vpop.xlane.xlu0 %386 }
 0x1b7   :  { %v404_v62 = vmul.f32 0.0078125, %v391_v60  ;;  %v402_v63 = vmul.f32 0.0078125, %v387_v61  ;;  %v417_v0 = vmul.f32 %v7026_v59, %v7026_v59  ;;  %v419_v9 = vmul.f32 %v7030_v1, %v7030_v1  ;;  %599 = vmatpush1.bf16.msra.mxu1 %v559_v35  ;;  %v531_v60 = vld [vmem:[%s9792_s8 + $0xf0] sm:$0xff]  ;;  %v534_v61 = vld [vmem:[%s9792_s8 + $0x108] sm:$0xff] }
 0x1b9   :  { %425 = vadd.xlane.f32.xlu0 %v417_v0  ;;  %v7032_v2 = vsub.f32 %v375_v38, %v402_v63  ;;  %v7034_v5 = vsub.f32 %v377_v37, %v404_v62  ;;  %v523_v37 = vld [vmem:[%s9792_s8 + $0xb0] sm:$0xff]  ;;  %v567_v62 = vpack.c.bf16 %v530_v58, %v527_v56  ;;  %v568_v63 = vpack.c.bf16 %v534_v61, %v531_v60  ;;  %v538_v0 = vld [vmem:[%s9792_s8 + $0x128] sm:$0xff] }
 0x1ba   :  { %v395_v3 = vpop.xlane.xlu1 %394  ;;  %v393_v4 = vpop.xlane.xlu0 %392  ;;  %v515_v38 = vld [vmem:[%s9792_s8 + $0x70] sm:$0xff] }
 0x1bb   :  { %v406_v6 = vmul.f32 0.0078125, %v395_v3  ;;  %v405_v8 = vmul.f32 0.0078125, %v393_v4  ;;  %v418_v10 = vmul.f32 %v7032_v2, %v7032_v2  ;;  %v420_v14 = vmul.f32 %v7034_v5, %v7034_v5  ;;  %v541_v3 = vld [vmem:[%s9792_s8 + $0x140] sm:$0xff] }
 0x1bc   :  { %v533_v4 = vld [vmem:[%s9792_s8 + $0x100] sm:$0xff] }
 0x1bd   :  { %429 = vadd.xlane.f32.xlu0 %v419_v9  ;;  %427 = vadd.xlane.f32.xlu1 %v418_v10  ;;  %v7040_v11 = vsub.f32 %v378_v40, %v405_v8  ;;  %v7046_v18 = vsub.f32 %v379_v39, %v406_v6  ;;  %v563_v39 = vpack.c.bf16 %v523_v37, %v520_v36  ;;  %v518_v40 = vld [vmem:[%s9792_s8 + $0x88] sm:$0xff]  ;;  %v536_v8 = vld [vmem:[%s9792_s8 + $0x118] sm:$0xff]  ;;  %v537_v9 = vld [vmem:[%s9792_s8 + $0x120] sm:$0xff] }
 0x1be   :  { %v399_v12 = vpop.xlane.xlu1 %398  ;;  %v397_v13 = vpop.xlane.xlu0 %396  ;;  %v561_v43 = vpack.c.bf16 %v518_v40, %v515_v38  ;;  %v572_v6 = vpack.c.bf16 %v541_v3, %v538_v0  ;;  %v540_v10 = vld [vmem:[%s9792_s8 + $0x138] sm:$0xff] }
 0x1bf   :  { %v408_v15 = vmul.f32 0.0078125, %v399_v12  ;;  %v407_v16 = vmul.f32 0.0078125, %v397_v13  ;;  %v421_v17 = vmul.f32 %v7040_v11, %v7040_v11  ;;  %v422_v20 = vmul.f32 %v7046_v18, %v7046_v18  ;;  %600 = vmatprep.subr.bf16.mxu1 %v563_v39 }
 0x1c0   :  { %5954 = vmatprep.subr.bf16.mxu0 %v561_v43  ;;  %v570_v12 = vpack.c.bf16 %v536_v8, %v533_v4  ;;  %v571_v13 = vpack.c.bf16 %v540_v10, %v537_v9 }
 0x1c1   :  { %431 = vadd.xlane.f32.xlu1 %v420_v14  ;;  %433 = vadd.xlane.f32.xlu0 %v421_v17  ;;  %v7048_v19 = vsub.f32 %v380_v42, %v407_v16  ;;  %v7054_v22 = vsub.f32 %v381_v41, %v408_v15  ;;  %v519_v41 = vld [vmem:[%s9792_s8 + $0x90] sm:$0xff]  ;;  %v522_v42 = vld [vmem:[%s9792_s8 + $0xa8] sm:$0xff]  ;;  %v544_v14 = vld [vmem:[%s9792_s8 + $0x158] sm:$0xff] }
 0x1c2   :  { %v562_v44 = vpack.c.bf16 %v522_v42, %v519_v41  ;;  %5955 = vmatpush3.bf16.msra.mxu0 %v561_v43  ;;  %v547_v15 = vld [vmem:[%s9792_s8 + $0x170] sm:$0xff] }
 0x1c3   :  { %v423_v21 = vmul.f32 %v7048_v19, %v7048_v19  ;;  %v424_v26 = vmul.f32 %v7054_v22, %v7054_v22  ;;  %5956 = vmatprep.subr.bf16.mxu0 %v564_v52  ;;  %v539_v16 = vld [vmem:[%s9792_s8 + $0x130] sm:$0xff]  ;;  %v575_v17 = vpack.c.bf16 %v547_v15, %v544_v14 }
 0x1c4   :  { %601 = vmatpush1.bf16.msra.mxu1 %v562_v44 }
 0x1c5   :  { %435 = vadd.xlane.f32.xlu1 %v422_v20  ;;  %437 = vadd.xlane.f32.xlu0 %v423_v21  ;;  %v542_v20 = vld [vmem:[%s9792_s8 + $0x148] sm:$0xff]  ;;  %v543_v21 = vld [vmem:[%s9792_s8 + $0x150] sm:$0xff] }
 0x1c6   :  { %602 = vmatprep.subr.bf16.mxu1 %v566_v48  ;;  %5957 = vmatpush3.bf16.msra.mxu0 %v564_v52  ;;  %v573_v24 = vpack.c.bf16 %v542_v20, %v539_v16  ;;  %v574_v25 = vpack.c.bf16 %v546_v23, %v543_v21 }
 0x1c7   :  { %5958 = vmatprep.subr.bf16.mxu0 %v567_v62 }
 0x1c8   :  { %603 = vmatpush1.bf16.msra.mxu1 %v565_v53 }
 0x1c9   :  { %439 = vadd.xlane.f32.xlu1 %v424_v26  ;;  %604 = vmatprep.subr.bf16.mxu1 %v569_v57  ;;  %v9813_v26 = vmov 0  }
 0x1ca   :  { %5959 = vmatpush3.bf16.msra.mxu0 %v567_v62  ;;  %626 = vmatprep.mubr.bf16.mxu1 %v9813_v26  ;;  %v5363_v62 = vld [vmem:[%s9791_s7] ss:$0 sm:$0xff] }
 0x1cb   :  { %5960 = vmatprep.subr.bf16.mxu0 %v570_v12 }
 0x1cc   :  { %605 = vmatpush1.bf16.msra.mxu1 %v568_v63 }
 0x1cd   :  { %606 = vmatprep.subr.bf16.mxu1 %v572_v6 }
 0x1ce   :  { %5961 = vmatpush3.bf16.msra.mxu0 %v570_v12 }
 0x1cf   :  { %5962 = vmatprep.subr.bf16.mxu0 %v573_v24 }
 0x1d0   :  { %607 = vmatpush1.bf16.msra.mxu1 %v571_v13 }
 0x1d1   :  { %608 = vmatprep.subr.bf16.mxu1 %v575_v17 }
 0x1d2   :  { %5963 = vmatpush3.bf16.msra.mxu0 %v573_v24 }
 0x1d3   :  { %5964 = vmatprep.subr.bf16.mxu0 %v576_v29 }
 0x1d4   :  { %609 = vmatpush1.bf16.msra.mxu1 %v574_v25 }
 0x1d5   :  { %5974 = vmatprep.subr.bf16.mxu1 %v9811_v7 }
 0x1d6   :  { %5965 = vmatpush3.bf16.msra.mxu0 %v576_v29 }
 0x1d7   :  { %5980 = vmatprep.subr.bf16.mxu0 %v9811_v7 }
 0x246   :  { %v426_v30 = vpop.xlane.xlu0 %425 }
 0x247   :  { %v441_v31 = vmul.f32 0.0078125, %v426_v30 }
 0x249   :  { %v449_v32 = vadd.f32 1e-06, %v441_v31 }
 0x24a   :  { %v428_v33 = vpop.xlane.xlu1 %427  ;;  %v430_v34 = vpop.xlane.xlu0 %429 }
 0x24b   :  { %6243 = vrsqrt.f32 %v449_v32  ;;  %v442_v35 = vmul.f32 0.0078125, %v428_v33  ;;  %v443_v36 = vmul.f32 0.0078125, %v430_v34  ;;  %v577_v33 = vld [vmem:[%s9793_s9] sm:$0x7] }
 0x24d   :  { %v450_v37 = vadd.f32 1e-06, %v442_v35  ;;  %v451_v38 = vadd.f32 1e-06, %v443_v36 }
 0x24e   :  { %v432_v39 = vpop.xlane.xlu1 %431  ;;  %v434_v40 = vpop.xlane.xlu0 %433 }
 0x24f   :  { %6245 = vrsqrt.f32 %v450_v37  ;;  %v444_v41 = vmul.f32 0.0078125, %v432_v39  ;;  %v445_v42 = vmul.f32 0.0078125, %v434_v40 }
 0x250   :  { %6247 = vrsqrt.f32 %v451_v38 }
 0x251   :  { %v452_v43 = vadd.f32 1e-06, %v444_v41  ;;  %v453_v44 = vadd.f32 1e-06, %v445_v42 }
 0x252   :  { %v436_v45 = vpop.xlane.xlu1 %435  ;;  %v438_v46 = vpop.xlane.xlu0 %437 }
 0x253   :  { %6249 = vrsqrt.f32 %v452_v43  ;;  %v446_v47 = vmul.f32 0.0078125, %v436_v45  ;;  %v447_v48 = vmul.f32 0.0078125, %v438_v46 }
 0x254   :  { %6251 = vrsqrt.f32 %v453_v44 }
 0x255   :  { %v6244_v49 = vpop.eup %6243  ;;  %v454_v50 = vadd.f32 1e-06, %v446_v47  ;;  %v455_v51 = vadd.f32 1e-06, %v447_v48 }
 0x256   :  { %v440_v52 = vpop.xlane.xlu1 %439  ;;  %v465_v53 = vmul.f32 %v6244_v49, %v7026_v59 }
 0x257   :  { %6253 = vrsqrt.f32 %v454_v50  ;;  %v448_v54 = vmul.f32 0.0078125, %v440_v52 }
 0x258   :  { %6255 = vrsqrt.f32 %v455_v51  ;;  %v479_v61 = vmul.f32 %v5362_v55, %v465_v53 }
 0x259   :  { %v6246_v56 = vpop.eup %6245  ;;  %v456_v57 = vadd.f32 1e-06, %v448_v54 }
 0x25a   :  { %v6248_v58 = vpop.eup %6247  ;;  %v466_v60 = vmul.f32 %v6246_v56, %v7032_v2  ;;  %v493_v6 = vadd.f32 %v5363_v62, %v479_v61 }
 0x25b   :  { %6257 = vrsqrt.f32 %v456_v57  ;;  %v467_v59 = vmul.f32 %v6248_v58, %v7030_v1 }
 0x25c   :  { %v480_v63 = vmul.f32 %v5362_v55, %v466_v60 }
 0x25d   :  { %v6250_v0 = vpop.eup %6249  ;;  %v481_v3 = vmul.f32 %v5362_v55, %v467_v59 }
 0x25e   :  { %v6252_v4 = vpop.eup %6251  ;;  %v494_v8 = vadd.f32 %v5363_v62, %v480_v63  ;;  %v468_v9 = vmul.f32 %v6250_v0, %v7034_v5 }
 0x25f   :  { %v469_v10 = vmul.f32 %v6252_v4, %v7040_v11  ;;  %v495_v14 = vadd.f32 %v5363_v62, %v481_v3 }
 0x260   :  { %v549_v12 = vpack.c.bf16 %v494_v8, %v493_v6  ;;  %v482_v2 = vmul.f32 %v5362_v55, %v468_v9 }
 0x261   :  { %v6254_v13 = vpop.eup %6253  ;;  %v483_v17 = vmul.f32 %v5362_v55, %v469_v10 }
 0x262   :  { %v6256_v15 = vpop.eup %6255  ;;  %627 = vmatmul.mubr.bf16.vlgmr.msra.gmra.mrb[4].mxu1 %v549_v12  ;;  %5966 = vmatprep.mubr.bf16.mxu0 %v549_v12  ;;  %v496_v16 = vadd.f32 %v5363_v62, %v482_v2  ;;  %v470_v1 = vmul.f32 %v6254_v13, %v7046_v18 }
 0x263   :  { %636 = vmatprep.mubr.bf16.mxu1 %v9813_v26  ;;  %v471_v20 = vmul.f32 %v6256_v15, %v7048_v19  ;;  %v497_v11 = vadd.f32 %v5363_v62, %v483_v17  ;;  %v370_v19 = vlaneseq }
 0x264   :  { %v550_v21 = vpack.c.bf16 %v496_v16, %v495_v14  ;;  %v484_v23 = vmul.f32 %v5362_v55, %v470_v1 }
 0x265   :  { %v6258_v5 = vpop.eup %6257  ;;  %v485_v27 = vmul.f32 %v5362_v55, %v471_v20 }
 0x266   :  { %5967 = vmatmul.mubr.bf16.vlgmr.msra.gmra.mrb[8].mxu0 %v550_v21  ;;  %v498_v24 = vadd.f32 %v5363_v62, %v484_v23  ;;  %v472_v25 = vmul.f32 %v6258_v5, %v7054_v22  ;;  %v7203_v22 = vshrl.u32 %v370_v19, 7 }
 0x267   :  { %v499_v30 = vadd.f32 %v5363_v62, %v485_v27 }
 0x268   :  { %v551_v28 = vpack.c.bf16 %v498_v24, %v497_v11  ;;  %v486_v29 = vmul.f32 %v5362_v55, %v472_v25  ;;  %9842 = vst [vmem:[#allocation7_spill] sm:$0xff] %v7203_v22  ;;  %v7206_v32 = vsub.s32 0, %v7203_v22  ;;  %v7212_v34 = vsub.s32 1, %v7203_v22 }
 0x269   :  { %v7218_v36 = vsub.s32 2, %v7203_v22 }
 0x26a   :  { %637 = vmatmul.mubr.bf16.gmra.mrb[8].mxu1 %v550_v21  ;;  %5970 = vmatprep.mubr.bf16.mxu0 %v551_v28  ;;  %v500_v18 = vadd.f32 %v5363_v62, %v486_v29  ;;  %9843 = vst [vmem:[#allocation8_spill] sm:$0xff] %v7206_v32  ;;  %9844 = vst [vmem:[#allocation9_spill] sm:$0xff] %v7212_v34  ;;  %v7215_v35 = vrot.slane %v577_v33, %v7206_v32 }
 0x26b   :  { %646 = vmatprep.mubr.bf16.mxu1 %v9813_v26  ;;  %9845 = vst [vmem:[#allocation10_spill] sm:$0xff] %v7218_v36  ;;  %v7221_v38 = vrot.slane %v577_v33, %v7212_v34  ;;  %v590_v41 = vrot.slane %v577_v33, %v7218_v36 }
 0x26c   :  { %v552_v31 = vpack.c.bf16 %v500_v18, %v499_v30 }
 0x26e   :  { %5971 = vmatmul.mubr.bf16.gmra.mrb[12].mxu0 %v552_v31 }
 0x26f   :  { %5982 = vmatprep.mubr.msk.bf16.mxu0 %vm6604_vm0, %v9811_v7 }
 0x272   :  { %647 = vmatmul.mubr.bf16.gmra.mrb[12].mxu1 %v551_v28 }
 0x273   :  { %656 = vmatprep.mubr.bf16.mxu1 %v9813_v26 }
 0x27a   :  { %657 = vmatmul.mubr.bf16.gmra.mrb[16].mxu1 %v552_v31 }
 0x27b   :  { %5976 = vmatprep.mubr.msk.bf16.mxu1 %vm6604_vm0, %v9811_v7 }
 0x335   :  { %v628_v37 = vpop.f32.mrb[4].mxu1 }
 0x336   :  { %v629_v39 = vadd.f32 %v628_v37, %v7215_v35  ;;  %v630_v40 = vpop.f32.mrb[5].mxu1 }
 0x337   :  { %v632_v42 = vpop.f32.mrb[6].mxu1  ;;  %v631_v45 = vadd.f32 %v630_v40, %v7221_v38 }
 0x338   :  { %v633_v43 = vadd.f32 %v632_v42, %v7215_v35  ;;  %v634_v44 = vpop.f32.mrb[7].mxu1  ;;  %v732_v48 = vmul.f32 0.125, %v629_v39 }
 0x339   :  { %v635_v46 = vadd.f32 %v634_v44, %v7221_v38  ;;  %v5968_v47 = vpop.f32.mrb[8].mxu0 }
 0x33a   :  { %v733_v49 = vmul.f32 0.125, %v633_v43  ;;  %v710_v50 = vadd.f32 %v5968_v47, %v590_v41  ;;  %v701_v51 = vpop.f32.mrb[9].mxu0 }
 0x33b   :  { %v741_v52 = vpack.c.bf16 %v635_v46, %v631_v45  ;;  %v5969_v53 = vpop.f32.mrb[10].mxu0  ;;  %v702_v57 = vadd.f32 %v701_v51, %v590_v41 }
 0x33c   :  { %v740_v54 = vpack.c.bf16 %v733_v49, %v732_v48  ;;  %v713_v55 = vadd.f32 %v5969_v53, %v590_v41  ;;  %v704_v56 = vpop.f32.mrb[11].mxu0 }
 0x33d   :  { %v705_v58 = vadd.f32 %v704_v56, %v590_v41  ;;  %865 = vrot.lane.b32.xlu0 %v741_v52, %s6606_s3  ;;  %v638_v60 = vpop.f32.mrb[8].mxu1  ;;  %v747_v61 = vsel %vm742_vm3, %v741_v52, 0 }
 0x33e   :  { %v7230_v62 = vpack.c.bf16 %v713_v55, %v710_v50  ;;  %v639_v59 = vadd.f32 %v638_v60, %v7215_v35  ;;  %5975 = vmatpush3.bf16.xpose.msra.mxu1 %v747_v61  ;;  %862 = vrot.lane.b32.xlu1 %v740_v54, %s6606_s3  ;;  %v640_v63 = vpop.f32.mrb[9].mxu1 }
 0x33f   :  { %v7234_v0 = vpack.c.bf16 %v705_v58, %v702_v57  ;;  %v642_v3 = vpop.f32.mrb[10].mxu1  ;;  %5986 = vmatprep.subr.bf16.mxu1 %v9811_v7  ;;  %v641_v8 = vadd.f32 %v640_v63, %v7221_v38 }
 0x340   :  { %v643_v4 = vadd.f32 %v642_v3, %v7215_v35  ;;  %v644_v6 = vpop.f32.mrb[11].mxu1  ;;  %v734_v12 = vmul.f32 0.125, %v639_v59 }
 0x341   :  { %v645_v9 = vadd.f32 %v644_v6, %v7221_v38  ;;  %v5972_v10 = vpop.f32.mrb[12].mxu0  ;;  %5981 = vmatpush3.bf16.msra.mxu0 %v7234_v0 }
 0x342   :  { %v735_v2 = vmul.f32 0.125, %v643_v4  ;;  %v726_v13 = vadd.f32 %v5972_v10, %v590_v41  ;;  %v717_v14 = vpop.f32.mrb[13].mxu0  ;;  %5992 = vmatprep.subr.bf16.mxu0 %v9811_v7 }
 0x343   :  { %v997_v15 = vpack.c.bf16 %v645_v9, %v641_v8  ;;  %v718_v16 = vadd.f32 %v717_v14, %v590_v41  ;;  %v5973_v1 = vpop.f32.mrb[14].mxu0  ;;  %v371_v8 = vand.u32 127, %v370_v19 }
 0x344   :  { %v996_v17 = vpack.c.bf16 %v735_v2, %v734_v12  ;;  %v729_v20 = vadd.f32 %v5973_v1, %v590_v41  ;;  %v720_v21 = vpop.f32.mrb[15].mxu0 }
 0x345   :  { %v721_v23 = vadd.f32 %v720_v21, %v590_v41  ;;  %1119 = vrot.lane.b32.xlu1 %v997_v15, %s6606_s3  ;;  %v648_v5 = vpop.f32.mrb[12].mxu1  ;;  %5977 = vmatmul.mubr.msk.bf16.vlgmr.msra.gmra.mrb[20].mxu1 %vm742_vm3, %v740_v54  ;;  %v1002_v55 = vsel %vm742_vm3, %v997_v15, 0  ;;  %vm372_vm4 = vcmp.ge.s32.totalorder %v371_v8, 9 }
 0x346   :  { %v7244_v11 = vpack.c.bf16 %v729_v20, %v726_v13  ;;  %v649_v24 = vadd.f32 %v648_v5, %v7215_v35  ;;  %v650_v25 = vpop.f32.mrb[13].mxu1  ;;  %5988 = vmatprep.mubr.msk.bf16.mxu1 %vm6604_vm0, %v9811_v7  ;;  %v7297_v9 = vsel %vm372_vm4, -1e+30, %v9811_v7 }
 0x347   :  { %v7249_v27 = vpack.c.bf16 %v721_v23, %v718_v16  ;;  %v652_v28 = vpop.f32.mrb[14].mxu1  ;;  %v651_v18 = vadd.f32 %v650_v25, %v7221_v38  ;;  %9846 = vst [vmem:[#allocation11_spill] sm:$0xff] %v7297_v9 }
 0x348   :  { %v653_v29 = vadd.f32 %v652_v28, %v7215_v35  ;;  %v654_v30 = vpop.f32.mrb[15].mxu1  ;;  %v736_v33 = vmul.f32 0.125, %v649_v24 }
 0x349   :  { %v655_v31 = vadd.f32 %v654_v30, %v7221_v38  ;;  %1116 = vrot.lane.b32.xlu1 %v996_v17, %s6606_s3 }
 0x34a   :  { %v737_v37 = vmul.f32 0.125, %v653_v29 }
 0x34b   :  { %v1250_v39 = vpack.c.bf16 %v655_v31, %v651_v18 }
 0x34c   :  { %v1249_v40 = vpack.c.bf16 %v737_v37, %v736_v33 }
 0x34d   :  { %1372 = vrot.lane.b32.xlu0 %v1250_v39, %s6606_s3  ;;  %v658_v41 = vpop.f32.mrb[16].mxu1  ;;  %v1255_v58 = vsel %vm742_vm3, %v1250_v39, 0 }
 0x34e   :  { %v659_v42 = vadd.f32 %v658_v41, %v7215_v35  ;;  %1369 = vrot.lane.b32.xlu1 %v1249_v40, %s6606_s3  ;;  %v660_v43 = vpop.f32.mrb[17].mxu1 }
 0x34f   :  { %v662_v44 = vpop.f32.mrb[18].mxu1  ;;  %v661_v47 = vadd.f32 %v660_v43, %v7221_v38 }
 0x350   :  { %v663_v45 = vadd.f32 %v662_v44, %v7215_v35  ;;  %v664_v46 = vpop.f32.mrb[19].mxu1  ;;  %v738_v49 = vmul.f32 0.125, %v659_v42 }
 0x351   :  { %v665_v48 = vadd.f32 %v664_v46, %v7221_v38 }
 0x352   :  { %v739_v50 = vmul.f32 0.125, %v663_v45 }
 0x353   :  { %v1503_v51 = vpack.c.bf16 %v665_v48, %v661_v47 }
 0x354   :  { %v1502_v52 = vpack.c.bf16 %v739_v50, %v738_v49 }
 0x355   :  { %1625 = vrot.lane.b32.xlu0 %v1503_v51, %s6606_s3  ;;  %v1508_v63 = vsel %vm742_vm3, %v1503_v51, 0 }
 0x356   :  { %1622 = vrot.lane.b32.xlu1 %v1502_v52, %s6606_s3 }
 0x3af   :  { %v866_v53 = vpop.permute.xlu0 %865 }
 0x3b0   :  { %v871_v54 = vsel %vm742_vm3, %v866_v53, 0  ;;  %v863_v35 = vpop.permute.xlu1 %862 }
 0x3b1   :  { %5987 = vmatpush3.bf16.xpose.msra.mxu1 %v871_v54 }
 0x3b2   :  { %5998 = vmatprep.subr.bf16.mxu1 %v9811_v7 }
 0x3b7   :  { %v1120_v38 = vpop.permute.xlu1 %1119 }
 0x3b8   :  { %5989 = vmatmul.mubr.msk.bf16.vlgmr.msra.gmra.mrb[24].mxu1 %vm742_vm3, %v863_v35  ;;  %v1125_v56 = vsel %vm742_vm3, %v1120_v38, 0 }
 0x3b9   :  { %5999 = vmatpush3.bf16.xpose.msra.mxu1 %v1002_v55  ;;  %6000 = vmatprep.mubr.msk.bf16.mxu1 %vm6604_vm0, %v9811_v7 }
 0x3ba   :  { %6010 = vmatprep.subr.bf16.mxu1 %v9811_v7 }
 0x3bb   :  { %v1117_v57 = vpop.permute.xlu1 %1116 }
 0x3bf   :  { %v1373_v60 = vpop.permute.xlu0 %1372 }
 0x3c0   :  { %6001 = vmatmul.mubr.msk.bf16.vlgmr.msra.gmra.mrb[28].mxu1 %vm742_vm3, %v996_v17  ;;  %v1378_v61 = vsel %vm742_vm3, %v1373_v60, 0  ;;  %v1370_v59 = vpop.permute.xlu1 %1369 }
 0x3c1   :  { %6011 = vmatpush3.bf16.xpose.msra.mxu1 %v1125_v56  ;;  %6012 = vmatprep.mubr.msk.bf16.mxu1 %vm6604_vm0, %v9811_v7 }
 0x3c2   :  { %6022 = vmatprep.subr.bf16.mxu1 %v9811_v7 }
 0x3c7   :  { %v1626_v3 = vpop.permute.xlu0 %1625 }
 0x3c8   :  { %6013 = vmatmul.mubr.msk.bf16.vlgmr.msra.gmra.mrb[32].mxu1 %vm742_vm3, %v1117_v57  ;;  %v1631_v4 = vsel %vm742_vm3, %v1626_v3, 0  ;;  %v1623_v6 = vpop.permute.xlu1 %1622 }
 0x3c9   :  { %6023 = vmatpush3.bf16.xpose.msra.mxu1 %v1255_v58  ;;  %6024 = vmatprep.mubr.msk.bf16.mxu1 %vm6604_vm0, %v9811_v7 }
 0x3ca   :  { %6034 = vmatprep.subr.bf16.mxu1 %v9811_v7 }
 0x3d0   :  { %6025 = vmatmul.mubr.msk.bf16.vlgmr.msra.gmra.mrb[36].mxu1 %vm742_vm3, %v1249_v40 }
 0x3d1   :  { %6035 = vmatpush3.bf16.xpose.msra.mxu1 %v1378_v61  ;;  %6036 = vmatprep.mubr.msk.bf16.mxu1 %vm6604_vm0, %v9811_v7 }
 0x3d2   :  { %6046 = vmatprep.subr.bf16.mxu1 %v9811_v7 }
 0x3d8   :  { %6037 = vmatmul.mubr.msk.bf16.vlgmr.msra.gmra.mrb[40].mxu1 %vm742_vm3, %v1370_v59 }
 0x3d9   :  { %6047 = vmatpush3.bf16.xpose.msra.mxu1 %v1508_v63  ;;  %6048 = vmatprep.mubr.msk.bf16.mxu1 %vm6604_vm0, %v9811_v7 }
 0x3da   :  { %6058 = vmatprep.subr.bf16.mxu1 %v9811_v7 }
 0x3e0   :  { %6049 = vmatmul.mubr.msk.bf16.vlgmr.msra.gmra.mrb[44].mxu1 %vm742_vm3, %v1502_v52 }
 0x3e1   :  { %6059 = vmatpush3.bf16.xpose.msra.mxu1 %v1631_v4  ;;  %6060 = vmatprep.mubr.msk.bf16.mxu1 %vm6604_vm0, %v9811_v7 }
 0x3e8   :  { %6061 = vmatmul.mubr.msk.bf16.vlgmr.msra.gmra.mrb[48].mxu1 %vm742_vm3, %v1623_v6 }
 0x418   :  { %v783_v10 = vpop.f32.mrb[20].mxu1 }
 0x419   :  { %v784_v12 = vadd.f32 %v783_v10, %v7297_v9  ;;  %v5978_v2 = vpop.f32.mrb[21].mxu1 }
 0x41a   :  { %v786_v13 = vpop.f32.mrb[22].mxu1 }
 0x41b   :  { %v787_v14 = vadd.f32 %v786_v13, %v7297_v9  ;;  %v5979_v15 = vpop.f32.mrb[23].mxu1  ;;  %v791_v16 = vsel %vm790_vm5, %v784_v12, -inf }
 0x41c   :  { %792 = vmax.xlane.f32.xlu0 %v791_v16 }
 0x41d   :  { %v794_v1 = vsel %vm790_vm5, %v787_v14, -inf }
 0x41e   :  { %795 = vmax.xlane.f32.xlu1 %v794_v1 }
 0x48b   :  { %v907_v19 = vpop.f32.mrb[24].mxu1 }
 0x48c   :  { %v7304_v17 = vadd.f32 %v907_v19, %v7297_v9  ;;  %v5990_v20 = vpop.f32.mrb[25].mxu1 }
 0x48d   :  { %v910_v21 = vpop.f32.mrb[26].mxu1 }
 0x48e   :  { %v7307_v23 = vadd.f32 %v910_v21, %v7297_v9  ;;  %v5991_v5 = vpop.f32.mrb[27].mxu1  ;;  %v914_v24 = vsel %vm790_vm5, %v7304_v17, -inf }
 0x48f   :  { %915 = vmax.xlane.f32.xlu0 %v914_v24 }
 0x490   :  { %v917_v25 = vsel %vm790_vm5, %v7307_v23, -inf }
 0x493   :  { %918 = vmax.xlane.f32.xlu0 %v917_v25  ;;  %v1038_v28 = vpop.f32.mrb[28].mxu1 }
 0x494   :  { %v7314_v29 = vadd.f32 %v1038_v28, %v7297_v9  ;;  %v6002_v30 = vpop.f32.mrb[29].mxu1 }
 0x495   :  { %v1041_v18 = vpop.f32.mrb[30].mxu1 }
 0x496   :  { %v7317_v31 = vadd.f32 %v1041_v18, %v7297_v9  ;;  %v6003_v33 = vpop.f32.mrb[31].mxu1  ;;  %v1045_v37 = vsel %vm790_vm5, %v7314_v29, -inf }
 0x497   :  { %1046 = vmax.xlane.f32.xlu0 %v1045_v37 }
 0x498   :  { %v1048_v39 = vsel %vm790_vm5, %v7317_v31, -inf }
 0x499   :  { %1049 = vmax.xlane.f32.xlu1 %v1048_v39 }
 0x49b   :  { %v1161_v40 = vpop.f32.mrb[32].mxu1 }
 0x49c   :  { %v7324_v41 = vadd.f32 %v1161_v40, %v7297_v9  ;;  %v6014_v42 = vpop.f32.mrb[33].mxu1 }
 0x49d   :  { %v1164_v43 = vpop.f32.mrb[34].mxu1 }
 0x49e   :  { %v7327_v44 = vadd.f32 %v1164_v43, %v7297_v9  ;;  %v6015_v45 = vpop.f32.mrb[35].mxu1  ;;  %v1168_v46 = vsel %vm790_vm5, %v7324_v41, -inf }
 0x49f   :  { %1169 = vmax.xlane.f32.xlu0 %v1168_v46 }
 0x4a0   :  { %v1171_v47 = vsel %vm790_vm5, %v7327_v44, -inf }
 0x4a1   :  { %1172 = vmax.xlane.f32.xlu1 %v1171_v47 }
 0x4a3   :  { %v1291_v48 = vpop.f32.mrb[36].mxu1 }
 0x4a4   :  { %v7334_v49 = vadd.f32 %v1291_v48, %v7297_v9  ;;  %v6026_v50 = vpop.f32.mrb[37].mxu1 }
 0x4a5   :  { %v1294_v51 = vpop.f32.mrb[38].mxu1 }
 0x4a6   :  { %v7337_v52 = vadd.f32 %v1294_v51, %v7297_v9  ;;  %v6027_v53 = vpop.f32.mrb[39].mxu1  ;;  %v1298_v54 = vsel %vm790_vm5, %v7334_v49, -inf }
 0x4a7   :  { %1299 = vmax.xlane.f32.xlu0 %v1298_v54 }
 0x4a8   :  { %v1301_v35 = vsel %vm790_vm5, %v7337_v52, -inf }
 0x4a9   :  { %1302 = vmax.xlane.f32.xlu1 %v1301_v35  ;;  %v793_v55 = vpop.xlane.xlu0 %792 }
 0x4aa   :  { %v797_v38 = vsub.f32 %v784_v12, %v793_v55 }
 0x4ab   :  { %v796_v56 = vpop.xlane.xlu1 %795  ;;  %v1414_v57 = vpop.f32.mrb[40].mxu1 }
 0x4ac   :  { %v799_v58 = vmul.f32 1.442695, %v797_v38  ;;  %v798_v60 = vsub.f32 %v787_v14, %v796_v56  ;;  %v7344_v61 = vadd.f32 %v1414_v57, %v7297_v9  ;;  %v6038_v59 = vpop.f32.mrb[41].mxu1 }
 0x4ad   :  { %v1417_v63 = vpop.f32.mrb[42].mxu1 }
 0x4ae   :  { %6259 = vpow2.f32 %v799_v58  ;;  %v801_v3 = vmul.f32 1.442695, %v798_v60  ;;  %v7347_v4 = vadd.f32 %v1417_v63, %v7297_v9  ;;  %v6039_v6 = vpop.f32.mrb[43].mxu1  ;;  %v1421_v8 = vsel %vm790_vm5, %v7344_v61, -inf }
 0x4af   :  { %1422 = vmax.xlane.f32.xlu0 %v1421_v8 }
 0x4b0   :  { %6261 = vpow2.f32 %v801_v3  ;;  %v1424_v10 = vsel %vm790_vm5, %v7347_v4, -inf }
 0x4b1   :  { %1425 = vmax.xlane.f32.xlu1 %v1424_v10 }
 0x4b3   :  { %v1544_v12 = vpop.f32.mrb[44].mxu1 }
 0x4b4   :  { %v7354_v2 = vadd.f32 %v1544_v12, %v7297_v9  ;;  %v6050_v13 = vpop.f32.mrb[45].mxu1 }
 0x4b5   :  { %v1547_v14 = vpop.f32.mrb[46].mxu1 }
 0x4b6   :  { %v7357_v15 = vadd.f32 %v1547_v14, %v7297_v9  ;;  %v6051_v16 = vpop.f32.mrb[47].mxu1  ;;  %v1551_v1 = vsel %vm790_vm5, %v7354_v2, -inf }
 0x4b7   :  { %1552 = vmax.xlane.f32.xlu0 %v1551_v1 }
 0x4b8   :  { %v7361_v19 = vpop.eup %6259  ;;  %v1554_v20 = vsel %vm790_vm5, %v7357_v15, -inf }
 0x4b9   :  { %1555 = vmax.xlane.f32.xlu1 %v1554_v20  ;;  %v803_v21 = vsel %vm790_vm5, %v7361_v19, 0.0 }
 0x4ba   :  { %v7367_v5 = vpop.eup %6261 }
 0x4bb   :  { %v1667_v24 = vpop.f32.mrb[48].mxu1  ;;  %804 = vadd.xlane.f32.xlu0 %v803_v21  ;;  %v806_v25 = vsel %vm790_vm5, %v7367_v5, 0.0 }
 0x4bc   :  { %v7372_v28 = vadd.f32 %v1667_v24, %v7297_v9  ;;  %v6062_v30 = vpop.f32.mrb[49].mxu1 }
 0x4bd   :  { %807 = vadd.xlane.f32.xlu1 %v806_v25  ;;  %v1670_v18 = vpop.f32.mrb[50].mxu1 }
 0x4be   :  { %v7375_v33 = vadd.f32 %v1670_v18, %v7297_v9  ;;  %v6063_v37 = vpop.f32.mrb[51].mxu1  ;;  %v1674_v39 = vsel %vm790_vm5, %v7372_v28, -inf }
 0x4bf   :  { %1675 = vmax.xlane.f32.xlu0 %v1674_v39 }
 0x4c0   :  { %v1677_v40 = vsel %vm790_vm5, %v7375_v33, -inf }
 0x4c1   :  { %1678 = vmax.xlane.f32.xlu1 %v1677_v40 }
 0x51c   :  { %v916_v42 = vpop.xlane.xlu0 %915 }
 0x51d   :  { %v920_v43 = vsub.f32 %v7304_v17, %v916_v42 }
 0x51f   :  { %v922_v45 = vmul.f32 1.442695, %v920_v43 }
 0x520   :  { %v919_v46 = vpop.xlane.xlu0 %918 }
 0x521   :  { %6263 = vpow2.f32 %v922_v45  ;;  %v921_v47 = vsub.f32 %v7307_v23, %v919_v46 }
 0x523   :  { %v924_v48 = vmul.f32 1.442695, %v921_v47 }
 0x524   :  { %v1047_v50 = vpop.xlane.xlu0 %1046 }
 0x525   :  { %6265 = vpow2.f32 %v924_v48  ;;  %v1051_v51 = vsub.f32 %v7314_v29, %v1047_v50 }
 0x526   :  { %v1050_v53 = vpop.xlane.xlu1 %1049 }
 0x527   :  { %v1053_v54 = vmul.f32 1.442695, %v1051_v51  ;;  %v1052_v35 = vsub.f32 %v7317_v31, %v1050_v53 }
 0x529   :  { %6267 = vpow2.f32 %v1053_v54  ;;  %v1055_v55 = vmul.f32 1.442695, %v1052_v35 }
 0x52b   :  { %v7385_v38 = vpop.eup %6263  ;;  %6269 = vpow2.f32 %v1055_v55 }
 0x52c   :  { %v1170_v17 = vpop.xlane.xlu0 %1169  ;;  %v926_v56 = vsel %vm790_vm5, %v7385_v38, 0.0 }
 0x52d   :  { %v1174_v23 = vsub.f32 %v7324_v41, %v1170_v17  ;;  %927 = vadd.xlane.f32.xlu0 %v926_v56 }
 0x52e   :  { %v1173_v63 = vpop.xlane.xlu1 %1172 }
 0x52f   :  { %v7390_v57 = vpop.eup %6265  ;;  %v1176_v58 = vmul.f32 1.442695, %v1174_v23  ;;  %v1175_v25 = vsub.f32 %v7327_v44, %v1173_v63 }
 0x530   :  { %v929_v29 = vsel %vm790_vm5, %v7390_v57, 0.0 }
 0x531   :  { %6271 = vpow2.f32 %v1176_v58  ;;  %930 = vadd.xlane.f32.xlu1 %v929_v29  ;;  %v1178_v39 = vmul.f32 1.442695, %v1175_v25 }
 0x533   :  { %v7394_v31 = vpop.eup %6267 }
 0x534   :  { %v1057_v60 = vsel %vm790_vm5, %v7394_v31, 0.0  ;;  %v1300_v6 = vpop.xlane.xlu0 %1299 }
 0x535   :  { %v7398_v59 = vpop.eup %6269  ;;  %1058 = vadd.xlane.f32.xlu0 %v1057_v60  ;;  %v1304_v42 = vsub.f32 %v7334_v49, %v1300_v6 }
 0x536   :  { %v1060_v41 = vsel %vm790_vm5, %v7398_v59, 0.0  ;;  %v1303_v10 = vpop.xlane.xlu1 %1302 }
 0x537   :  { %1061 = vadd.xlane.f32.xlu1 %v1060_v41  ;;  %v1305_v40 = vsub.f32 %v7337_v52, %v1303_v10  ;;  %v1306_v45 = vmul.f32 1.442695, %v1304_v42 }
 0x539   :  { %v1308_v43 = vmul.f32 1.442695, %v1305_v40 }
 0x53b   :  { %v7402_v3 = vpop.eup %6271 }
 0x53c   :  { %v1180_v8 = vsel %vm790_vm5, %v7402_v3, 0.0  ;;  %v1423_v12 = vpop.xlane.xlu0 %1422 }
 0x53d   :  { %1181 = vadd.xlane.f32.xlu0 %v1180_v8  ;;  %v1427_v44 = vsub.f32 %v7344_v61, %v1423_v12 }
 0x53e   :  { %v1426_v13 = vpop.xlane.xlu1 %1425 }
 0x53f   :  { %v1428_v46 = vsub.f32 %v7347_v4, %v1426_v13 }
 0x541   :  { %v1431_v47 = vmul.f32 1.442695, %v1428_v46 }
 0x544   :  { %v1553_v14 = vpop.xlane.xlu0 %1552 }
 0x545   :  { %v1557_v49 = vsub.f32 %v7354_v2, %v1553_v14 }
 0x546   :  { %v1556_v16 = vpop.xlane.xlu1 %1555 }
 0x547   :  { %v1559_v50 = vmul.f32 1.442695, %v1557_v49  ;;  %v1558_v61 = vsub.f32 %v7357_v15, %v1556_v16 }
 0x548   :  { %1192 = vrot.lane.b32.xlu1 %v7230_v62, %s6606_s3  ;;  %v805_v1 = vpop.xlane.xlu0 %804 }
 0x549   :  { %6273 = vrcp.f32 %v805_v1  ;;  %v1561_v54 = vmul.f32 1.442695, %v1558_v61 }
 0x54a   :  { %v808_v20 = vpop.xlane.xlu1 %807 }
 0x54b   :  { %6275 = vrcp.f32 %v808_v20 }
 0x54c   :  { %6277 = vpow2.f32 %v1178_v39 }
 0x54d   :  { %6279 = vpow2.f32 %v1308_v43 }
 0x54e   :  { %6281 = vpow2.f32 %v1306_v45  ;;  %v1679_v51 = vpop.xlane.xlu1 %1678 }
 0x54f   :  { %v1681_v2 = vsub.f32 %v7375_v33, %v1679_v51 }
 0x551   :  { %v1684_v56 = vmul.f32 1.442695, %v1681_v2 }
 0x553   :  { %938 = vrot.lane.b32.xlu0 %v7234_v0, %s6606_s3  ;;  %v6274_v21 = vpop.eup %6273  ;;  %v1676_v0 = vpop.xlane.xlu0 %1675 }
 0x554   :  { %v811_v30 = vmul.f32 %v6274_v21, %v7361_v19  ;;  %v1680_v19 = vsub.f32 %v7372_v28, %v1676_v0 }
 0x555   :  { %v6276_v24 = vpop.eup %6275 }
 0x556   :  { %v812_v18 = vmul.f32 %v6276_v24, %v7367_v5  ;;  %v1429_v5 = vmul.f32 1.442695, %v1427_v44  ;;  %v1682_v52 = vmul.f32 1.442695, %v1680_v19  ;;  %v7422_v48 = vpop.eup %6277 }
 0x557   :  { %v1183_v28 = vsel %vm790_vm5, %v7422_v48, 0.0  ;;  %v7427_v53 = vpop.eup %6279 }
 0x558   :  { %v813_v37 = vpack.c.bf16 %v812_v18, %v811_v30  ;;  %6283 = vpow2.f32 %v1429_v5  ;;  %v7429_v4 = vpop.eup %6281  ;;  %v1313_v35 = vsel %vm790_vm5, %v7427_v53, 0.0 }
 0x559   :  { %6285 = vpow2.f32 %v1682_v52  ;;  %v1310_v15 = vsel %vm790_vm5, %v7429_v4, 0.0 }
 0x55a   :  { %5983 = vmatmul.mubr.msk.bf16.vlgmr.msra.gmra.mrb[16].mxu0 %vm790_vm5, %v813_v37  ;;  %6287 = vpow2.f32 %v1431_v47 }
 0x55b   :  { %5994 = vmatprep.mubr.msk.bf16.mxu0 %vm6604_vm0, %v9811_v7  ;;  %6289 = vpow2.f32 %v1559_v50 }
 0x55c   :  { %6291 = vpow2.f32 %v1561_v54 }
 0x55d   :  { %6293 = vpow2.f32 %v1684_v56 }
 0x562   :  { %v7434_v55 = vpop.eup %6283 }
 0x563   :  { %v7438_v17 = vpop.eup %6285  ;;  %v1433_v23 = vsel %vm790_vm5, %v7434_v55, 0.0 }
 0x564   :  { %v7442_v58 = vpop.eup %6287  ;;  %v1686_v33 = vsel %vm790_vm5, %v7438_v17, 0.0 }
 0x565   :  { %v1436_v29 = vsel %vm790_vm5, %v7442_v58, 0.0  ;;  %v7448_v60 = vpop.eup %6289 }
 0x566   :  { %v1563_v41 = vsel %vm790_vm5, %v7448_v60, 0.0  ;;  %v7452_v63 = vpop.eup %6291 }
 0x567   :  { %v1566_v6 = vsel %vm790_vm5, %v7452_v63, 0.0  ;;  %v7456_v8 = vpop.eup %6293 }
 0x568   :  { %v1689_v10 = vsel %vm790_vm5, %v7456_v8, 0.0 }
 0x56c   :  { %1184 = vadd.xlane.f32.xlu1 %v1183_v28 }
 0x570   :  { %1314 = vadd.xlane.f32.xlu1 %v1313_v35 }
 0x572   :  { %1311 = vadd.xlane.f32.xlu0 %v1310_v15 }
 0x574   :  { %1434 = vadd.xlane.f32.xlu1 %v1433_v23 }
 0x576   :  { %1687 = vadd.xlane.f32.xlu0 %v1686_v33 }
 0x578   :  { %1437 = vadd.xlane.f32.xlu1 %v1436_v29 }
 0x57c   :  { %1564 = vadd.xlane.f32.xlu1 %v1563_v41 }
 0x580   :  { %1567 = vadd.xlane.f32.xlu1 %v1566_v6 }
 0x584   :  { %1690 = vadd.xlane.f32.xlu1 %v1689_v10 }
 0x58c   :  { %1445 = vrot.lane.b32.xlu0 %v7249_v27, %s6606_s3 }
 0x595   :  { %1698 = vrot.lane.b32.xlu1 %v7244_v11, %s6606_s3 }
 0x5ba   :  { %v928_v12 = vpop.xlane.xlu0 %927 }
 0x5be   :  { %v931_v13 = vpop.xlane.xlu1 %930 }
 0x5bf   :  { %6295 = vrcp.f32 %v931_v13 }
 0x5c0   :  { %6297 = vrcp.f32 %v928_v12 }
 0x5c2   :  { %v1059_v16 = vpop.xlane.xlu0 %1058 }
 0x5c4   :  { %v1062_v14 = vpop.xlane.xlu1 %1061 }
 0x5c5   :  { %6299 = vrcp.f32 %v1062_v14 }
 0x5c6   :  { %6301 = vrcp.f32 %v1059_v16 }
 0x5c8   :  { %v1193_v42 = vpop.permute.xlu1 %1192 }
 0x5c9   :  { %v6296_v1 = vpop.eup %6295 }
 0x5ca   :  { %v1182_v20 = vpop.xlane.xlu0 %1181  ;;  %v6298_v21 = vpop.eup %6297  ;;  %v935_v24 = vmul.f32 %v6296_v1, %v7390_v57  ;;  %v1764_v1 = vld [vmem:[%s9794_s10 + $0x8] sm:$0xff] }
 0x5cb   :  { %v934_v25 = vmul.f32 %v6298_v21, %v7385_v38  ;;  %6303 = vrcp.f32 %v1182_v20  ;;  %v1765_v20 = vld [vmem:[%s9794_s10 + $0x10] sm:$0xff] }
 0x5cd   :  { %v936_v18 = vpack.c.bf16 %v935_v24, %v934_v25  ;;  %v1766_v25 = vld [vmem:[%s9794_s10 + $0x18] sm:$0xff] }
 0x5ce   :  { %v939_v30 = vpop.permute.xlu0 %938 }
 0x5cf   :  { %5993 = vmatpush3.bf16.msra.mxu0 %v939_v30  ;;  %v6300_v37 = vpop.eup %6299  ;;  %v1784_v30 = vpack.c.bf16 %v1766_v25, %v1765_v20 }
 0x5d0   :  { %6004 = vmatprep.subr.bf16.mxu0 %v9811_v7  ;;  %v6302_v39 = vpop.eup %6301  ;;  %v1066_v40 = vmul.f32 %v6300_v37, %v7398_v59  ;;  %v1768_v37 = vld [vmem:[%s9794_s10 + $0x28] sm:$0xff] }
 0x5d1   :  { %v1065_v38 = vmul.f32 %v6302_v39, %v7394_v31 }
 0x5d2   :  { %5995 = vmatmul.mubr.msk.bf16.vlgmr.msra.gmra.mrb[20].mxu0 %vm790_vm5, %v936_v18  ;;  %v1767_v18 = vld [vmem:[%s9794_s10 + $0x20] sm:$0xff] }
 0x5d3   :  { %6005 = vmatpush3.bf16.msra.mxu0 %v7230_v62  ;;  %6006 = vmatprep.mubr.msk.bf16.mxu0 %vm6604_vm0, %v9811_v7  ;;  %v1067_v57 = vpack.c.bf16 %v1066_v40, %v1065_v38  ;;  %v1785_v39 = vpack.c.bf16 %v1768_v37, %v1767_v18  ;;  %v1769_v38 = vld [vmem:[%s9794_s10 + $0x30] sm:$0xff] }
 0x5d4   :  { %6016 = vmatprep.subr.bf16.mxu0 %v9811_v7 }
 0x5d5   :  { %v6304_v44 = vpop.eup %6303 }
 0x5d6   :  { %v1188_v45 = vmul.f32 %v6304_v44, %v7402_v3  ;;  %v1772_v44 = vld [vmem:[%s9794_s10 + $0x48] sm:$0xff] }
 0x5da   :  { %6007 = vmatmul.mubr.msk.bf16.vlgmr.msra.gmra.mrb[24].mxu0 %vm790_vm5, %v1067_v57  ;;  %v1770_v57 = vld [vmem:[%s9794_s10 + $0x38] sm:$0xff] }
 0x5db   :  { %6017 = vmatpush3.bf16.msra.mxu0 %v1193_v42  ;;  %6018 = vmatprep.mubr.msk.bf16.mxu0 %vm6604_vm0, %v9811_v7 }
 0x5dc   :  { %6028 = vmatprep.subr.bf16.mxu0 %v9811_v7 }
 0x5f9   :  { %v1185_v62 = vpop.xlane.xlu1 %1184 }
 0x5fa   :  { %6305 = vrcp.f32 %v1185_v62 }
 0x5fd   :  { %v1315_v0 = vpop.xlane.xlu1 %1314 }
 0x5fe   :  { %6307 = vrcp.f32 %v1315_v0 }
 0x5ff   :  { %v1312_v59 = vpop.xlane.xlu0 %1311 }
 0x600   :  { %6309 = vrcp.f32 %v1312_v59  ;;  %v1786_v59 = vpack.c.bf16 %v1770_v57, %v1769_v38  ;;  %v5380_v57 = vld [vmem:[%s9795_s11] ss:$0 sm:$0xff] }
 0x601   :  { %v1435_v43 = vpop.xlane.xlu1 %1434 }
 0x603   :  { %v1688_v61 = vpop.xlane.xlu0 %1687 }
 0x604   :  { %v6306_v31 = vpop.eup %6305 }
 0x605   :  { %v1189_v19 = vmul.f32 %v6306_v31, %v7422_v48  ;;  %v1438_v5 = vpop.xlane.xlu1 %1437 }
 0x606   :  { %6311 = vrcp.f32 %v1438_v5 }
 0x607   :  { %v1190_v46 = vpack.c.bf16 %v1189_v19, %v1188_v45  ;;  %6313 = vrcp.f32 %v1435_v43  ;;  %v1446_v54 = vpop.permute.xlu0 %1445  ;;  %v1771_v43 = vld [vmem:[%s9794_s10 + $0x40] sm:$0xff]  ;;  %v1773_v45 = vld [vmem:[%s9794_s10 + $0x50] sm:$0xff]  ;;  %v1774_v19 = vld [vmem:[%s9794_s10 + $0x58] sm:$0xff] }
 0x608   :  { %v6308_v52 = vpop.eup %6307  ;;  %v1787_v31 = vpack.c.bf16 %v1772_v44, %v1771_v43  ;;  %v1788_v5 = vpack.c.bf16 %v1774_v19, %v1773_v45 }
 0x609   :  { %v1565_v47 = vpop.xlane.xlu1 %1564  ;;  %6019 = vmatmul.mubr.msk.bf16.vlgmr.msra.gmra.mrb[28].mxu0 %vm790_vm5, %v1190_v46  ;;  %v1319_v3 = vmul.f32 %v6308_v52, %v7427_v53  ;;  %v1775_v46 = vld [vmem:[%s9794_s10 + $0x60] sm:$0xff]  ;;  %v1776_v52 = vld [vmem:[%s9794_s10 + $0x68] sm:$0xff] }
 0x60a   :  { %v6310_v49 = vpop.eup %6309  ;;  %6029 = vmatpush3.bf16.msra.mxu0 %v7249_v27  ;;  %6030 = vmatprep.mubr.msk.bf16.mxu0 %vm6604_vm0, %v9811_v7 }
 0x60b   :  { %v1318_v50 = vmul.f32 %v6310_v49, %v7429_v4  ;;  %6040 = vmatprep.subr.bf16.mxu0 %v9811_v7  ;;  %v1789_v49 = vpack.c.bf16 %v1776_v52, %v1775_v46 }
 0x60d   :  { %v1568_v48 = vpop.xlane.xlu1 %1567  ;;  %v1320_v51 = vpack.c.bf16 %v1319_v3, %v1318_v50  ;;  %v1778_v50 = vld [vmem:[%s9794_s10 + $0x78] sm:$0xff] }
 0x60e   :  { %6315 = vrcp.f32 %v1568_v48 }
 0x60f   :  { %6317 = vrcp.f32 %v1565_v47  ;;  %v1777_v47 = vld [vmem:[%s9794_s10 + $0x70] sm:$0xff] }
 0x610   :  { %v6312_v28 = vpop.eup %6311 }
 0x611   :  { %6031 = vmatmul.mubr.msk.bf16.vlgmr.msra.gmra.mrb[32].mxu0 %vm790_vm5, %v1320_v51  ;;  %v6314_v2 = vpop.eup %6313  ;;  %v1442_v27 = vmul.f32 %v6312_v28, %v7442_v58  ;;  %v1691_v4 = vpop.xlane.xlu1 %1690 }
 0x612   :  { %6041 = vmatpush3.bf16.msra.mxu0 %v1446_v54  ;;  %6042 = vmatprep.mubr.msk.bf16.mxu0 %vm6604_vm0, %v9811_v7  ;;  %v1441_v53 = vmul.f32 %v6314_v2, %v7434_v55  ;;  %6319 = vrcp.f32 %v1691_v4 }
 0x613   :  { %6052 = vmatprep.subr.bf16.mxu0 %v9811_v7  ;;  %6321 = vrcp.f32 %v1688_v61  ;;  %v1790_v61 = vpack.c.bf16 %v1778_v50, %v1777_v47  ;;  %v6571_v47 = vld [vmem:[#allocation2] sm:$0xff]  ;;  %v6572_v50 = vld [vmem:[#allocation2 + $0x8] sm:$0xff] }
 0x614   :  { %v1443_v35 = vpack.c.bf16 %v1442_v27, %v1441_v53 }
 0x615   :  { %v1699_v29 = vpop.permute.xlu1 %1698 }
 0x618   :  { %v6316_v15 = vpop.eup %6315 }
 0x619   :  { %6043 = vmatmul.mubr.msk.bf16.vlgmr.msra.gmra.mrb[36].mxu0 %vm790_vm5, %v1443_v35  ;;  %v6318_v56 = vpop.eup %6317  ;;  %v1572_v23 = vmul.f32 %v6316_v15, %v7452_v63 }
 0x61a   :  { %6053 = vmatpush3.bf16.msra.mxu0 %v7244_v11  ;;  %6054 = vmatprep.mubr.msk.bf16.mxu0 %vm6604_vm0, %v9811_v7  ;;  %v1571_v58 = vmul.f32 %v6318_v56, %v7448_v60 }
 0x61b   :  { %6064 = vmatprep.subr.bf16.mxu0 %v9811_v7 }
 0x61c   :  { %v1573_v33 = vpack.c.bf16 %v1572_v23, %v1571_v58  ;;  %v6320_v55 = vpop.eup %6319 }
 0x61d   :  { %v6322_v41 = vpop.eup %6321  ;;  %v1695_v11 = vmul.f32 %v6320_v55, %v7456_v8 }
 0x61e   :  { %v1694_v6 = vmul.f32 %v6322_v41, %v7438_v17  ;;  %v1763_v17 = vld [vmem:[%s9794_s10] sm:$0xff] }
 0x61f   :  { %v1783_v24 = vpack.c.bf16 %v1764_v1, %v1763_v17 }
 0x620   :  { %v1696_v10 = vpack.c.bf16 %v1695_v11, %v1694_v6 }
 0x621   :  { %6055 = vmatmul.mubr.msk.bf16.vlgmr.msra.gmra.mrb[40].mxu0 %vm790_vm5, %v1573_v33  ;;  %6070 = vmatprep.subr.bf16.mxu1 %v1783_v24 }
 0x622   :  { %6065 = vmatpush3.bf16.msra.mxu0 %v1699_v29  ;;  %6066 = vmatprep.mubr.msk.bf16.mxu0 %vm6604_vm0, %v9811_v7 }
 0x623   :  { %6071 = vmatpush3.bf16.msra.mxu1 %v1783_v24 }
 0x624   :  { %6072 = vmatprep.subr.bf16.mxu1 %v1784_v30 }
 0x627   :  { %6073 = vmatpush3.bf16.msra.mxu1 %v1784_v30 }
 0x628   :  { %6074 = vmatprep.subr.bf16.mxu1 %v1785_v39 }
 0x629   :  { %6067 = vmatmul.mubr.msk.bf16.vlgmr.msra.gmra.mrb[44].mxu0 %vm790_vm5, %v1696_v10 }
 0x62a   :  { %2158 = vmatprep.mubr.bf16.mxu0 %v9813_v26 }
 0x62b   :  { %6075 = vmatpush3.bf16.msra.mxu1 %v1785_v39 }
 0x62c   :  { %6076 = vmatprep.subr.bf16.mxu1 %v1786_v59 }
 0x62d   :  { %v852_v60 = vpop.f32.mrb[16].mxu0 }
 0x62e   :  { %859 = vst.msk [vmem:[#allocation3] sm:$0xff] %vm742_vm3, %v852_v60  ;;  %v5984_v63 = vpop.f32.mrb[17].mxu0 }
 0x62f   :  { %v855_v12 = vpop.f32.mrb[18].mxu0  ;;  %6077 = vmatpush3.bf16.msra.mxu1 %v1786_v59 }
 0x630   :  { %860 = vst.msk [vmem:[#allocation3 + $0x8] sm:$0xff] %vm742_vm3, %v855_v12  ;;  %v5985_v13 = vpop.f32.mrb[19].mxu0  ;;  %6078 = vmatprep.subr.bf16.mxu1 %v1787_v31 }
 0x633   :  { %6079 = vmatpush3.bf16.msra.mxu1 %v1787_v31 }
 0x634   :  { %6080 = vmatprep.subr.bf16.mxu1 %v1788_v5 }
 0x637   :  { %6081 = vmatpush3.bf16.msra.mxu1 %v1788_v5 }
 0x638   :  { %6082 = vmatprep.subr.bf16.mxu1 %v1789_v49 }
 0x63b   :  { %6083 = vmatpush3.bf16.msra.mxu1 %v1789_v49 }
 0x63c   :  { %6084 = vmatprep.subr.bf16.mxu1 %v1790_v61 }
 0x63f   :  { %6085 = vmatpush3.bf16.msra.mxu1 %v1790_v61 }
 0x6a5   :  { %v978_v14 = vpop.f32.mrb[20].mxu0 }
 0x6a6   :  { %987 = vrot.lane.b32.xlu0 %v978_v14, %s6606_s3  ;;  %v5996_v16 = vpop.f32.mrb[21].mxu0 }
 0x6a7   :  { %v981_v8 = vpop.f32.mrb[22].mxu0 }
 0x6a8   :  { %v5997_v21 = vpop.f32.mrb[23].mxu0 }
 0x6aa   :  { %989 = vrot.lane.b32.xlu0 %v981_v8, %s6606_s3 }
 0x6ad   :  { %v1106_v40 = vpop.f32.mrb[24].mxu0 }
 0x6ae   :  { %1113 = vst.msk [vmem:[#allocation3 + $0x10] sm:$0xff] %vm742_vm3, %v1106_v40  ;;  %v6008_v42 = vpop.f32.mrb[25].mxu0 }
 0x6af   :  { %v1109_v62 = vpop.f32.mrb[26].mxu0 }
 0x6b0   :  { %1114 = vst.msk [vmem:[#allocation3 + $0x18] sm:$0xff] %vm742_vm3, %v1109_v62  ;;  %v6009_v0 = vpop.f32.mrb[27].mxu0  ;;  %v5381_v62 = vld [vmem:[%s9796_s12] ss:$0 sm:$0xff] }
 0x6dc   :  { %v1232_v3 = vpop.f32.mrb[28].mxu0 }
 0x6dd   :  { %1241 = vrot.lane.b32.xlu0 %v1232_v3, %s6606_s3  ;;  %v6020_v48 = vpop.f32.mrb[29].mxu0 }
 0x6de   :  { %v1235_v51 = vpop.f32.mrb[30].mxu0  ;;  %v6573_v48 = vld [vmem:[#allocation2 + $0x10] sm:$0xff] }
 0x6df   :  { %1243 = vrot.lane.b32.xlu1 %v1235_v51, %s6606_s3  ;;  %v6021_v28 = vpop.f32.mrb[31].mxu0 }
 0x6e0   :  { %v6574_v28 = vld [vmem:[#allocation2 + $0x18] sm:$0xff] }
 0x6e4   :  { %v1359_v54 = vpop.f32.mrb[32].mxu0 }
 0x6e5   :  { %1366 = vst.msk [vmem:[#allocation3 + $0x20] sm:$0xff] %vm742_vm3, %v1359_v54  ;;  %v6032_v2 = vpop.f32.mrb[33].mxu0 }
 0x6e6   :  { %v1362_v27 = vpop.f32.mrb[34].mxu0 }
 0x6e7   :  { %1367 = vst.msk [vmem:[#allocation3 + $0x28] sm:$0xff] %vm742_vm3, %v1362_v27  ;;  %v6033_v4 = vpop.f32.mrb[35].mxu0 }
 0x6ec   :  { %v1485_v53 = vpop.f32.mrb[36].mxu0 }
 0x6ed   :  { %1494 = vrot.lane.b32.xlu0 %v1485_v53, %s6606_s3  ;;  %v6044_v35 = vpop.f32.mrb[37].mxu0 }
 0x6ee   :  { %v1488_v15 = vpop.f32.mrb[38].mxu0 }
 0x6ef   :  { %1496 = vrot.lane.b32.xlu1 %v1488_v15, %s6606_s3  ;;  %v6045_v56 = vpop.f32.mrb[39].mxu0 }
 0x6f4   :  { %v1612_v23 = vpop.f32.mrb[40].mxu0 }
 0x6f5   :  { %1619 = vst.msk [vmem:[#allocation3 + $0x30] sm:$0xff] %vm742_vm3, %v1612_v23  ;;  %v6056_v58 = vpop.f32.mrb[41].mxu0 }
 0x6f6   :  { %v1615_v33 = vpop.f32.mrb[42].mxu0 }
 0x6f7   :  { %1620 = vst.msk [vmem:[#allocation3 + $0x38] sm:$0xff] %vm742_vm3, %v1615_v33  ;;  %v6057_v55 = vpop.f32.mrb[43].mxu0 }
 0x6fc   :  { %v1738_v29 = vpop.f32.mrb[44].mxu0 }
 0x6fd   :  { %1747 = vrot.lane.b32.xlu0 %v1738_v29, %s6606_s3  ;;  %v6068_v41 = vpop.f32.mrb[45].mxu0  ;;  %v6575_v29 = vld [vmem:[#allocation2 + $0x20] sm:$0xff] }
 0x6fe   :  { %v1741_v11 = vpop.f32.mrb[46].mxu0 }
 0x6ff   :  { %1749 = vrot.lane.b32.xlu1 %v1741_v11, %s6606_s3  ;;  %v6069_v6 = vpop.f32.mrb[47].mxu0 }
 0x700   :  { %v6576_v6 = vld [vmem:[#allocation2 + $0x28] sm:$0xff] }
 0x718   :  { %v988_v10 = vpop.permute.xlu0 %987 }
 0x719   :  { %994 = vst.msk [vmem:[#allocation3] sm:$0xff] %vm993_vm6, %v988_v10 }
 0x71c   :  { %v990_v60 = vpop.permute.xlu0 %989 }
 0x71d   :  { %995 = vst.msk [vmem:[#allocation3 + $0x8] sm:$0xff] %vm993_vm6, %v990_v60  ;;  %v6577_v60 = vld [vmem:[#allocation2 + $0x30] sm:$0xff] }
 0x720   :  { %v1755_v63 = vld [vmem:[#allocation3] sm:$0xff] }
 0x724   :  { %v1756_v12 = vld [vmem:[#allocation3 + $0x8] sm:$0xff] }
 0x725   :  { %v1779_v13 = vpack.c.bf16 %v1756_v12, %v1755_v63  ;;  %v6578_v12 = vld [vmem:[#allocation2 + $0x38] sm:$0xff] }
 0x727   :  { %6086 = vmatprep.mubr.bf16.mxu1 %v1779_v13 }
 0x74f   :  { %v1242_v14 = vpop.permute.xlu0 %1241 }
 0x750   :  { %1247 = vst.msk [vmem:[#allocation3 + $0x10] sm:$0xff] %vm993_vm6, %v1242_v14  ;;  %v2005_v14 = vld [vmem:[%s9799_s15 + $0x8] sm:$0xff] }
 0x751   :  { %v1244_v16 = vpop.permute.xlu1 %1243 }
 0x752   :  { %1248 = vst.msk [vmem:[#allocation3 + $0x18] sm:$0xff] %vm993_vm6, %v1244_v16  ;;  %v2009_v16 = vld [vmem:[%s9799_s15 + $0x28] sm:$0xff] }
 0x757   :  { %v1757_v8 = vld [vmem:[#allocation3 + $0x10] sm:$0xff] }
 0x759   :  { %v1758_v17 = vld [vmem:[#allocation3 + $0x18] sm:$0xff] }
 0x75a   :  { %v1780_v1 = vpack.c.bf16 %v1758_v17, %v1757_v8  ;;  %v2007_v8 = vld [vmem:[%s9799_s15 + $0x18] sm:$0xff]  ;;  %v2073_v17 = vpack.c.bf16 %v2009_v16, %v2005_v14  ;;  %v2022_v14 = vld [vmem:[%s9799_s15 + $0x90] sm:$0xff] }
 0x75b   :  { %v2026_v16 = vld [vmem:[%s9799_s15 + $0xb0] sm:$0xff] }
 0x75c   :  { %6087 = vmatmul.mubr.bf16.vlgmr.msra.gmra.mrb[52].mxu1 %v1780_v1  ;;  %v2011_v1 = vld [vmem:[%s9799_s15 + $0x38] sm:$0xff]  ;;  %2126 = vmatprep.subr.bf16.mxu0 %v2073_v17  ;;  %v2029_v17 = vld [vmem:[%s9799_s15 + $0xc8] sm:$0xff] }
 0x75f   :  { %v1495_v20 = vpop.permute.xlu0 %1494 }
 0x760   :  { %1500 = vst.msk [vmem:[#allocation3 + $0x20] sm:$0xff] %vm993_vm6, %v1495_v20  ;;  %v2004_v20 = vld [vmem:[%s9799_s15] sm:$0xff] }
 0x761   :  { %v1497_v21 = vpop.permute.xlu1 %1496 }
 0x762   :  { %1501 = vst.msk [vmem:[#allocation3 + $0x28] sm:$0xff] %vm993_vm6, %v1497_v21  ;;  %v2008_v21 = vld [vmem:[%s9799_s15 + $0x20] sm:$0xff] }
 0x767   :  { %v1759_v24 = vld [vmem:[#allocation3 + $0x20] sm:$0xff] }
 0x769   :  { %v1760_v25 = vld [vmem:[#allocation3 + $0x28] sm:$0xff] }
 0x76a   :  { %v1781_v30 = vpack.c.bf16 %v1760_v25, %v1759_v24  ;;  %v2075_v24 = vpack.c.bf16 %v2011_v1, %v2007_v8  ;;  %v2072_v25 = vpack.c.bf16 %v2008_v21, %v2004_v20  ;;  %v2082_v8 = vpack.c.bf16 %v2026_v16, %v2022_v14  ;;  %v2033_v1 = vld [vmem:[%s9799_s15 + $0xe8] sm:$0xff]  ;;  %v2031_v20 = vld [vmem:[%s9799_s15 + $0xd8] sm:$0xff] }
 0x76b   :  { %v2085_v21 = vpack.c.bf16 %v2033_v1, %v2029_v17  ;;  %v2057_v14 = vld [vmem:[%s9799_s15 + $0x1a8] sm:$0xff]  ;;  %v2055_v16 = vld [vmem:[%s9799_s15 + $0x198] sm:$0xff] }
 0x76c   :  { %6090 = vmatprep.mubr.bf16.mxu1 %v1781_v30  ;;  %v2006_v30 = vld [vmem:[%s9799_s15 + $0x10] sm:$0xff]  ;;  %2199 = vmatprep.subr.bf16.mxu1 %v2075_v24  ;;  %v2035_v24 = vld [vmem:[%s9799_s15 + $0xf8] sm:$0xff] }
 0x76d   :  { %2127 = vmatpush1.bf16.msra.mxu0 %v2072_v25  ;;  %v2028_v25 = vld [vmem:[%s9799_s15 + $0xc0] sm:$0xff] }
 0x76f   :  { %v1748_v18 = vpop.permute.xlu0 %1747 }
 0x770   :  { %1753 = vst.msk [vmem:[#allocation3 + $0x30] sm:$0xff] %vm993_vm6, %v1748_v18  ;;  %v2010_v18 = vld [vmem:[%s9799_s15 + $0x30] sm:$0xff] }
 0x771   :  { %v1750_v37 = vpop.permute.xlu1 %1749 }
 0x772   :  { %1754 = vst.msk [vmem:[#allocation3 + $0x38] sm:$0xff] %vm993_vm6, %v1750_v37  ;;  %v2013_v37 = vld [vmem:[%s9799_s15 + $0x48] sm:$0xff] }
 0x777   :  { %v1761_v39 = vld [vmem:[#allocation3 + $0x30] sm:$0xff] }
 0x779   :  { %v1762_v40 = vld [vmem:[#allocation3 + $0x38] sm:$0xff] }
 0x77a   :  { %v1782_v38 = vpack.c.bf16 %v1762_v40, %v1761_v39  ;;  %v2074_v39 = vpack.c.bf16 %v2010_v18, %v2006_v30  ;;  %v2017_v40 = vld [vmem:[%s9799_s15 + $0x68] sm:$0xff]  ;;  %v2032_v30 = vld [vmem:[%s9799_s15 + $0xe0] sm:$0xff]  ;;  %v2087_v18 = vpack.c.bf16 %v2035_v24, %v2031_v20 }
 0x77b   :  { %v2056_v24 = vld [vmem:[%s9799_s15 + $0x1a0] sm:$0xff] }
 0x77c   :  { %6091 = vmatmul.mubr.bf16.gmra.mrb[56].mxu1 %v1782_v38  ;;  %v2015_v38 = vld [vmem:[%s9799_s15 + $0x58] sm:$0xff] }
 0x77d   :  { %2231 = vmatprep.mubr.bf16.mxu1 %v9813_v26  ;;  %2200 = vmatpush1.bf16.msra.mxu1 %v2074_v39  ;;  %v2030_v39 = vld [vmem:[%s9799_s15 + $0xd0] sm:$0xff] }
 0x82f   :  { %v6088_v42 = vpop.f32.mrb[52].mxu1 }
 0x830   :  { %v1832_v0 = vpop.f32.mrb[53].mxu1  ;;  %v1841_v59 = vadd.f32 %v6088_v42, %v5380_v57  ;;  %v2077_v42 = vpack.c.bf16 %v2017_v40, %v2013_v37  ;;  %v2084_v37 = vpack.c.bf16 %v2032_v30, %v2028_v25  ;;  %v2034_v40 = vld [vmem:[%s9799_s15 + $0xf0] sm:$0xff] }
 0x831   :  { %v1833_v43 = vadd.f32 %v5380_v57, %v1832_v0  ;;  %v6089_v44 = vpop.f32.mrb[54].mxu1  ;;  %v2012_v0 = vld [vmem:[%s9799_s15 + $0x40] sm:$0xff]  ;;  %v2054_v25 = vld [vmem:[%s9799_s15 + $0x190] sm:$0xff] }
 0x832   :  { %v1835_v31 = vpop.f32.mrb[55].mxu1  ;;  %v1872_v5 = vmul.f32 %v5381_v62, %v1841_v59  ;;  %v1844_v46 = vadd.f32 %v6089_v44, %v5380_v57  ;;  %v2016_v59 = vld [vmem:[%s9799_s15 + $0x60] sm:$0xff]  ;;  %2128 = vmatprep.subr.bf16.mxu0 %v2077_v42  ;;  %v2041_v42 = vld [vmem:[%s9799_s15 + $0x128] sm:$0xff] }
 0x833   :  { %v1870_v45 = vmul.f32 %v5381_v62, %v1833_v43  ;;  %v1836_v19 = vadd.f32 %v5380_v57, %v1835_v31  ;;  %v2014_v43 = vld [vmem:[%s9799_s15 + $0x50] sm:$0xff]  ;;  %v2076_v44 = vpack.c.bf16 %v2016_v59, %v2012_v0  ;;  %v2043_v59 = vld [vmem:[%s9799_s15 + $0x138] sm:$0xff] }
 0x834   :  { %v1873_v3 = vmul.f32 %v5381_v62, %v1844_v46  ;;  %v7592_v51 = vadd.f32 %v6573_v48, %v1872_v5  ;;  %v2018_v31 = vld [vmem:[%s9799_s15 + $0x70] sm:$0xff] }
 0x835   :  { %v1871_v52 = vmul.f32 %v5381_v62, %v1836_v19  ;;  %v7586_v49 = vadd.f32 %v6571_v47, %v1870_v45  ;;  %v2078_v45 = vpack.c.bf16 %v2018_v31, %v2014_v43  ;;  %2129 = vmatpush1.bf16.msra.mxu0 %v2076_v44  ;;  %v2036_v43 = vld [vmem:[%s9799_s15 + $0x100] sm:$0xff] }
 0x836   :  { %v7595_v54 = vadd.f32 %v6574_v28, %v1873_v3  ;;  %v2040_v44 = vld [vmem:[%s9799_s15 + $0x120] sm:$0xff] }
 0x837   :  { %1888 = vadd.xlane.f32.xlu0 %v7586_v49  ;;  %v7589_v61 = vadd.f32 %v6572_v50, %v1871_v52 }
 0x839   :  { %1890 = vadd.xlane.f32.xlu1 %v7589_v61 }
 0x83b   :  { %1892 = vadd.xlane.f32.xlu0 %v7592_v51 }
 0x83f   :  { %1894 = vadd.xlane.f32.xlu0 %v7595_v54 }
 0x84f   :  { %v6092_v2 = vpop.f32.mrb[56].mxu1 }
 0x850   :  { %v1848_v27 = vpop.f32.mrb[57].mxu1  ;;  %v1857_v4 = vadd.f32 %v6092_v2, %v5380_v57 }
 0x851   :  { %v1849_v53 = vadd.f32 %v5380_v57, %v1848_v27  ;;  %v6093_v35 = vpop.f32.mrb[58].mxu1 }
 0x852   :  { %v1851_v15 = vpop.f32.mrb[59].mxu1  ;;  %v1860_v23 = vadd.f32 %v6093_v35, %v5380_v57  ;;  %v1876_v33 = vmul.f32 %v5381_v62, %v1857_v4 }
 0x853   :  { %v1874_v56 = vmul.f32 %v5381_v62, %v1849_v53  ;;  %v1852_v58 = vadd.f32 %v5380_v57, %v1851_v15  ;;  %v2019_v57 = vld [vmem:[%s9799_s15 + $0x78] sm:$0xff] }
 0x854   :  { %v1877_v11 = vmul.f32 %v5381_v62, %v1860_v23  ;;  %v7604_v63 = vadd.f32 %v6577_v60, %v1876_v33  ;;  %v2021_v23 = vld [vmem:[%s9799_s15 + $0x88] sm:$0xff]  ;;  %v2023_v33 = vld [vmem:[%s9799_s15 + $0x98] sm:$0xff] }
 0x855   :  { %v1875_v55 = vmul.f32 %v5381_v62, %v1852_v58  ;;  %v7598_v41 = vadd.f32 %v6575_v29, %v1874_v56  ;;  %v2079_v62 = vpack.c.bf16 %v2019_v57, %v2015_v38  ;;  %v2025_v58 = vld [vmem:[%s9799_s15 + $0xa8] sm:$0xff]  ;;  %v2027_v29 = vld [vmem:[%s9799_s15 + $0xb8] sm:$0xff]  ;;  %v2086_v38 = vpack.c.bf16 %v2034_v40, %v2030_v39  ;;  %v2058_v40 = vld [vmem:[%s9799_s15 + $0x1b0] sm:$0xff] }
 0x856   :  { %9849 = vst [vmem:[#allocation14_spill] sm:$0xff] %v7604_v63  ;;  %v7607_v13 = vadd.f32 %v6578_v12, %v1877_v11  ;;  %v2020_v11 = vld [vmem:[%s9799_s15 + $0x80] sm:$0xff]  ;;  %v2083_v60 = vpack.c.bf16 %v2027_v29, %v2023_v33  ;;  %v2037_v57 = vld [vmem:[%s9799_s15 + $0x108] sm:$0xff]  ;;  %v2050_v29 = vld [vmem:[%s9799_s15 + $0x170] sm:$0xff] }
 0x857   :  { %9847 = vst [vmem:[#allocation12_spill] sm:$0xff] %v7598_v41  ;;  %1896 = vadd.xlane.f32.xlu0 %v7598_v41  ;;  %v7601_v10 = vadd.f32 %v6576_v6, %v1875_v55  ;;  %2201 = vmatprep.subr.bf16.mxu1 %v2079_v62  ;;  %v2081_v55 = vpack.c.bf16 %v2025_v58, %v2021_v23  ;;  %v2024_v6 = vld [vmem:[%s9799_s15 + $0xa0] sm:$0xff]  ;;  %v2039_v62 = vld [vmem:[%s9799_s15 + $0x118] sm:$0xff] }
 0x858   :  { %9850 = vst [vmem:[#allocation15_spill] sm:$0xff] %v7607_v13  ;;  %2202 = vmatpush1.bf16.msra.mxu1 %v2078_v45  ;;  %v2080_v12 = vpack.c.bf16 %v2024_v6, %v2020_v11  ;;  %v2089_v0 = vpack.c.bf16 %v2041_v42, %v2037_v57  ;;  %v2091_v31 = vpack.c.bf16 %v2043_v59, %v2039_v62  ;;  %v2053_v11 = vld [vmem:[%s9799_s15 + $0x188] sm:$0xff]  ;;  %v2063_v59 = vld [vmem:[%s9799_s15 + $0x1d8] sm:$0xff] }
 0x859   :  { %9848 = vst [vmem:[#allocation13_spill] sm:$0xff] %v7601_v10  ;;  %1898 = vadd.xlane.f32.xlu1 %v7601_v10  ;;  %2130 = vmatprep.subr.bf16.mxu0 %v2081_v55  ;;  %v2088_v45 = vpack.c.bf16 %v2040_v44, %v2036_v43  ;;  %v2046_v55 = vld [vmem:[%s9799_s15 + $0x150] sm:$0xff]  ;;  %v2097_v1 = vpack.c.bf16 %v2057_v14, %v2053_v11  ;;  %v2065_v57 = vld [vmem:[%s9799_s15 + $0x1e8] sm:$0xff]  ;;  %v2067_v43 = vld [vmem:[%s9799_s15 + $0x1f8] sm:$0xff] }
 0x85a   :  { %2203 = vmatprep.subr.bf16.mxu1 %v2083_v60  ;;  %2131 = vmatpush1.bf16.msra.mxu0 %v2080_v12  ;;  %v2094_v12 = vpack.c.bf16 %v2050_v29, %v2046_v55  ;;  %v2098_v62 = vpack.c.bf16 %v2058_v40, %v2054_v25  ;;  %v2060_v44 = vld [vmem:[%s9799_s15 + $0x1c0] sm:$0xff] }
 0x85b   :  { %1900 = vadd.xlane.f32.xlu0 %v7604_v63  ;;  %2132 = vmatprep.subr.bf16.mxu0 %v2085_v21  ;;  %v2052_v21 = vld [vmem:[%s9799_s15 + $0x180] sm:$0xff] }
 0x85c   :  { %2204 = vmatpush1.bf16.msra.mxu1 %v2082_v8  ;;  %v2059_v8 = vld [vmem:[%s9799_s15 + $0x1b8] sm:$0xff]  ;;  %v2096_v39 = vpack.c.bf16 %v2056_v24, %v2052_v21 }
 0x85d   :  { %1902 = vadd.xlane.f32.xlu1 %v7607_v13  ;;  %2205 = vmatprep.subr.bf16.mxu1 %v2087_v18  ;;  %v2099_v20 = vpack.c.bf16 %v2059_v8, %v2055_v16 }
 0x85e   :  { %2133 = vmatpush1.bf16.msra.mxu0 %v2084_v37 }
 0x85f   :  { %2134 = vmatprep.subr.bf16.mxu0 %v2089_v0 }
 0x860   :  { %2206 = vmatpush1.bf16.msra.mxu1 %v2086_v38  ;;  %v2061_v38 = vld [vmem:[%s9799_s15 + $0x1c8] sm:$0xff] }
 0x861   :  { %2207 = vmatprep.subr.bf16.mxu1 %v2091_v31  ;;  %v2101_v0 = vpack.c.bf16 %v2065_v57, %v2061_v38 }
 0x862   :  { %2135 = vmatpush1.bf16.msra.mxu0 %v2088_v45 }
 0x8c4   :  { %v1889_v19 = vpop.xlane.xlu0 %1888 }
 0x8c5   :  { %v1904_v5 = vmul.f32 0.0078125, %v1889_v19  ;;  %v2038_v19 = vld [vmem:[%s9799_s15 + $0x110] sm:$0xff] }
 0x8c6   :  { %v1891_v46 = vpop.xlane.xlu1 %1890 }
 0x8c7   :  { %v1905_v52 = vmul.f32 0.0078125, %v1891_v46  ;;  %v7659_v47 = vsub.f32 %v7586_v49, %v1904_v5  ;;  %v2042_v5 = vld [vmem:[%s9799_s15 + $0x130] sm:$0xff] }
 0x8c8   :  { %v1893_v50 = vpop.xlane.xlu0 %1892  ;;  %v2090_v46 = vpack.c.bf16 %v2042_v5, %v2038_v19  ;;  %v2103_v5 = vpack.c.bf16 %v2067_v43, %v2063_v59 }
 0x8c9   :  { %v1906_v3 = vmul.f32 0.0078125, %v1893_v50  ;;  %v1920_v48 = vmul.f32 %v7659_v47, %v7659_v47  ;;  %v7664_v28 = vsub.f32 %v7589_v61, %v1905_v52  ;;  %v2045_v50 = vld [vmem:[%s9799_s15 + $0x148] sm:$0xff] }
 0x8ca   :  { %2208 = vmatpush1.bf16.msra.mxu1 %v2090_v46  ;;  %v2064_v46 = vld [vmem:[%s9799_s15 + $0x1e0] sm:$0xff] }
 0x8cb   :  { %1928 = vadd.xlane.f32.xlu0 %v1920_v48  ;;  %v1921_v2 = vmul.f32 %v7664_v28, %v7664_v28  ;;  %v7669_v27 = vsub.f32 %v7592_v51, %v1906_v3  ;;  %v2049_v3 = vld [vmem:[%s9799_s15 + $0x168] sm:$0xff]  ;;  %v2047_v48 = vld [vmem:[%s9799_s15 + $0x158] sm:$0xff] }
 0x8cc   :  { %v1895_v4 = vpop.xlane.xlu0 %1894 }
 0x8cd   :  { %v1907_v53 = vmul.f32 0.0078125, %v1895_v4  ;;  %1930 = vadd.xlane.f32.xlu1 %v1921_v2  ;;  %v1922_v35 = vmul.f32 %v7669_v27, %v7669_v27  ;;  %v2093_v4 = vpack.c.bf16 %v2049_v3, %v2045_v50  ;;  %v2066_v50 = vld [vmem:[%s9799_s15 + $0x1f0] sm:$0xff]  ;;  %v2100_v3 = vpack.c.bf16 %v2064_v46, %v2060_v44 }
 0x8cf   :  { %1932 = vadd.xlane.f32.xlu0 %v1922_v35  ;;  %v7674_v15 = vsub.f32 %v7595_v54, %v1907_v53  ;;  %v2051_v53 = vld [vmem:[%s9799_s15 + $0x178] sm:$0xff]  ;;  %v2044_v35 = vld [vmem:[%s9799_s15 + $0x140] sm:$0xff]  ;;  %2136 = vmatprep.subr.bf16.mxu0 %v2093_v4 }
 0x8d0   :  { %v2095_v58 = vpack.c.bf16 %v2051_v53, %v2047_v48 }
 0x8d1   :  { %v1923_v56 = vmul.f32 %v7674_v15, %v7674_v15 }
 0x8d2   :  { %2209 = vmatprep.subr.bf16.mxu1 %v2095_v58 }
 0x8d3   :  { %1934 = vadd.xlane.f32.xlu1 %v1923_v56  ;;  %v2048_v56 = vld [vmem:[%s9799_s15 + $0x160] sm:$0xff]  ;;  %2210 = vmatpush1.bf16.msra.mxu1 %v2094_v12 }
 0x8d4   :  { %v2092_v33 = vpack.c.bf16 %v2048_v56, %v2044_v35  ;;  %2211 = vmatprep.subr.bf16.mxu1 %v2099_v20 }
 0x8d6   :  { %2137 = vmatpush1.bf16.msra.mxu0 %v2092_v33 }
 0x8d7   :  { %2138 = vmatprep.subr.bf16.mxu0 %v2097_v1  ;;  %2212 = vmatpush1.bf16.msra.mxu1 %v2098_v62 }
 0x8d8   :  { %2213 = vmatprep.subr.bf16.mxu1 %v2103_v5 }
 0x8da   :  { %2139 = vmatpush1.bf16.msra.mxu0 %v2096_v39 }
 0x8db   :  { %2140 = vmatprep.subr.bf16.mxu0 %v2101_v0 }
 0x8de   :  { %2141 = vmatpush1.bf16.msra.mxu0 %v2100_v3 }
 0x8e4   :  { %v1897_v52 = vpop.xlane.xlu0 %1896 }
 0x8e5   :  { %v1908_v2 = vmul.f32 0.0078125, %v1897_v52  ;;  %v2062_v52 = vld [vmem:[%s9799_s15 + $0x1d0] sm:$0xff] }
 0x8e6   :  { %v1899_v23 = vpop.xlane.xlu1 %1898  ;;  %v2102_v4 = vpack.c.bf16 %v2066_v50, %v2062_v52 }
 0x8e7   :  { %v1909_v6 = vmul.f32 0.0078125, %v1899_v23  ;;  %v7778_v60 = vsub.f32 %v7598_v41, %v1908_v2 }
 0x8e8   :  { %v1901_v17 = vpop.xlane.xlu0 %1900  ;;  %2214 = vmatpush1.bf16.msra.mxu1 %v2102_v4 }
 0x8e9   :  { %v1910_v30 = vmul.f32 0.0078125, %v1901_v17  ;;  %v1924_v18 = vmul.f32 %v7778_v60, %v7778_v60  ;;  %v7801_v37 = vsub.f32 %v7601_v10, %v1909_v6  ;;  %v5382_v17 = vld [vmem:[%s9797_s13] ss:$0 sm:$0xff] }
 0x8ea   :  { %v1903_v42 = vpop.xlane.xlu1 %1902 }
 0x8eb   :  { %v1911_v31 = vmul.f32 0.0078125, %v1903_v42  ;;  %1936 = vadd.xlane.f32.xlu0 %v1924_v18  ;;  %v1925_v45 = vmul.f32 %v7801_v37, %v7801_v37  ;;  %v7824_v19 = vsub.f32 %v7604_v63, %v1910_v30  ;;  %v5383_v30 = vld [vmem:[%s9798_s14] ss:$0 sm:$0xff] }
 0x8ed   :  { %1938 = vadd.xlane.f32.xlu1 %v1925_v45  ;;  %v1926_v48 = vmul.f32 %v7824_v19, %v7824_v19  ;;  %v7838_v2 = vsub.f32 %v7607_v13, %v1911_v31 }
 0x8ef   :  { %1940 = vadd.xlane.f32.xlu0 %v1926_v48  ;;  %v1927_v53 = vmul.f32 %v7838_v2, %v7838_v2 }
 0x8f1   :  { %1942 = vadd.xlane.f32.xlu1 %v1927_v53 }
 0x958   :  { %v1929_v35 = vpop.xlane.xlu0 %1928 }
 0x959   :  { %v1944_v56 = vmul.f32 0.0078125, %v1929_v35 }
 0x95a   :  { %v1931_v23 = vpop.xlane.xlu1 %1930 }
 0x95b   :  { %v1952_v58 = vadd.f32 1e-06, %v1944_v56  ;;  %v1945_v33 = vmul.f32 0.0078125, %v1931_v23 }
 0x95c   :  { %v1933_v55 = vpop.xlane.xlu0 %1932 }
 0x95d   :  { %6323 = vrsqrt.f32 %v1952_v58  ;;  %v1953_v29 = vadd.f32 1e-06, %v1945_v33  ;;  %v1946_v11 = vmul.f32 0.0078125, %v1933_v55 }
 0x95f   :  { %6325 = vrsqrt.f32 %v1953_v29  ;;  %v1954_v6 = vadd.f32 1e-06, %v1946_v11 }
 0x960   :  { %v1935_v12 = vpop.xlane.xlu1 %1934 }
 0x961   :  { %6327 = vrsqrt.f32 %v1954_v6  ;;  %v1947_v14 = vmul.f32 0.0078125, %v1935_v12 }
 0x963   :  { %v1955_v16 = vadd.f32 1e-06, %v1947_v14 }
 0x965   :  { %6329 = vrsqrt.f32 %v1955_v16 }
 0x967   :  { %v6324_v8 = vpop.eup %6323 }
 0x968   :  { %v1968_v1 = vmul.f32 %v6324_v8, %v7659_v47 }
 0x969   :  { %v6326_v20 = vpop.eup %6325 }
 0x96a   :  { %v1969_v21 = vmul.f32 %v6326_v20, %v7664_v28  ;;  %v1982_v24 = vmul.f32 %v5382_v17, %v1968_v1 }
 0x96b   :  { %v6328_v25 = vpop.eup %6327 }
 0x96c   :  { %v1983_v18 = vmul.f32 %v5382_v17, %v1969_v21  ;;  %v1996_v39 = vadd.f32 %v5383_v30, %v1982_v24  ;;  %v1970_v38 = vmul.f32 %v6328_v25, %v7669_v27  ;;  %v2609_v24 = vld [vmem:[%s9801_s17 + $0x188] sm:$0xff] }
 0x96e   :  { %v1997_v40 = vadd.f32 %v5383_v30, %v1983_v18  ;;  %v1984_v47 = vmul.f32 %v5382_v17, %v1970_v38  ;;  %v2561_v18 = vld [vmem:[%s9801_s17 + $0x8] sm:$0xff] }
 0x96f   :  { %v6330_v57 = vpop.eup %6329  ;;  %v2593_v38 = vld [vmem:[%s9801_s17 + $0x108] sm:$0xff] }
 0x970   :  { %v2068_v42 = vpack.c.bf16 %v1997_v40, %v1996_v39  ;;  %v1971_v62 = vmul.f32 %v6330_v57, %v7674_v15  ;;  %v1998_v59 = vadd.f32 %v5383_v30, %v1984_v47  ;;  %v2592_v39 = vld [vmem:[%s9801_s17 + $0x100] sm:$0xff]  ;;  %v2610_v47 = vld [vmem:[%s9801_s17 + $0x190] sm:$0xff] }
 0x971   :  { %v2656_v57 = vpack.c.bf16 %v2593_v38, %v2592_v39  ;;  %v2600_v39 = vld [vmem:[%s9801_s17 + $0x140] sm:$0xff] }
 0x972   :  { %2159 = vmatmul.mubr.bf16.vlgmr.msra.gmra.mrb[48].mxu0 %v2068_v42  ;;  %2232 = vmatmul.mubr.bf16.vlgmr.msra.gmra.mrb[60].mxu1 %v2068_v42  ;;  %v1985_v0 = vmul.f32 %v5382_v17, %v1971_v62  ;;  %v2578_v42 = vld [vmem:[%s9801_s17 + $0x90] sm:$0xff]  ;;  %v2579_v62 = vld [vmem:[%s9801_s17 + $0x98] sm:$0xff] }
 0x973   :  { %2168 = vmatprep.mubr.bf16.mxu0 %v9813_v26  ;;  %2241 = vmatprep.mubr.bf16.mxu1 %v9813_v26 }
 0x974   :  { %v1999_v28 = vadd.f32 %v5383_v30, %v1985_v0  ;;  %v2649_v0 = vpack.c.bf16 %v2579_v62, %v2578_v42  ;;  %v2587_v42 = vld [vmem:[%s9801_s17 + $0xd8] sm:$0xff]  ;;  %v2618_v62 = vld [vmem:[%s9801_s17 + $0x1d0] sm:$0xff] }
 0x976   :  { %v2069_v44 = vpack.c.bf16 %v1999_v28, %v1998_v59  ;;  %v2611_v28 = vld [vmem:[%s9801_s17 + $0x198] sm:$0xff]  ;;  %v2562_v59 = vld [vmem:[%s9801_s17 + $0x10] sm:$0xff] }
 0x978   :  { %v1937_v43 = vpop.xlane.xlu0 %1936 }
 0x979   :  { %v1948_v31 = vmul.f32 0.0078125, %v1937_v43  ;;  %v2563_v43 = vld [vmem:[%s9801_s17 + $0x18] sm:$0xff] }
 0x97a   :  { %v1939_v45 = vpop.xlane.xlu1 %1938  ;;  %2169 = vmatmul.mubr.bf16.gmra.mrb[52].mxu0 %v2069_v44  ;;  %2242 = vmatmul.mubr.bf16.gmra.mrb[64].mxu1 %v2069_v44  ;;  %v2665_v44 = vpack.c.bf16 %v2611_v28, %v2610_v47  ;;  %v2570_v28 = vld [vmem:[%s9801_s17 + $0x50] sm:$0xff] }
 0x97b   :  { %v1956_v27 = vadd.f32 1e-06, %v1948_v31  ;;  %v1949_v5 = vmul.f32 0.0078125, %v1939_v45  ;;  %2178 = vmatprep.mubr.bf16.mxu0 %v9813_v26  ;;  %2251 = vmatprep.mubr.bf16.mxu1 %v9813_v26  ;;  %v2641_v31 = vpack.c.bf16 %v2563_v43, %v2562_v59  ;;  %v2594_v45 = vld [vmem:[%s9801_s17 + $0x110] sm:$0xff]  ;;  %v2571_v59 = vld [vmem:[%s9801_s17 + $0x58] sm:$0xff] }
 0x97c   :  { %v1941_v15 = vpop.xlane.xlu0 %1940 }
 0x97d   :  { %6331 = vrsqrt.f32 %v1956_v27  ;;  %v1957_v46 = vadd.f32 1e-06, %v1949_v5  ;;  %v1950_v52 = vmul.f32 0.0078125, %v1941_v15  ;;  %v2595_v27 = vld [vmem:[%s9801_s17 + $0x118] sm:$0xff]  ;;  %v2580_v15 = vld [vmem:[%s9801_s17 + $0xa0] sm:$0xff] }
 0x97e   :  { %v1943_v50 = vpop.xlane.xlu1 %1942  ;;  %v2657_v5 = vpack.c.bf16 %v2595_v27, %v2594_v45  ;;  %v2603_v45 = vld [vmem:[%s9801_s17 + $0x158] sm:$0xff]  ;;  %v2588_v27 = vld [vmem:[%s9801_s17 + $0xe0] sm:$0xff] }
 0x97f   :  { %6333 = vrsqrt.f32 %v1957_v46  ;;  %v1958_v3 = vadd.f32 1e-06, %v1950_v52  ;;  %v1951_v48 = vmul.f32 0.0078125, %v1943_v50  ;;  %v2581_v46 = vld [vmem:[%s9801_s17 + $0xa8] sm:$0xff]  ;;  %v2612_v52 = vld [vmem:[%s9801_s17 + $0x1a0] sm:$0xff] }
 0x980   :  { %v2650_v50 = vpack.c.bf16 %v2581_v46, %v2580_v15  ;;  %v2589_v15 = vld [vmem:[%s9801_s17 + $0xe8] sm:$0xff]  ;;  %v2620_v46 = vld [vmem:[%s9801_s17 + $0x1e0] sm:$0xff] }
 0x981   :  { %6335 = vrsqrt.f32 %v1958_v3  ;;  %v1959_v4 = vadd.f32 1e-06, %v1951_v48  ;;  %v2613_v3 = vld [vmem:[%s9801_s17 + $0x1a8] sm:$0xff] }
 0x982   :  { %v2666_v48 = vpack.c.bf16 %v2613_v3, %v2612_v52  ;;  %v2621_v52 = vld [vmem:[%s9801_s17 + $0x1e8] sm:$0xff] }
 0x983   :  { %6337 = vrsqrt.f32 %v1959_v4  ;;  %v2564_v4 = vld [vmem:[%s9801_s17 + $0x20] sm:$0xff]  ;;  %v2670_v3 = vpack.c.bf16 %v2621_v52, %v2620_v46 }
 0x987   :  { %v6332_v53 = vpop.eup %6331 }
 0x988   :  { %v1972_v35 = vmul.f32 %v6332_v53, %v7778_v60  ;;  %v2565_v53 = vld [vmem:[%s9801_s17 + $0x28] sm:$0xff] }
 0x989   :  { %v6334_v56 = vpop.eup %6333 }
 0x98a   :  { %v1973_v23 = vmul.f32 %v6334_v56, %v7801_v37  ;;  %v1986_v58 = vmul.f32 %v5382_v17, %v1972_v35  ;;  %v2596_v35 = vld [vmem:[%s9801_s17 + $0x120] sm:$0xff]  ;;  %v2642_v56 = vpack.c.bf16 %v2565_v53, %v2564_v4  ;;  %v2573_v4 = vld [vmem:[%s9801_s17 + $0x68] sm:$0xff] }
 0x98b   :  { %v6336_v33 = vpop.eup %6335  ;;  %v2604_v53 = vld [vmem:[%s9801_s17 + $0x160] sm:$0xff] }
 0x98c   :  { %v1987_v55 = vmul.f32 %v5382_v17, %v1973_v23  ;;  %v2000_v11 = vadd.f32 %v5383_v30, %v1986_v58  ;;  %v1974_v12 = vmul.f32 %v6336_v33, %v7824_v19  ;;  %v2576_v19 = vld [vmem:[%s9801_s17 + $0x80] sm:$0xff]  ;;  %v2597_v23 = vld [vmem:[%s9801_s17 + $0x128] sm:$0xff]  ;;  %v2582_v33 = vld [vmem:[%s9801_s17 + $0xb0] sm:$0xff] }
 0x98d   :  { %v6338_v29 = vpop.eup %6337  ;;  %v2658_v58 = vpack.c.bf16 %v2597_v23, %v2596_v35  ;;  %v2590_v23 = vld [vmem:[%s9801_s17 + $0xf0] sm:$0xff] }
 0x98e   :  { %v2001_v6 = vadd.f32 %v5383_v30, %v1987_v55  ;;  %v1975_v14 = vmul.f32 %v6338_v29, %v7838_v2  ;;  %v1988_v1 = vmul.f32 %v5382_v17, %v1974_v12  ;;  %v2577_v2 = vld [vmem:[%s9801_s17 + $0x88] sm:$0xff]  ;;  %v2583_v55 = vld [vmem:[%s9801_s17 + $0xb8] sm:$0xff]  ;;  %v2614_v29 = vld [vmem:[%s9801_s17 + $0x1b0] sm:$0xff] }
 0x98f   :  { %v2648_v21 = vpack.c.bf16 %v2577_v2, %v2576_v19  ;;  %v2566_v12 = vld [vmem:[%s9801_s17 + $0x30] sm:$0xff]  ;;  %v2585_v19 = vld [vmem:[%s9801_s17 + $0xc8] sm:$0xff]  ;;  %v2616_v2 = vld [vmem:[%s9801_s17 + $0x1c0] sm:$0xff] }
 0x990   :  { %v2070_v16 = vpack.c.bf16 %v2001_v6, %v2000_v11  ;;  %v1989_v8 = vmul.f32 %v5382_v17, %v1975_v14  ;;  %v2002_v37 = vadd.f32 %v5383_v30, %v1988_v1  ;;  %v2608_v17 = vld [vmem:[%s9801_s17 + $0x180] sm:$0xff]  ;;  %v2651_v11 = vpack.c.bf16 %v2583_v55, %v2582_v33  ;;  %v2615_v6 = vld [vmem:[%s9801_s17 + $0x1b8] sm:$0xff]  ;;  %v2598_v1 = vld [vmem:[%s9801_s17 + $0x130] sm:$0xff] }
 0x991   :  { %v2664_v25 = vpack.c.bf16 %v2609_v24, %v2608_v17  ;;  %5720 = vmatprep.subr.bf16.mxu0 %v2648_v21  ;;  %v2567_v14 = vld [vmem:[%s9801_s17 + $0x38] sm:$0xff]  ;;  %v2617_v21 = vld [vmem:[%s9801_s17 + $0x1c8] sm:$0xff]  ;;  %v2568_v24 = vld [vmem:[%s9801_s17 + $0x40] sm:$0xff] }
 0x992   :  { %2179 = vmatmul.mubr.bf16.gmra.mrb[56].mxu0 %v2070_v16  ;;  %2252 = vmatmul.mubr.bf16.gmra.mrb[68].mxu1 %v2070_v16  ;;  %v2003_v60 = vadd.f32 %v5383_v30, %v1989_v8  ;;  %v2560_v30 = vld [vmem:[%s9801_s17] sm:$0xff]  ;;  %v2667_v16 = vpack.c.bf16 %v2615_v6, %v2614_v29  ;;  %v2643_v8 = vpack.c.bf16 %v2567_v14, %v2566_v12  ;;  %v2622_v29 = vld [vmem:[%s9801_s17 + $0x1f0] sm:$0xff]  ;;  %v2575_v14 = vld [vmem:[%s9801_s17 + $0x78] sm:$0xff] }
 0x993   :  { %2188 = vmatprep.mubr.bf16.mxu0 %v9813_v26  ;;  %2261 = vmatprep.mubr.bf16.mxu1 %v9813_v26  ;;  %v2640_v40 = vpack.c.bf16 %v2561_v18, %v2560_v30  ;;  %v2668_v30 = vpack.c.bf16 %v2617_v21, %v2616_v2  ;;  %v2574_v6 = vld [vmem:[%s9801_s17 + $0x70] sm:$0xff]  ;;  %v9810_v2 = vsub.s32 3, %v7203_v22 }
 0x994   :  { %v2071_v20 = vpack.c.bf16 %v2003_v60, %v2002_v37  ;;  %5760 = vmatprep.subr.bf16.mxu1 %v2664_v25  ;;  %v2599_v60 = vld [vmem:[%s9801_s17 + $0x138] sm:$0xff]  ;;  %v2569_v25 = vld [vmem:[%s9801_s17 + $0x48] sm:$0xff] }
 0x995   :  { %5721 = vmatpush3.bf16.msra.mxu0 %v2640_v40  ;;  %5761 = vmatpush3.bf16.msra.mxu1 %v2656_v57  ;;  %v2659_v37 = vpack.c.bf16 %v2599_v60, %v2598_v1  ;;  %v2644_v18 = vpack.c.bf16 %v2569_v25, %v2568_v24  ;;  %v2601_v40 = vld [vmem:[%s9801_s17 + $0x148] sm:$0xff]  ;;  %v2586_v57 = vld [vmem:[%s9801_s17 + $0xd0] sm:$0xff]  ;;  %v2647_v1 = vpack.c.bf16 %v2575_v14, %v2574_v6 }
 0x996   :  { %5722 = vmatprep.subr.bf16.mxu0 %v2649_v0  ;;  %5762 = vmatprep.subr.bf16.mxu1 %v2665_v44  ;;  %v2660_v38 = vpack.c.bf16 %v2601_v40, %v2600_v39  ;;  %v2653_v47 = vpack.c.bf16 %v2587_v42, %v2586_v57  ;;  %v2619_v0 = vld [vmem:[%s9801_s17 + $0x1d8] sm:$0xff]  ;;  %v2645_v44 = vpack.c.bf16 %v2571_v59, %v2570_v28 }
 0x997   :  { %v2669_v43 = vpack.c.bf16 %v2619_v0, %v2618_v62 }
 0x999   :  { %5723 = vmatpush3.bf16.msra.mxu0 %v2641_v31  ;;  %5763 = vmatpush3.bf16.msra.mxu1 %v2657_v5  ;;  %v2602_v31 = vld [vmem:[%s9801_s17 + $0x150] sm:$0xff] }
 0x99a   :  { %2189 = vmatmul.mubr.bf16.gmra.mrb[60].mxu0 %v2071_v20  ;;  %2262 = vmatmul.mubr.bf16.gmra.mrb[72].mxu1 %v2071_v20  ;;  %v2584_v20 = vld [vmem:[%s9801_s17 + $0xc0] sm:$0xff]  ;;  %v2661_v5 = vpack.c.bf16 %v2603_v45, %v2602_v31 }
 0x99b   :  { %5724 = vmatprep.subr.bf16.mxu0 %v2650_v50  ;;  %5764 = vmatprep.subr.bf16.mxu1 %v2666_v48  ;;  %v2652_v17 = vpack.c.bf16 %v2585_v19, %v2584_v20  ;;  %v2654_v50 = vpack.c.bf16 %v2589_v15, %v2588_v27  ;;  %v2572_v48 = vld [vmem:[%s9801_s17 + $0x60] sm:$0xff] }
 0x99c   :  { %v2646_v35 = vpack.c.bf16 %v2573_v4, %v2572_v48 }
 0x99d   :  { %5725 = vmatpush3.bf16.msra.mxu0 %v2642_v56  ;;  %5765 = vmatpush3.bf16.msra.mxu1 %v2658_v58  ;;  %v2605_v56 = vld [vmem:[%s9801_s17 + $0x168] sm:$0xff]  ;;  %v2591_v58 = vld [vmem:[%s9801_s17 + $0xf8] sm:$0xff] }
 0x99e   :  { %5726 = vmatprep.subr.bf16.mxu0 %v2651_v11  ;;  %5766 = vmatprep.subr.bf16.mxu1 %v2667_v16  ;;  %v2662_v33 = vpack.c.bf16 %v2605_v56, %v2604_v53  ;;  %v2655_v55 = vpack.c.bf16 %v2591_v58, %v2590_v23  ;;  %v2623_v11 = vld [vmem:[%s9801_s17 + $0x1f8] sm:$0xff]  ;;  %v2606_v16 = vld [vmem:[%s9801_s17 + $0x170] sm:$0xff] }
 0x99f   :  { %v2671_v12 = vpack.c.bf16 %v2623_v11, %v2622_v29 }
 0x9a1   :  { %5727 = vmatpush3.bf16.msra.mxu0 %v2643_v8  ;;  %5767 = vmatpush3.bf16.msra.mxu1 %v2659_v37  ;;  %v2607_v8 = vld [vmem:[%s9801_s17 + $0x178] sm:$0xff]  ;;  %v2104_v37 = vld [vmem:[%s9800_s16] sm:$0xf] }
 0x9a2   :  { %5728 = vmatprep.subr.bf16.mxu0 %v2652_v17  ;;  %5768 = vmatprep.subr.bf16.mxu1 %v2668_v30  ;;  %v2663_v60 = vpack.c.bf16 %v2607_v8, %v2606_v16  ;;  %v8059_v20 = vrot.slane %v2104_v37, %v7206_v32  ;;  %v8062_v19 = vrot.slane %v2104_v37, %v7218_v36 }
 0x9a3   :  { %v8066_v24 = vrot.slane %v2104_v37, %v7212_v34  ;;  %v8072_v39 = vrot.slane %v2104_v37, %v9810_v2 }
 0x9a5   :  { %5729 = vmatpush3.bf16.msra.mxu0 %v2644_v18  ;;  %5769 = vmatpush3.bf16.msra.mxu1 %v2660_v38 }
 0x9a6   :  { %5730 = vmatprep.subr.bf16.mxu0 %v2653_v47  ;;  %5770 = vmatprep.subr.bf16.mxu1 %v2669_v43 }
 0x9a9   :  { %5731 = vmatpush3.bf16.msra.mxu0 %v2645_v44  ;;  %5771 = vmatpush3.bf16.msra.mxu1 %v2661_v5 }
 0x9aa   :  { %5732 = vmatprep.subr.bf16.mxu0 %v2654_v50  ;;  %5772 = vmatprep.subr.bf16.mxu1 %v2670_v3 }
 0x9ad   :  { %5733 = vmatpush3.bf16.msra.mxu0 %v2646_v35  ;;  %5773 = vmatpush3.bf16.msra.mxu1 %v2662_v33 }
 0x9ae   :  { %5734 = vmatprep.subr.bf16.mxu0 %v2655_v55  ;;  %5774 = vmatprep.subr.bf16.mxu1 %v2671_v12 }
 0x9b1   :  { %5735 = vmatpush3.bf16.msra.mxu0 %v2647_v1  ;;  %5775 = vmatpush3.bf16.msra.mxu1 %v2663_v60 }
 0x9b2   :  { %6130 = vmatprep.subr.bf16.mxu1 %v9811_v7 }
 0xa45   :  { %v2160_v17 = vpop.f32.mrb[48].mxu0  ;;  %v2233_v21 = vpop.f32.mrb[60].mxu1 }
 0xa46   :  { %v2161_v25 = vadd.f32 %v2160_v17, %v8059_v20  ;;  %v2234_v30 = vadd.f32 %v2233_v21, %v8062_v19  ;;  %v2162_v18 = vpop.f32.mrb[49].mxu0  ;;  %v2235_v40 = vpop.f32.mrb[61].mxu1 }
 0xa47   :  { %v2164_v38 = vpop.f32.mrb[50].mxu0  ;;  %v2237_v57 = vpop.f32.mrb[62].mxu1  ;;  %v8075_v47 = vadd.f32 %v2162_v18, %v8066_v24  ;;  %v8082_v45 = vadd.f32 %v2235_v40, %v8072_v39 }
 0xa48   :  { %v2304_v42 = vmul.f32 0.044715, %v2161_v25  ;;  %v2306_v62 = vmul.f32 0.044715, %v2234_v30  ;;  %v2165_v0 = vadd.f32 %v2164_v38, %v8059_v20  ;;  %v8079_v28 = vadd.f32 %v2237_v57, %v8062_v19  ;;  %v2166_v59 = vpop.f32.mrb[51].mxu0  ;;  %v2239_v43 = vpop.f32.mrb[63].mxu1 }
 0xa49   :  { %v8085_v27 = vadd.f32 %v2166_v59, %v8066_v24  ;;  %v8088_v15 = vadd.f32 %v2239_v43, %v8072_v39  ;;  %v8090_v46 = vmul.f32 0.5, %v2161_v25  ;;  %v2305_v48 = vmul.f32 0.044715, %v8075_v47 }
 0xa4a   :  { %v2336_v44 = vmul.f32 %v2304_v42, %v2161_v25  ;;  %v2338_v31 = vmul.f32 %v2306_v62, %v2234_v30  ;;  %v2308_v5 = vmul.f32 0.044715, %v2165_v0  ;;  %v2310_v3 = vmul.f32 0.044715, %v8079_v28 }
 0xa4b   :  { %v2309_v53 = vmul.f32 0.044715, %v8085_v27  ;;  %v2307_v33 = vmul.f32 0.044715, %v8082_v45  ;;  %v2311_v12 = vmul.f32 0.044715, %v8088_v15  ;;  %v2337_v18 = vmul.f32 %v2305_v48, %v8075_v47 }
 0xa4c   :  { %v2368_v52 = vmul.f32 %v2336_v44, %v2161_v25  ;;  %v2370_v50 = vmul.f32 %v2338_v31, %v2234_v30  ;;  %v2340_v4 = vmul.f32 %v2308_v5, %v2165_v0  ;;  %v2342_v55 = vmul.f32 %v2310_v3, %v8079_v28 }
 0xa4d   :  { %v2170_v35 = vpop.f32.mrb[52].mxu0  ;;  %v2243_v56 = vpop.f32.mrb[64].mxu1  ;;  %v2341_v38 = vmul.f32 %v2309_v53, %v8085_v27  ;;  %v2339_v43 = vmul.f32 %v2307_v33, %v8082_v45  ;;  %v2343_v31 = vmul.f32 %v2311_v12, %v8088_v15  ;;  %v2274_v48 = vmul.f32 0.5, %v2234_v30 }
 0xa4e   :  { %v2400_v23 = vadd.f32 %v2368_v52, %v2161_v25  ;;  %v2402_v58 = vadd.f32 %v2370_v50, %v2234_v30  ;;  %v2172_v29 = vpop.f32.mrb[53].mxu0  ;;  %v2245_v11 = vpop.f32.mrb[65].mxu1  ;;  %v2372_v6 = vmul.f32 %v2340_v4, %v2165_v0  ;;  %v8099_v14 = vadd.f32 %v2170_v35, %v8059_v20 }
 0xa4f   :  { %v8102_v16 = vadd.f32 %v2243_v56, %v8062_v19  ;;  %v2174_v8 = vpop.f32.mrb[54].mxu0  ;;  %v2247_v1 = vpop.f32.mrb[66].mxu1  ;;  %v2374_v17 = vmul.f32 %v2342_v55, %v8079_v28  ;;  %v8111_v59 = vadd.f32 %v2172_v29, %v8066_v24  ;;  %v8117_v50 = vadd.f32 %v2245_v11, %v8072_v39 }
 0xa50   :  { %v2432_v60 = vmul.f32 0.7978846, %v2400_v23  ;;  %v2434_v37 = vmul.f32 0.7978846, %v2402_v58  ;;  %v2176_v21 = vpop.f32.mrb[55].mxu0  ;;  %v2249_v25 = vpop.f32.mrb[67].mxu1  ;;  %v2404_v40 = vadd.f32 %v2372_v6, %v2165_v0  ;;  %v8120_v3 = vadd.f32 %v2174_v8, %v8059_v20 }
 0xa51   :  { %v2312_v57 = vmul.f32 0.044715, %v8099_v14  ;;  %v2406_v42 = vadd.f32 %v2374_v17, %v8079_v28  ;;  %v2314_v62 = vmul.f32 0.044715, %v8102_v16  ;;  %v2313_v52 = vmul.f32 0.044715, %v8111_v59 }
 0xa52   :  { %6339 = vtanh.f32 %v2432_v60  ;;  %v2436_v44 = vmul.f32 0.7978846, %v2404_v40  ;;  %v2369_v4 = vmul.f32 %v2337_v18, %v8075_v47  ;;  %v2373_v53 = vmul.f32 %v2341_v38, %v8085_v27 }
 0xa53   :  { %6341 = vtanh.f32 %v2434_v37  ;;  %v2438_v5 = vmul.f32 0.7978846, %v2406_v42  ;;  %v2344_v35 = vmul.f32 %v2312_v57, %v8099_v14  ;;  %v2346_v56 = vmul.f32 %v2314_v62, %v8102_v16 }
 0xa54   :  { %6343 = vtanh.f32 %v2436_v44  ;;  %v2315_v23 = vmul.f32 0.044715, %v8117_v50  ;;  %v2276_v58 = vmul.f32 0.5, %v2165_v0  ;;  %v2345_v33 = vmul.f32 %v2313_v52, %v8111_v59 }
 0xa55   :  { %6345 = vtanh.f32 %v2438_v5  ;;  %v2177_v55 = vadd.f32 %v2176_v21, %v8066_v24  ;;  %v8130_v29 = vadd.f32 %v2249_v25, %v8072_v39  ;;  %v2371_v30 = vmul.f32 %v2339_v43, %v8082_v45 }
 0xa56   :  { %v2375_v11 = vmul.f32 %v2343_v31, %v8088_v15  ;;  %v2316_v6 = vmul.f32 0.044715, %v8120_v3  ;;  %v8136_v12 = vadd.f32 %v2247_v1, %v8062_v19  ;;  %v2347_v8 = vmul.f32 %v2315_v23, %v8117_v50 }
 0xa57   :  { %v2317_v60 = vmul.f32 0.044715, %v2177_v55  ;;  %v2319_v0 = vmul.f32 0.044715, %v8130_v29  ;;  %v2401_v37 = vadd.f32 %v2369_v4, %v8075_v47  ;;  %v2278_v17 = vmul.f32 0.5, %v8079_v28 }
 0xa58   :  { %v8143_v21 = vmul.f32 %v2344_v35, %v8099_v14  ;;  %v8146_v25 = vmul.f32 %v2346_v56, %v8102_v16  ;;  %v2405_v18 = vadd.f32 %v2373_v53, %v8085_v27  ;;  %v2377_v1 = vmul.f32 %v2345_v33, %v8111_v59 }
 0xa59   :  { %v2349_v40 = vmul.f32 %v2317_v60, %v2177_v55  ;;  %v2351_v38 = vmul.f32 %v2319_v0, %v8130_v29  ;;  %v2433_v57 = vmul.f32 0.7978846, %v2401_v37  ;;  %v2318_v62 = vmul.f32 0.044715, %v8136_v12 }
 0xa5a   :  { %v2437_v43 = vmul.f32 0.7978846, %v2405_v18  ;;  %v2403_v28 = vadd.f32 %v2371_v30, %v8082_v45  ;;  %v2407_v44 = vadd.f32 %v2375_v11, %v8088_v15  ;;  %v2379_v5 = vmul.f32 %v2347_v8, %v8117_v50 }
 0xa5b   :  { %v2348_v52 = vmul.f32 %v2316_v6, %v8120_v3  ;;  %v2381_v4 = vmul.f32 %v2349_v40, %v2177_v55  ;;  %6347 = vtanh.f32 %v2433_v57  ;;  %v2383_v33 = vmul.f32 %v2351_v38, %v8130_v29 }
 0xa5c   :  { %v6340_v42 = vpop.eup %6339  ;;  %6349 = vtanh.f32 %v2437_v43  ;;  %v2435_v53 = vmul.f32 0.7978846, %v2403_v28  ;;  %v2439_v35 = vmul.f32 0.7978846, %v2407_v44  ;;  %v2273_v60 = vmul.f32 0.5, %v8075_v47 }
 0xa5d   :  { %v6342_v31 = vpop.eup %6341  ;;  %v2496_v56 = vadd.f32 1.0, %v6340_v42  ;;  %v2409_v30 = vadd.f32 %v2377_v1, %v8111_v59  ;;  %v2350_v37 = vmul.f32 %v2318_v62, %v8136_v12  ;;  %v2413_v6 = vadd.f32 %v2381_v4, %v2177_v55 }
 0xa5e   :  { %v6344_v23 = vpop.eup %6343  ;;  %v2498_v0 = vadd.f32 1.0, %v6342_v31  ;;  %6351 = vtanh.f32 %v2435_v53  ;;  %v2380_v18 = vmul.f32 %v2348_v52, %v8120_v3  ;;  %v2277_v40 = vmul.f32 0.5, %v8085_v27 }
 0xa5f   :  { %v6346_v11 = vpop.eup %6345  ;;  %v2500_v8 = vadd.f32 1.0, %v6344_v23  ;;  %6353 = vtanh.f32 %v2439_v35  ;;  %v8163_v42 = vmul.f32 %v2496_v56, %v8090_v46  ;;  %v2441_v47 = vmul.f32 0.7978846, %v2409_v30 }
 0xa60   :  { %v2502_v57 = vadd.f32 1.0, %v6346_v11  ;;  %v2411_v1 = vadd.f32 %v2379_v5, %v8117_v50  ;;  %v8168_v43 = vmul.f32 %v2498_v0, %v2274_v48  ;;  %v2445_v28 = vmul.f32 0.7978846, %v2413_v6 }
 0xa61   :  { %v8165_v38 = vmul.f32 %v2500_v8, %v2276_v58  ;;  %v2415_v44 = vadd.f32 %v2383_v33, %v8130_v29  ;;  %v8174_v31 = vmul.f32 %v2350_v37, %v8136_v12  ;;  %v2275_v27 = vmul.f32 0.5, %v8082_v45 }
 0xa62   :  { %v8170_v62 = vmul.f32 %v2502_v57, %v2278_v17  ;;  %v2443_v58 = vmul.f32 0.7978846, %v2411_v1  ;;  %v2279_v5 = vmul.f32 0.5, %v8088_v15  ;;  %v8183_v17 = vmul.f32 0.5, %v8111_v59 }
 0xa63   :  { %v8185_v53 = vmul.f32 0.5, %v2177_v55  ;;  %6355 = vtanh.f32 %v2441_v47  ;;  %v2447_v33 = vmul.f32 0.7978846, %v2415_v44  ;;  %v8197_v59 = vmul.f32 0.5, %v8117_v50 }
 0xa64   :  { %6357 = vtanh.f32 %v2445_v28  ;;  %v8200_v55 = vmul.f32 0.5, %v8130_v29  ;;  %v8206_v47 = vmul.f32 0.5, %v8099_v14  ;;  %v2412_v48 = vadd.f32 %v2380_v18, %v8120_v3 }
 0xa65   :  { %v2180_v52 = vpop.f32.mrb[56].mxu0  ;;  %v2253_v4 = vpop.f32.mrb[68].mxu1  ;;  %6359 = vtanh.f32 %v2443_v58  ;;  %v2408_v58 = vadd.f32 %v8143_v21, %v8099_v14 }
 0xa66   :  { %v8188_v35 = vadd.f32 %v2180_v52, %v8059_v20  ;;  %v8191_v45 = vadd.f32 %v2253_v4, %v8062_v19  ;;  %v2182_v56 = vpop.f32.mrb[57].mxu0  ;;  %v2255_v23 = vpop.f32.mrb[69].mxu1  ;;  %6361 = vtanh.f32 %v2447_v33 }
 0xa67   :  { %v6348_v0 = vpop.eup %6347  ;;  %v8194_v15 = vadd.f32 %v2182_v56, %v8066_v24  ;;  %v2184_v30 = vpop.f32.mrb[58].mxu0  ;;  %v8203_v8 = vadd.f32 %v2255_v23, %v8072_v39  ;;  %v8217_v56 = vmul.f32 0.5, %v8120_v3 }
 0xa68   :  { %v2257_v11 = vpop.f32.mrb[70].mxu1  ;;  %v6350_v37 = vpop.eup %6349  ;;  %v2497_v6 = vadd.f32 1.0, %v6348_v0  ;;  %v2320_v1 = vmul.f32 0.044715, %v8188_v35  ;;  %v2322_v28 = vmul.f32 0.044715, %v8191_v45  ;;  %v8211_v50 = vadd.f32 %v2184_v30, %v8059_v20 }
 0xa69   :  { %v2186_v57 = vpop.f32.mrb[59].mxu0  ;;  %v2501_v44 = vadd.f32 1.0, %v6350_v37  ;;  %v2259_v29 = vpop.f32.mrb[71].mxu1  ;;  %v8214_v4 = vadd.f32 %v2257_v11, %v8062_v19  ;;  %v2321_v0 = vmul.f32 0.044715, %v8194_v15  ;;  %v8225_v11 = vmul.f32 0.5, %v8102_v16 }
 0xa6a   :  { %v6352_v52 = vpop.eup %6351  ;;  %v2529_v2 = vmul.f32 %v2497_v6, %v2273_v60  ;;  %v2323_v30 = vmul.f32 0.044715, %v8203_v8  ;;  %v2352_v33 = vmul.f32 %v2320_v1, %v8188_v35  ;;  %v2354_v46 = vmul.f32 %v2322_v28, %v8191_v45 }
 0xa6b   :  { %v6354_v23 = vpop.eup %6353  ;;  %v2533_v37 = vmul.f32 %v2501_v44, %v2277_v40  ;;  %v2499_v7 = vadd.f32 1.0, %v6352_v52  ;;  %v2324_v14 = vmul.f32 0.044715, %v8211_v50  ;;  %v2326_v6 = vmul.f32 0.044715, %v8214_v4 }
 0xa6c   :  { %v2503_v26 = vadd.f32 1.0, %v6354_v23  ;;  %v8232_v44 = vadd.f32 %v2186_v57, %v8066_v24  ;;  %v2353_v52 = vmul.f32 %v2321_v0, %v8194_v15  ;;  %v8236_v1 = vadd.f32 %v2259_v29, %v8072_v39 }
 0xa6d   :  { %v2625_v22 = vpack.c.bf16 %v2533_v37, %v2529_v2  ;;  %v2190_v21 = vpop.f32.mrb[60].mxu0  ;;  %v2263_v9 = vpop.f32.mrb[72].mxu1  ;;  %v2531_v60 = vmul.f32 %v2499_v7, %v2275_v27  ;;  %v9851_v23 = vpack.c.bf16 %v8165_v38, %v8163_v42  ;;  %v2358_v36 = vmul.f32 %v2326_v6, %v8214_v4 }
 0xa6e   :  { %v2535_v40 = vmul.f32 %v2503_v26, %v2279_v5  ;;  %v2192_v3 = vpop.f32.mrb[61].mxu0  ;;  %v2265_v18 = vpop.f32.mrb[73].mxu1  ;;  %v8239_v2 = vadd.f32 %v2190_v21, %v8059_v20  ;;  %v8242_v28 = vadd.f32 %v2263_v9, %v8062_v19  ;;  %v2355_v5 = vmul.f32 %v2323_v30, %v8203_v8 }
 0xa6f   :  { %2711 = vmatprep.mubr.bf16.mxu0 %v2625_v22  ;;  %v2194_v7 = vpop.f32.mrb[62].mxu0  ;;  %v2267_v26 = vpop.f32.mrb[74].mxu1  ;;  %v2325_v22 = vmul.f32 0.044715, %v8232_v44  ;;  %v8250_v29 = vadd.f32 %v2192_v3, %v8066_v24  ;;  %v2356_v9 = vmul.f32 %v2324_v14, %v8211_v50  ;;  %v2327_v34 = vmul.f32 0.044715, %v8236_v1 }
 0xa70   :  { %v6356_v27 = vpop.eup %6355  ;;  %v2627_v57 = vpack.c.bf16 %v2535_v40, %v2531_v60  ;;  %2712 = vmatmul.mubr.bf16.vlgmr.msra.gmra.mrb[64].mxu0 %v9851_v23  ;;  %v2196_v0 = vpop.f32.mrb[63].mxu0  ;;  %v8256_v30 = vadd.f32 %v2265_v18, %v8072_v39  ;;  %v8259_v42 = vmul.f32 %v2352_v33, %v8188_v35  ;;  %v8262_v38 = vmul.f32 %v2354_v46, %v8191_v45 }
 0xa71   :  { %v2269_v37 = vpop.f32.mrb[75].mxu1  ;;  %v6358_v21 = vpop.eup %6357  ;;  %v2328_v40 = vmul.f32 0.044715, %v8239_v2  ;;  %v2440_v3 = vmul.f32 0.7978846, %v2408_v58  ;;  %v2385_v14 = vmul.f32 %v2353_v52, %v8194_v15  ;;  %v9852_v6 = vpack.c.bf16 %v8170_v62, %v8168_v43 }
 0xa72   :  { %v6360_v60 = vpop.eup %6359  ;;  %2776 = vmatprep.mubr.bf16.mxu1 %v2627_v57  ;;  %v2357_v18 = vmul.f32 %v2325_v22, %v8232_v44  ;;  %v2330_v23 = vmul.f32 0.044715, %v8242_v28  ;;  %v2505_v32 = vadd.f32 1.0, %v6356_v27  ;;  %v2387_v13 = vmul.f32 %v2355_v5, %v8203_v8 }
 0xa73   :  { %2777 = vmatmul.mubr.bf16.vlgmr.msra.gmra.mrb[76].mxu1 %v9852_v6  ;;  %v6362_v33 = vpop.eup %6361  ;;  %v2329_v46 = vmul.f32 0.044715, %v8250_v29  ;;  %v2509_v57 = vadd.f32 1.0, %v6358_v21  ;;  %v8274_v63 = vadd.f32 %v2194_v7, %v8059_v20  ;;  %v2388_v58 = vmul.f32 %v2356_v9, %v8211_v50 }
 0xa74   :  { %v8278_v52 = vmul.f32 %v2358_v36, %v8214_v4  ;;  %v2359_v43 = vmul.f32 %v2327_v34, %v8236_v1  ;;  %v2331_v62 = vmul.f32 0.044715, %v8256_v30  ;;  %v2360_v27 = vmul.f32 %v2328_v40, %v8239_v2 }
 0xa75   :  { %v2537_v22 = vmul.f32 %v2505_v32, %v8183_v17  ;;  %v2541_v5 = vmul.f32 %v2509_v57, %v8185_v53  ;;  %v2507_v6 = vadd.f32 1.0, %v6360_v60  ;;  %v2389_v21 = vmul.f32 %v2357_v18, %v8232_v44 }
 0xa76   :  { %v2362_v20 = vmul.f32 %v2330_v23, %v8242_v28  ;;  %v2511_v7 = vadd.f32 1.0, %v6362_v33  ;;  %v2444_v9 = vmul.f32 0.7978846, %v2412_v48  ;;  %v2361_v36 = vmul.f32 %v2329_v46, %v8250_v29 }
 0xa77   :  { %v2629_v10 = vpack.c.bf16 %v2541_v5, %v2537_v22  ;;  %v2332_v34 = vmul.f32 0.044715, %v8274_v63  ;;  %6363 = vtanh.f32 %v2440_v3  ;;  %v2539_v41 = vmul.f32 %v2507_v6, %v8197_v59 }
 0xa78   :  { %v2543_v40 = vmul.f32 %v2511_v7, %v8200_v55  ;;  %v8292_v32 = vadd.f32 %v2267_v26, %v8062_v19  ;;  %6365 = vtanh.f32 %v2444_v9  ;;  %v2410_v17 = vadd.f32 %v8146_v25, %v8102_v16 }
 0xa79   :  { %2719 = vmatprep.mubr.bf16.mxu0 %v2629_v10  ;;  %v2414_v48 = vadd.f32 %v8174_v31, %v8136_v12  ;;  %v8299_v53 = vadd.f32 %v2196_v0, %v8066_v24  ;;  %v8302_v60 = vadd.f32 %v2269_v37, %v8072_v39  ;;  %v2391_v59 = vmul.f32 %v2359_v43, %v8236_v1 }
 0xa7a   :  { %v8306_v55 = vmul.f32 %v2360_v27, %v8239_v2  ;;  %v2363_v19 = vmul.f32 %v2331_v62, %v8256_v30  ;;  %v2631_v10 = vpack.c.bf16 %v2543_v40, %v2539_v41  ;;  %v2442_v26 = vmul.f32 0.7978846, %v2410_v17 }
 0xa7b   :  { %v2446_v3 = vmul.f32 0.7978846, %v2414_v48  ;;  %v2333_v16 = vmul.f32 0.044715, %v8299_v53  ;;  %v2417_v25 = vadd.f32 %v2385_v14, %v8194_v15  ;;  %v2364_v24 = vmul.f32 %v2332_v34, %v8274_v63 }
 0xa7c   :  { %2784 = vmatprep.mubr.bf16.mxu1 %v2631_v10  ;;  %v2334_v39 = vmul.f32 0.044715, %v8292_v32  ;;  %v2335_v31 = vmul.f32 0.044715, %v8302_v60  ;;  %v2421_v0 = vadd.f32 %v2389_v21, %v8232_v44  ;;  %v8316_v37 = vmul.f32 %v2362_v20, %v8242_v28 }
 0xa7d   :  { %v2393_v41 = vmul.f32 %v2361_v36, %v8250_v29  ;;  %6367 = vtanh.f32 %v2442_v26  ;;  %v2449_v18 = vmul.f32 0.7978846, %v2417_v25  ;;  %v2395_v23 = vmul.f32 %v2363_v19, %v8256_v30 }
 0xa7e   :  { %6369 = vtanh.f32 %v2446_v3  ;;  %v2365_v14 = vmul.f32 %v2333_v16, %v8299_v53  ;;  %v2453_v33 = vmul.f32 0.7978846, %v2421_v0  ;;  %v2286_v46 = vmul.f32 0.5, %v8136_v12 }
 0xa7f   :  { %6371 = vtanh.f32 %v2449_v18  ;;  %v2419_v57 = vadd.f32 %v2387_v13, %v8203_v8  ;;  %v2423_v43 = vadd.f32 %v2391_v59, %v8236_v1  ;;  %v2396_v62 = vmul.f32 %v2364_v24, %v8274_v63 }
 0xa80   :  { %v2366_v27 = vmul.f32 %v2334_v39, %v8292_v32  ;;  %v2367_v22 = vmul.f32 %v2335_v31, %v8302_v60  ;;  %6373 = vtanh.f32 %v2453_v33  ;;  %v2416_v20 = vadd.f32 %v8259_v42, %v8188_v35 }
 0xa81   :  { %v6364_v5 = vpop.eup %6363  ;;  %v2451_v6 = vmul.f32 0.7978846, %v2419_v57  ;;  %v2455_v21 = vmul.f32 0.7978846, %v2423_v43  ;;  %v2420_v12 = vadd.f32 %v2388_v58, %v8211_v50  ;;  %v2397_v13 = vmul.f32 %v2365_v14, %v8299_v53 }
 0xa82   :  { %v6366_v7 = vpop.eup %6365  ;;  %v2504_v9 = vadd.f32 1.0, %v6364_v5  ;;  %v2289_v36 = vmul.f32 0.5, %v8194_v15  ;;  %v2418_v34 = vadd.f32 %v8262_v38, %v8191_v45  ;;  %v2448_v17 = vmul.f32 0.7978846, %v2416_v20 }
 0xa83   :  { %v2508_v40 = vadd.f32 1.0, %v6366_v7  ;;  %6375 = vtanh.f32 %v2451_v6  ;;  %v2452_v48 = vmul.f32 0.7978846, %v2420_v12  ;;  %v2398_v59 = vmul.f32 %v2366_v27, %v8292_v32 }
 0xa84   :  { %6377 = vtanh.f32 %v2455_v21  ;;  %v2422_v42 = vadd.f32 %v8278_v52, %v8214_v4  ;;  %v2450_v58 = vmul.f32 0.7978846, %v2418_v34  ;;  %v2536_v19 = vmul.f32 %v2504_v9, %v8206_v47 }
 0xa85   :  { %v2540_v10 = vmul.f32 %v2508_v40, %v8217_v56  ;;  %v2399_v15 = vmul.f32 %v2367_v22, %v8302_v60  ;;  %6379 = vtanh.f32 %v2448_v17  ;;  %v2425_v26 = vadd.f32 %v2393_v41, %v8250_v29 }
 0xa86   :  { %6381 = vtanh.f32 %v2452_v48  ;;  %v2454_v38 = vmul.f32 0.7978846, %v2422_v42  ;;  %v2429_v3 = vadd.f32 %v2397_v13, %v8299_v53  ;;  %v2293_v24 = vmul.f32 0.5, %v8232_v44 }
 0xa87   :  { %v6368_v16 = vpop.eup %6367  ;;  %v2628_v25 = vpack.c.bf16 %v2540_v10, %v2536_v19  ;;  %v2291_v52 = vmul.f32 0.5, %v8203_v8  ;;  %6383 = vtanh.f32 %v2450_v58  ;;  %v2457_v56 = vmul.f32 0.7978846, %v2425_v26 }
 0xa88   :  { %v6370_v39 = vpop.eup %6369  ;;  %v2506_v47 = vadd.f32 1.0, %v6368_v16  ;;  %6385 = vtanh.f32 %v2454_v38  ;;  %v2461_v31 = vmul.f32 0.7978846, %v2429_v3  ;;  %v2295_v14 = vmul.f32 0.5, %v8236_v1 }
 0xa89   :  { %v6372_v0 = vpop.eup %6371  ;;  %2720 = vmatmul.mubr.bf16.gmra.mrb[68].mxu0 %v2628_v25  ;;  %v2510_v18 = vadd.f32 1.0, %v6370_v39  ;;  %v2427_v41 = vadd.f32 %v2395_v23, %v8256_v30  ;;  %v2431_v33 = vadd.f32 %v2399_v15, %v8302_v60  ;;  %v2288_v8 = vmul.f32 0.5, %v8188_v35 }
 0xa8a   :  { %v6374_v57 = vpop.eup %6373  ;;  %v2538_v44 = vmul.f32 %v2506_v47, %v8225_v11  ;;  %v2513_v43 = vadd.f32 1.0, %v6372_v0  ;;  %6387 = vtanh.f32 %v2457_v56  ;;  %v2292_v6 = vmul.f32 0.5, %v8211_v50 }
 0xa8b   :  { %v2542_v27 = vmul.f32 %v2510_v18, %v2286_v46  ;;  %v2517_v22 = vadd.f32 1.0, %v6374_v57  ;;  %6389 = vtanh.f32 %v2461_v31  ;;  %v2459_v5 = vmul.f32 0.7978846, %v2427_v41 }
 0xa8c   :  { %v2463_v21 = vmul.f32 0.7978846, %v2431_v33  ;;  %v2424_v1 = vadd.f32 %v8306_v55, %v8239_v2  ;;  %v2428_v23 = vadd.f32 %v2396_v62, %v8274_v63  ;;  %v2545_v7 = vmul.f32 %v2513_v43, %v2289_v36 }
 0xa8d   :  { %v6376_v20 = vpop.eup %6375  ;;  %v2630_v12 = vpack.c.bf16 %v2542_v27, %v2538_v44  ;;  %v2549_v11 = vmul.f32 %v2517_v22, %v2293_v24  ;;  %6391 = vtanh.f32 %v2459_v5  ;;  %v2290_v17 = vmul.f32 0.5, %v8191_v45 }
 0xa8e   :  { %v6378_v9 = vpop.eup %6377  ;;  %v2515_v35 = vadd.f32 1.0, %v6376_v20  ;;  %6393 = vtanh.f32 %v2463_v21  ;;  %v2456_v46 = vmul.f32 0.7978846, %v2424_v1  ;;  %v2460_v13 = vmul.f32 0.7978846, %v2428_v23 }
 0xa8f   :  { %v6380_v34 = vpop.eup %6379  ;;  %2785 = vmatmul.mubr.bf16.gmra.mrb[80].mxu1 %v2630_v12  ;;  %v2633_v40 = vpack.c.bf16 %v2549_v11, %v2545_v7  ;;  %v2519_v50 = vadd.f32 1.0, %v6378_v9  ;;  %v2426_v55 = vadd.f32 %v8316_v37, %v8242_v28  ;;  %v2430_v36 = vadd.f32 %v2398_v59, %v8292_v32 }
 0xa90   :  { %v6382_v62 = vpop.eup %6381  ;;  %v2547_v48 = vmul.f32 %v2515_v35, %v2291_v52  ;;  %v2512_v42 = vadd.f32 1.0, %v6380_v34  ;;  %6395 = vtanh.f32 %v2456_v46  ;;  %v2294_v3 = vmul.f32 0.5, %v8214_v4 }
 0xa91   :  { %v6384_v58 = vpop.eup %6383  ;;  %2727 = vmatprep.mubr.bf16.mxu0 %v2633_v40  ;;  %v2551_v19 = vmul.f32 %v2519_v50, %v2295_v14  ;;  %v2516_v10 = vadd.f32 1.0, %v6382_v62  ;;  %6397 = vtanh.f32 %v2460_v13  ;;  %v2458_v15 = vmul.f32 0.7978846, %v2426_v55 }
 0xa92   :  { %v6386_v38 = vpop.eup %6385  ;;  %v2544_v26 = vmul.f32 %v2512_v42, %v2288_v8  ;;  %v2514_v45 = vadd.f32 1.0, %v6384_v58  ;;  %v2462_v16 = vmul.f32 0.7978846, %v2430_v36  ;;  %v2297_v0 = vmul.f32 0.5, %v8250_v29 }
 0xa93   :  { %v2635_v25 = vpack.c.bf16 %v2551_v19, %v2547_v48  ;;  %v2548_v37 = vmul.f32 %v2516_v10, %v2292_v6  ;;  %v2518_v24 = vadd.f32 1.0, %v6386_v38  ;;  %6399 = vtanh.f32 %v2458_v15  ;;  %v8372_v48 = vld [vmem:[%s9802_s18] ss:$0 sm:$0xff] }
 0xa94   :  { %v6388_v52 = vpop.eup %6387  ;;  %6401 = vtanh.f32 %v2462_v16  ;;  %v2546_v47 = vmul.f32 %v2514_v45, %v2290_v17  ;;  %v2301_v18 = vmul.f32 0.5, %v8299_v53  ;;  %v2299_v8 = vmul.f32 0.5, %v8256_v30 }
 0xa95   :  { %v6390_v39 = vpop.eup %6389  ;;  %2792 = vmatprep.mubr.bf16.mxu1 %v2635_v25  ;;  %v2632_v59 = vpack.c.bf16 %v2548_v37, %v2544_v26  ;;  %v2550_v56 = vmul.f32 %v2518_v24, %v2294_v3  ;;  %v2521_v31 = vadd.f32 1.0, %v6388_v52  ;;  %v2303_v27 = vmul.f32 0.5, %v8302_v60  ;;  %v8378_v3 = vld [vmem:[%s9803_s19] ss:$0 sm:$0xff] }
 0xa96   :  { %v2525_v14 = vadd.f32 1.0, %v6390_v39  ;;  %v2296_v23 = vmul.f32 0.5, %v8239_v2  ;;  %v2300_v20 = vmul.f32 0.5, %v8274_v63  ;;  %v2298_v60 = vmul.f32 0.5, %v8242_v28 }
 0xa97   :  { %v6392_v4 = vpop.eup %6391  ;;  %2728 = vmatmul.mubr.bf16.gmra.mrb[72].mxu0 %v2632_v59  ;;  %v2634_v41 = vpack.c.bf16 %v2550_v56, %v2546_v47  ;;  %v2553_v57 = vmul.f32 %v2521_v31, %v2297_v0  ;;  %v2302_v13 = vmul.f32 0.5, %v8292_v32  ;;  %v9853_v55 = vmov 0  }
 0xa98   :  { %v6394_v33 = vpop.eup %6393  ;;  %v2557_v44 = vmul.f32 %v2525_v14, %v2301_v18  ;;  %v2523_v43 = vadd.f32 1.0, %v6392_v4  ;;  %v9854_v63 = vmov 0.0  }
 0xa99   :  { %2793 = vmatmul.mubr.bf16.gmra.mrb[84].mxu1 %v2634_v41  ;;  %v2527_v22 = vadd.f32 1.0, %v6394_v33 }
 0xa9a   :  { %v6396_v5 = vpop.eup %6395  ;;  %v2637_v6 = vpack.c.bf16 %v2557_v44, %v2553_v57  ;;  %v2555_v29 = vmul.f32 %v2523_v43, %v2299_v8 }
 0xa9b   :  { %v6398_v21 = vpop.eup %6397  ;;  %v2559_v1 = vmul.f32 %v2527_v22, %v2303_v27  ;;  %v2520_v53 = vadd.f32 1.0, %v6396_v5 }
 0xa9c   :  { %2735 = vmatprep.mubr.bf16.mxu0 %v2637_v6  ;;  %v2524_v12 = vadd.f32 1.0, %v6398_v21 }
 0xa9d   :  { %v6400_v7 = vpop.eup %6399  ;;  %v2639_v11 = vpack.c.bf16 %v2559_v1, %v2555_v29  ;;  %v2552_v35 = vmul.f32 %v2520_v53, %v2296_v23 }
 0xa9e   :  { %v6402_v9 = vpop.eup %6401  ;;  %v2556_v30 = vmul.f32 %v2524_v12, %v2300_v20  ;;  %v2522_v46 = vadd.f32 1.0, %v6400_v7 }
 0xa9f   :  { %2800 = vmatprep.mubr.bf16.mxu1 %v2639_v11  ;;  %v2526_v34 = vadd.f32 1.0, %v6402_v9 }
 0xaa0   :  { %v2636_v40 = vpack.c.bf16 %v2556_v30, %v2552_v35  ;;  %v2554_v50 = vmul.f32 %v2522_v46, %v2298_v60 }
 0xaa1   :  { %v2558_v17 = vmul.f32 %v2526_v34, %v2302_v13 }
 0xaa2   :  { %2736 = vmatmul.mubr.bf16.gmra.mrb[76].mxu0 %v2636_v40 }
 0xaa3   :  { %v2638_v2 = vpack.c.bf16 %v2558_v17, %v2554_v50  ;;  %3079 = vmatprep.mubr.bf16.mxu0 %v9853_v55  ;;  %v9855_v17 = vld [vmem:[#allocation12_spill] sm:$0xff] }
 0xaa5   :  { %2801 = vmatmul.mubr.bf16.gmra.mrb[88].mxu1 %v2638_v2 }
 0xaa6   :  { %6132 = vmatprep.mubr.msk.bf16.mxu1 %vm6604_vm0, %v9854_v63 }
 0xb43   :  { %v5736_v62 = vpop.f32.mrb[64].mxu0 }
 0xb44   :  { %v5737_v28 = vpop.f32.mrb[65].mxu0 }
 0xb45   :  { %v5738_v32 = vadd.f32 %v5737_v28, %v5736_v62  ;;  %v5739_v42 = vpop.f32.mrb[66].mxu0 }
 0xb46   :  { %v5776_v36 = vpop.f32.mrb[76].mxu1  ;;  %v5740_v58 = vpop.f32.mrb[67].mxu0 }
 0xb47   :  { %v2714_v19 = vadd.f32 %v5738_v32, %v8372_v48  ;;  %v5777_v10 = vpop.f32.mrb[77].mxu1  ;;  %v5741_v15 = vadd.f32 %v5740_v58, %v5739_v42  ;;  %v9856_v32 = vld [vmem:[#allocation13_spill] sm:$0xff] }
 0xb48   :  { %v5778_v38 = vadd.f32 %v5777_v10, %v5776_v36  ;;  %v5779_v26 = vpop.f32.mrb[78].mxu1 }
 0xb49   :  { %v2717_v45 = vadd.f32 %v5741_v15, %v8372_v48  ;;  %v5780_v16 = vpop.f32.mrb[79].mxu1 }
 0xb4a   :  { %v2779_v25 = vadd.f32 %v5778_v38, %v2714_v19  ;;  %v5781_v37 = vadd.f32 %v5780_v16, %v5779_v26 }
 0xb4c   :  { %v2816_v24 = vmul.f32 %v8378_v3, %v2779_v25  ;;  %v2782_v52 = vadd.f32 %v5781_v37, %v2717_v45 }
 0xb4e   :  { %v2817_v39 = vmul.f32 %v8378_v3, %v2782_v52  ;;  %v8384_v59 = vadd.f32 %v2816_v24, %v7586_v49 }
 0xb50   :  { %2836 = vadd.xlane.f32.xlu0 %v8384_v59  ;;  %v8388_v47 = vadd.f32 %v2817_v39, %v7589_v61 }
 0xb52   :  { %2838 = vadd.xlane.f32.xlu1 %v8388_v47 }
 0xb5c   :  { %v5742_v56 = vpop.f32.mrb[68].mxu0 }
 0xb5d   :  { %v5743_v31 = vpop.f32.mrb[69].mxu0 }
 0xb5e   :  { %v5744_v0 = vadd.f32 %v5743_v31, %v5742_v56  ;;  %v5745_v18 = vpop.f32.mrb[70].mxu0 }
 0xb5f   :  { %v5746_v14 = vpop.f32.mrb[71].mxu0 }
 0xb60   :  { %v5747_v4 = vadd.f32 %v5746_v14, %v5745_v18  ;;  %v2722_v33 = vadd.f32 %v5744_v0, %v8372_v48  ;;  %v9857_v0 = vld [vmem:[#allocation14_spill] sm:$0xff]  ;;  %v9858_v14 = vld [vmem:[#allocation15_spill] sm:$0xff] }
 0xb62   :  { %v5782_v41 = vpop.f32.mrb[80].mxu1  ;;  %v2725_v43 = vadd.f32 %v5747_v4, %v8372_v48 }
 0xb63   :  { %v5783_v57 = vpop.f32.mrb[81].mxu1 }
 0xb64   :  { %v5784_v44 = vadd.f32 %v5783_v57, %v5782_v41  ;;  %v5785_v49 = vpop.f32.mrb[82].mxu1  ;;  %v5394_v41 = vld [vmem:[%s9792_s8 + $0x1a0] sm:$0xff]  ;;  %v5393_v57 = vld [vmem:[%s9792_s8 + $0x198] sm:$0xff] }
 0xb65   :  { %v5786_v8 = vpop.f32.mrb[83].mxu1 }
 0xb66   :  { %v2787_v27 = vadd.f32 %v5784_v44, %v2722_v33  ;;  %v5787_v61 = vadd.f32 %v5786_v8, %v5785_v49  ;;  %v5397_v44 = vld [vmem:[%s9792_s8 + $0x1b8] sm:$0xff]  ;;  %v5400_v49 = vld [vmem:[%s9792_s8 + $0x1d0] sm:$0xff] }
 0xb67   :  { %v3009_v8 = vpack.c.bf16 %v5400_v49, %v5397_v44  ;;  %v5417_v44 = vld [vmem:[%s9792_s8 + $0x258] sm:$0xff] }
 0xb68   :  { %v2818_v22 = vmul.f32 %v8378_v3, %v2787_v27  ;;  %v2790_v5 = vadd.f32 %v5787_v61, %v2725_v43  ;;  %v5396_v27 = vld [vmem:[%s9792_s8 + $0x1b0] sm:$0xff]  ;;  %v5399_v61 = vld [vmem:[%s9792_s8 + $0x1c8] sm:$0xff]  ;;  %v5421_v49 = vld [vmem:[%s9792_s8 + $0x278] sm:$0xff] }
 0xb6a   :  { %v2819_v6 = vmul.f32 %v8378_v3, %v2790_v5  ;;  %v8396_v21 = vadd.f32 %v2818_v22, %v7592_v51  ;;  %v5748_v29 = vpop.f32.mrb[72].mxu0  ;;  %v3008_v22 = vpack.c.bf16 %v5399_v61, %v5396_v27  ;;  %v5420_v27 = vld [vmem:[%s9792_s8 + $0x270] sm:$0xff]  ;;  %v5423_v61 = vld [vmem:[%s9792_s8 + $0x288] sm:$0xff] }
 0xb6b   :  { %v5749_v1 = vpop.f32.mrb[73].mxu0 }
 0xb6c   :  { %2840 = vadd.xlane.f32.xlu0 %v8396_v21  ;;  %v8400_v53 = vadd.f32 %v2819_v6, %v7595_v54  ;;  %v5788_v23 = vpop.f32.mrb[84].mxu1  ;;  %v5750_v20 = vadd.f32 %v5749_v1, %v5748_v29  ;;  %v5751_v12 = vpop.f32.mrb[74].mxu0 }
 0xb6d   :  { %v5789_v7 = vpop.f32.mrb[85].mxu1  ;;  %v5752_v11 = vpop.f32.mrb[75].mxu0 }
 0xb6e   :  { %2842 = vadd.xlane.f32.xlu1 %v8400_v53  ;;  %v2730_v9 = vadd.f32 %v5750_v20, %v8372_v48  ;;  %v5790_v35 = vadd.f32 %v5789_v7, %v5788_v23  ;;  %v5791_v30 = vpop.f32.mrb[86].mxu1  ;;  %v5753_v51 = vadd.f32 %v5752_v11, %v5751_v12 }
 0xb6f   :  { %v5792_v46 = vpop.f32.mrb[87].mxu1 }
 0xb70   :  { %v2795_v60 = vadd.f32 %v5790_v35, %v2730_v9  ;;  %v2733_v13 = vadd.f32 %v5753_v51, %v8372_v48  ;;  %v5793_v34 = vadd.f32 %v5792_v46, %v5791_v30 }
 0xb72   :  { %v2820_v54 = vmul.f32 %v8378_v3, %v2795_v60  ;;  %v2798_v40 = vadd.f32 %v5793_v34, %v2733_v13  ;;  %v5403_v34 = vld [vmem:[%s9792_s8 + $0x1e8] sm:$0xff] }
 0xb74   :  { %v2821_v50 = vmul.f32 %v8378_v3, %v2798_v40  ;;  %v8408_v2 = vadd.f32 %v2820_v54, %v9855_v17  ;;  %v5406_v54 = vld [vmem:[%s9792_s8 + $0x200] sm:$0xff] }
 0xb75   :  { %v5754_v62 = vpop.f32.mrb[76].mxu0 }
 0xb76   :  { %v5755_v28 = vpop.f32.mrb[77].mxu0  ;;  %2844 = vadd.xlane.f32.xlu0 %v8408_v2  ;;  %v8412_v42 = vadd.f32 %v2821_v50, %v9856_v32  ;;  %v3012_v50 = vpack.c.bf16 %v5406_v54, %v5403_v34  ;;  %v5409_v32 = vld [vmem:[%s9792_s8 + $0x218] sm:$0xff]  ;;  %v5435_v34 = vld [vmem:[%s9792_s8 + $0x2e8] sm:$0xff] }
 0xb77   :  { %v5756_v36 = vadd.f32 %v5755_v28, %v5754_v62  ;;  %v5757_v58 = vpop.f32.mrb[78].mxu0  ;;  %v5402_v62 = vld [vmem:[%s9792_s8 + $0x1e0] sm:$0xff]  ;;  %v5405_v28 = vld [vmem:[%s9792_s8 + $0x1f8] sm:$0xff] }
 0xb78   :  { %v5794_v19 = vpop.f32.mrb[88].mxu1  ;;  %v5758_v10 = vpop.f32.mrb[79].mxu0  ;;  %2846 = vadd.xlane.f32.xlu1 %v8412_v42 }
 0xb79   :  { %v2738_v15 = vadd.f32 %v5756_v36, %v8372_v48  ;;  %v5795_v38 = vpop.f32.mrb[89].mxu1  ;;  %v5759_v26 = vadd.f32 %v5758_v10, %v5757_v58  ;;  %v3011_v58 = vpack.c.bf16 %v5405_v28, %v5402_v62  ;;  %v5408_v10 = vld [vmem:[%s9792_s8 + $0x210] sm:$0xff] }
 0xb7a   :  { %v5796_v45 = vadd.f32 %v5795_v38, %v5794_v19  ;;  %v5797_v16 = vpop.f32.mrb[90].mxu1  ;;  %v5412_v19 = vld [vmem:[%s9792_s8 + $0x230] sm:$0xff] }
 0xb7b   :  { %v2741_v25 = vadd.f32 %v5759_v26, %v8372_v48  ;;  %v5798_v37 = vpop.f32.mrb[91].mxu1  ;;  %v5391_v48 = vld [vmem:[%s9792_s8 + $0x188] sm:$0xff] }
 0xb7c   :  { %v2803_v24 = vadd.f32 %v5796_v45, %v2738_v15  ;;  %v5799_v52 = vadd.f32 %v5798_v37, %v5797_v16  ;;  %v3006_v33 = vpack.c.bf16 %v5394_v41, %v5391_v48  ;;  %v5411_v15 = vld [vmem:[%s9792_s8 + $0x228] sm:$0xff]  ;;  %v3015_v45 = vpack.c.bf16 %v5412_v19, %v5409_v32  ;;  %v5418_v48 = vld [vmem:[%s9792_s8 + $0x260] sm:$0xff] }
 0xb7d   :  { %v3014_v16 = vpack.c.bf16 %v5411_v15, %v5408_v10  ;;  %v8572_v15 = vld [vmem:[%s9841_s6 + $0x1] ss:$0 sm:$0xff] }
 0xb7e   :  { %v2822_v39 = vmul.f32 %v8378_v3, %v2803_v24  ;;  %v2806_v56 = vadd.f32 %v5799_v52, %v2741_v25  ;;  %3047 = vmatprep.subr.bf16.mxu0 %v3006_v33 }
 0xb80   :  { %v2823_v31 = vmul.f32 %v8378_v3, %v2806_v56  ;;  %v8420_v18 = vadd.f32 %v2822_v39, %v9857_v0  ;;  %v5390_v3 = vld [vmem:[%s9792_s8 + $0x180] sm:$0xff] }
 0xb81   :  { %v3005_v43 = vpack.c.bf16 %v5393_v57, %v5390_v3  ;;  %v5414_v57 = vld [vmem:[%s9792_s8 + $0x240] sm:$0xff] }
 0xb82   :  { %2848 = vadd.xlane.f32.xlu0 %v8420_v18  ;;  %v8424_v4 = vadd.f32 %v2823_v31, %v9858_v14  ;;  %v5415_v14 = vld [vmem:[%s9792_s8 + $0x248] sm:$0xff] }
 0xb83   :  { %3048 = vmatpush1.bf16.msra.mxu0 %v3005_v43  ;;  %v3018_v41 = vpack.c.bf16 %v5418_v48, %v5415_v14  ;;  %v3017_v43 = vpack.c.bf16 %v5417_v44, %v5414_v57  ;;  %v5404_v48 = vld [vmem:[%s9792_s8 + $0x1f0] sm:$0xff]  ;;  %v5410_v44 = vld [vmem:[%s9792_s8 + $0x220] sm:$0xff] }
 0xb84   :  { %2850 = vadd.xlane.f32.xlu1 %v8424_v4  ;;  %3049 = vmatprep.subr.bf16.mxu0 %v3009_v8  ;;  %v5424_v8 = vld [vmem:[%s9792_s8 + $0x290] sm:$0xff] }
 0xb87   :  { %3050 = vmatpush1.bf16.msra.mxu0 %v3008_v22 }
 0xb88   :  { %3051 = vmatprep.subr.bf16.mxu0 %v3012_v50  ;;  %v5395_v50 = vld [vmem:[%s9792_s8 + $0x1a8] sm:$0xff] }
 0xb8b   :  { %3052 = vmatpush1.bf16.msra.mxu0 %v3011_v58 }
 0xb8c   :  { %3053 = vmatprep.subr.bf16.mxu0 %v3015_v45 }
 0xb8f   :  { %3054 = vmatpush1.bf16.msra.mxu0 %v3014_v16 }
 0xb90   :  { %3055 = vmatprep.subr.bf16.mxu0 %v3018_v41  ;;  %v5407_v41 = vld [vmem:[%s9792_s8 + $0x208] sm:$0xff] }
 0xb93   :  { %3056 = vmatpush1.bf16.msra.mxu0 %v3017_v43 }
 0xbdd   :  { %v2837_v5 = vpop.xlane.xlu0 %2836 }
 0xbde   :  { %v2852_v6 = vmul.f32 0.0078125, %v2837_v5  ;;  %v3021_v5 = vpack.c.bf16 %v5424_v8, %v5421_v49  ;;  %v5413_v49 = vld [vmem:[%s9792_s8 + $0x238] sm:$0xff] }
 0xbdf   :  { %v2839_v29 = vpop.xlane.xlu1 %2838 }
 0xbe0   :  { %v8452_v1 = vsub.f32 %v8384_v59, %v2852_v6  ;;  %v2853_v23 = vmul.f32 0.0078125, %v2839_v29  ;;  %v5427_v6 = vld [vmem:[%s9792_s8 + $0x2a8] sm:$0xff]  ;;  %v5430_v29 = vld [vmem:[%s9792_s8 + $0x2c0] sm:$0xff]  ;;  %3057 = vmatprep.subr.bf16.mxu0 %v3021_v5  ;;  %v5416_v5 = vld [vmem:[%s9792_s8 + $0x250] sm:$0xff] }
 0xbe2   :  { %v8455_v20 = vsub.f32 %v8388_v47, %v2853_v23  ;;  %v2868_v12 = vmul.f32 %v8452_v1, %v8452_v1  ;;  %v3020_v23 = vpack.c.bf16 %v5423_v61, %v5420_v27 }
 0xbe4   :  { %2876 = vadd.xlane.f32.xlu0 %v2868_v12  ;;  %v2869_v7 = vmul.f32 %v8455_v20, %v8455_v20  ;;  %v3024_v12 = vpack.c.bf16 %v5430_v29, %v5427_v6  ;;  %3058 = vmatpush1.bf16.msra.mxu0 %v3020_v23  ;;  %v5419_v6 = vld [vmem:[%s9792_s8 + $0x268] sm:$0xff] }
 0xbe5   :  { %v3019_v23 = vpack.c.bf16 %v5419_v6, %v5416_v5 }
 0xbe6   :  { %2878 = vadd.xlane.f32.xlu1 %v2869_v7  ;;  %v5426_v7 = vld [vmem:[%s9792_s8 + $0x2a0] sm:$0xff]  ;;  %3059 = vmatprep.subr.bf16.mxu0 %v3024_v12 }
 0xbe7   :  { %v5422_v12 = vld [vmem:[%s9792_s8 + $0x280] sm:$0xff] }
 0xbf9   :  { %v2841_v11 = vpop.xlane.xlu0 %2840 }
 0xbfa   :  { %v2854_v9 = vmul.f32 0.0078125, %v2841_v11  ;;  %v5429_v11 = vld [vmem:[%s9792_s8 + $0x2b8] sm:$0xff] }
 0xbfb   :  { %v2843_v35 = vpop.xlane.xlu1 %2842 }
 0xbfc   :  { %v8462_v30 = vsub.f32 %v8396_v21, %v2854_v9  ;;  %v2855_v51 = vmul.f32 0.0078125, %v2843_v35  ;;  %v5433_v9 = vld [vmem:[%s9792_s8 + $0x2d8] sm:$0xff]  ;;  %v5436_v35 = vld [vmem:[%s9792_s8 + $0x2f0] sm:$0xff] }
 0xbfe   :  { %v8465_v46 = vsub.f32 %v8400_v53, %v2855_v51  ;;  %v2870_v60 = vmul.f32 %v8462_v30, %v8462_v30  ;;  %v3023_v51 = vpack.c.bf16 %v5429_v11, %v5426_v7  ;;  %v5425_v7 = vld [vmem:[%s9792_s8 + $0x298] sm:$0xff] }
 0xc00   :  { %2880 = vadd.xlane.f32.xlu0 %v2870_v60  ;;  %v2871_v13 = vmul.f32 %v8465_v46, %v8465_v46  ;;  %v3027_v60 = vpack.c.bf16 %v5436_v35, %v5433_v9  ;;  %3060 = vmatpush1.bf16.msra.mxu0 %v3023_v51  ;;  %v3022_v35 = vpack.c.bf16 %v5425_v7, %v5422_v12  ;;  %v9860_v12 = vld [vmem:[#allocation9_spill] sm:$0xff] }
 0xc02   :  { %2882 = vadd.xlane.f32.xlu1 %v2871_v13  ;;  %v5432_v13 = vld [vmem:[%s9792_s8 + $0x2d0] sm:$0xff]  ;;  %3061 = vmatprep.subr.bf16.mxu0 %v3027_v60 }
 0xc03   :  { %v2845_v40 = vpop.xlane.xlu0 %2844  ;;  %v3026_v54 = vpack.c.bf16 %v5435_v34, %v5432_v13  ;;  %v5428_v60 = vld [vmem:[%s9792_s8 + $0x2b0] sm:$0xff]  ;;  %v5431_v13 = vld [vmem:[%s9792_s8 + $0x2c8] sm:$0xff] }
 0xc04   :  { %v2856_v17 = vmul.f32 0.0078125, %v2845_v40  ;;  %v5392_v40 = vld [vmem:[%s9792_s8 + $0x190] sm:$0xff] }
 0xc05   :  { %v2847_v36 = vpop.xlane.xlu1 %2846  ;;  %3062 = vmatpush1.bf16.msra.mxu0 %v3026_v54 }
 0xc06   :  { %v8496_v38 = vsub.f32 %v8408_v2, %v2856_v17  ;;  %v2857_v26 = vmul.f32 0.0078125, %v2847_v36  ;;  %v3007_v17 = vpack.c.bf16 %v5395_v50, %v5392_v40 }
 0xc08   :  { %v8499_v25 = vsub.f32 %v8412_v42, %v2857_v26  ;;  %v2872_v37 = vmul.f32 %v8496_v38, %v8496_v38  ;;  %6094 = vmatprep.subr.bf16.mxu0 %v3007_v17 }
 0xc0a   :  { %2884 = vadd.xlane.f32.xlu0 %v2872_v37  ;;  %v2873_v24 = vmul.f32 %v8499_v25, %v8499_v25 }
 0xc0c   :  { %2886 = vadd.xlane.f32.xlu1 %v2873_v24  ;;  %v8580_v24 = vld [vmem:[%s9791_s7 + $0x1] ss:$0 sm:$0xff] }
 0xc0f   :  { %v2849_v52 = vpop.xlane.xlu0 %2848 }
 0xc10   :  { %v2858_v39 = vmul.f32 0.0078125, %v2849_v52 }
 0xc11   :  { %v2851_v56 = vpop.xlane.xlu1 %2850 }
 0xc12   :  { %v8506_v31 = vsub.f32 %v8420_v18, %v2858_v39  ;;  %v2859_v0 = vmul.f32 0.0078125, %v2851_v56  ;;  %v5398_v39 = vld [vmem:[%s9792_s8 + $0x1c0] sm:$0xff] }
 0xc14   :  { %v8515_v3 = vsub.f32 %v8424_v4, %v2859_v0  ;;  %v2874_v33 = vmul.f32 %v8506_v31, %v8506_v31 }
 0xc16   :  { %2888 = vadd.xlane.f32.xlu0 %v2874_v33  ;;  %v2875_v22 = vmul.f32 %v8515_v3, %v8515_v3  ;;  %v3013_v33 = vpack.c.bf16 %v5407_v41, %v5404_v48 }
 0xc18   :  { %2890 = vadd.xlane.f32.xlu1 %v2875_v22  ;;  %v3016_v22 = vpack.c.bf16 %v5413_v49, %v5410_v44 }
 0xc71   :  { %v2877_v62 = vpop.xlane.xlu0 %2876 }
 0xc72   :  { %v2892_v28 = vmul.f32 0.0078125, %v2877_v62 }
 0xc73   :  { %v2879_v32 = vpop.xlane.xlu1 %2878 }
 0xc74   :  { %v2900_v36 = vadd.f32 1e-06, %v2892_v28  ;;  %v2893_v58 = vmul.f32 0.0078125, %v2879_v32  ;;  %v5434_v28 = vld [vmem:[%s9792_s8 + $0x2e0] sm:$0xff]  ;;  %v5437_v32 = vld [vmem:[%s9792_s8 + $0x2f8] sm:$0xff] }
 0xc76   :  { %6403 = vrsqrt.f32 %v2900_v36  ;;  %v2901_v19 = vadd.f32 1e-06, %v2893_v58 }
 0xc78   :  { %6405 = vrsqrt.f32 %v2901_v19 }
 0xc80   :  { %v6404_v10 = vpop.eup %6403 }
 0xc81   :  { %v2916_v26 = vmul.f32 %v6404_v10, %v8452_v1  ;;  %v5401_v1 = vld [vmem:[%s9792_s8 + $0x1d8] sm:$0xff]  ;;  %v3028_v10 = vpack.c.bf16 %v5437_v32, %v5434_v28 }
 0xc82   :  { %v6406_v45 = vpop.eup %6405  ;;  %v3010_v14 = vpack.c.bf16 %v5401_v1, %v5398_v39 }
 0xc83   :  { %v2930_v16 = vmul.f32 %v8572_v15, %v2916_v26  ;;  %v2917_v37 = vmul.f32 %v6406_v45, %v8455_v20 }
 0xc85   :  { %v2931_v52 = vmul.f32 %v8572_v15, %v2917_v37  ;;  %v2944_v56 = vadd.f32 %v8580_v24, %v2930_v16 }
 0xc87   :  { %v2945_v0 = vadd.f32 %v8580_v24, %v2931_v52 }
 0xc89   :  { %v8591_v20 = vpack.c.bf16 %v2945_v0, %v2944_v56 }
 0xc8b   :  { %3080 = vmatmul.mubr.bf16.vlgmr.msra.gmra.mrb[80].mxu0 %v8591_v20 }
 0xc8c   :  { %3089 = vmatprep.mubr.bf16.mxu0 %v9853_v55  ;;  %6095 = vmatpush3.bf16.msra.mxu0 %v3007_v17  ;;  %v3025_v17 = vpack.c.bf16 %v5431_v13, %v5428_v60 }
 0xc8d   :  { %6096 = vmatprep.subr.bf16.mxu0 %v3010_v14  ;;  %v2881_v57 = vpop.xlane.xlu0 %2880 }
 0xc8e   :  { %v2894_v43 = vmul.f32 0.0078125, %v2881_v57 }
 0xc8f   :  { %v2883_v8 = vpop.xlane.xlu1 %2882 }
 0xc90   :  { %6097 = vmatpush3.bf16.msra.mxu0 %v3010_v14  ;;  %v2902_v27 = vadd.f32 1e-06, %v2894_v43  ;;  %v2895_v61 = vmul.f32 0.0078125, %v2883_v8 }
 0xc91   :  { %6098 = vmatprep.subr.bf16.mxu0 %v3013_v33 }
 0xc92   :  { %6407 = vrsqrt.f32 %v2902_v27  ;;  %v2903_v29 = vadd.f32 1e-06, %v2895_v61 }
 0xc94   :  { %6099 = vmatpush3.bf16.msra.mxu0 %v3013_v33  ;;  %6409 = vrsqrt.f32 %v2903_v29 }
 0xc95   :  { %6100 = vmatprep.subr.bf16.mxu0 %v3016_v22 }
 0xc97   :  { %v2885_v11 = vpop.xlane.xlu0 %2884 }
 0xc98   :  { %6101 = vmatpush3.bf16.msra.mxu0 %v3016_v22  ;;  %v2896_v9 = vmul.f32 0.0078125, %v2885_v11 }
 0xc99   :  { %6102 = vmatprep.subr.bf16.mxu0 %v3019_v23  ;;  %v2887_v51 = vpop.xlane.xlu1 %2886 }
 0xc9a   :  { %v2904_v34 = vadd.f32 1e-06, %v2896_v9  ;;  %v2897_v54 = vmul.f32 0.0078125, %v2887_v51 }
 0xc9c   :  { %6103 = vmatpush3.bf16.msra.mxu0 %v3019_v23  ;;  %v6408_v40 = vpop.eup %6407  ;;  %6411 = vrsqrt.f32 %v2904_v34  ;;  %v2905_v50 = vadd.f32 1e-06, %v2897_v54 }
 0xc9d   :  { %6104 = vmatprep.subr.bf16.mxu0 %v3022_v35  ;;  %v2918_v62 = vmul.f32 %v6408_v40, %v8462_v30 }
 0xc9e   :  { %v6410_v36 = vpop.eup %6409  ;;  %6413 = vrsqrt.f32 %v2905_v50 }
 0xc9f   :  { %v2919_v58 = vmul.f32 %v6410_v36, %v8465_v46  ;;  %v2932_v19 = vmul.f32 %v8572_v15, %v2918_v62 }
 0xca0   :  { %6105 = vmatpush3.bf16.msra.mxu0 %v3022_v35 }
 0xca1   :  { %6106 = vmatprep.subr.bf16.mxu0 %v3025_v17  ;;  %v2933_v26 = vmul.f32 %v8572_v15, %v2919_v58  ;;  %v2946_v30 = vadd.f32 %v8580_v24, %v2932_v19 }
 0xca3   :  { %v2947_v45 = vadd.f32 %v8580_v24, %v2933_v26  ;;  %v2889_v16 = vpop.xlane.xlu0 %2888 }
 0xca4   :  { %6107 = vmatpush3.bf16.msra.mxu0 %v3025_v17  ;;  %v2898_v37 = vmul.f32 0.0078125, %v2889_v16 }
 0xca5   :  { %6108 = vmatprep.subr.bf16.mxu0 %v3028_v10  ;;  %v3002_v52 = vpack.c.bf16 %v2947_v45, %v2946_v30  ;;  %v2891_v39 = vpop.xlane.xlu1 %2890 }
 0xca6   :  { %v6412_v1 = vpop.eup %6411  ;;  %v2906_v56 = vadd.f32 1e-06, %v2898_v37  ;;  %v2899_v46 = vmul.f32 0.0078125, %v2891_v39 }
 0xca7   :  { %3090 = vmatmul.mubr.bf16.gmra.mrb[84].mxu0 %v3002_v52  ;;  %v2920_v0 = vmul.f32 %v6412_v1, %v8496_v38 }
 0xca8   :  { %v6414_v14 = vpop.eup %6413  ;;  %6415 = vrsqrt.f32 %v2906_v56  ;;  %v2907_v48 = vadd.f32 1e-06, %v2899_v46  ;;  %3099 = vmatprep.mubr.bf16.mxu0 %v9853_v55  ;;  %6109 = vmatpush3.bf16.msra.mxu0 %v3028_v10 }
 0xca9   :  { %v2921_v41 = vmul.f32 %v6414_v14, %v8499_v25  ;;  %v2934_v33 = vmul.f32 %v8572_v15, %v2920_v0  ;;  %6118 = vmatprep.subr.bf16.mxu0 %v9854_v63 }
 0xcaa   :  { %6417 = vrsqrt.f32 %v2907_v48 }
 0xcab   :  { %v2935_v57 = vmul.f32 %v8572_v15, %v2921_v41  ;;  %v2948_v44 = vadd.f32 %v8580_v24, %v2934_v33 }
 0xcad   :  { %v2949_v49 = vadd.f32 %v8580_v24, %v2935_v57 }
 0xcaf   :  { %v3003_v38 = vpack.c.bf16 %v2949_v49, %v2948_v44 }
 0xcb1   :  { %3100 = vmatmul.mubr.bf16.gmra.mrb[88].mxu0 %v3003_v38 }
 0xcb2   :  { %v6416_v43 = vpop.eup %6415  ;;  %3109 = vmatprep.mubr.bf16.mxu0 %v9853_v55 }
 0xcb3   :  { %v2922_v8 = vmul.f32 %v6416_v43, %v8506_v31  ;;  %v5438_v31 = vld [vmem:[%s9793_s9 + $0x3] sm:$0x7] }
 0xcb4   :  { %v6418_v27 = vpop.eup %6417  ;;  %v3039_v7 = vrot.slane %v5438_v31, %v9860_v12 }
 0xcb5   :  { %v2923_v25 = vmul.f32 %v6418_v27, %v8515_v3  ;;  %v2936_v61 = vmul.f32 %v8572_v15, %v2922_v8  ;;  %v9859_v3 = vld [vmem:[#allocation8_spill] sm:$0xff] }
 0xcb7   :  { %v2937_v22 = vmul.f32 %v8572_v15, %v2923_v25  ;;  %v2950_v5 = vadd.f32 %v8580_v24, %v2936_v61  ;;  %v3035_v15 = vrot.slane %v5438_v31, %v9859_v3 }
 0xcb9   :  { %v2951_v6 = vadd.f32 %v8580_v24, %v2937_v22 }
 0xcbb   :  { %v3004_v29 = vpack.c.bf16 %v2951_v6, %v2950_v5  ;;  %v9861_v6 = vld [vmem:[#allocation10_spill] sm:$0xff] }
 0xcbd   :  { %3110 = vmatmul.mubr.bf16.gmra.mrb[92].mxu0 %v3004_v29 }
 0xcbe   :  { %6110 = vmatprep.mubr.bf16.mxu0 %v8591_v20 }
 0xcc5   :  { %6111 = vmatmul.mubr.bf16.vlgmr.msra.gmra.mrb[96].mxu0 %v3002_v52 }
 0xcc6   :  { %6114 = vmatprep.mubr.bf16.mxu0 %v3003_v38 }
 0xccd   :  { %6115 = vmatmul.mubr.bf16.gmra.mrb[100].mxu0 %v3004_v29  ;;  %v3043_v29 = vrot.slane %v5438_v31, %v9861_v6 }
 0xcce   :  { %6120 = vmatprep.mubr.msk.bf16.mxu0 %vm6604_vm0, %v9854_v63 }
 0xd5e   :  { %v3081_v23 = vpop.f32.mrb[80].mxu0 }
 0xd5f   :  { %v3082_v24 = vadd.f32 %v3081_v23, %v3035_v15  ;;  %v3083_v11 = vpop.f32.mrb[81].mxu0 }
 0xd60   :  { %v3085_v9 = vpop.f32.mrb[82].mxu0  ;;  %v3084_v51 = vadd.f32 %v3083_v11, %v3039_v7 }
 0xd61   :  { %v3086_v35 = vadd.f32 %v3085_v9, %v3035_v15  ;;  %v3087_v20 = vpop.f32.mrb[83].mxu0  ;;  %v3185_v13 = vmul.f32 0.125, %v3082_v24 }
 0xd62   :  { %v3088_v60 = vadd.f32 %v3087_v20, %v3039_v7 }
 0xd63   :  { %v3186_v34 = vmul.f32 0.125, %v3086_v35 }
 0xd64   :  { %v3194_v54 = vpack.c.bf16 %v3088_v60, %v3084_v51 }
 0xd65   :  { %v3193_v40 = vpack.c.bf16 %v3186_v34, %v3185_v13 }
 0xd66   :  { %3316 = vrot.lane.b32.xlu0 %v3194_v54, %s6606_s3  ;;  %v3199_v50 = vsel %vm742_vm3, %v3194_v54, 0 }
 0xd67   :  { %3313 = vrot.lane.b32.xlu1 %v3193_v40, %s6606_s3  ;;  %6119 = vmatpush3.bf16.xpose.msra.mxu0 %v3199_v50 }
 0xd68   :  { %6124 = vmatprep.subr.bf16.mxu0 %v9854_v63 }
 0xd6e   :  { %6121 = vmatmul.mubr.msk.bf16.vlgmr.msra.gmra.mrb[104].mxu0 %vm742_vm3, %v3193_v40 }
 0xd6f   :  { %6126 = vmatprep.mubr.msk.bf16.mxu0 %vm6604_vm0, %v9854_v63 }
 0xd7a   :  { %v3091_v17 = vpop.f32.mrb[84].mxu0 }
 0xd7b   :  { %v3092_v62 = vadd.f32 %v3091_v17, %v3035_v15  ;;  %v3093_v28 = vpop.f32.mrb[85].mxu0 }
 0xd7c   :  { %v3095_v32 = vpop.f32.mrb[86].mxu0  ;;  %v3094_v19 = vadd.f32 %v3093_v28, %v3039_v7 }
 0xd7d   :  { %v3096_v36 = vadd.f32 %v3095_v32, %v3035_v15  ;;  %v3097_v58 = vpop.f32.mrb[87].mxu0  ;;  %v3187_v26 = vmul.f32 0.125, %v3092_v62 }
 0xd7e   :  { %v3098_v10 = vadd.f32 %v3097_v58, %v3039_v7 }
 0xd7f   :  { %v3188_v30 = vmul.f32 0.125, %v3096_v36 }
 0xd80   :  { %v3447_v45 = vpack.c.bf16 %v3098_v10, %v3094_v19 }
 0xd81   :  { %v8667_v16 = vpack.c.bf16 %v3188_v30, %v3187_v26 }
 0xd82   :  { %3569 = vrot.lane.b32.xlu1 %v3447_v45, %s6606_s3  ;;  %v3452_v30 = vsel %vm742_vm3, %v3447_v45, 0 }
 0xd84   :  { %v3101_v37 = vpop.f32.mrb[88].mxu0 }
 0xd85   :  { %v3102_v52 = vadd.f32 %v3101_v37, %v3035_v15  ;;  %v3103_v39 = vpop.f32.mrb[89].mxu0 }
 0xd86   :  { %3566 = vrot.lane.b32.xlu1 %v8667_v16, %s6606_s3  ;;  %v3105_v1 = vpop.f32.mrb[90].mxu0  ;;  %v3104_v0 = vadd.f32 %v3103_v39, %v3039_v7 }
 0xd87   :  { %v3106_v56 = vadd.f32 %v3105_v1, %v3035_v15  ;;  %v3107_v46 = vpop.f32.mrb[91].mxu0  ;;  %v3189_v48 = vmul.f32 0.125, %v3102_v52 }
 0xd88   :  { %v3108_v14 = vadd.f32 %v3107_v46, %v3039_v7 }
 0xd89   :  { %v3190_v41 = vmul.f32 0.125, %v3106_v56 }
 0xd8a   :  { %v3700_v33 = vpack.c.bf16 %v3108_v14, %v3104_v0 }
 0xd8b   :  { %v8672_v57 = vpack.c.bf16 %v3190_v41, %v3189_v48 }
 0xd8c   :  { %3822 = vrot.lane.b32.xlu0 %v3700_v33, %s6606_s3  ;;  %v3705_v45 = vsel %vm742_vm3, %v3700_v33, 0  ;;  %v9862_v33 = vld [vmem:[#allocation11_spill] sm:$0xff] }
 0xd8d   :  { %3819 = vrot.lane.b32.xlu1 %v8672_v57, %s6606_s3 }
 0xd90   :  { %v3111_v44 = vpop.f32.mrb[92].mxu0 }
 0xd91   :  { %v3112_v49 = vadd.f32 %v3111_v44, %v3035_v15  ;;  %v3113_v38 = vpop.f32.mrb[93].mxu0 }
 0xd92   :  { %v3115_v43 = vpop.f32.mrb[94].mxu0  ;;  %v3114_v25 = vadd.f32 %v3113_v38, %v3039_v7 }
 0xd93   :  { %v3116_v8 = vadd.f32 %v3115_v43, %v3035_v15  ;;  %v3117_v27 = vpop.f32.mrb[95].mxu0  ;;  %v3191_v22 = vmul.f32 0.125, %v3112_v49 }
 0xd94   :  { %v3118_v61 = vadd.f32 %v3117_v27, %v3039_v7 }
 0xd95   :  { %v3192_v5 = vmul.f32 0.125, %v3116_v8 }
 0xd96   :  { %v3953_v23 = vpack.c.bf16 %v3118_v61, %v3114_v25 }
 0xd97   :  { %v3952_v24 = vpack.c.bf16 %v3192_v5, %v3191_v22 }
 0xd98   :  { %v6112_v11 = vpop.f32.mrb[96].mxu0  ;;  %4075 = vrot.lane.b32.xlu0 %v3953_v23, %s6606_s3  ;;  %v3958_v46 = vsel %vm742_vm3, %v3953_v23, 0 }
 0xd99   :  { %v3163_v9 = vadd.f32 %v6112_v11, %v3043_v29  ;;  %v3154_v35 = vpop.f32.mrb[97].mxu0  ;;  %4072 = vrot.lane.b32.xlu1 %v3952_v24, %s6606_s3 }
 0xd9a   :  { %v6113_v20 = vpop.f32.mrb[98].mxu0  ;;  %v3155_v15 = vadd.f32 %v3154_v35, %v3043_v29 }
 0xd9b   :  { %v3166_v51 = vadd.f32 %v6113_v20, %v3043_v29  ;;  %v3157_v60 = vpop.f32.mrb[99].mxu0 }
 0xd9c   :  { %v3158_v13 = vadd.f32 %v3157_v60, %v3043_v29 }
 0xd9d   :  { %v8680_v34 = vpack.c.bf16 %v3166_v51, %v3163_v9 }
 0xd9e   :  { %v8682_v7 = vpack.c.bf16 %v3158_v13, %v3155_v15 }
 0xda0   :  { %v6116_v54 = vpop.f32.mrb[100].mxu0  ;;  %6125 = vmatpush3.bf16.msra.mxu0 %v8682_v7 }
 0xda1   :  { %v3179_v31 = vadd.f32 %v6116_v54, %v3043_v29  ;;  %v3170_v40 = vpop.f32.mrb[101].mxu0  ;;  %6136 = vmatprep.subr.bf16.mxu0 %v9854_v63 }
 0xda2   :  { %v3171_v50 = vadd.f32 %v3170_v40, %v3043_v29  ;;  %v6117_v17 = vpop.f32.mrb[102].mxu0 }
 0xda3   :  { %v3182_v62 = vadd.f32 %v6117_v17, %v3043_v29  ;;  %v3173_v28 = vpop.f32.mrb[103].mxu0 }
 0xda4   :  { %v3174_v32 = vadd.f32 %v3173_v28, %v3043_v29 }
 0xda5   :  { %v8686_v36 = vpack.c.bf16 %v3182_v62, %v3179_v31 }
 0xda6   :  { %v8688_v58 = vpack.c.bf16 %v3174_v32, %v3171_v50 }
 0xdd8   :  { %v3317_v19 = vpop.permute.xlu0 %3316 }
 0xdd9   :  { %v3322_v10 = vsel %vm742_vm3, %v3317_v19, 0  ;;  %v3314_v26 = vpop.permute.xlu1 %3313 }
 0xdda   :  { %6131 = vmatpush3.bf16.xpose.msra.mxu1 %v3322_v10 }
 0xddb   :  { %6142 = vmatprep.subr.bf16.mxu1 %v9854_v63 }
 0xde1   :  { %6133 = vmatmul.mubr.msk.bf16.vlgmr.msra.gmra.mrb[92].mxu1 %vm742_vm3, %v3314_v26 }
 0xde2   :  { %6143 = vmatpush3.bf16.xpose.msra.mxu1 %v3452_v30  ;;  %6144 = vmatprep.mubr.msk.bf16.mxu1 %vm6604_vm0, %v9854_v63 }
 0xde3   :  { %6154 = vmatprep.subr.bf16.mxu1 %v9854_v63 }
 0xde9   :  { %6145 = vmatmul.mubr.msk.bf16.vlgmr.msra.gmra.mrb[96].mxu1 %vm742_vm3, %v8667_v16 }
 0xdea   :  { %6156 = vmatprep.mubr.msk.bf16.mxu1 %vm6604_vm0, %v9854_v63 }
 0xdf4   :  { %v3570_v37 = vpop.permute.xlu1 %3569 }
 0xdf5   :  { %v3575_v52 = vsel %vm742_vm3, %v3570_v37, 0 }
 0xdf6   :  { %6155 = vmatpush3.bf16.xpose.msra.mxu1 %v3575_v52 }
 0xdf7   :  { %6166 = vmatprep.subr.bf16.mxu1 %v9854_v63 }
 0xdf8   :  { %v3567_v39 = vpop.permute.xlu1 %3566 }
 0xdfd   :  { %6157 = vmatmul.mubr.msk.bf16.vlgmr.msra.gmra.mrb[100].mxu1 %vm742_vm3, %v3567_v39 }
 0xdfe   :  { %6167 = vmatpush3.bf16.xpose.msra.mxu1 %v3705_v45  ;;  %6168 = vmatprep.mubr.msk.bf16.mxu1 %vm6604_vm0, %v9854_v63  ;;  %v3823_v16 = vpop.permute.xlu0 %3822 }
 0xdff   :  { %6178 = vmatprep.subr.bf16.mxu1 %v9854_v63  ;;  %v3828_v1 = vsel %vm742_vm3, %v3823_v16, 0  ;;  %v3820_v56 = vpop.permute.xlu1 %3819 }
 0xe05   :  { %6169 = vmatmul.mubr.msk.bf16.vlgmr.msra.gmra.mrb[104].mxu1 %vm742_vm3, %v8672_v57 }
 0xe06   :  { %6179 = vmatpush3.bf16.xpose.msra.mxu1 %v3828_v1  ;;  %6180 = vmatprep.mubr.msk.bf16.mxu1 %vm6604_vm0, %v9854_v63 }
 0xe07   :  { %6190 = vmatprep.subr.bf16.mxu1 %v9854_v63 }
 0xe0a   :  { %v4076_v0 = vpop.permute.xlu0 %4075 }
 0xe0b   :  { %v4081_v14 = vsel %vm742_vm3, %v4076_v0, 0  ;;  %v4073_v48 = vpop.permute.xlu1 %4072 }
 0xe0d   :  { %6181 = vmatmul.mubr.msk.bf16.vlgmr.msra.gmra.mrb[108].mxu1 %vm742_vm3, %v3820_v56 }
 0xe0e   :  { %6191 = vmatpush3.bf16.xpose.msra.mxu1 %v3958_v46  ;;  %6192 = vmatprep.mubr.msk.bf16.mxu1 %vm6604_vm0, %v9854_v63 }
 0xe0f   :  { %6202 = vmatprep.subr.bf16.mxu1 %v9854_v63 }
 0xe15   :  { %6193 = vmatmul.mubr.msk.bf16.vlgmr.msra.gmra.mrb[112].mxu1 %vm742_vm3, %v3952_v24 }
 0xe16   :  { %6203 = vmatpush3.bf16.xpose.msra.mxu1 %v4081_v14  ;;  %6204 = vmatprep.mubr.msk.bf16.mxu1 %vm6604_vm0, %v9854_v63 }
 0xe1d   :  { %6205 = vmatmul.mubr.msk.bf16.vlgmr.msra.gmra.mrb[116].mxu1 %vm742_vm3, %v4073_v48 }
 0xe41   :  { %v3235_v41 = vpop.f32.mrb[104].mxu0 }
 0xe42   :  { %v3236_v57 = vadd.f32 %v3235_v41, %v9862_v33  ;;  %v6122_v44 = vpop.f32.mrb[105].mxu0 }
 0xe43   :  { %v3238_v49 = vpop.f32.mrb[106].mxu0 }
 0xe44   :  { %v3239_v38 = vadd.f32 %v3238_v49, %v9862_v33  ;;  %v6123_v43 = vpop.f32.mrb[107].mxu0  ;;  %v3242_v8 = vsel %vm790_vm5, %v3236_v57, -inf }
 0xe45   :  { %3243 = vmax.xlane.f32.xlu0 %v3242_v8 }
 0xe46   :  { %v3245_v27 = vsel %vm790_vm5, %v3239_v38, -inf }
 0xe47   :  { %3246 = vmax.xlane.f32.xlu1 %v3245_v27 }
 0xeb4   :  { %v3358_v25 = vpop.f32.mrb[92].mxu1 }
 0xeb5   :  { %v8729_v61 = vadd.f32 %v3358_v25, %v9862_v33  ;;  %v6134_v22 = vpop.f32.mrb[93].mxu1 }
 0xeb6   :  { %v3361_v5 = vpop.f32.mrb[94].mxu1 }
 0xeb7   :  { %v8732_v29 = vadd.f32 %v3361_v5, %v9862_v33  ;;  %v6135_v23 = vpop.f32.mrb[95].mxu1  ;;  %v3365_v24 = vsel %vm790_vm5, %v8729_v61, -inf }
 0xeb8   :  { %3366 = vmax.xlane.f32.xlu0 %v3365_v24 }
 0xeb9   :  { %v3368_v11 = vsel %vm790_vm5, %v8732_v29, -inf }
 0xebc   :  { %3369 = vmax.xlane.f32.xlu0 %v3368_v11  ;;  %v3488_v9 = vpop.f32.mrb[96].mxu1 }
 0xebd   :  { %v8739_v35 = vadd.f32 %v3488_v9, %v9862_v33  ;;  %v6146_v20 = vpop.f32.mrb[97].mxu1 }
 0xebe   :  { %v3491_v51 = vpop.f32.mrb[98].mxu1 }
 0xebf   :  { %v8742_v60 = vadd.f32 %v3491_v51, %v9862_v33  ;;  %v6147_v15 = vpop.f32.mrb[99].mxu1  ;;  %v3495_v13 = vsel %vm790_vm5, %v8739_v35, -inf }
 0xec0   :  { %3496 = vmax.xlane.f32.xlu0 %v3495_v13 }
 0xec1   :  { %v3498_v54 = vsel %vm790_vm5, %v8742_v60, -inf }
 0xec2   :  { %3499 = vmax.xlane.f32.xlu1 %v3498_v54 }
 0xed0   :  { %v3611_v31 = vpop.f32.mrb[100].mxu1 }
 0xed1   :  { %v8749_v40 = vadd.f32 %v3611_v31, %v9862_v33  ;;  %v6158_v50 = vpop.f32.mrb[101].mxu1 }
 0xed2   :  { %v3614_v17 = vpop.f32.mrb[102].mxu1  ;;  %v3244_v10 = vpop.xlane.xlu0 %3243 }
 0xed3   :  { %v8752_v62 = vadd.f32 %v3614_v17, %v9862_v33  ;;  %v6159_v28 = vpop.f32.mrb[103].mxu1  ;;  %v3618_v32 = vsel %vm790_vm5, %v8749_v40, -inf  ;;  %v3248_v37 = vsub.f32 %v3236_v57, %v3244_v10 }
 0xed4   :  { %3619 = vmax.xlane.f32.xlu0 %v3618_v32  ;;  %v3247_v26 = vpop.xlane.xlu1 %3246 }
 0xed5   :  { %v3621_v19 = vsel %vm790_vm5, %v8752_v62, -inf  ;;  %v3249_v16 = vsub.f32 %v3239_v38, %v3247_v26  ;;  %v3250_v0 = vmul.f32 1.442695, %v3248_v37 }
 0xed6   :  { %3622 = vmax.xlane.f32.xlu1 %v3621_v19 }
 0xed7   :  { %v3252_v48 = vmul.f32 1.442695, %v3249_v16  ;;  %6419 = vpow2.f32 %v3250_v0 }
 0xed8   :  { %v3741_v30 = vpop.f32.mrb[104].mxu1 }
 0xed9   :  { %v8759_v52 = vadd.f32 %v3741_v30, %v9862_v33  ;;  %v6170_v39 = vpop.f32.mrb[105].mxu1  ;;  %6421 = vpow2.f32 %v3252_v48 }
 0xeda   :  { %v3744_v45 = vpop.f32.mrb[106].mxu1 }
 0xedb   :  { %v8762_v1 = vadd.f32 %v3744_v45, %v9862_v33  ;;  %v6171_v56 = vpop.f32.mrb[107].mxu1  ;;  %v3748_v46 = vsel %vm790_vm5, %v8759_v52, -inf }
 0xedc   :  { %3749 = vmax.xlane.f32.xlu0 %v3748_v46 }
 0xedd   :  { %v3751_v14 = vsel %vm790_vm5, %v8762_v1, -inf }
 0xede   :  { %3752 = vmax.xlane.f32.xlu1 %v3751_v14 }
 0xee0   :  { %v3864_v41 = vpop.f32.mrb[108].mxu1 }
 0xee1   :  { %v8769_v57 = vadd.f32 %v3864_v41, %v9862_v33  ;;  %v6182_v44 = vpop.f32.mrb[109].mxu1  ;;  %v8781_v23 = vpop.eup %6419 }
 0xee2   :  { %v3867_v49 = vpop.f32.mrb[110].mxu1  ;;  %v3254_v13 = vsel %vm790_vm5, %v8781_v23, 0.0 }
 0xee3   :  { %v8772_v38 = vadd.f32 %v3867_v49, %v9862_v33  ;;  %v6183_v43 = vpop.f32.mrb[111].mxu1  ;;  %v3871_v8 = vsel %vm790_vm5, %v8769_v57, -inf  ;;  %v8788_v51 = vpop.eup %6421 }
 0xee4   :  { %3872 = vmax.xlane.f32.xlu0 %v3871_v8  ;;  %v3257_v54 = vsel %vm790_vm5, %v8788_v51, 0.0 }
 0xee5   :  { %v3874_v27 = vsel %vm790_vm5, %v8772_v38, -inf }
 0xee6   :  { %3875 = vmax.xlane.f32.xlu1 %v3874_v27 }
 0xee8   :  { %v3994_v25 = vpop.f32.mrb[112].mxu1 }
 0xee9   :  { %v8779_v22 = vadd.f32 %v3994_v25, %v9862_v33  ;;  %v6194_v5 = vpop.f32.mrb[113].mxu1 }
 0xeea   :  { %v3997_v24 = vpop.f32.mrb[114].mxu1 }
 0xeeb   :  { %v8784_v11 = vadd.f32 %v3997_v24, %v9862_v33  ;;  %v6195_v9 = vpop.f32.mrb[115].mxu1  ;;  %v4001_v20 = vsel %vm790_vm5, %v8779_v22, -inf }
 0xeec   :  { %4002 = vmax.xlane.f32.xlu0 %v4001_v20 }
 0xeed   :  { %v4004_v15 = vsel %vm790_vm5, %v8784_v11, -inf }
 0xeee   :  { %4005 = vmax.xlane.f32.xlu1 %v4004_v15 }
 0xef0   :  { %v4117_v31 = vpop.f32.mrb[116].mxu1  ;;  %3255 = vadd.xlane.f32.xlu0 %v3254_v13 }
 0xef1   :  { %v8797_v50 = vadd.f32 %v4117_v31, %v9862_v33  ;;  %v6206_v17 = vpop.f32.mrb[117].mxu1 }
 0xef2   :  { %3258 = vadd.xlane.f32.xlu1 %v3257_v54  ;;  %v4120_v28 = vpop.f32.mrb[118].mxu1 }
 0xef3   :  { %v8800_v32 = vadd.f32 %v4120_v28, %v9862_v33  ;;  %v6207_v19 = vpop.f32.mrb[119].mxu1  ;;  %v4124_v10 = vsel %vm790_vm5, %v8797_v50, -inf }
 0xef4   :  { %4125 = vmax.xlane.f32.xlu0 %v4124_v10 }
 0xef5   :  { %v4127_v26 = vsel %vm790_vm5, %v8800_v32, -inf }
 0xef6   :  { %4128 = vmax.xlane.f32.xlu1 %v4127_v26 }
 0xf45   :  { %v3367_v30 = vpop.xlane.xlu0 %3366 }
 0xf46   :  { %v3371_v37 = vsub.f32 %v8729_v61, %v3367_v30 }
 0xf48   :  { %v3373_v39 = vmul.f32 1.442695, %v3371_v37 }
 0xf49   :  { %v3370_v45 = vpop.xlane.xlu0 %3369 }
 0xf4a   :  { %6423 = vpow2.f32 %v3373_v39  ;;  %v3372_v16 = vsub.f32 %v8732_v29, %v3370_v45 }
 0xf4c   :  { %v3375_v56 = vmul.f32 1.442695, %v3372_v16 }
 0xf4d   :  { %v3497_v33 = vpop.xlane.xlu0 %3496 }
 0xf4e   :  { %6425 = vpow2.f32 %v3375_v56  ;;  %v3501_v46 = vsub.f32 %v8739_v35, %v3497_v33 }
 0xf4f   :  { %v3500_v0 = vpop.xlane.xlu1 %3499 }
 0xf50   :  { %v3503_v14 = vmul.f32 1.442695, %v3501_v46  ;;  %v3502_v48 = vsub.f32 %v8742_v60, %v3500_v0 }
 0xf52   :  { %6427 = vpow2.f32 %v3503_v14  ;;  %v3505_v41 = vmul.f32 1.442695, %v3502_v48 }
 0xf54   :  { %v8810_v44 = vpop.eup %6423  ;;  %6429 = vpow2.f32 %v3505_v41 }
 0xf55   :  { %v3377_v61 = vsel %vm790_vm5, %v8810_v44, 0.0 }
 0xf56   :  { %3378 = vadd.xlane.f32.xlu0 %v3377_v61 }
 0xf58   :  { %v8814_v49 = vpop.eup %6425 }
 0xf59   :  { %v3380_v29 = vsel %vm790_vm5, %v8814_v49, 0.0 }
 0xf5a   :  { %3381 = vadd.xlane.f32.xlu1 %v3380_v29 }
 0xf5c   :  { %v8818_v35 = vpop.eup %6427 }
 0xf5d   :  { %v3507_v60 = vsel %vm790_vm5, %v8818_v35, 0.0 }
 0xf5e   :  { %v8822_v43 = vpop.eup %6429  ;;  %3508 = vadd.xlane.f32.xlu0 %v3507_v60 }
 0xf5f   :  { %v3510_v8 = vsel %vm790_vm5, %v8822_v43, 0.0 }
 0xf60   :  { %3511 = vadd.xlane.f32.xlu1 %v3510_v8 }
 0xf61   :  { %v3620_v27 = vpop.xlane.xlu0 %3619 }
 0xf62   :  { %v3624_v25 = vsub.f32 %v8749_v40, %v3620_v27 }
 0xf63   :  { %v3623_v24 = vpop.xlane.xlu1 %3622 }
 0xf64   :  { %v3626_v5 = vmul.f32 1.442695, %v3624_v25  ;;  %v3625_v40 = vsub.f32 %v8752_v62, %v3623_v24 }
 0xf66   :  { %6431 = vpow2.f32 %v3626_v5  ;;  %v3628_v26 = vmul.f32 1.442695, %v3625_v40 }
 0xf69   :  { %v3750_v20 = vpop.xlane.xlu0 %3749 }
 0xf6b   :  { %v3753_v13 = vpop.xlane.xlu1 %3752 }
 0xf6c   :  { %v3755_v30 = vsub.f32 %v8762_v1, %v3753_v13 }
 0xf6e   :  { %v3758_v37 = vmul.f32 1.442695, %v3755_v30 }
 0xf70   :  { %v8827_v9 = vpop.eup %6431 }
 0xf71   :  { %3642 = vrot.lane.b32.xlu1 %v8680_v34, %s6606_s3  ;;  %v3630_v15 = vsel %vm790_vm5, %v8827_v9, 0.0  ;;  %v3873_v54 = vpop.xlane.xlu0 %3872 }
 0xf72   :  { %3631 = vadd.xlane.f32.xlu0 %v3630_v15  ;;  %v3877_v39 = vsub.f32 %v8769_v57, %v3873_v54 }
 0xf73   :  { %v3876_v31 = vpop.xlane.xlu1 %3875 }
 0xf74   :  { %v3879_v16 = vmul.f32 1.442695, %v3877_v39  ;;  %v3878_v56 = vsub.f32 %v8772_v38, %v3876_v31 }
 0xf76   :  { %v3881_v0 = vmul.f32 1.442695, %v3878_v56 }
 0xf79   :  { %v4003_v17 = vpop.xlane.xlu0 %4002 }
 0xf7a   :  { %v4007_v1 = vsub.f32 %v8779_v22, %v4003_v17 }
 0xf7b   :  { %v4006_v28 = vpop.xlane.xlu1 %4005 }
 0xf7c   :  { %v4009_v57 = vmul.f32 1.442695, %v4007_v1  ;;  %v4008_v38 = vsub.f32 %v8784_v11, %v4006_v28 }
 0xf7d   :  { %v3256_v19 = vpop.xlane.xlu0 %3255 }
 0xf7e   :  { %6433 = vrcp.f32 %v3256_v19 }
 0xf7f   :  { %v3259_v10 = vpop.xlane.xlu1 %3258 }
 0xf80   :  { %6435 = vrcp.f32 %v3259_v10 }
 0xf81   :  { %6437 = vpow2.f32 %v3628_v26 }
 0xf82   :  { %6439 = vpow2.f32 %v3758_v37 }
 0xf83   :  { %6441 = vpow2.f32 %v3879_v16 }
 0xf84   :  { %6443 = vpow2.f32 %v3881_v0 }
 0xf85   :  { %6445 = vpow2.f32 %v4009_v57 }
 0xf88   :  { %3389 = vrot.lane.b32.xlu0 %v8682_v7, %s6606_s3  ;;  %v6434_v45 = vpop.eup %6433  ;;  %v3754_v7 = vsub.f32 %v8759_v52, %v3750_v20  ;;  %v4011_v52 = vmul.f32 1.442695, %v4008_v38 }
 0xf89   :  { %v3262_v62 = vmul.f32 %v6434_v45, %v8781_v23  ;;  %v4126_v23 = vpop.xlane.xlu0 %4125 }
 0xf8a   :  { %v6436_v33 = vpop.eup %6435  ;;  %v3756_v61 = vmul.f32 1.442695, %v3754_v7  ;;  %v4130_v29 = vsub.f32 %v8797_v50, %v4126_v23 }
 0xf8b   :  { %v3263_v46 = vmul.f32 %v6436_v33, %v8788_v51  ;;  %v8842_v48 = vpop.eup %6437  ;;  %v4129_v51 = vpop.xlane.xlu1 %4128 }
 0xf8c   :  { %v3633_v41 = vsel %vm790_vm5, %v8842_v48, 0.0  ;;  %v8851_v22 = vpop.eup %6439  ;;  %v4131_v60 = vsub.f32 %v8800_v32, %v4129_v51  ;;  %6447 = vpow2.f32 %v3756_v61  ;;  %v4132_v11 = vmul.f32 1.442695, %v4130_v29 }
 0xf8d   :  { %v3264_v14 = vpack.c.bf16 %v3263_v46, %v3262_v62  ;;  %v3763_v8 = vsel %vm790_vm5, %v8851_v22, 0.0  ;;  %v8857_v27 = vpop.eup %6441  ;;  %6449 = vpow2.f32 %v4011_v52 }
 0xf8e   :  { %v4134_v25 = vmul.f32 1.442695, %v4131_v60  ;;  %v3883_v5 = vsel %vm790_vm5, %v8857_v27, 0.0  ;;  %v8861_v24 = vpop.eup %6443  ;;  %6451 = vpow2.f32 %v4132_v11 }
 0xf8f   :  { %6127 = vmatmul.mubr.msk.bf16.vlgmr.msra.gmra.mrb[108].mxu0 %vm790_vm5, %v3264_v14  ;;  %v3886_v50 = vsel %vm790_vm5, %v8861_v24, 0.0  ;;  %v8865_v32 = vpop.eup %6445 }
 0xf90   :  { %6138 = vmatprep.mubr.msk.bf16.mxu0 %vm6604_vm0, %v9854_v63  ;;  %6453 = vpow2.f32 %v4134_v25  ;;  %v4013_v15 = vsel %vm790_vm5, %v8865_v32, 0.0 }
 0xf95   :  { %3634 = vadd.xlane.f32.xlu1 %v3633_v41 }
 0xf96   :  { %v8867_v20 = vpop.eup %6447 }
 0xf97   :  { %v8871_v13 = vpop.eup %6449  ;;  %v3760_v54 = vsel %vm790_vm5, %v8867_v20, 0.0 }
 0xf98   :  { %v8875_v31 = vpop.eup %6451  ;;  %v4016_v17 = vsel %vm790_vm5, %v8871_v13, 0.0 }
 0xf99   :  { %3764 = vadd.xlane.f32.xlu1 %v3763_v8  ;;  %v4136_v19 = vsel %vm790_vm5, %v8875_v31, 0.0 }
 0xf9a   :  { %v8879_v28 = vpop.eup %6453 }
 0xf9b   :  { %v4139_v40 = vsel %vm790_vm5, %v8879_v28, 0.0 }
 0xf9d   :  { %3884 = vadd.xlane.f32.xlu1 %v3883_v5 }
 0xfa1   :  { %3887 = vadd.xlane.f32.xlu1 %v3886_v50 }
 0xfa5   :  { %4014 = vadd.xlane.f32.xlu1 %v4013_v15 }
 0xfa7   :  { %3761 = vadd.xlane.f32.xlu0 %v3760_v54 }
 0xfa9   :  { %4017 = vadd.xlane.f32.xlu1 %v4016_v17 }
 0xfab   :  { %4137 = vadd.xlane.f32.xlu0 %v4136_v19 }
 0xfad   :  { %4140 = vadd.xlane.f32.xlu1 %v4139_v40 }
 0xfbe   :  { %4148 = vrot.lane.b32.xlu1 %v8686_v36, %s6606_s3 }
 0xfc1   :  { %3895 = vrot.lane.b32.xlu0 %v8688_v58, %s6606_s3 }
 0xfe3   :  { %v3379_v26 = vpop.xlane.xlu0 %3378 }
 0xfe7   :  { %v3382_v10 = vpop.xlane.xlu1 %3381 }
 0xfe8   :  { %6455 = vrcp.f32 %v3382_v10 }
 0xfe9   :  { %6457 = vrcp.f32 %v3379_v26 }
 0xfeb   :  { %v3509_v37 = vpop.xlane.xlu0 %3508 }
 0xfed   :  { %v3512_v30 = vpop.xlane.xlu1 %3511 }
 0xfee   :  { %6459 = vrcp.f32 %v3512_v30 }
 0xfef   :  { %6461 = vrcp.f32 %v3509_v37 }
 0xff1   :  { %v3643_v7 = vpop.permute.xlu1 %3642 }
 0xff2   :  { %v6456_v39 = vpop.eup %6455 }
 0xff3   :  { %v6458_v16 = vpop.eup %6457  ;;  %v3386_v56 = vmul.f32 %v6456_v39, %v8814_v49 }
 0xff4   :  { %v3385_v33 = vmul.f32 %v6458_v16, %v8810_v44 }
 0xff6   :  { %v3387_v46 = vpack.c.bf16 %v3386_v56, %v3385_v33 }
 0xff8   :  { %v6460_v0 = vpop.eup %6459 }
 0xff9   :  { %v6462_v1 = vpop.eup %6461  ;;  %v3516_v14 = vmul.f32 %v6460_v0, %v8822_v43 }
 0xffa   :  { %v3515_v44 = vmul.f32 %v6462_v1, %v8818_v35 }
 0xffc   :  { %v3517_v49 = vpack.c.bf16 %v3516_v14, %v3515_v44  ;;  %v5458_v14 = vld [vmem:[%s9794_s10 + $0x98] sm:$0xff] }
 0xfff   :  { %v3632_v45 = vpop.xlane.xlu0 %3631 }
0x1000   :  { %6463 = vrcp.f32 %v3632_v45 }
0x1003   :  { %v3390_v62 = vpop.permute.xlu0 %3389 }
0x1004   :  { %6137 = vmatpush3.bf16.msra.mxu0 %v3390_v62  ;;  %v5456_v62 = vld [vmem:[%s9794_s10 + $0x88] sm:$0xff] }
0x1005   :  { %6148 = vmatprep.subr.bf16.mxu0 %v9854_v63 }
0x1007   :  { %6139 = vmatmul.mubr.msk.bf16.vlgmr.msra.gmra.mrb[112].mxu0 %vm790_vm5, %v3387_v46  ;;  %v5457_v46 = vld [vmem:[%s9794_s10 + $0x90] sm:$0xff] }
0x1008   :  { %6149 = vmatpush3.bf16.msra.mxu0 %v8680_v34  ;;  %6150 = vmatprep.mubr.msk.bf16.mxu0 %vm6604_vm0, %v9854_v63  ;;  %v4235_v44 = vpack.c.bf16 %v5458_v14, %v5457_v46 }
0x1009   :  { %6160 = vmatprep.subr.bf16.mxu0 %v9854_v63 }
0x100a   :  { %v6464_v38 = vpop.eup %6463 }
0x100b   :  { %v3638_v51 = vmul.f32 %v6464_v38, %v8827_v9  ;;  %v5461_v38 = vld [vmem:[%s9794_s10 + $0xb0] sm:$0xff] }
0x100f   :  { %6151 = vmatmul.mubr.msk.bf16.vlgmr.msra.gmra.mrb[116].mxu0 %vm790_vm5, %v3517_v49  ;;  %v5459_v49 = vld [vmem:[%s9794_s10 + $0xa0] sm:$0xff] }
0x1010   :  { %6161 = vmatpush3.bf16.msra.mxu0 %v3643_v7  ;;  %6162 = vmatprep.mubr.msk.bf16.mxu0 %vm6604_vm0, %v9854_v63  ;;  %v5460_v7 = vld [vmem:[%s9794_s10 + $0xa8] sm:$0xff] }
0x1011   :  { %6172 = vmatprep.subr.bf16.mxu0 %v9854_v63 }
0x1022   :  { %v3635_v34 = vpop.xlane.xlu1 %3634 }
0x1023   :  { %6465 = vrcp.f32 %v3635_v34  ;;  %v4236_v34 = vpack.c.bf16 %v5460_v7, %v5459_v49 }
0x1026   :  { %v3765_v57 = vpop.xlane.xlu1 %3764 }
0x1027   :  { %6467 = vrcp.f32 %v3765_v57 }
0x102a   :  { %v3885_v23 = vpop.xlane.xlu1 %3884 }
0x102d   :  { %v6466_v43 = vpop.eup %6465 }
0x102e   :  { %v3639_v35 = vmul.f32 %v6466_v43, %v8842_v48  ;;  %v3888_v61 = vpop.xlane.xlu1 %3887  ;;  %v5462_v43 = vld [vmem:[%s9794_s10 + $0xb8] sm:$0xff] }
0x1030   :  { %v3640_v41 = vpack.c.bf16 %v3639_v35, %v3638_v51 }
0x1031   :  { %v6468_v9 = vpop.eup %6467 }
0x1032   :  { %6163 = vmatmul.mubr.msk.bf16.vlgmr.msra.gmra.mrb[120].mxu0 %vm790_vm5, %v3640_v41  ;;  %v4015_v52 = vpop.xlane.xlu1 %4014  ;;  %v3769_v11 = vmul.f32 %v6468_v9, %v8851_v22  ;;  %v4237_v41 = vpack.c.bf16 %v5462_v43, %v5461_v38  ;;  %v5465_v9 = vld [vmem:[%s9794_s10 + $0xd0] sm:$0xff] }
0x1033   :  { %6173 = vmatpush3.bf16.msra.mxu0 %v8688_v58  ;;  %6174 = vmatprep.mubr.msk.bf16.mxu0 %vm6604_vm0, %v9854_v63 }
0x1034   :  { %6184 = vmatprep.subr.bf16.mxu0 %v9854_v63  ;;  %v3762_v29 = vpop.xlane.xlu0 %3761 }
0x1035   :  { %6469 = vrcp.f32 %v3762_v29  ;;  %v5464_v29 = vld [vmem:[%s9794_s10 + $0xc8] sm:$0xff] }
0x1036   :  { %6471 = vrcp.f32 %v3888_v61  ;;  %v4018_v48 = vpop.xlane.xlu1 %4017  ;;  %v5463_v61 = vld [vmem:[%s9794_s10 + $0xc0] sm:$0xff] }
0x1037   :  { %6473 = vrcp.f32 %v3885_v23 }
0x1038   :  { %v4138_v60 = vpop.xlane.xlu0 %4137  ;;  %6475 = vrcp.f32 %v4018_v48 }
0x1039   :  { %6477 = vrcp.f32 %v4015_v52  ;;  %v4238_v52 = vpack.c.bf16 %v5464_v29, %v5463_v61  ;;  %v5472_v61 = vld [vmem:[%s9795_s11 + $0x1] ss:$0 sm:$0xff] }
0x103a   :  { %v4141_v17 = vpop.xlane.xlu1 %4140 }
0x103b   :  { %6479 = vrcp.f32 %v4141_v17 }
0x103c   :  { %v3896_v50 = vpop.permute.xlu0 %3895  ;;  %6481 = vrcp.f32 %v4138_v60  ;;  %v5466_v60 = vld [vmem:[%s9794_s10 + $0xd8] sm:$0xff] }
0x103d   :  { %v4239_v48 = vpack.c.bf16 %v5466_v60, %v5465_v9 }
0x103e   :  { %v4149_v30 = vpop.permute.xlu1 %4148 }
0x103f   :  { %v6470_v8 = vpop.eup %6469 }
0x1040   :  { %v3768_v25 = vmul.f32 %v6470_v8, %v8867_v20  ;;  %v6472_v5 = vpop.eup %6471  ;;  %v5467_v8 = vld [vmem:[%s9794_s10 + $0xe0] sm:$0xff] }
0x1041   :  { %v6474_v15 = vpop.eup %6473  ;;  %v3892_v54 = vmul.f32 %v6472_v5, %v8861_v24  ;;  %v5470_v5 = vld [vmem:[%s9794_s10 + $0xf8] sm:$0xff] }
0x1042   :  { %v3770_v58 = vpack.c.bf16 %v3769_v11, %v3768_v25  ;;  %v3891_v22 = vmul.f32 %v6474_v15, %v8857_v27  ;;  %v6476_v19 = vpop.eup %6475  ;;  %v5468_v11 = vld [vmem:[%s9794_s10 + $0xe8] sm:$0xff]  ;;  %v5469_v25 = vld [vmem:[%s9794_s10 + $0xf0] sm:$0xff] }
0x1043   :  { %v6478_v40 = vpop.eup %6477  ;;  %v4022_v10 = vmul.f32 %v6476_v19, %v8871_v13 }
0x1044   :  { %6175 = vmatmul.mubr.msk.bf16.vlgmr.msra.gmra.mrb[124].mxu0 %vm790_vm5, %v3770_v58  ;;  %v3893_v20 = vpack.c.bf16 %v3892_v54, %v3891_v22  ;;  %v4021_v24 = vmul.f32 %v6478_v40, %v8865_v32  ;;  %v4240_v58 = vpack.c.bf16 %v5468_v11, %v5467_v8 }
0x1045   :  { %6185 = vmatpush3.bf16.msra.mxu0 %v3896_v50  ;;  %6186 = vmatprep.mubr.msk.bf16.mxu0 %vm6604_vm0, %v9854_v63  ;;  %v6480_v27 = vpop.eup %6479  ;;  %v4241_v50 = vpack.c.bf16 %v5470_v5, %v5469_v25 }
0x1046   :  { %6196 = vmatprep.subr.bf16.mxu0 %v9854_v63  ;;  %v4023_v26 = vpack.c.bf16 %v4022_v10, %v4021_v24  ;;  %v6482_v37 = vpop.eup %6481 }
0x1047   :  { %v4144_v39 = vmul.f32 %v6482_v37, %v8875_v31  ;;  %v5455_v31 = vld [vmem:[%s9794_s10 + $0x80] sm:$0xff] }
0x1048   :  { %v4234_v1 = vpack.c.bf16 %v5456_v62, %v5455_v31 }
0x104a   :  { %6214 = vmatprep.subr.bf16.mxu1 %v4234_v1 }
0x104b   :  { %6215 = vmatpush3.bf16.msra.mxu1 %v4234_v1 }
0x104c   :  { %6187 = vmatmul.mubr.msk.bf16.vlgmr.msra.gmra.mrb[128].mxu0 %vm790_vm5, %v3893_v20  ;;  %6216 = vmatprep.subr.bf16.mxu1 %v4235_v44 }
0x104d   :  { %6197 = vmatpush3.bf16.msra.mxu0 %v8686_v36  ;;  %6198 = vmatprep.mubr.msk.bf16.mxu0 %vm6604_vm0, %v9854_v63  ;;  %v4145_v36 = vmul.f32 %v6480_v27, %v8879_v28 }
0x104e   :  { %6208 = vmatprep.subr.bf16.mxu0 %v9854_v63 }
0x104f   :  { %v4146_v45 = vpack.c.bf16 %v4145_v36, %v4144_v39  ;;  %6217 = vmatpush3.bf16.msra.mxu1 %v4235_v44 }
0x1050   :  { %6218 = vmatprep.subr.bf16.mxu1 %v4236_v34 }
0x1053   :  { %6219 = vmatpush3.bf16.msra.mxu1 %v4236_v34 }
0x1054   :  { %6199 = vmatmul.mubr.msk.bf16.vlgmr.msra.gmra.mrb[132].mxu0 %vm790_vm5, %v4023_v26  ;;  %6220 = vmatprep.subr.bf16.mxu1 %v4237_v41 }
0x1055   :  { %6209 = vmatpush3.bf16.msra.mxu0 %v4149_v30  ;;  %6210 = vmatprep.mubr.msk.bf16.mxu0 %vm6604_vm0, %v9854_v63 }
0x1057   :  { %6221 = vmatpush3.bf16.msra.mxu1 %v4237_v41 }
0x1058   :  { %6222 = vmatprep.subr.bf16.mxu1 %v4238_v52 }
0x105b   :  { %6223 = vmatpush3.bf16.msra.mxu1 %v4238_v52  ;;  %v5474_v52 = vld [vmem:[%s9796_s12 + $0x1] ss:$0 sm:$0xff] }
0x105c   :  { %6211 = vmatmul.mubr.msk.bf16.vlgmr.msra.gmra.mrb[136].mxu0 %vm790_vm5, %v4146_v45  ;;  %6224 = vmatprep.subr.bf16.mxu1 %v4239_v48 }
0x105d   :  { %4615 = vmatprep.mubr.bf16.mxu0 %v9853_v55 }
0x105f   :  { %6225 = vmatpush3.bf16.msra.mxu1 %v4239_v48 }
0x1060   :  { %6226 = vmatprep.subr.bf16.mxu1 %v4240_v58 }
0x1062   :  { %v3303_v32 = vpop.f32.mrb[108].mxu0 }
0x1063   :  { %3310 = vst.msk [vmem:[#allocation3] sm:$0xff] %vm742_vm3, %v3303_v32  ;;  %v6128_v13 = vpop.f32.mrb[109].mxu0  ;;  %6227 = vmatpush3.bf16.msra.mxu1 %v4240_v58 }
0x1064   :  { %v3306_v16 = vpop.f32.mrb[110].mxu0  ;;  %6228 = vmatprep.subr.bf16.mxu1 %v4241_v50 }
0x1065   :  { %3311 = vst.msk [vmem:[#allocation3 + $0x8] sm:$0xff] %vm742_vm3, %v3306_v16  ;;  %v6129_v56 = vpop.f32.mrb[111].mxu0 }
0x1067   :  { %6229 = vmatpush3.bf16.msra.mxu1 %v4241_v50 }
0x10da   :  { %v3429_v33 = vpop.f32.mrb[112].mxu0 }
0x10db   :  { %3438 = vrot.lane.b32.xlu0 %v3429_v33, %s6606_s3  ;;  %v6140_v63 = vpop.f32.mrb[113].mxu0 }
0x10dc   :  { %v3432_v28 = vpop.f32.mrb[114].mxu0 }
0x10dd   :  { %v6141_v0 = vpop.f32.mrb[115].mxu0 }
0x10df   :  { %3440 = vrot.lane.b32.xlu0 %v3432_v28, %s6606_s3 }
0x10e2   :  { %v3556_v57 = vpop.f32.mrb[116].mxu0 }
0x10e3   :  { %3563 = vst.msk [vmem:[#allocation3 + $0x10] sm:$0xff] %vm742_vm3, %v3556_v57  ;;  %v6152_v23 = vpop.f32.mrb[117].mxu0 }
0x10e4   :  { %v3559_v51 = vpop.f32.mrb[118].mxu0 }
0x10e5   :  { %3564 = vst.msk [vmem:[#allocation3 + $0x18] sm:$0xff] %vm742_vm3, %v3559_v51  ;;  %v6153_v35 = vpop.f32.mrb[119].mxu0 }
0x1105   :  { %v3682_v15 = vpop.f32.mrb[120].mxu0 }
0x1106   :  { %3691 = vrot.lane.b32.xlu0 %v3682_v15, %s6606_s3  ;;  %v6164_v54 = vpop.f32.mrb[121].mxu0 }
0x1107   :  { %v3685_v17 = vpop.f32.mrb[122].mxu0 }
0x1108   :  { %3693 = vrot.lane.b32.xlu1 %v3685_v17, %s6606_s3  ;;  %v6165_v22 = vpop.f32.mrb[123].mxu0 }
0x1117   :  { %v3809_v20 = vpop.f32.mrb[124].mxu0 }
0x1118   :  { %3816 = vst.msk [vmem:[#allocation3 + $0x20] sm:$0xff] %vm742_vm3, %v3809_v20  ;;  %v6176_v19 = vpop.f32.mrb[125].mxu0 }
0x1119   :  { %v3812_v40 = vpop.f32.mrb[126].mxu0 }
0x111a   :  { %3817 = vst.msk [vmem:[#allocation3 + $0x28] sm:$0xff] %vm742_vm3, %v3812_v40  ;;  %v6177_v10 = vpop.f32.mrb[127].mxu0 }
0x111f   :  { %v3935_v24 = vpop.f32.mrb[128].mxu0 }
0x1120   :  { %3944 = vrot.lane.b32.xlu0 %v3935_v24, %s6606_s3  ;;  %v6188_v26 = vpop.f32.mrb[129].mxu0 }
0x1121   :  { %v3938_v27 = vpop.f32.mrb[130].mxu0 }
0x1122   :  { %3946 = vrot.lane.b32.xlu1 %v3938_v27, %s6606_s3  ;;  %v6189_v30 = vpop.f32.mrb[131].mxu0 }
0x1127   :  { %v4062_v37 = vpop.f32.mrb[132].mxu0 }
0x1128   :  { %4069 = vst.msk [vmem:[#allocation3 + $0x30] sm:$0xff] %vm742_vm3, %v4062_v37  ;;  %v6200_v36 = vpop.f32.mrb[133].mxu0 }
0x1129   :  { %v4065_v39 = vpop.f32.mrb[134].mxu0 }
0x112a   :  { %4070 = vst.msk [vmem:[#allocation3 + $0x38] sm:$0xff] %vm742_vm3, %v4065_v39  ;;  %v6201_v45 = vpop.f32.mrb[135].mxu0 }
0x112f   :  { %v4188_v32 = vpop.f32.mrb[136].mxu0 }
0x1130   :  { %4197 = vrot.lane.b32.xlu0 %v4188_v32, %s6606_s3  ;;  %v6212_v13 = vpop.f32.mrb[137].mxu0 }
0x1131   :  { %v4191_v16 = vpop.f32.mrb[138].mxu0 }
0x1132   :  { %4199 = vrot.lane.b32.xlu1 %v4191_v16, %s6606_s3  ;;  %v6213_v56 = vpop.f32.mrb[139].mxu0 }
0x1133   :  { %v5479_v56 = vld [vmem:[%s9799_s15 + $0x200] sm:$0xff] }
0x114d   :  { %v3439_v33 = vpop.permute.xlu0 %3438 }
0x114e   :  { %3444 = vst.msk [vmem:[#allocation3] sm:$0xff] %vm993_vm6, %v3439_v33  ;;  %v5483_v33 = vld [vmem:[%s9799_s15 + $0x220] sm:$0xff] }
0x1151   :  { %v3441_v63 = vpop.permute.xlu0 %3440 }
0x1152   :  { %3445 = vst.msk [vmem:[#allocation3 + $0x8] sm:$0xff] %vm993_vm6, %v3441_v63 }
0x1155   :  { %v4205_v28 = vld [vmem:[#allocation3] sm:$0xff] }
0x1159   :  { %v4206_v31 = vld [vmem:[#allocation3 + $0x8] sm:$0xff] }
0x115a   :  { %v4230_v62 = vpack.c.bf16 %v4206_v31, %v4205_v28  ;;  %v4528_v28 = vpack.c.bf16 %v5483_v33, %v5479_v56  ;;  %v5481_v31 = vld [vmem:[%s9799_s15 + $0x210] sm:$0xff]  ;;  %v5507_v56 = vld [vmem:[%s9799_s15 + $0x2e0] sm:$0xff] }
0x115b   :  { %v5505_v33 = vld [vmem:[%s9799_s15 + $0x2d0] sm:$0xff] }
0x115c   :  { %6230 = vmatprep.mubr.bf16.mxu1 %v4230_v62  ;;  %v5485_v62 = vld [vmem:[%s9799_s15 + $0x230] sm:$0xff] }
0x1178   :  { %v3692_v46 = vpop.permute.xlu0 %3691 }
0x1179   :  { %3697 = vst.msk [vmem:[#allocation3 + $0x10] sm:$0xff] %vm993_vm6, %v3692_v46  ;;  %v5488_v46 = vld [vmem:[%s9799_s15 + $0x248] sm:$0xff] }
0x117a   :  { %v3694_v0 = vpop.permute.xlu1 %3693 }
0x117b   :  { %3698 = vst.msk [vmem:[#allocation3 + $0x18] sm:$0xff] %vm993_vm6, %v3694_v0  ;;  %v4530_v0 = vpack.c.bf16 %v5485_v62, %v5481_v31  ;;  %v5512_v62 = vld [vmem:[%s9799_s15 + $0x308] sm:$0xff] }
0x1180   :  { %v4207_v1 = vld [vmem:[#allocation3 + $0x10] sm:$0xff] }
0x1182   :  { %v4208_v14 = vld [vmem:[#allocation3 + $0x18] sm:$0xff] }
0x1183   :  { %v4231_v44 = vpack.c.bf16 %v4208_v14, %v4207_v1  ;;  %v5492_v1 = vld [vmem:[%s9799_s15 + $0x268] sm:$0xff]  ;;  %v5490_v14 = vld [vmem:[%s9799_s15 + $0x258] sm:$0xff] }
0x1185   :  { %6231 = vmatmul.mubr.bf16.vlgmr.msra.gmra.mrb[120].mxu1 %v4231_v44  ;;  %v5494_v44 = vld [vmem:[%s9799_s15 + $0x278] sm:$0xff] }
0x1192   :  { %v3945_v49 = vpop.permute.xlu0 %3944 }
0x1193   :  { %3950 = vst.msk [vmem:[#allocation3 + $0x20] sm:$0xff] %vm993_vm6, %v3945_v49  ;;  %v4533_v49 = vpack.c.bf16 %v5492_v1, %v5488_v46  ;;  %v5516_v46 = vld [vmem:[%s9799_s15 + $0x328] sm:$0xff] }
0x1194   :  { %v3947_v7 = vpop.permute.xlu1 %3946 }
0x1195   :  { %3951 = vst.msk [vmem:[#allocation3 + $0x28] sm:$0xff] %vm993_vm6, %v3947_v7  ;;  %v4535_v7 = vpack.c.bf16 %v5494_v44, %v5490_v14  ;;  %v4545_v14 = vpack.c.bf16 %v5516_v46, %v5512_v62  ;;  %v5518_v44 = vld [vmem:[%s9799_s15 + $0x338] sm:$0xff] }
0x1196   :  { %v5538_v62 = vld [vmem:[%s9799_s15 + $0x3d8] sm:$0xff] }
0x1197   :  { %v5542_v46 = vld [vmem:[%s9799_s15 + $0x3f8] sm:$0xff] }
0x119a   :  { %v4209_v34 = vld [vmem:[#allocation3 + $0x20] sm:$0xff] }
0x119c   :  { %v4210_v57 = vld [vmem:[#allocation3 + $0x28] sm:$0xff] }
0x119d   :  { %v4232_v38 = vpack.c.bf16 %v4210_v57, %v4209_v34  ;;  %v5487_v34 = vld [vmem:[%s9799_s15 + $0x240] sm:$0xff] }
0x119e   :  { %v5491_v57 = vld [vmem:[%s9799_s15 + $0x260] sm:$0xff] }
0x119f   :  { %6234 = vmatprep.mubr.bf16.mxu1 %v4232_v38  ;;  %v5489_v38 = vld [vmem:[%s9799_s15 + $0x250] sm:$0xff] }
0x11a2   :  { %v4198_v43 = vpop.permute.xlu0 %4197 }
0x11a3   :  { %4203 = vst.msk [vmem:[#allocation3 + $0x30] sm:$0xff] %vm993_vm6, %v4198_v43  ;;  %v4532_v43 = vpack.c.bf16 %v5491_v57, %v5487_v34 }
0x11a4   :  { %v4200_v23 = vpop.permute.xlu1 %4199 }
0x11a5   :  { %4204 = vst.msk [vmem:[#allocation3 + $0x38] sm:$0xff] %vm993_vm6, %v4200_v23  ;;  %v5493_v23 = vld [vmem:[%s9799_s15 + $0x270] sm:$0xff] }
0x11aa   :  { %v4211_v51 = vld [vmem:[#allocation3 + $0x30] sm:$0xff] }
0x11ac   :  { %v4212_v35 = vld [vmem:[#allocation3 + $0x38] sm:$0xff] }
0x11ad   :  { %v4233_v41 = vpack.c.bf16 %v4212_v35, %v4211_v51  ;;  %v4534_v51 = vpack.c.bf16 %v5493_v23, %v5489_v38  ;;  %v5513_v38 = vld [vmem:[%s9799_s15 + $0x310] sm:$0xff]  ;;  %v5520_v23 = vld [vmem:[%s9799_s15 + $0x348] sm:$0xff] }
0x11af   :  { %6235 = vmatmul.mubr.bf16.gmra.mrb[124].mxu1 %v4233_v41 }
0x11b0   :  { %4688 = vmatprep.mubr.bf16.mxu1 %v9853_v55 }
0x1258   :  { %v6232_v29 = vpop.f32.mrb[120].mxu1 }
0x1259   :  { %v4284_v9 = vpop.f32.mrb[121].mxu1  ;;  %v4293_v60 = vadd.f32 %v6232_v29, %v5472_v61 }
0x125a   :  { %v4285_v48 = vadd.f32 %v5472_v61, %v4284_v9  ;;  %v6233_v8 = vpop.f32.mrb[122].mxu1 }
0x125b   :  { %v4287_v11 = vpop.f32.mrb[123].mxu1  ;;  %v4325_v5 = vmul.f32 %v5474_v52, %v4293_v60  ;;  %v4296_v50 = vadd.f32 %v6233_v8, %v5472_v61 }
0x125c   :  { %v4323_v25 = vmul.f32 %v5474_v52, %v4285_v48  ;;  %v4288_v58 = vadd.f32 %v5472_v61, %v4287_v11 }
0x125d   :  { %v4326_v22 = vmul.f32 %v5474_v52, %v4296_v50  ;;  %v9020_v20 = vadd.f32 %v4325_v5, %v8396_v21 }
0x125e   :  { %v4324_v15 = vmul.f32 %v5474_v52, %v4288_v58  ;;  %v9012_v54 = vadd.f32 %v4323_v25, %v8384_v59 }
0x125f   :  { %v9024_v19 = vadd.f32 %v4326_v22, %v8400_v53  ;;  %v5496_v22 = vld [vmem:[%s9799_s15 + $0x288] sm:$0xff] }
0x1260   :  { %4343 = vadd.xlane.f32.xlu0 %v9012_v54  ;;  %v9016_v17 = vadd.f32 %v4324_v15, %v8388_v47 }
0x1262   :  { %4345 = vadd.xlane.f32.xlu1 %v9016_v17 }
0x1264   :  { %4347 = vadd.xlane.f32.xlu0 %v9020_v20 }
0x1268   :  { %4349 = vadd.xlane.f32.xlu0 %v9024_v19 }
0x1282   :  { %v6236_v59 = vpop.f32.mrb[124].mxu1 }
0x1283   :  { %v4300_v40 = vpop.f32.mrb[125].mxu1  ;;  %v4309_v10 = vadd.f32 %v6236_v59, %v5472_v61  ;;  %v5500_v59 = vld [vmem:[%s9799_s15 + $0x2a8] sm:$0xff] }
0x1284   :  { %v4301_v24 = vadd.f32 %v5472_v61, %v4300_v40  ;;  %v6237_v26 = vpop.f32.mrb[126].mxu1  ;;  %v5498_v40 = vld [vmem:[%s9799_s15 + $0x298] sm:$0xff] }
0x1285   :  { %v4303_v47 = vpop.f32.mrb[127].mxu1  ;;  %v4312_v30 = vadd.f32 %v6237_v26, %v5472_v61  ;;  %v4329_v36 = vmul.f32 %v5474_v52, %v4309_v10  ;;  %v4537_v10 = vpack.c.bf16 %v5500_v59, %v5496_v22  ;;  %v5495_v26 = vld [vmem:[%s9799_s15 + $0x280] sm:$0xff]  ;;  %v5521_v22 = vld [vmem:[%s9799_s15 + $0x350] sm:$0xff] }
0x1286   :  { %v4327_v27 = vmul.f32 %v5474_v52, %v4301_v24  ;;  %v4304_v37 = vadd.f32 %v5472_v61, %v4303_v47  ;;  %v5499_v47 = vld [vmem:[%s9799_s15 + $0x2a0] sm:$0xff]  ;;  %v5525_v59 = vld [vmem:[%s9799_s15 + $0x370] sm:$0xff] }
0x1287   :  { %v4330_v45 = vmul.f32 %v5474_v52, %v4312_v30  ;;  %v9036_v32 = vadd.f32 %v4329_v36, %v8420_v18  ;;  %v5482_v18 = vld [vmem:[%s9799_s15 + $0x218] sm:$0xff]  ;;  %v4536_v30 = vpack.c.bf16 %v5499_v47, %v5495_v26  ;;  %v5504_v36 = vld [vmem:[%s9799_s15 + $0x2c8] sm:$0xff] }
0x1288   :  { %v4328_v39 = vmul.f32 %v5474_v52, %v4304_v37  ;;  %v9028_v21 = vadd.f32 %v4327_v27, %v8408_v2  ;;  %v5480_v2 = vld [vmem:[%s9799_s15 + $0x208] sm:$0xff]  ;;  %v5497_v27 = vld [vmem:[%s9799_s15 + $0x290] sm:$0xff]  ;;  %v5530_v47 = vld [vmem:[%s9799_s15 + $0x398] sm:$0xff] }
0x1289   :  { %v9040_v13 = vadd.f32 %v4330_v45, %v8424_v4  ;;  %v5486_v4 = vld [vmem:[%s9799_s15 + $0x238] sm:$0xff]  ;;  %v5501_v37 = vld [vmem:[%s9799_s15 + $0x2b0] sm:$0xff]  ;;  %v5532_v26 = vld [vmem:[%s9799_s15 + $0x3a8] sm:$0xff] }
0x128a   :  { %4351 = vadd.xlane.f32.xlu0 %v9028_v21  ;;  %v9032_v53 = vadd.f32 %v4328_v39, %v8412_v42  ;;  %v5484_v42 = vld [vmem:[%s9799_s15 + $0x228] sm:$0xff]  ;;  %v4531_v63 = vpack.c.bf16 %v5486_v4, %v5482_v18  ;;  %v4538_v45 = vpack.c.bf16 %v5501_v37, %v5497_v27  ;;  %v5510_v18 = vld [vmem:[%s9799_s15 + $0x2f8] sm:$0xff] }
0x128b   :  { %v4529_v16 = vpack.c.bf16 %v5484_v42, %v5480_v2  ;;  %v5508_v39 = vld [vmem:[%s9799_s15 + $0x2e8] sm:$0xff]  ;;  %v5506_v42 = vld [vmem:[%s9799_s15 + $0x2d8] sm:$0xff] }
0x128c   :  { %4353 = vadd.xlane.f32.xlu1 %v9032_v53  ;;  %4656 = vmatprep.subr.bf16.mxu1 %v4531_v63  ;;  %v4541_v2 = vpack.c.bf16 %v5508_v39, %v5504_v36  ;;  %v4543_v4 = vpack.c.bf16 %v5510_v18, %v5506_v42  ;;  %v5509_v63 = vld [vmem:[%s9799_s15 + $0x2f0] sm:$0xff]  ;;  %v5534_v27 = vld [vmem:[%s9799_s15 + $0x3b8] sm:$0xff]  ;;  %v5531_v42 = vld [vmem:[%s9799_s15 + $0x3a0] sm:$0xff] }
0x128d   :  { %4583 = vmatprep.subr.bf16.mxu0 %v4529_v16  ;;  %4657 = vmatpush1.bf16.msra.mxu1 %v4530_v0  ;;  %v5503_v16 = vld [vmem:[%s9799_s15 + $0x2c0] sm:$0xff]  ;;  %v4542_v31 = vpack.c.bf16 %v5509_v63, %v5505_v33  ;;  %v5514_v0 = vld [vmem:[%s9799_s15 + $0x318] sm:$0xff]  ;;  %v5529_v18 = vld [vmem:[%s9799_s15 + $0x390] sm:$0xff] }
0x128e   :  { %4355 = vadd.xlane.f32.xlu0 %v9036_v32  ;;  %4584 = vmatpush1.bf16.msra.mxu0 %v4528_v28  ;;  %v4540_v28 = vpack.c.bf16 %v5507_v56, %v5503_v16  ;;  %v4547_v57 = vpack.c.bf16 %v5518_v44, %v5514_v0  ;;  %v5533_v56 = vld [vmem:[%s9799_s15 + $0x3b0] sm:$0xff]  ;;  %v5536_v33 = vld [vmem:[%s9799_s15 + $0x3c8] sm:$0xff]  ;;  %v5535_v44 = vld [vmem:[%s9799_s15 + $0x3c0] sm:$0xff] }
0x128f   :  { %4585 = vmatprep.subr.bf16.mxu0 %v4533_v49  ;;  %4658 = vmatprep.subr.bf16.mxu1 %v4535_v7  ;;  %v5511_v49 = vld [vmem:[%s9799_s15 + $0x300] sm:$0xff]  ;;  %v5540_v63 = vld [vmem:[%s9799_s15 + $0x3e8] sm:$0xff] }
0x1290   :  { %4357 = vadd.xlane.f32.xlu1 %v9040_v13  ;;  %v5515_v7 = vld [vmem:[%s9799_s15 + $0x320] sm:$0xff] }
0x1291   :  { %4659 = vmatpush1.bf16.msra.mxu1 %v4534_v51 }
0x1292   :  { %4586 = vmatpush1.bf16.msra.mxu0 %v4532_v43  ;;  %v5517_v43 = vld [vmem:[%s9799_s15 + $0x330] sm:$0xff] }
0x1293   :  { %4587 = vmatprep.subr.bf16.mxu0 %v4537_v10 }
0x1296   :  { %4588 = vmatpush1.bf16.msra.mxu0 %v4536_v30 }
0x1297   :  { %4589 = vmatprep.subr.bf16.mxu0 %v4541_v2  ;;  %v5527_v2 = vld [vmem:[%s9799_s15 + $0x380] sm:$0xff] }
0x1298   :  { %v4552_v0 = vpack.c.bf16 %v5531_v42, %v5527_v2 }
0x129a   :  { %4590 = vmatpush1.bf16.msra.mxu0 %v4540_v28 }
0x129b   :  { %4591 = vmatprep.subr.bf16.mxu0 %v4545_v14  ;;  %v4557_v14 = vpack.c.bf16 %v5540_v63, %v5536_v33 }
0x12ed   :  { %v4344_v35 = vpop.xlane.xlu0 %4343 }
0x12ee   :  { %v4359_v41 = vmul.f32 0.0078125, %v4344_v35  ;;  %v4544_v35 = vpack.c.bf16 %v5515_v7, %v5511_v49  ;;  %v5539_v49 = vld [vmem:[%s9799_s15 + $0x3e0] sm:$0xff]  ;;  %v4559_v7 = vpack.c.bf16 %v5542_v46, %v5538_v62 }
0x12ef   :  { %v4346_v61 = vpop.xlane.xlu1 %4345 }
0x12f0   :  { %v9092_v29 = vsub.f32 %v9012_v54, %v4359_v41  ;;  %v4360_v52 = vmul.f32 0.0078125, %v4346_v61  ;;  %v5524_v41 = vld [vmem:[%s9799_s15 + $0x368] sm:$0xff]  ;;  %v5522_v61 = vld [vmem:[%s9799_s15 + $0x358] sm:$0xff]  ;;  %4592 = vmatpush1.bf16.msra.mxu0 %v4544_v35 }
0x12f1   :  { %v4348_v9 = vpop.xlane.xlu0 %4347 }
0x12f2   :  { %v9095_v60 = vsub.f32 %v9016_v17, %v4360_v52  ;;  %v4361_v48 = vmul.f32 0.0078125, %v4348_v9  ;;  %v4375_v8 = vmul.f32 %v9092_v29, %v9092_v29  ;;  %v5526_v52 = vld [vmem:[%s9799_s15 + $0x378] sm:$0xff] }
0x12f4   :  { %v9100_v11 = vsub.f32 %v9020_v20, %v4361_v48  ;;  %4383 = vadd.xlane.f32.xlu0 %v4375_v8  ;;  %v4376_v25 = vmul.f32 %v9095_v60, %v9095_v60  ;;  %v4546_v8 = vpack.c.bf16 %v5517_v43, %v5513_v38  ;;  %v4556_v38 = vpack.c.bf16 %v5539_v49, %v5535_v44 }
0x12f5   :  { %v4350_v58 = vpop.xlane.xlu0 %4349 }
0x12f6   :  { %v4362_v5 = vmul.f32 0.0078125, %v4350_v58  ;;  %4385 = vadd.xlane.f32.xlu1 %v4376_v25  ;;  %v4377_v50 = vmul.f32 %v9100_v11, %v9100_v11  ;;  %v5519_v25 = vld [vmem:[%s9799_s15 + $0x340] sm:$0xff] }
0x12f7   :  { %v5523_v58 = vld [vmem:[%s9799_s15 + $0x360] sm:$0xff] }
0x12f8   :  { %v9107_v15 = vsub.f32 %v9024_v19, %v4362_v5  ;;  %4387 = vadd.xlane.f32.xlu0 %v4377_v50  ;;  %v5502_v19 = vld [vmem:[%s9799_s15 + $0x2b8] sm:$0xff]  ;;  %v4549_v50 = vpack.c.bf16 %v5524_v41, %v5520_v23 }
0x12f9   :  { %v4539_v24 = vpack.c.bf16 %v5502_v19, %v5498_v40  ;;  %v5528_v40 = vld [vmem:[%s9799_s15 + $0x388] sm:$0xff] }
0x12fa   :  { %v4378_v17 = vmul.f32 %v9107_v15, %v9107_v15  ;;  %4593 = vmatprep.subr.bf16.mxu0 %v4549_v50  ;;  %v4553_v16 = vpack.c.bf16 %v5532_v26, %v5528_v40 }
0x12fb   :  { %4660 = vmatprep.subr.bf16.mxu1 %v4539_v24 }
0x12fc   :  { %4389 = vadd.xlane.f32.xlu1 %v4378_v17  ;;  %4661 = vmatpush1.bf16.msra.mxu1 %v4538_v45  ;;  %v4551_v17 = vpack.c.bf16 %v5526_v52, %v5522_v61  ;;  %v4550_v45 = vpack.c.bf16 %v5525_v59, %v5521_v22  ;;  %v5477_v22 = vld [vmem:[%s9797_s13 + $0x1] ss:$0 sm:$0xff] }
0x12fd   :  { %4662 = vmatprep.subr.bf16.mxu1 %v4543_v4  ;;  %v4555_v4 = vpack.c.bf16 %v5534_v27, %v5530_v47  ;;  %v5478_v47 = vld [vmem:[%s9798_s14 + $0x1] ss:$0 sm:$0xff] }
0x1300   :  { %4663 = vmatpush1.bf16.msra.mxu1 %v4542_v31 }
0x1301   :  { %4664 = vmatprep.subr.bf16.mxu1 %v4547_v57  ;;  %v5541_v57 = vld [vmem:[%s9799_s15 + $0x3f0] sm:$0xff] }
0x1304   :  { %4665 = vmatpush1.bf16.msra.mxu1 %v4546_v8 }
0x1305   :  { %4666 = vmatprep.subr.bf16.mxu1 %v4551_v17 }
0x1308   :  { %4667 = vmatpush1.bf16.msra.mxu1 %v4550_v45 }
0x1309   :  { %4668 = vmatprep.subr.bf16.mxu1 %v4555_v4 }
0x1317   :  { %v4352_v1 = vpop.xlane.xlu0 %4351 }
0x1318   :  { %v4363_v34 = vmul.f32 0.0078125, %v4352_v1 }
0x1319   :  { %v4354_v51 = vpop.xlane.xlu1 %4353 }
0x131a   :  { %v9196_v9 = vsub.f32 %v9028_v21, %v4363_v34  ;;  %v4364_v48 = vmul.f32 0.0078125, %v4354_v51  ;;  %v5537_v34 = vld [vmem:[%s9799_s15 + $0x3d0] sm:$0xff] }
0x131b   :  { %v4356_v5 = vpop.xlane.xlu0 %4355  ;;  %v4558_v43 = vpack.c.bf16 %v5541_v57, %v5537_v34 }
0x131c   :  { %v9214_v10 = vsub.f32 %v9032_v53, %v4364_v48  ;;  %v4365_v19 = vmul.f32 0.0078125, %v4356_v5  ;;  %v4379_v24 = vmul.f32 %v9196_v9, %v9196_v9  ;;  %v4548_v53 = vpack.c.bf16 %v5523_v58, %v5519_v25 }
0x131d   :  { %v4358_v30 = vpop.xlane.xlu1 %4357 }
0x131e   :  { %v9228_v37 = vsub.f32 %v9036_v32, %v4365_v19  ;;  %v4366_v36 = vmul.f32 0.0078125, %v4358_v30  ;;  %4391 = vadd.xlane.f32.xlu0 %v4379_v24  ;;  %v4380_v39 = vmul.f32 %v9214_v10, %v9214_v10  ;;  %4594 = vmatpush1.bf16.msra.mxu0 %v4548_v53 }
0x131f   :  { %4595 = vmatprep.subr.bf16.mxu0 %v4553_v16 }
0x1320   :  { %v9251_v28 = vsub.f32 %v9040_v13, %v4366_v36  ;;  %4393 = vadd.xlane.f32.xlu1 %v4380_v39  ;;  %v4381_v31 = vmul.f32 %v9228_v37, %v9228_v37  ;;  %v4554_v13 = vpack.c.bf16 %v5533_v56, %v5529_v18 }
0x1322   :  { %4395 = vadd.xlane.f32.xlu0 %v4381_v31  ;;  %v4382_v1 = vmul.f32 %v9251_v28, %v9251_v28  ;;  %4596 = vmatpush1.bf16.msra.mxu0 %v4552_v0 }
0x1323   :  { %4669 = vmatpush1.bf16.msra.mxu1 %v4554_v13  ;;  %4597 = vmatprep.subr.bf16.mxu0 %v4557_v14 }
0x1324   :  { %4397 = vadd.xlane.f32.xlu1 %v4382_v1  ;;  %4670 = vmatprep.subr.bf16.mxu1 %v4559_v7 }
0x1326   :  { %4598 = vmatpush1.bf16.msra.mxu0 %v4556_v38 }
0x1327   :  { %4671 = vmatpush1.bf16.msra.mxu1 %v4558_v43 }
0x1381   :  { %v4384_v23 = vpop.xlane.xlu0 %4383 }
0x1382   :  { %v4399_v51 = vmul.f32 0.0078125, %v4384_v23 }
0x1383   :  { %v4386_v35 = vpop.xlane.xlu1 %4385 }
0x1384   :  { %v4407_v41 = vadd.f32 1e-06, %v4399_v51  ;;  %v4400_v61 = vmul.f32 0.0078125, %v4386_v35 }
0x1385   :  { %v4388_v52 = vpop.xlane.xlu0 %4387 }
0x1386   :  { %6483 = vrsqrt.f32 %v4407_v41  ;;  %v4408_v48 = vadd.f32 1e-06, %v4400_v61  ;;  %v4401_v8 = vmul.f32 0.0078125, %v4388_v52 }
0x1388   :  { %6485 = vrsqrt.f32 %v4408_v48  ;;  %v4409_v25 = vadd.f32 1e-06, %v4401_v8 }
0x1389   :  { %v4390_v58 = vpop.xlane.xlu1 %4389 }
0x138a   :  { %6487 = vrsqrt.f32 %v4409_v25  ;;  %v4402_v5 = vmul.f32 0.0078125, %v4390_v58  ;;  %v5592_v25 = vld [vmem:[%s9801_s17 + $0x380] sm:$0xff] }
0x138c   :  { %v4410_v50 = vadd.f32 1e-06, %v4402_v5  ;;  %v5544_v5 = vld [vmem:[%s9801_s17 + $0x200] sm:$0xff] }
0x138e   :  { %6489 = vrsqrt.f32 %v4410_v50  ;;  %v5545_v50 = vld [vmem:[%s9801_s17 + $0x208] sm:$0xff] }
0x1390   :  { %v6484_v17 = vpop.eup %6483 }
0x1391   :  { %v4423_v59 = vmul.f32 %v6484_v17, %v9092_v29 }
0x1392   :  { %v6486_v40 = vpop.eup %6485 }
0x1393   :  { %v4424_v19 = vmul.f32 %v6486_v40, %v9095_v60  ;;  %v4437_v24 = vmul.f32 %v5477_v22, %v4423_v59  ;;  %v5576_v59 = vld [vmem:[%s9801_s17 + $0x300] sm:$0xff]  ;;  %v5577_v40 = vld [vmem:[%s9801_s17 + $0x308] sm:$0xff] }
0x1394   :  { %v6488_v26 = vpop.eup %6487 }
0x1395   :  { %v4438_v27 = vmul.f32 %v5477_v22, %v4424_v19  ;;  %v4451_v30 = vadd.f32 %v5478_v47, %v4437_v24  ;;  %v4425_v36 = vmul.f32 %v6488_v26, %v9100_v11  ;;  %v5562_v19 = vld [vmem:[%s9801_s17 + $0x290] sm:$0xff]  ;;  %v5114_v24 = vpack.c.bf16 %v5577_v40, %v5576_v59  ;;  %v5563_v26 = vld [vmem:[%s9801_s17 + $0x298] sm:$0xff] }
0x1396   :  { %v5555_v59 = vld [vmem:[%s9801_s17 + $0x258] sm:$0xff]  ;;  %v5586_v40 = vld [vmem:[%s9801_s17 + $0x350] sm:$0xff] }
0x1397   :  { %v4452_v53 = vadd.f32 %v5478_v47, %v4438_v27  ;;  %v4439_v29 = vmul.f32 %v5477_v22, %v4425_v36  ;;  %v5595_v27 = vld [vmem:[%s9801_s17 + $0x398] sm:$0xff]  ;;  %v5546_v36 = vld [vmem:[%s9801_s17 + $0x210] sm:$0xff] }
0x1398   :  { %v6490_v39 = vpop.eup %6489 }
0x1399   :  { %v4524_v45 = vpack.c.bf16 %v4452_v53, %v4451_v30  ;;  %v4426_v2 = vmul.f32 %v6490_v39, %v9107_v15  ;;  %v4453_v18 = vadd.f32 %v5478_v47, %v4439_v29  ;;  %v5107_v30 = vpack.c.bf16 %v5563_v26, %v5562_v19  ;;  %v5547_v39 = vld [vmem:[%s9801_s17 + $0x218] sm:$0xff]  ;;  %v5572_v26 = vld [vmem:[%s9801_s17 + $0x2e0] sm:$0xff] }
0x139a   :  { %v5579_v29 = vld [vmem:[%s9801_s17 + $0x318] sm:$0xff] }
0x139b   :  { %4616 = vmatmul.mubr.bf16.vlgmr.msra.gmra.mrb[140].mxu0 %v4524_v45  ;;  %4689 = vmatmul.mubr.bf16.vlgmr.msra.gmra.mrb[128].mxu1 %v4524_v45  ;;  %v4440_v42 = vmul.f32 %v5477_v22, %v4426_v2  ;;  %v5578_v45 = vld [vmem:[%s9801_s17 + $0x310] sm:$0xff]  ;;  %v5099_v2 = vpack.c.bf16 %v5547_v39, %v5546_v36 }
0x139c   :  { %4625 = vmatprep.mubr.bf16.mxu0 %v9853_v55  ;;  %4698 = vmatprep.mubr.bf16.mxu1 %v9853_v55 }
0x139d   :  { %v4454_v60 = vadd.f32 %v5478_v47, %v4440_v42  ;;  %v5564_v42 = vld [vmem:[%s9801_s17 + $0x2a0] sm:$0xff] }
0x139f   :  { %v4525_v16 = vpack.c.bf16 %v4454_v60, %v4453_v18  ;;  %v5565_v60 = vld [vmem:[%s9801_s17 + $0x2a8] sm:$0xff]  ;;  %v5115_v18 = vpack.c.bf16 %v5579_v29, %v5578_v45  ;;  %v5556_v45 = vld [vmem:[%s9801_s17 + $0x260] sm:$0xff] }
0x13a0   :  { %v5588_v29 = vld [vmem:[%s9801_s17 + $0x360] sm:$0xff] }
0x13a3   :  { %4626 = vmatmul.mubr.bf16.gmra.mrb[144].mxu0 %v4525_v16  ;;  %4699 = vmatmul.mubr.bf16.gmra.mrb[132].mxu1 %v4525_v16  ;;  %v5108_v16 = vpack.c.bf16 %v5565_v60, %v5564_v42  ;;  %v5589_v60 = vld [vmem:[%s9801_s17 + $0x368] sm:$0xff] }
0x13a4   :  { %4635 = vmatprep.mubr.bf16.mxu0 %v9853_v55  ;;  %4708 = vmatprep.mubr.bf16.mxu1 %v9853_v55 }
0x13ab   :  { %v4392_v11 = vpop.xlane.xlu0 %4391 }
0x13ac   :  { %v4403_v4 = vmul.f32 0.0078125, %v4392_v11  ;;  %v5596_v11 = vld [vmem:[%s9801_s17 + $0x3a0] sm:$0xff] }
0x13ad   :  { %v4394_v15 = vpop.xlane.xlu1 %4393 }
0x13ae   :  { %v4411_v56 = vadd.f32 1e-06, %v4403_v4  ;;  %v4404_v33 = vmul.f32 0.0078125, %v4394_v15  ;;  %v5597_v4 = vld [vmem:[%s9801_s17 + $0x3a8] sm:$0xff] }
0x13af   :  { %v4396_v63 = vpop.xlane.xlu0 %4395  ;;  %v5124_v15 = vpack.c.bf16 %v5597_v4, %v5596_v11  ;;  %v5606_v11 = vld [vmem:[%s9801_s17 + $0x3f0] sm:$0xff]  ;;  %v5607_v4 = vld [vmem:[%s9801_s17 + $0x3f8] sm:$0xff] }
0x13b0   :  { %6491 = vrsqrt.f32 %v4411_v56  ;;  %v4412_v31 = vadd.f32 1e-06, %v4404_v33  ;;  %v4405_v62 = vmul.f32 0.0078125, %v4396_v63  ;;  %v5548_v56 = vld [vmem:[%s9801_s17 + $0x220] sm:$0xff]  ;;  %v5549_v33 = vld [vmem:[%s9801_s17 + $0x228] sm:$0xff] }
0x13b1   :  { %v4398_v46 = vpop.xlane.xlu1 %4397  ;;  %v5580_v63 = vld [vmem:[%s9801_s17 + $0x320] sm:$0xff] }
0x13b2   :  { %6493 = vrsqrt.f32 %v4412_v31  ;;  %v4413_v0 = vadd.f32 1e-06, %v4405_v62  ;;  %v4406_v1 = vmul.f32 0.0078125, %v4398_v46  ;;  %v5100_v31 = vpack.c.bf16 %v5549_v33, %v5548_v56  ;;  %v5581_v62 = vld [vmem:[%s9801_s17 + $0x328] sm:$0xff]  ;;  %v5566_v46 = vld [vmem:[%s9801_s17 + $0x2b0] sm:$0xff] }
0x13b3   :  { %v5120_v56 = vpack.c.bf16 %v5589_v60, %v5588_v29 }
0x13b4   :  { %6495 = vrsqrt.f32 %v4413_v0  ;;  %v4414_v13 = vadd.f32 1e-06, %v4406_v1  ;;  %v5567_v0 = vld [vmem:[%s9801_s17 + $0x2b8] sm:$0xff]  ;;  %v5116_v1 = vpack.c.bf16 %v5581_v62, %v5580_v63  ;;  %v5558_v63 = vld [vmem:[%s9801_s17 + $0x270] sm:$0xff]  ;;  %v5129_v62 = vpack.c.bf16 %v5607_v4, %v5606_v11 }
0x13b6   :  { %6497 = vrsqrt.f32 %v4414_v13  ;;  %v5109_v13 = vpack.c.bf16 %v5567_v0, %v5566_v46  ;;  %v5590_v46 = vld [vmem:[%s9801_s17 + $0x370] sm:$0xff]  ;;  %v5591_v0 = vld [vmem:[%s9801_s17 + $0x378] sm:$0xff] }
0x13ba   :  { %v6492_v14 = vpop.eup %6491 }
0x13bb   :  { %v4427_v44 = vmul.f32 %v6492_v14, %v9196_v9  ;;  %v5598_v14 = vld [vmem:[%s9801_s17 + $0x3b0] sm:$0xff] }
0x13bc   :  { %v6494_v49 = vpop.eup %6493 }
0x13bd   :  { %v4428_v7 = vmul.f32 %v6494_v49, %v9214_v10  ;;  %v4441_v34 = vmul.f32 %v5477_v22, %v4427_v44  ;;  %v5599_v44 = vld [vmem:[%s9801_s17 + $0x3b8] sm:$0xff]  ;;  %v5550_v49 = vld [vmem:[%s9801_s17 + $0x230] sm:$0xff] }
0x13be   :  { %v6496_v57 = vpop.eup %6495 }
0x13bf   :  { %v4442_v38 = vmul.f32 %v5477_v22, %v4428_v7  ;;  %v4455_v23 = vadd.f32 %v5478_v47, %v4441_v34  ;;  %v4429_v35 = vmul.f32 %v6496_v57, %v9228_v37  ;;  %v5560_v37 = vld [vmem:[%s9801_s17 + $0x280] sm:$0xff]  ;;  %v5125_v7 = vpack.c.bf16 %v5599_v44, %v5598_v14  ;;  %v5551_v34 = vld [vmem:[%s9801_s17 + $0x238] sm:$0xff]  ;;  %v5582_v57 = vld [vmem:[%s9801_s17 + $0x330] sm:$0xff] }
0x13c0   :  { %v6498_v43 = vpop.eup %6497  ;;  %v5543_v14 = vld [vmem:[%s9800_s16 + $0x4] sm:$0xf] }
0x13c1   :  { %v4456_v51 = vadd.f32 %v5478_v47, %v4442_v38  ;;  %v4430_v41 = vmul.f32 %v6498_v43, %v9251_v28  ;;  %v4443_v48 = vmul.f32 %v5477_v22, %v4429_v35  ;;  %v5561_v28 = vld [vmem:[%s9801_s17 + $0x288] sm:$0xff]  ;;  %v5583_v38 = vld [vmem:[%s9801_s17 + $0x338] sm:$0xff]  ;;  %v5568_v43 = vld [vmem:[%s9801_s17 + $0x2c0] sm:$0xff]  ;;  %v5101_v35 = vpack.c.bf16 %v5551_v34, %v5550_v49 }
0x13c2   :  { %v5106_v58 = vpack.c.bf16 %v5561_v28, %v5560_v37  ;;  %v5585_v37 = vld [vmem:[%s9801_s17 + $0x348] sm:$0xff]  ;;  %v5570_v28 = vld [vmem:[%s9801_s17 + $0x2d0] sm:$0xff]  ;;  %v9491_v44 = vrot.slane %v5543_v14, %v9859_v3  ;;  %v9494_v49 = vrot.slane %v5543_v14, %v9861_v6 }
0x13c3   :  { %v4526_v61 = vpack.c.bf16 %v4456_v51, %v4455_v23  ;;  %v4444_v52 = vmul.f32 %v5477_v22, %v4430_v41  ;;  %v4457_v10 = vadd.f32 %v5478_v47, %v4443_v48  ;;  %v5098_v22 = vpack.c.bf16 %v5545_v50, %v5544_v5  ;;  %v5569_v23 = vld [vmem:[%s9801_s17 + $0x2c8] sm:$0xff]  ;;  %v5600_v51 = vld [vmem:[%s9801_s17 + $0x3c0] sm:$0xff] }
0x13c4   :  { %5856 = vmatprep.subr.bf16.mxu0 %v5106_v58  ;;  %v5601_v41 = vld [vmem:[%s9801_s17 + $0x3c8] sm:$0xff]  ;;  %v5552_v48 = vld [vmem:[%s9801_s17 + $0x240] sm:$0xff]  ;;  %v5602_v58 = vld [vmem:[%s9801_s17 + $0x3d0] sm:$0xff] }
0x13c5   :  { %4636 = vmatmul.mubr.bf16.gmra.mrb[148].mxu0 %v4526_v61  ;;  %4709 = vmatmul.mubr.bf16.gmra.mrb[136].mxu1 %v4526_v61  ;;  %v4458_v9 = vadd.f32 %v5478_v47, %v4444_v52  ;;  %v5594_v47 = vld [vmem:[%s9801_s17 + $0x390] sm:$0xff]  ;;  %v5117_v61 = vpack.c.bf16 %v5583_v38, %v5582_v57  ;;  %v5110_v52 = vpack.c.bf16 %v5569_v23, %v5568_v43 }
0x13c6   :  { %4645 = vmatprep.mubr.bf16.mxu0 %v9853_v55  ;;  %4718 = vmatprep.mubr.bf16.mxu1 %v9853_v55  ;;  %v5593_v55 = vld [vmem:[%s9801_s17 + $0x388] sm:$0xff]  ;;  %v5123_v53 = vpack.c.bf16 %v5595_v27, %v5594_v47  ;;  %v5604_v27 = vld [vmem:[%s9801_s17 + $0x3e0] sm:$0xff]  ;;  %v9497_v57 = vrot.slane %v5543_v14, %v9860_v12 }
0x13c7   :  { %v4527_v8 = vpack.c.bf16 %v4458_v9, %v4457_v10  ;;  %v5122_v17 = vpack.c.bf16 %v5593_v55, %v5592_v25  ;;  %5857 = vmatpush3.bf16.msra.mxu0 %v5098_v22  ;;  %v5553_v9 = vld [vmem:[%s9801_s17 + $0x248] sm:$0xff]  ;;  %v5584_v10 = vld [vmem:[%s9801_s17 + $0x340] sm:$0xff]  ;;  %v5571_v25 = vld [vmem:[%s9801_s17 + $0x2d8] sm:$0xff] }
0x13c8   :  { %5858 = vmatprep.subr.bf16.mxu0 %v5107_v30  ;;  %v5603_v55 = vld [vmem:[%s9801_s17 + $0x3d8] sm:$0xff]  ;;  %v5102_v5 = vpack.c.bf16 %v5553_v9, %v5552_v48  ;;  %v5118_v50 = vpack.c.bf16 %v5585_v37, %v5584_v10  ;;  %v5554_v22 = vld [vmem:[%s9801_s17 + $0x250] sm:$0xff]  ;;  %v5573_v47 = vld [vmem:[%s9801_s17 + $0x2e8] sm:$0xff] }
0x13c9   :  { %5896 = vmatprep.subr.bf16.mxu1 %v5122_v17  ;;  %v5111_v17 = vpack.c.bf16 %v5571_v25, %v5570_v28  ;;  %v5127_v19 = vpack.c.bf16 %v5603_v55, %v5602_v58  ;;  %v5605_v30 = vld [vmem:[%s9801_s17 + $0x3e8] sm:$0xff]  ;;  %v5112_v39 = vpack.c.bf16 %v5573_v47, %v5572_v26 }
0x13ca   :  { %5897 = vmatpush3.bf16.msra.mxu1 %v5114_v24  ;;  %v5587_v24 = vld [vmem:[%s9801_s17 + $0x358] sm:$0xff]  ;;  %v5128_v42 = vpack.c.bf16 %v5605_v30, %v5604_v27 }
0x13cb   :  { %5898 = vmatprep.subr.bf16.mxu1 %v5123_v53  ;;  %5859 = vmatpush3.bf16.msra.mxu0 %v5099_v2  ;;  %v5103_v53 = vpack.c.bf16 %v5555_v59, %v5554_v22  ;;  %v5119_v36 = vpack.c.bf16 %v5587_v24, %v5586_v40  ;;  %v5557_v2 = vld [vmem:[%s9801_s17 + $0x268] sm:$0xff] }
0x13cc   :  { %5860 = vmatprep.subr.bf16.mxu0 %v5108_v16  ;;  %v5575_v16 = vld [vmem:[%s9801_s17 + $0x2f8] sm:$0xff] }
0x13cd   :  { %4646 = vmatmul.mubr.bf16.gmra.mrb[152].mxu0 %v4527_v8  ;;  %4719 = vmatmul.mubr.bf16.gmra.mrb[140].mxu1 %v4527_v8  ;;  %v5126_v8 = vpack.c.bf16 %v5601_v41, %v5600_v51 }
0x13ce   :  { %5899 = vmatpush3.bf16.msra.mxu1 %v5115_v18  ;;  %v5574_v18 = vld [vmem:[%s9801_s17 + $0x2f0] sm:$0xff] }
0x13cf   :  { %5900 = vmatprep.subr.bf16.mxu1 %v5124_v15  ;;  %5861 = vmatpush3.bf16.msra.mxu0 %v5100_v31  ;;  %v5104_v15 = vpack.c.bf16 %v5557_v2, %v5556_v45  ;;  %v5113_v33 = vpack.c.bf16 %v5575_v16, %v5574_v18  ;;  %v5559_v31 = vld [vmem:[%s9801_s17 + $0x278] sm:$0xff] }
0x13d0   :  { %5862 = vmatprep.subr.bf16.mxu0 %v5109_v13  ;;  %v5121_v13 = vpack.c.bf16 %v5591_v0, %v5590_v46 }
0x13d2   :  { %5901 = vmatpush3.bf16.msra.mxu1 %v5116_v1  ;;  %v5105_v1 = vpack.c.bf16 %v5559_v31, %v5558_v63 }
0x13d3   :  { %5902 = vmatprep.subr.bf16.mxu1 %v5125_v7  ;;  %5863 = vmatpush3.bf16.msra.mxu0 %v5101_v35  ;;  %v9863_v35 = vld [vmem:[#allocation7_spill] sm:$0xff] }
0x13d4   :  { %5864 = vmatprep.subr.bf16.mxu0 %v5110_v52  ;;  %v9864_v41 = vsub.s32 3, %v9863_v35 }
0x13d6   :  { %5903 = vmatpush3.bf16.msra.mxu1 %v5117_v61  ;;  %v9503_v61 = vrot.slane %v5543_v14, %v9864_v41 }
0x13d7   :  { %5904 = vmatprep.subr.bf16.mxu1 %v5126_v8  ;;  %5865 = vmatpush3.bf16.msra.mxu0 %v5102_v5 }
0x13d8   :  { %5866 = vmatprep.subr.bf16.mxu0 %v5111_v17 }
0x13da   :  { %5905 = vmatpush3.bf16.msra.mxu1 %v5118_v50 }
0x13db   :  { %5906 = vmatprep.subr.bf16.mxu1 %v5127_v19  ;;  %5867 = vmatpush3.bf16.msra.mxu0 %v5103_v53 }
0x13dc   :  { %5868 = vmatprep.subr.bf16.mxu0 %v5112_v39 }
0x13de   :  { %5907 = vmatpush3.bf16.msra.mxu1 %v5119_v36 }
0x13df   :  { %5908 = vmatprep.subr.bf16.mxu1 %v5128_v42  ;;  %5869 = vmatpush3.bf16.msra.mxu0 %v5104_v15 }
0x13e0   :  { %5870 = vmatprep.subr.bf16.mxu0 %v5113_v33 }
0x13e2   :  { %5909 = vmatpush3.bf16.msra.mxu1 %v5120_v56 }
0x13e3   :  { %5910 = vmatprep.subr.bf16.mxu1 %v5129_v62  ;;  %5871 = vmatpush3.bf16.msra.mxu0 %v5105_v1 }
0x13e6   :  { %5911 = vmatpush3.bf16.msra.mxu1 %v5121_v13 }
0x146e   :  { %v4617_v7 = vpop.f32.mrb[140].mxu0  ;;  %v4690_v34 = vpop.f32.mrb[128].mxu1 }
0x146f   :  { %v4618_v38 = vadd.f32 %v4617_v7, %v9491_v44  ;;  %v4691_v43 = vadd.f32 %v4690_v34, %v9494_v49  ;;  %v4619_v23 = vpop.f32.mrb[141].mxu0  ;;  %v4692_v51 = vpop.f32.mrb[129].mxu1 }
0x1470   :  { %v4621_v3 = vpop.f32.mrb[142].mxu0  ;;  %v4694_v52 = vpop.f32.mrb[130].mxu1  ;;  %v9506_v9 = vadd.f32 %v4619_v23, %v9497_v57  ;;  %v9516_v55 = vadd.f32 %v4692_v51, %v9503_v61 }
0x1471   :  { %v4761_v48 = vmul.f32 0.044715, %v4618_v38  ;;  %v4763_v6 = vmul.f32 0.044715, %v4691_v43  ;;  %v4622_v12 = vadd.f32 %v4621_v3, %v9491_v44  ;;  %v9510_v10 = vadd.f32 %v4694_v52, %v9494_v49  ;;  %v4623_v8 = vpop.f32.mrb[143].mxu0  ;;  %v4696_v37 = vpop.f32.mrb[131].mxu1 }
0x1472   :  { %v9513_v58 = vadd.f32 %v4623_v8, %v9497_v57  ;;  %v9519_v50 = vadd.f32 %v4696_v37, %v9503_v61  ;;  %v4762_v40 = vmul.f32 0.044715, %v9506_v9  ;;  %v4764_v45 = vmul.f32 0.044715, %v9516_v55 }
0x1473   :  { %v4793_v28 = vmul.f32 %v4761_v48, %v4618_v38  ;;  %v4795_v25 = vmul.f32 %v4763_v6, %v4691_v43  ;;  %v4765_v5 = vmul.f32 0.044715, %v4622_v12  ;;  %v4767_v59 = vmul.f32 0.044715, %v9510_v10 }
0x1474   :  { %v4766_v53 = vmul.f32 0.044715, %v9513_v58  ;;  %v4768_v29 = vmul.f32 0.044715, %v9519_v50  ;;  %v4794_v56 = vmul.f32 %v4762_v40, %v9506_v9  ;;  %v4796_v46 = vmul.f32 %v4764_v45, %v9516_v55 }
0x1475   :  { %v4825_v17 = vmul.f32 %v4793_v28, %v4618_v38  ;;  %v4827_v22 = vmul.f32 %v4795_v25, %v4691_v43  ;;  %v4797_v19 = vmul.f32 %v4765_v5, %v4622_v12  ;;  %v4799_v30 = vmul.f32 %v4767_v59, %v9510_v10 }
0x1476   :  { %v4627_v24 = vpop.f32.mrb[144].mxu0  ;;  %v4700_v26 = vpop.f32.mrb[132].mxu1  ;;  %v4798_v31 = vmul.f32 %v4766_v53, %v9513_v58  ;;  %v4800_v13 = vmul.f32 %v4768_v29, %v9519_v50  ;;  %v4729_v34 = vmul.f32 0.5, %v4618_v38  ;;  %v4826_v23 = vmul.f32 %v4794_v56, %v9506_v9 }
0x1477   :  { %v4857_v47 = vadd.f32 %v4825_v17, %v4618_v38  ;;  %v4859_v27 = vadd.f32 %v4827_v22, %v4691_v43  ;;  %v4629_v36 = vpop.f32.mrb[145].mxu0  ;;  %v4702_v39 = vpop.f32.mrb[133].mxu1  ;;  %v4829_v2 = vmul.f32 %v4797_v19, %v4622_v12  ;;  %v4831_v11 = vmul.f32 %v4799_v30, %v9510_v10 }
0x1478   :  { %v4631_v42 = vpop.f32.mrb[146].mxu0  ;;  %v4704_v60 = vpop.f32.mrb[134].mxu1  ;;  %v9532_v62 = vadd.f32 %v4629_v36, %v9497_v57  ;;  %v9538_v7 = vadd.f32 %v4702_v39, %v9503_v61  ;;  %v9542_v51 = vadd.f32 %v4627_v24, %v9491_v44  ;;  %v4830_v35 = vmul.f32 %v4798_v31, %v9513_v58 }
0x1479   :  { %v4889_v18 = vmul.f32 0.7978846, %v4857_v47  ;;  %v4891_v16 = vmul.f32 0.7978846, %v4859_v27  ;;  %v4633_v4 = vpop.f32.mrb[147].mxu0  ;;  %v4706_v15 = vpop.f32.mrb[135].mxu1  ;;  %v4861_v33 = vadd.f32 %v4829_v2, %v4622_v12  ;;  %v4863_v63 = vadd.f32 %v4831_v11, %v9510_v10 }
0x147a   :  { %v4770_v14 = vmul.f32 0.044715, %v9532_v62  ;;  %v9546_v41 = vadd.f32 %v4700_v26, %v9494_v49  ;;  %v4772_v3 = vmul.f32 0.044715, %v9538_v7  ;;  %v4731_v52 = vmul.f32 0.5, %v4691_v43 }
0x147b   :  { %6499 = vtanh.f32 %v4889_v18  ;;  %v4893_v0 = vmul.f32 0.7978846, %v4861_v33  ;;  %v4895_v1 = vmul.f32 0.7978846, %v4863_v63  ;;  %v9551_v6 = vadd.f32 %v4633_v4, %v9497_v57 }
0x147c   :  { %6501 = vtanh.f32 %v4891_v16  ;;  %v4802_v48 = vmul.f32 %v4770_v14, %v9532_v62  ;;  %v9554_v38 = vadd.f32 %v4706_v15, %v9503_v61  ;;  %v4828_v8 = vmul.f32 %v4796_v46, %v9516_v55 }
0x147d   :  { %6503 = vtanh.f32 %v4893_v0  ;;  %v4733_v37 = vmul.f32 0.5, %v4622_v12  ;;  %v4832_v28 = vmul.f32 %v4800_v13, %v9519_v50  ;;  %v9559_v25 = vadd.f32 %v4631_v42, %v9491_v44 }
0x147e   :  { %6505 = vtanh.f32 %v4895_v1  ;;  %v4804_v5 = vmul.f32 %v4772_v3, %v9538_v7  ;;  %v4774_v43 = vmul.f32 0.044715, %v9551_v6  ;;  %v4776_v17 = vmul.f32 0.044715, %v9554_v38 }
0x147f   :  { %v4858_v22 = vadd.f32 %v4826_v23, %v9506_v9  ;;  %v4735_v59 = vmul.f32 0.5, %v9510_v10  ;;  %v4769_v40 = vmul.f32 0.044715, %v9542_v51  ;;  %v4771_v19 = vmul.f32 0.044715, %v9546_v41 }
0x1480   :  { %v4862_v12 = vadd.f32 %v4830_v35, %v9513_v58  ;;  %v4834_v24 = vmul.f32 %v4802_v48, %v9532_v62  ;;  %v4806_v26 = vmul.f32 %v4774_v43, %v9551_v6  ;;  %v4808_v47 = vmul.f32 %v4776_v17, %v9554_v38 }
0x1481   :  { %v4890_v27 = vmul.f32 0.7978846, %v4858_v22  ;;  %v9573_v53 = vadd.f32 %v4704_v60, %v9494_v49  ;;  %v4860_v10 = vadd.f32 %v4828_v8, %v9516_v55  ;;  %v4864_v39 = vadd.f32 %v4832_v28, %v9519_v50 }
0x1482   :  { %v4894_v36 = vmul.f32 0.7978846, %v4862_v12  ;;  %v4836_v2 = vmul.f32 %v4804_v5, %v9538_v7  ;;  %v4773_v29 = vmul.f32 0.044715, %v9559_v25  ;;  %v4838_v42 = vmul.f32 %v4806_v26, %v9551_v6 }
0x1483   :  { %6507 = vtanh.f32 %v4890_v27  ;;  %v4892_v18 = vmul.f32 0.7978846, %v4860_v10  ;;  %v4896_v16 = vmul.f32 0.7978846, %v4864_v39  ;;  %v4801_v60 = vmul.f32 %v4769_v40, %v9542_v51 }
0x1484   :  { %6509 = vtanh.f32 %v4894_v36  ;;  %v4840_v15 = vmul.f32 %v4808_v47, %v9554_v38  ;;  %v4866_v33 = vadd.f32 %v4834_v24, %v9532_v62  ;;  %v4775_v31 = vmul.f32 0.044715, %v9573_v53 }
0x1485   :  { %v6500_v30 = vpop.eup %6499  ;;  %6511 = vtanh.f32 %v4892_v18  ;;  %v4870_v0 = vadd.f32 %v4838_v42, %v9551_v6  ;;  %v4803_v1 = vmul.f32 %v4771_v19, %v9546_v41  ;;  %v4805_v13 = vmul.f32 %v4773_v29, %v9559_v25 }
0x1486   :  { %v6502_v45 = vpop.eup %6501  ;;  %v4953_v11 = vadd.f32 1.0, %v6500_v30  ;;  %6513 = vtanh.f32 %v4896_v16  ;;  %v4868_v48 = vadd.f32 %v4836_v2, %v9538_v7  ;;  %v4898_v5 = vmul.f32 0.7978846, %v4866_v33 }
0x1487   :  { %v6504_v4 = vpop.eup %6503  ;;  %v4955_v56 = vadd.f32 1.0, %v6502_v45  ;;  %v4902_v3 = vmul.f32 0.7978846, %v4870_v0  ;;  %v4872_v43 = vadd.f32 %v4840_v15, %v9554_v38  ;;  %v4833_v17 = vmul.f32 %v4801_v60, %v9542_v51 }
0x1488   :  { %v6506_v63 = vpop.eup %6505  ;;  %v4957_v46 = vadd.f32 1.0, %v6504_v4  ;;  %v4985_v23 = vmul.f32 %v4953_v11, %v4729_v34  ;;  %v4807_v22 = vmul.f32 %v4775_v31, %v9573_v53  ;;  %v4837_v19 = vmul.f32 %v4805_v13, %v9559_v25 }
0x1489   :  { %v4959_v14 = vadd.f32 1.0, %v6506_v63  ;;  %v9588_v8 = vmul.f32 %v4955_v56, %v4731_v52  ;;  %6515 = vtanh.f32 %v4902_v3  ;;  %v4900_v52 = vmul.f32 0.7978846, %v4868_v48 }
0x148a   :  { %v4989_v35 = vmul.f32 %v4957_v46, %v4733_v37  ;;  %v4835_v37 = vmul.f32 %v4803_v1, %v9546_v41  ;;  %6517 = vtanh.f32 %v4898_v5  ;;  %v4839_v26 = vmul.f32 %v4807_v22, %v9573_v53 }
0x148b   :  { %v9590_v28 = vmul.f32 %v4959_v14, %v4735_v59  ;;  %v4904_v59 = vmul.f32 0.7978846, %v4872_v43  ;;  %v4865_v27 = vadd.f32 %v4833_v17, %v9542_v51  ;;  %v4730_v30 = vmul.f32 0.5, %v9506_v9 }
0x148c   :  { %v5082_v40 = vpack.c.bf16 %v4989_v35, %v4985_v23  ;;  %v4734_v36 = vmul.f32 0.5, %v9513_v58  ;;  %v4869_v39 = vadd.f32 %v4837_v19, %v9559_v25  ;;  %v4732_v2 = vmul.f32 0.5, %v9516_v55 }
0x148d   :  { %v5084_v34 = vpack.c.bf16 %v9590_v28, %v9588_v8  ;;  %v6508_v12 = vpop.eup %6507  ;;  %6519 = vtanh.f32 %v4900_v52  ;;  %v4867_v29 = vadd.f32 %v4835_v37, %v9546_v41  ;;  %v4736_v4 = vmul.f32 0.5, %v9519_v50 }
0x148e   :  { %v6510_v24 = vpop.eup %6509  ;;  %v4954_v47 = vadd.f32 1.0, %v6508_v12  ;;  %6521 = vtanh.f32 %v4904_v59  ;;  %v4897_v9 = vmul.f32 0.7978846, %v4865_v27  ;;  %v4871_v58 = vadd.f32 %v4839_v26, %v9573_v53 }
0x148f   :  { %v4958_v10 = vadd.f32 1.0, %v6510_v24  ;;  %v6512_v45 = vpop.eup %6511  ;;  %v4901_v56 = vmul.f32 0.7978846, %v4869_v39  ;;  %v4899_v31 = vmul.f32 0.7978846, %v4867_v29  ;;  %v4738_v55 = vmul.f32 0.5, %v9532_v62 }
0x1490   :  { %v6514_v42 = vpop.eup %6513  ;;  %v4986_v18 = vmul.f32 %v4954_v47, %v4730_v30  ;;  %v4956_v11 = vadd.f32 1.0, %v6512_v45  ;;  %v4742_v46 = vmul.f32 0.5, %v9551_v6  ;;  %v9611_v50 = vmul.f32 0.5, %v9538_v7 }
0x1491   :  { %v4990_v16 = vmul.f32 %v4958_v10, %v4734_v36  ;;  %v4960_v60 = vadd.f32 1.0, %v6514_v42  ;;  %6523 = vtanh.f32 %v4897_v9  ;;  %v4903_v23 = vmul.f32 0.7978846, %v4871_v58 }
0x1492   :  { %v4988_v33 = vmul.f32 %v4956_v11, %v4732_v2  ;;  %v4744_v6 = vmul.f32 0.5, %v9554_v38  ;;  %6525 = vtanh.f32 %v4901_v56  ;;  %v9627_v17 = vmul.f32 0.5, %v9542_v51 }
0x1493   :  { %v5083_v15 = vpack.c.bf16 %v4990_v16, %v4986_v18  ;;  %v4992_v63 = vmul.f32 %v4960_v60, %v4736_v4  ;;  %v6516_v0 = vpop.eup %6515  ;;  %6527 = vtanh.f32 %v4899_v31  ;;  %v4741_v10 = vmul.f32 0.5, %v9559_v25 }
0x1494   :  { %v6518_v35 = vpop.eup %6517  ;;  %v4966_v52 = vadd.f32 1.0, %v6516_v0  ;;  %6529 = vtanh.f32 %v4903_v23  ;;  %v9649_v39 = vmul.f32 0.5, %v9546_v41  ;;  %v4743_v42 = vmul.f32 0.5, %v9573_v53 }
0x1495   :  { %5170 = vmatprep.mubr.bf16.mxu0 %v5083_v15  ;;  %v5085_v14 = vpack.c.bf16 %v4992_v63, %v4988_v33  ;;  %v4962_v24 = vadd.f32 1.0, %v6518_v35 }
0x1496   :  { %5171 = vmatmul.mubr.bf16.vlgmr.msra.gmra.mrb[156].mxu0 %v5082_v40  ;;  %v4998_v29 = vmul.f32 %v4966_v52, %v4742_v46 }
0x1497   :  { %5231 = vmatprep.mubr.bf16.mxu1 %v5085_v14  ;;  %v6520_v12 = vpop.eup %6519  ;;  %v4994_v56 = vmul.f32 %v4962_v24, %v4738_v55 }
0x1498   :  { %v4637_v1 = vpop.f32.mrb[148].mxu0  ;;  %v4710_v13 = vpop.f32.mrb[136].mxu1  ;;  %5232 = vmatmul.mubr.bf16.vlgmr.msra.gmra.mrb[144].mxu1 %v5084_v34  ;;  %v4964_v4 = vadd.f32 1.0, %v6520_v12 }
0x1499   :  { %v9614_v3 = vadd.f32 %v4637_v1, %v9491_v44  ;;  %v9617_v48 = vadd.f32 %v4710_v13, %v9494_v49  ;;  %v4639_v62 = vpop.f32.mrb[149].mxu0  ;;  %v4712_v8 = vpop.f32.mrb[137].mxu1  ;;  %v5087_v35 = vpack.c.bf16 %v4998_v29, %v4994_v56 }
0x149a   :  { %v9621_v28 = vadd.f32 %v4639_v62, %v9497_v57  ;;  %v9624_v7 = vadd.f32 %v4712_v8, %v9503_v61  ;;  %v4641_v5 = vpop.f32.mrb[150].mxu0  ;;  %v4714_v43 = vpop.f32.mrb[138].mxu1 }
0x149b   :  { %v4777_v22 = vmul.f32 0.044715, %v9614_v3  ;;  %v9631_v40 = vadd.f32 %v4641_v5, %v9491_v44  ;;  %v9634_v38 = vadd.f32 %v4714_v43, %v9494_v49  ;;  %v4643_v19 = vpop.f32.mrb[151].mxu0  ;;  %v4716_v37 = vpop.f32.mrb[139].mxu1  ;;  %v4779_v47 = vmul.f32 0.044715, %v9617_v48  ;;  %5177 = vmatprep.mubr.bf16.mxu0 %v5087_v35 }
0x149c   :  { %v9637_v59 = vadd.f32 %v4643_v19, %v9497_v57  ;;  %v9640_v51 = vadd.f32 %v4716_v37, %v9503_v61  ;;  %v6522_v26 = vpop.eup %6521  ;;  %v4778_v27 = vmul.f32 0.044715, %v9621_v28  ;;  %v4780_v30 = vmul.f32 0.044715, %v9624_v7 }
0x149d   :  { %v4809_v34 = vmul.f32 %v4777_v22, %v9614_v3  ;;  %v4781_v36 = vmul.f32 0.044715, %v9631_v40  ;;  %v4783_v45 = vmul.f32 0.044715, %v9634_v38  ;;  %v4968_v60 = vadd.f32 1.0, %v6522_v26  ;;  %v6524_v33 = vpop.eup %6523 }
0x149e   :  { %v4782_v2 = vmul.f32 0.044715, %v9637_v59  ;;  %v4784_v18 = vmul.f32 0.044715, %v9640_v51  ;;  %v4811_v9 = vmul.f32 %v4779_v47, %v9617_v48  ;;  %v4810_v25 = vmul.f32 %v4778_v27, %v9621_v28  ;;  %v6526_v13 = vpop.eup %6525 }
0x149f   :  { %v4812_v41 = vmul.f32 %v4780_v30, %v9624_v7  ;;  %v9659_v63 = vmul.f32 %v4809_v34, %v9614_v3  ;;  %v4813_v53 = vmul.f32 %v4781_v36, %v9631_v40  ;;  %v4815_v14 = vmul.f32 %v4783_v45, %v9634_v38  ;;  %v6528_v5 = vpop.eup %6527 }
0x14a0   :  { %v4647_v16 = vpop.f32.mrb[152].mxu0  ;;  %v4720_v11 = vpop.f32.mrb[140].mxu1  ;;  %v4814_v23 = vmul.f32 %v4782_v2, %v9637_v59  ;;  %v4816_v43 = vmul.f32 %v4784_v18, %v9640_v51  ;;  %v4996_v19 = vmul.f32 %v4964_v4, %v9611_v50  ;;  %v5000_v37 = vmul.f32 %v4968_v60, %v4744_v6 }
0x14a1   :  { %v4649_v58 = vpop.f32.mrb[153].mxu0  ;;  %v4722_v15 = vpop.f32.mrb[141].mxu1  ;;  %v9663_v31 = vadd.f32 %v4647_v16, %v9491_v44  ;;  %v9675_v22 = vadd.f32 %v4720_v11, %v9494_v49  ;;  %v4843_v52 = vmul.f32 %v4811_v9, %v9617_v48  ;;  %v4842_v12 = vmul.f32 %v4810_v25, %v9621_v28 }
0x14a2   :  { %v9666_v46 = vadd.f32 %v4649_v58, %v9497_v57  ;;  %v4651_v0 = vpop.f32.mrb[154].mxu0  ;;  %v4724_v1 = vpop.f32.mrb[142].mxu1  ;;  %v9671_v55 = vadd.f32 %v4722_v15, %v9503_v61  ;;  %v4844_v24 = vmul.f32 %v4812_v41, %v9624_v7  ;;  %v4961_v26 = vadd.f32 1.0, %v6524_v33 }
0x14a3   :  { %v4653_v62 = vpop.f32.mrb[155].mxu0  ;;  %v4726_v8 = vpop.f32.mrb[143].mxu1  ;;  %v4845_v27 = vmul.f32 %v4813_v53, %v9631_v40  ;;  %v4785_v30 = vmul.f32 0.044715, %v9663_v31  ;;  %v5089_v36 = vpack.c.bf16 %v5000_v37, %v4996_v19  ;;  %v4847_v45 = vmul.f32 %v4815_v14, %v9634_v38 }
0x14a4   :  { %v6530_v47 = vpop.eup %6529  ;;  %v4786_v34 = vmul.f32 0.044715, %v9666_v46  ;;  %v4846_v50 = vmul.f32 %v4814_v23, %v9637_v59  ;;  %v4788_v6 = vmul.f32 0.044715, %v9671_v55  ;;  %v4965_v2 = vadd.f32 1.0, %v6526_v13 }
0x14a5   :  { %v4848_v29 = vmul.f32 %v4816_v43, %v9640_v51  ;;  %v4787_v18 = vmul.f32 0.044715, %v9675_v22  ;;  %5238 = vmatprep.mubr.bf16.mxu1 %v5089_v36  ;;  %v9690_v16 = vadd.f32 %v4651_v0, %v9491_v44  ;;  %v9693_v11 = vadd.f32 %v4724_v1, %v9494_v49 }
0x14a6   :  { %v4993_v4 = vmul.f32 %v4961_v26, %v9627_v17  ;;  %v4997_v60 = vmul.f32 %v4965_v2, %v4741_v10  ;;  %v4963_v9 = vadd.f32 1.0, %v6528_v5  ;;  %v4967_v25 = vadd.f32 1.0, %v6530_v47 }
0x14a7   :  { %v4817_v41 = vmul.f32 %v4785_v30, %v9663_v31  ;;  %v4818_v58 = vmul.f32 %v4786_v34, %v9666_v46  ;;  %v9699_v15 = vadd.f32 %v4653_v62, %v9497_v57  ;;  %v9702_v56 = vadd.f32 %v4726_v8, %v9503_v61 }
0x14a8   :  { %v4820_v44 = vmul.f32 %v4788_v6, %v9671_v55  ;;  %v5086_v33 = vpack.c.bf16 %v4997_v60, %v4993_v4  ;;  %v4995_v49 = vmul.f32 %v4963_v9, %v9649_v39  ;;  %v4999_v53 = vmul.f32 %v4967_v25, %v4743_v42 }
0x14a9   :  { %v4789_v17 = vmul.f32 0.044715, %v9690_v16  ;;  %v4790_v10 = vmul.f32 0.044715, %v9699_v15  ;;  %v4792_v0 = vmul.f32 0.044715, %v9702_v56  ;;  %v4874_v1 = vadd.f32 %v4842_v12, %v9621_v28 }
0x14aa   :  { %v4819_v57 = vmul.f32 %v4787_v18, %v9675_v22  ;;  %v4791_v13 = vmul.f32 0.044715, %v9693_v11  ;;  %5178 = vmatmul.mubr.bf16.gmra.mrb[160].mxu0 %v5086_v33  ;;  %v5088_v61 = vpack.c.bf16 %v4999_v53, %v4995_v49  ;;  %v4878_v14 = vadd.f32 %v4846_v50, %v9637_v59 }
0x14ab   :  { %v4822_v23 = vmul.f32 %v4790_v10, %v9699_v15  ;;  %v4824_v39 = vmul.f32 %v4792_v0, %v9702_v56  ;;  %v4906_v42 = vmul.f32 0.7978846, %v4874_v1  ;;  %v4876_v35 = vadd.f32 %v4844_v24, %v9624_v7 }
0x14ac   :  { %v4850_v62 = vmul.f32 %v4818_v58, %v9666_v46  ;;  %v4852_v8 = vmul.f32 %v4820_v44, %v9671_v55  ;;  %5239 = vmatmul.mubr.bf16.gmra.mrb[148].mxu1 %v5088_v61  ;;  %v4910_v5 = vmul.f32 0.7978846, %v4878_v14  ;;  %v4880_v43 = vadd.f32 %v4848_v29, %v9640_v51 }
0x14ad   :  { %v4821_v19 = vmul.f32 %v4789_v17, %v9690_v16  ;;  %v4854_v37 = vmul.f32 %v4822_v23, %v9699_v15  ;;  %6531 = vtanh.f32 %v4906_v42  ;;  %v4908_v12 = vmul.f32 0.7978846, %v4876_v35 }
0x14ae   :  { %6533 = vtanh.f32 %v4910_v5  ;;  %v4912_v26 = vmul.f32 0.7978846, %v4880_v43  ;;  %v4873_v47 = vadd.f32 %v9659_v63, %v9614_v3  ;;  %v4877_v24 = vadd.f32 %v4845_v27, %v9631_v40 }
0x14af   :  { %v4823_v30 = vmul.f32 %v4791_v13, %v9693_v11  ;;  %v4856_v34 = vmul.f32 %v4824_v39, %v9702_v56  ;;  %6535 = vtanh.f32 %v4908_v12  ;;  %v4875_v36 = vadd.f32 %v4843_v52, %v9617_v48 }
0x14b0   :  { %6537 = vtanh.f32 %v4912_v26  ;;  %v4905_v50 = vmul.f32 0.7978846, %v4873_v47  ;;  %v4909_v6 = vmul.f32 0.7978846, %v4877_v24  ;;  %v4879_v2 = vadd.f32 %v4847_v45, %v9634_v38 }
0x14b1   :  { %v4849_v29 = vmul.f32 %v4817_v41, %v9663_v31  ;;  %v4907_v18 = vmul.f32 0.7978846, %v4875_v36  ;;  %v4882_v4 = vadd.f32 %v4850_v62, %v9666_v46  ;;  %v4853_v63 = vmul.f32 %v4821_v19, %v9690_v16 }
0x14b2   :  { %6539 = vtanh.f32 %v4905_v50  ;;  %v4911_v27 = vmul.f32 0.7978846, %v4879_v2  ;;  %v4886_v60 = vadd.f32 %v4854_v37, %v9699_v15  ;;  %v4851_v9 = vmul.f32 %v4819_v57, %v9675_v22 }
0x14b3   :  { %6541 = vtanh.f32 %v4909_v6  ;;  %v4914_v52 = vmul.f32 0.7978846, %v4882_v4  ;;  %v4884_v25 = vadd.f32 %v4852_v8, %v9671_v55  ;;  %v4855_v58 = vmul.f32 %v4823_v30, %v9693_v11 }
0x14b4   :  { %6543 = vtanh.f32 %v4907_v18  ;;  %v4918_v45 = vmul.f32 0.7978846, %v4886_v60  ;;  %v4888_v41 = vadd.f32 %v4856_v34, %v9702_v56  ;;  %v4881_v33 = vadd.f32 %v4849_v29, %v9663_v31 }
0x14b5   :  { %6545 = vtanh.f32 %v4911_v27  ;;  %v4916_v44 = vmul.f32 0.7978846, %v4884_v25  ;;  %v4746_v49 = vmul.f32 0.5, %v9621_v28  ;;  %v4885_v17 = vadd.f32 %v4853_v63, %v9690_v16 }
0x14b6   :  { %6547 = vtanh.f32 %v4914_v52  ;;  %v4920_v53 = vmul.f32 0.7978846, %v4888_v41  ;;  %v4750_v0 = vmul.f32 0.5, %v9637_v59  ;;  %v4913_v1 = vmul.f32 0.7978846, %v4881_v33 }
0x14b7   :  { %v6532_v10 = vpop.eup %6531  ;;  %6549 = vtanh.f32 %v4918_v45  ;;  %v4883_v57 = vadd.f32 %v4851_v9, %v9675_v22  ;;  %v4917_v14 = vmul.f32 0.7978846, %v4885_v17  ;;  %v4887_v23 = vadd.f32 %v4855_v58, %v9693_v11 }
0x14b8   :  { %v6534_v13 = vpop.eup %6533  ;;  %v4970_v61 = vadd.f32 1.0, %v6532_v10  ;;  %6551 = vtanh.f32 %v4916_v44  ;;  %v4748_v28 = vmul.f32 0.5, %v9624_v7  ;;  %v4752_v8 = vmul.f32 0.5, %v9640_v51 }
0x14b9   :  { %v6536_v39 = vpop.eup %6535  ;;  %v4974_v42 = vadd.f32 1.0, %v6534_v13  ;;  %6553 = vtanh.f32 %v4920_v53  ;;  %v4915_v35 = vmul.f32 0.7978846, %v4883_v57  ;;  %v4919_v5 = vmul.f32 0.7978846, %v4887_v23 }
0x14ba   :  { %v6538_v62 = vpop.eup %6537  ;;  %v4972_v59 = vadd.f32 1.0, %v6536_v39  ;;  %6555 = vtanh.f32 %v4913_v1  ;;  %v5002_v43 = vmul.f32 %v4970_v61, %v4746_v49  ;;  %v4745_v36 = vmul.f32 0.5, %v9614_v3 }
0x14bb   :  { %v5006_v19 = vmul.f32 %v4974_v42, %v4750_v0  ;;  %v4976_v37 = vadd.f32 1.0, %v6538_v62  ;;  %6557 = vtanh.f32 %v4917_v14  ;;  %v4749_v51 = vmul.f32 0.5, %v9631_v40 }
0x14bc   :  { %v6540_v12 = vpop.eup %6539  ;;  %v5004_v26 = vmul.f32 %v4972_v59, %v4748_v28  ;;  %6559 = vtanh.f32 %v4915_v35  ;;  %v4747_v29 = vmul.f32 0.5, %v9617_v48  ;;  %v4751_v60 = vmul.f32 0.5, %v9634_v38 }
0x14bd   :  { %v6542_v47 = vpop.eup %6541  ;;  %v5091_v24 = vpack.c.bf16 %v5006_v19, %v5002_v43  ;;  %v5008_v30 = vmul.f32 %v4976_v37, %v4752_v8  ;;  %v4969_v34 = vadd.f32 1.0, %v6540_v12  ;;  %6561 = vtanh.f32 %v4919_v5 }
0x14be   :  { %v6544_v7 = vpop.eup %6543  ;;  %v4973_v50 = vadd.f32 1.0, %v6542_v47  ;;  %v4754_v25 = vmul.f32 0.5, %v9666_v46  ;;  %v4758_v3 = vmul.f32 0.5, %v9699_v15  ;;  %v4756_v49 = vmul.f32 0.5, %v9671_v55 }
0x14bf   :  { %v6546_v6 = vpop.eup %6545  ;;  %5184 = vmatprep.mubr.bf16.mxu0 %v5091_v24  ;;  %v5093_v2 = vpack.c.bf16 %v5008_v30, %v5004_v26  ;;  %v4971_v18 = vadd.f32 1.0, %v6544_v7  ;;  %v5001_v63 = vmul.f32 %v4969_v34, %v4745_v36  ;;  %v4760_v53 = vmul.f32 0.5, %v9702_v56 }
0x14c0   :  { %v6548_v4 = vpop.eup %6547  ;;  %v5005_v27 = vmul.f32 %v4973_v50, %v4749_v51  ;;  %v4975_v9 = vadd.f32 1.0, %v6546_v6  ;;  %v4753_v15 = vmul.f32 0.5, %v9663_v31  ;;  %v4757_v13 = vmul.f32 0.5, %v9690_v16  ;;  %v5611_v50 = vld [vmem:[%s9803_s19 + $0x1] ss:$0 sm:$0xff] }
0x14c1   :  { %v6550_v52 = vpop.eup %6549  ;;  %5245 = vmatprep.mubr.bf16.mxu1 %v5093_v2  ;;  %v4978_v40 = vadd.f32 1.0, %v6548_v4  ;;  %v5003_v41 = vmul.f32 %v4971_v18, %v4747_v29  ;;  %v4755_v28 = vmul.f32 0.5, %v9675_v22  ;;  %v4759_v35 = vmul.f32 0.5, %v9693_v11  ;;  %v5609_v22 = vld [vmem:[%s9802_s18 + $0x1] ss:$0 sm:$0xff] }
0x14c2   :  { %v6552_v58 = vpop.eup %6551  ;;  %v5090_v45 = vpack.c.bf16 %v5005_v27, %v5001_v63  ;;  %v5007_v44 = vmul.f32 %v4975_v9, %v4751_v60  ;;  %v4982_v33 = vadd.f32 1.0, %v6550_v52 }
0x14c3   :  { %v6554_v48 = vpop.eup %6553  ;;  %v4980_v17 = vadd.f32 1.0, %v6552_v58  ;;  %v5010_v0 = vmul.f32 %v4978_v40, %v4754_v25 }
0x14c4   :  { %v6556_v38 = vpop.eup %6555  ;;  %5185 = vmatmul.mubr.bf16.gmra.mrb[164].mxu0 %v5090_v45  ;;  %v5092_v10 = vpack.c.bf16 %v5007_v44, %v5003_v41  ;;  %v5014_v1 = vmul.f32 %v4982_v33, %v4758_v3  ;;  %v4984_v46 = vadd.f32 1.0, %v6554_v48 }
0x14c5   :  { %v6558_v57 = vpop.eup %6557  ;;  %v4977_v61 = vadd.f32 1.0, %v6556_v38  ;;  %v5012_v39 = vmul.f32 %v4980_v17, %v4756_v49 }
0x14c6   :  { %v6560_v14 = vpop.eup %6559  ;;  %5246 = vmatmul.mubr.bf16.gmra.mrb[152].mxu1 %v5092_v10  ;;  %v5095_v23 = vpack.c.bf16 %v5014_v1, %v5010_v0  ;;  %v5016_v55 = vmul.f32 %v4984_v46, %v4760_v53  ;;  %v4981_v42 = vadd.f32 1.0, %v6558_v57 }
0x14c7   :  { %v6562_v56 = vpop.eup %6561  ;;  %v4979_v62 = vadd.f32 1.0, %v6560_v14  ;;  %v5009_v59 = vmul.f32 %v4977_v61, %v4753_v15 }
0x14c8   :  { %5191 = vmatprep.mubr.bf16.mxu0 %v5095_v23  ;;  %v5097_v8 = vpack.c.bf16 %v5016_v55, %v5012_v39  ;;  %v5013_v5 = vmul.f32 %v4981_v42, %v4757_v13  ;;  %v4983_v31 = vadd.f32 1.0, %v6562_v56 }
0x14c9   :  { %v5011_v43 = vmul.f32 %v4979_v62, %v4755_v28 }
0x14ca   :  { %5252 = vmatprep.mubr.bf16.mxu1 %v5097_v8  ;;  %v5094_v16 = vpack.c.bf16 %v5013_v5, %v5009_v59  ;;  %v5015_v19 = vmul.f32 %v4983_v31, %v4759_v35 }
0x14cc   :  { %5192 = vmatmul.mubr.bf16.gmra.mrb[168].mxu0 %v5094_v16  ;;  %v5096_v37 = vpack.c.bf16 %v5015_v19, %v5011_v43 }
0x14ce   :  { %5253 = vmatmul.mubr.bf16.gmra.mrb[156].mxu1 %v5096_v37 }
0x1569   :  { %v5872_v12 = vpop.f32.mrb[156].mxu0 }
0x156a   :  { %v5873_v26 = vpop.f32.mrb[157].mxu0 }
0x156b   :  { %v5874_v11 = vadd.f32 %v5873_v26, %v5872_v12  ;;  %v5875_v47 = vpop.f32.mrb[158].mxu0  ;;  %v5912_v24 = vpop.f32.mrb[144].mxu1 }
0x156c   :  { %v5876_v30 = vpop.f32.mrb[159].mxu0  ;;  %v5913_v7 = vpop.f32.mrb[145].mxu1 }
0x156d   :  { %v5173_v34 = vadd.f32 %v5874_v11, %v5609_v22  ;;  %v5914_v36 = vadd.f32 %v5913_v7, %v5912_v24  ;;  %v5915_v51 = vpop.f32.mrb[146].mxu1 }
0x156e   :  { %v5916_v6 = vpop.f32.mrb[147].mxu1 }
0x156f   :  { %v5234_v2 = vadd.f32 %v5914_v36, %v5173_v34 }
0x1571   :  { %v5268_v29 = vmul.f32 %v5611_v50, %v5234_v2 }
0x1573   :  { %v5272_v18 = vadd.f32 %v5268_v29, %v9012_v54  ;;  %v5612_v29 = vld [vmem:[%s9804_s20] ss:$0 sm:$0xff]  ;;  %s6607_s20 = smov [#allocation4]  }
0x1575   :  { %5278 = vadd.xlane.f32.xlu0 %v5272_v18 }
0x157d   :  { %v5878_v4 = vpop.f32.mrb[160].mxu0 }
0x157e   :  { %v5879_v63 = vpop.f32.mrb[161].mxu0 }
0x157f   :  { %v5918_v27 = vpop.f32.mrb[148].mxu1  ;;  %v5880_v60 = vadd.f32 %v5879_v63, %v5878_v4  ;;  %v5881_v9 = vpop.f32.mrb[162].mxu0  ;;  %v5613_v4 = vld [vmem:[%s9805_s21] ss:$0 sm:$0xff]  ;;  %s5352_s21 = sshll.u32 %s6607_s20, 4  ;;  %s5353_s21 = int_to_ptr.vmem [resolvable:$true] %s5352_s21 }
0x1580   :  { %v5919_v52 = vpop.f32.mrb[149].mxu1  ;;  %v5882_v25 = vpop.f32.mrb[163].mxu0  ;;  %s6579_s10 = scalar_lea.vmem %s5353_s21, 64  ;;  %p6584_p1 = scmp.lt.s32.totalorder %s5353_s21, %s5353_s21 }
0x1581   :  { %v5180_v3 = vadd.f32 %v5880_v60, %v5609_v22  ;;  %v5920_v40 = vadd.f32 %v5919_v52, %v5918_v27  ;;  %v5921_v58 = vpop.f32.mrb[150].mxu1  ;;  %p6580_p0 = scmp.ne.s32.totalorder %s5353_s21, %s6579_s10  ;;  %p6585_p2 = scmp.lt.s32.totalorder %s6579_s10, %s6579_s10 }
0x1582   :  { %v5922_v45 = vpop.f32.mrb[151].mxu1 }
0x1583   :  { %v5241_v41 = vadd.f32 %v5920_v40, %v5180_v3  ;;  %p6586_p3 = por %p6585_p2, %p6584_p1 }
0x1585   :  { %v5269_v44 = vmul.f32 %v5611_v50, %v5241_v41  ;;  %p6587_p4 = pnand %p6586_p3, %p6580_p0 }
0x1587   :  { %v5273_v33 = vadd.f32 %v5269_v44, %v9020_v20 }
0x1589   :  { %5280 = vadd.xlane.f32.xlu1 %v5273_v33 }
0x1597   :  { %v5884_v48 = vpop.f32.mrb[164].mxu0 }
0x1598   :  { %v5885_v49 = vpop.f32.mrb[165].mxu0 }
0x1599   :  { %v5924_v54 = vpop.f32.mrb[152].mxu1  ;;  %v5886_v53 = vadd.f32 %v5885_v49, %v5884_v48  ;;  %v5887_v17 = vpop.f32.mrb[166].mxu0 }
0x159a   :  { %v5925_v38 = vpop.f32.mrb[153].mxu1  ;;  %v5888_v10 = vpop.f32.mrb[167].mxu0 }
0x159b   :  { %v5187_v0 = vadd.f32 %v5886_v53, %v5609_v22  ;;  %v5926_v1 = vadd.f32 %v5925_v38, %v5924_v54  ;;  %v5927_v46 = vpop.f32.mrb[154].mxu1 }
0x159c   :  { %v5928_v57 = vpop.f32.mrb[155].mxu1 }
0x159d   :  { %v5248_v15 = vadd.f32 %v5926_v1, %v5187_v0 }
0x159f   :  { %v5270_v13 = vmul.f32 %v5611_v50, %v5248_v15  ;;  %v5890_v61 = vpop.f32.mrb[168].mxu0 }
0x15a0   :  { %v5891_v14 = vpop.f32.mrb[169].mxu0 }
0x15a1   :  { %v5930_v23 = vpop.f32.mrb[156].mxu1  ;;  %v5892_v39 = vadd.f32 %v5891_v14, %v5890_v61  ;;  %v5893_v55 = vpop.f32.mrb[170].mxu0  ;;  %v5274_v20 = vadd.f32 %v5270_v13, %v9028_v21 }
0x15a2   :  { %v5931_v42 = vpop.f32.mrb[157].mxu1  ;;  %v5894_v56 = vpop.f32.mrb[171].mxu0 }
0x15a3   :  { %v5194_v28 = vadd.f32 %v5892_v39, %v5609_v22  ;;  %v5932_v35 = vadd.f32 %v5931_v42, %v5930_v23  ;;  %v5933_v62 = vpop.f32.mrb[158].mxu1  ;;  %5282 = vadd.xlane.f32.xlu0 %v5274_v20 }
0x15a4   :  { %v5934_v8 = vpop.f32.mrb[159].mxu1 }
0x15a5   :  { %v5255_v59 = vadd.f32 %v5932_v35, %v5194_v28 }
0x15a7   :  { %v5271_v5 = vmul.f32 %v5611_v50, %v5255_v59 }
0x15a9   :  { %v5275_v31 = vadd.f32 %v5271_v5, %v9036_v32 }
0x15ab   :  { %5284 = vadd.xlane.f32.xlu1 %v5275_v31 }
0x1602   :  { %v5279_v16 = vpop.xlane.xlu0 %5278 }
0x1603   :  { %v5286_v43 = vmul.f32 0.0078125, %v5279_v16 }
0x1605   :  { %v5290_v19 = vsub.f32 %v5272_v18, %v5286_v43 }
0x1607   :  { %v5294_v37 = vmul.f32 %v5290_v19, %v5290_v19 }
0x1609   :  { %5298 = vadd.xlane.f32.xlu0 %v5294_v37 }
0x1616   :  { %v5281_v12 = vpop.xlane.xlu1 %5280 }
0x1617   :  { %v5287_v26 = vmul.f32 0.0078125, %v5281_v12 }
0x1619   :  { %v5291_v21 = vsub.f32 %v5273_v33, %v5287_v26 }
0x161b   :  { %v5295_v11 = vmul.f32 %v5291_v21, %v5291_v21 }
0x161d   :  { %5300 = vadd.xlane.f32.xlu1 %v5295_v11 }
0x1630   :  { %v5283_v22 = vpop.xlane.xlu0 %5282 }
0x1631   :  { %v5288_v47 = vmul.f32 0.0078125, %v5283_v22 }
0x1633   :  { %v5292_v24 = vsub.f32 %v5274_v20, %v5288_v47 }
0x1635   :  { %v5296_v30 = vmul.f32 %v5292_v24, %v5292_v24 }
0x1637   :  { %5302 = vadd.xlane.f32.xlu0 %v5296_v30 }
0x1638   :  { %v5285_v34 = vpop.xlane.xlu1 %5284 }
0x1639   :  { %v5289_v7 = vmul.f32 0.0078125, %v5285_v34 }
0x163b   :  { %v5293_v36 = vsub.f32 %v5275_v31, %v5289_v7 }
0x163d   :  { %v5297_v32 = vmul.f32 %v5293_v36, %v5293_v36 }
0x163f   :  { %5304 = vadd.xlane.f32.xlu1 %v5297_v32 }
0x1696   :  { %v5299_v51 = vpop.xlane.xlu0 %5298 }
0x1697   :  { %v5306_v50 = vmul.f32 0.0078125, %v5299_v51 }
0x1699   :  { %v5310_v6 = vadd.f32 1e-06, %v5306_v50 }
0x169b   :  { %6563 = vrsqrt.f32 %v5310_v6 }
0x16a5   :  { %v6564_v2 = vpop.eup %6563 }
0x16a6   :  { %v5318_v18 = vmul.f32 %v6564_v2, %v5290_v19 }
0x16a8   :  { %v5328_v63 = vmul.f32 %v5612_v29, %v5318_v18 }
0x16aa   :  { %v5301_v27 = vpop.xlane.xlu1 %5300  ;;  %v5338_v60 = vadd.f32 %v5613_v4, %v5328_v63 }
0x16ab   :  { %v5307_v9 = vmul.f32 0.0078125, %v5301_v27 }
0x16ac   :  { %5342 = vst [vmem:[#allocation4] sm:$0x1] %v5338_v60 }
0x16ad   :  { %v5311_v52 = vadd.f32 1e-06, %v5307_v9 }
0x16af   :  { %6565 = vrsqrt.f32 %v5311_v52 }
0x16b9   :  { %v6566_v25 = vpop.eup %6565 }
0x16ba   :  { %v5319_v3 = vmul.f32 %v6566_v25, %v5291_v21 }
0x16bc   :  { %v5329_v40 = vmul.f32 %v5612_v29, %v5319_v3 }
0x16be   :  { %v5339_v58 = vadd.f32 %v5613_v4, %v5329_v40 }
0x16c0   :  { %5343 = vst [vmem:[#allocation4 + $0x1] sm:$0x1] %v5339_v58 }
0x16c4   :  { %v5303_v45 = vpop.xlane.xlu0 %5302 }
0x16c5   :  { %v5308_v41 = vmul.f32 0.0078125, %v5303_v45 }
0x16c7   :  { %v5312_v44 = vadd.f32 1e-06, %v5308_v41 }
0x16c9   :  { %6567 = vrsqrt.f32 %v5312_v44 }
0x16cc   :  { %v5305_v33 = vpop.xlane.xlu1 %5304 }
0x16cd   :  { %v5309_v48 = vmul.f32 0.0078125, %v5305_v33 }
0x16cf   :  { %v5313_v49 = vadd.f32 1e-06, %v5309_v48 }
0x16d1   :  { %6569 = vrsqrt.f32 %v5313_v49 }
0x16d3   :  { %v6568_v54 = vpop.eup %6567 }
0x16d4   :  { %v5320_v53 = vmul.f32 %v6568_v54, %v5292_v24 }
0x16d6   :  { %v5330_v17 = vmul.f32 %v5612_v29, %v5320_v53 }
0x16d8   :  { %v5340_v38 = vadd.f32 %v5613_v4, %v5330_v17 }
0x16da   :  { %5344 = vst [vmem:[#allocation4 + $0x2] sm:$0x1] %v5340_v38 }
0x16db   :  { %v6570_v10 = vpop.eup %6569 }
0x16dc   :  { %v5321_v0 = vmul.f32 %v6570_v10, %v5293_v36 }
0x16de   :  { %v5331_v1 = vmul.f32 %v5612_v29, %v5321_v0 }
0x16e0   :  { %v5341_v46 = vadd.f32 %v5613_v4, %v5331_v1 }
0x16e2   :  { %5345 = vst [vmem:[#allocation4 + $0x3] sm:$0x1] %v5341_v46 }
0x16e3   :  { %6590 = shalt.err (!%p6587_p4)
}
0x16e4   :  { %s6591_s24 = scalar_lea.hbm %s9806_s22, 64 }
0x16e5   :  { %p6592_p5 = scmp.ne.s32.totalorder %s9806_s22, %s6591_s24  ;;  %p6595_p6 = scmp.lt.u32.totalorder %s6591_s24, %s9806_s22 }
0x16e7   :  { %p6597_p7 = pnand %p6595_p6, %p6592_p5 }
0x16e9   :  { %6600 = shalt.err (!%p6597_p7)
}
0x16ea   :  { %5355 = dma.vmem_to_hbm [thread:$0]  %s5353_s21, 64, %s9806_s22, [#allocation5]  }
0x16eb   :  { %6601 = dma.done.wait [#allocation5], 64  }
0x16ec   :  { %6602 = vsyncadd [#allocation5], 4294967232 }
0x16ed   :  { %5359 = vsyncpa [#allocation5], 1 }

</bundles_post_ra>
